<compile_context>
chip_gen: v7x
topology: tpu7x:2x2x1
jax: 0.10.0
libtpu: 0.0.40
codegen_flags: <defaults>
</compile_context>

<pallas_src>
import math

import jax
import jax.numpy as jnp
import numpy as np
from jax.experimental import pallas as pl
from jax.experimental.pallas import tpu as pltpu


# ----------------------------------------------------------------------------
# Architecture config (matches Summary_net_lc_smol with layer_size*=1)
# ----------------------------------------------------------------------------
CONV_CFGS = [
    dict(cin=1,  cout=48, k=(3, 3, 17), s=(1, 1, 17), p=(1, 1, 0)),
    dict(cin=48, cout=48, k=(3, 3, 3),  s=(1, 1, 1),  p=(1, 1, 1)),
    dict(cin=48, cout=64, k=(3, 3, 3),  s=(1, 1, 1),  p=(1, 1, 1)),
    dict(cin=64, cout=96, k=(3, 3, 3),  s=(1, 1, 1),  p=(1, 1, 1)),
]
FC_DIMS = [(96, 96), (96, 64), (64, 32), (32, 6)]

_GELU_C = math.sqrt(2.0 / math.pi)


def gelu_tanh(x):
    """tanh-approximation GELU (used in-kernel and in the reference)."""
    return 0.5 * x * (1.0 + jnp.tanh(_GELU_C * (x + 0.044715 * x * x * x)))


def _round_up(n, m):
    return ((n + m - 1) // m) * m


def _pick_tile(n):
    """Lane tile for the matmul N dim. `n` is a multiple of 128.

    Bounded tiles (<=2048) keep per-step VMEM at a few MB; >=2 blocks (>=4 for
    the 2048 tile) keeps both v7x TensorCores busy when the problem allows.
    """
    for t in (2048, 1024, 512, 256, 128):
        if n % t == 0 and n // t >= (4 if t == 2048 else 2):
            return t
    return n  # only hit when n == 128


# ----------------------------------------------------------------------------
# Pallas kernel 1: fused (folded-BN) conv-as-matmul + bias + GELU
# ----------------------------------------------------------------------------
def conv_mm_gelu_kernel(w_ref, p_ref, b_ref, o_ref):
    # w_ref: (C_out, Kp)  bf16   folded conv weight (C_in*Kd*Kh*Kw, 16-padded)
    # p_ref: (Kp, TN)     bf16   im2col patches tile (batch folded into lanes)
    # b_ref: (C_out, 1)   f32    folded bias
    # o_ref: (C_out, TN)  bf16
    # Compute in f32 (bf16 is only for HBM bytes; these layers are BW bound).
    w = w_ref[...].astype(jnp.float32)
    p = p_ref[...].astype(jnp.float32)
    acc = jnp.dot(w, p, preferred_element_type=jnp.float32)
    acc = acc + b_ref[...]
    o_ref[...] = gelu_tanh(acc).astype(o_ref.dtype)


def conv_mm_gelu(w2d_bf, patches_bf, bias):
    """GELU(w2d @ patches + bias): w2d (C_out, K) bf16, patches (K, N) bf16
    -> (C_out, N) bf16."""
    c_out, kdim = w2d_bf.shape
    n = patches_bf.shape[1]

    # Cheap pad of the contraction dim to a multiple of 16 (bf16 sublane
    # packing); exact (zero products). No 128-pad anymore.
    kp = _round_up(kdim, 16)
    if kp != kdim:
        w2d_bf = jnp.pad(w2d_bf, ((0, 0), (0, kp - kdim)))
        patches_bf = jnp.pad(patches_bf, ((0, kp - kdim), (0, 0)))

    # Pad lane (N) dim to a multiple of 128 for lane-dense stores and bounded
    # tiles (extra columns are sliced off afterwards).
    n_pad = _round_up(n, 128)
    if n_pad != n:
        patches_bf = jnp.pad(patches_bf, ((0, 0), (0, n_pad - n)))

    b2 = bias.reshape(c_out, 1).astype(jnp.float32)
    tn = _pick_tile(n_pad)

    out = pl.pallas_call(
        conv_mm_gelu_kernel,
        out_shape=jax.ShapeDtypeStruct((c_out, n_pad), jnp.bfloat16),
        grid_spec=pltpu.PrefetchScalarGridSpec(
            num_scalar_prefetch=0,
            grid=(n_pad // tn,),
            in_specs=[
                pl.BlockSpec((c_out, kp), lambda i: (0, 0)),   # weights (resident)
                pl.BlockSpec((kp, tn), lambda i: (0, i)),      # patch lane-tile
                pl.BlockSpec((c_out, 1), lambda i: (0, 0)),    # bias
            ],
            out_specs=pl.BlockSpec((c_out, tn), lambda i: (0, i)),
        ),
        compiler_params=pltpu.CompilerParams(
            dimension_semantics=("parallel",)),
    )(w2d_bf, patches_bf, b2)
    return out[:, :n] if n_pad != n else out


# ----------------------------------------------------------------------------
# Pallas kernel 2: fused MLP head (Linear+GELU x3, Linear+Tanh), eval-mode
# ----------------------------------------------------------------------------
def mlp_head_kernel(x_ref, *refs):
    o_ref = refs[-1]
    n_layers = (len(refs) - 1) // 2
    h = x_ref[...]                                    # (B, 96) f32
    for li in range(n_layers):
        w = refs[2 * li][...].astype(jnp.float32)     # (d_in, d_out) bf16 -> f32
        b = refs[2 * li + 1][...]                     # (1, d_out)    f32
        h = jnp.dot(h, w, preferred_element_type=jnp.float32) + b
        h = gelu_tanh(h) if li < n_layers - 1 else jnp.tanh(h)
    o_ref[...] = h.astype(o_ref.dtype)


def mlp_head(x, fc_params):
    """x: (B, 96) f32; fc_params: list of (w, b) with w in PyTorch (out, in)."""
    operands = []
    in_specs = [pl.BlockSpec(x.shape, lambda i: (0, 0))]
    for w, b in fc_params:
        wt = w.T.astype(jnp.bfloat16)                 # (d_in, d_out)
        b2 = b.reshape(1, -1).astype(jnp.float32)
        operands += [wt, b2]
        in_specs += [pl.BlockSpec(wt.shape, lambda i: (0, 0)),
                     pl.BlockSpec(b2.shape, lambda i: (0, 0))]
    bsz = x.shape[0]
    out_dim = fc_params[-1][0].shape[0]
    return pl.pallas_call(
        mlp_head_kernel,
        out_shape=jax.ShapeDtypeStruct((bsz, out_dim), jnp.float32),
        grid_spec=pltpu.PrefetchScalarGridSpec(
            num_scalar_prefetch=0,
            grid=(1,),
            in_specs=in_specs,
            out_specs=pl.BlockSpec((bsz, out_dim), lambda i: (0, 0)),
        ),
    )(x.astype(jnp.float32), *operands)


# ----------------------------------------------------------------------------
# Wrapper glue (XLA): BN folding, channel-major im2col, max-pool, global mean
# ----------------------------------------------------------------------------
def fold_bn(w, b, gamma, beta, mean, var, eps=1e-5):
    """Fold eval-mode BatchNorm3d into the preceding conv weight/bias (exact)."""
    s = gamma / jnp.sqrt(var + eps)
    w_f = w * s[:, None, None, None, None]
    b_f = (b - mean) * s + beta
    return w_f, b_f


def im2col_cm(x_cm, ksize, stride, padding):
    """Channel-major im2col.

    x_cm: (C, B, D, H, W) -> patches (C*Kd*Kh*Kw, B*Do*Ho*Wo), matching the
    row-major flattening of a (C_out, C_in, Kd, Kh, Kw) conv weight. Keeping
    the channel-major layout avoids any transpose between conv layers.
    """
    c, bsz, d, h, w = x_cm.shape
    kd, kh, kw = ksize
    sd, sh, sw = stride
    pd, ph, pw = padding
    xp = jnp.pad(x_cm, ((0, 0), (0, 0), (pd, pd), (ph, ph), (pw, pw)))
    do = (d + 2 * pd - kd) // sd + 1
    ho = (h + 2 * ph - kh) // sh + 1
    wo = (w + 2 * pw - kw) // sw + 1
    taps = []
    for a in range(kd):
        for bb in range(kh):
            for cc in range(kw):
                taps.append(xp[:, :,
                               a:a + sd * (do - 1) + 1:sd,
                               bb:bb + sh * (ho - 1) + 1:sh,
                               cc:cc + sw * (wo - 1) + 1:sw])
    k = kd * kh * kw
    pt = jnp.stack(taps, axis=1)                       # (C, K, B, Do, Ho, Wo)
    pt = pt.reshape(c * k, bsz * do * ho * wo)
    return pt, (do, ho, wo)


def maxpool3d_2_cm(x):
    """MaxPool3d(kernel=2, stride=2), channel-major (C,B,D,H,W), floor semantics."""
    c, bsz, d, h, w = x.shape
    x = x[:, :, : (d // 2) * 2, : (h // 2) * 2, : (w // 2) * 2]
    x = x.reshape(c, bsz, d // 2, 2, h // 2, 2, w // 2, 2)
    return x.max(axis=(3, 5, 7))


def forward_pallas(params, x):
    bsz = x.shape[0]
    # One-time cast to bf16 + channel-major layout; activations stay bf16/CM.
    xc = jnp.transpose(x, (1, 0, 2, 3, 4)).astype(jnp.bfloat16)   # (C,B,D,H,W)
    for cfg, prm in zip(CONV_CFGS, params["convs"]):
        w_f, b_f = fold_bn(prm["w"], prm["b"], prm["gamma"], prm["beta"],
                           prm["mean"], prm["var"])
        c_out = w_f.shape[0]
        patches, (do, ho, wo) = im2col_cm(xc, cfg["k"], cfg["s"], cfg["p"])
        out_flat = conv_mm_gelu(w_f.reshape(c_out, -1).astype(jnp.bfloat16),
                                patches, b_f)                     # (C_out, B*S) bf16
        xc = out_flat.reshape(c_out, bsz, do, ho, wo)             # no transpose
        xc = maxpool3d_2_cm(xc)
    feat = jnp.mean(xc.astype(jnp.float32), axis=(2, 3, 4)).T     # (B, C4)
    return mlp_head(feat, params["fcs"])


# ----------------------------------------------------------------------------
# Pure-XLA reference (independent conv / pooling / FC, same numeric recipe:
# bf16-rounded weights/activations, f32 compute)
# ----------------------------------------------------------------------------
def forward_reference(params, x):
    xb = x.astype(jnp.bfloat16).astype(jnp.float32)
    for cfg, prm in zip(CONV_CFGS, params["convs"]):
        w_f, b_f = fold_bn(prm["w"], prm["b"], prm["gamma"], prm["beta"],
                           prm["mean"], prm["var"])
        w32 = w_f.astype(jnp.bfloat16).astype(jnp.float32)
        out = jax.lax.conv_general_dilated(
            xb, w32, window_strides=cfg["s"],
            padding=[(q, q) for q in cfg["p"]],
            dimension_numbers=("NCDHW", "OIDHW", "NCDHW"))
        out = out + b_f[None, :, None, None, None]
        out = gelu_tanh(out).astype(jnp.bfloat16).astype(jnp.float32)
        xb = jax.lax.reduce_window(out, jnp.float32(-jnp.inf), jax.lax.max,
                                   (1, 1, 2, 2, 2), (1, 1, 2, 2, 2), "VALID")
    h = jnp.mean(xb, axis=(2, 3, 4))
    n_fc = len(params["fcs"])
    for i, (w, b) in enumerate(params["fcs"]):
        w32 = w.astype(jnp.bfloat16).astype(jnp.float32)
        h = jnp.dot(h, w32.T) + b
        h = gelu_tanh(h) if i < n_fc - 1 else jnp.tanh(h)
    return h


# ----------------------------------------------------------------------------
# Deterministic parameter init (PyTorch-like fan-in uniform; nontrivial BN)
# ----------------------------------------------------------------------------
def init_params(key):
    params = {"convs": [], "fcs": []}
    for cfg in CONV_CFGS:
        key, k1, k2, k3, k4, k5, k6 = jax.random.split(key, 7)
        fan_in = cfg["cin"] * int(np.prod(cfg["k"]))
        bound = 1.0 / math.sqrt(fan_in)
        c_out = cfg["cout"]
        params["convs"].append(dict(
            w=jax.random.uniform(k1, (c_out, cfg["cin"], *cfg["k"]),
                                 jnp.float32, -bound, bound),
            b=jax.random.uniform(k2, (c_out,), jnp.float32, -bound, bound),
            gamma=jax.random.uniform(k3, (c_out,), jnp.float32, 0.5, 1.5),
            beta=jax.random.uniform(k4, (c_out,), jnp.float32, -0.5, 0.5),
            mean=jax.random.uniform(k5, (c_out,), jnp.float32, -0.5, 0.5),
            var=jax.random.uniform(k6, (c_out,), jnp.float32, 0.5, 1.5),
        ))
    for d_in, d_out in FC_DIMS:
        key, k1, k2 = jax.random.split(key, 3)
        bound = 1.0 / math.sqrt(d_in)
        params["fcs"].append((
            jax.random.uniform(k1, (d_out, d_in), jnp.float32, -bound, bound),
            jax.random.uniform(k2, (d_out,), jnp.float32, -bound, bound),
        ))
    return params


if __name__ == "__main__":
    # Smallest input that survives the stride-17 first conv and four /2 pools:
    # (B, C_in, D, H, W) = (2, 1, 16, 16, 272) -> features (B, 96) -> output (B, 6).
    B, D, H, W = 2, 16, 16, 272
    key = jax.random.PRNGKey(0)
    kp, kx = jax.random.split(key)
    params = init_params(kp)
    x = jax.random.normal(kx, (B, 1, D, H, W), jnp.float32)

    out = jax.jit(forward_pallas)(params, x)
    out = jax.block_until_ready(out)

    ref = jax.jit(forward_reference)(params, x)
    ref = jax.block_until_ready(ref)

    assert out.shape == (B, 6)
    # Both paths use identical bf16-rounded weights/activations and f32 compute;
    # they differ only in accumulation order (conv vs im2col matmul).
    np.testing.assert_allclose(np.asarray(out), np.asarray(ref),
                               rtol=2e-3, atol=2e-3)
    print("KERNEL_OK")
</pallas_src>

<mosaic_0001>
module attributes {stable_mosaic.version = 11 : i64} {
  func.func @conv_mm_gelu_kernel(%arg0: i32, %arg1: memref<48x160xbf16, #tpu.memory_space<vmem>>, %arg2: memref<160x2048xbf16, #tpu.memory_space<vmem>>, %arg3: memref<48x1xf32, #tpu.memory_space<vmem>>, %arg4: memref<48x2048xbf16, #tpu.memory_space<vmem>>) attributes {dimension_semantics = [#tpu.dimension_semantics<parallel>], iteration_bounds = array<i64: 4>, scalar_prefetch = 0 : i64, scratch_operands = 0 : i64, tpu.core_type = #tpu.core_type<tc>, window_params = [{pipeline_mode = #tpu.pipeline_mode<synchronous>, transform_indices = @transform_0, window_bounds = array<i64: 48, 160>}, {transform_indices = @transform_1, window_bounds = array<i64: 160, 2048>}, {pipeline_mode = #tpu.pipeline_mode<synchronous>, transform_indices = @transform_2, window_bounds = array<i64: 48, 1>}, {transform_indices = @transform_3, window_bounds = array<i64: 48, 2048>}]} {
    %c0 = arith.constant 0 : index
    %c0_0 = arith.constant 0 : index
    %0 = vector.load %arg1[%c0, %c0_0] : memref<48x160xbf16, #tpu.memory_space<vmem>>, vector<48x160xbf16>
    %1 = arith.extf %0 : vector<48x160xbf16> to vector<48x160xf32>
    %c0_1 = arith.constant 0 : index
    %c0_2 = arith.constant 0 : index
    %2 = vector.load %arg2[%c0_1, %c0_2] : memref<160x2048xbf16, #tpu.memory_space<vmem>>, vector<160x2048xbf16>
    %3 = arith.extf %2 : vector<160x2048xbf16> to vector<160x2048xf32>
    %cst = arith.constant dense<0.000000e+00> : vector<48x2048xf32>
    %4 = tpu.matmul %1, %3, %cst {dimension_numbers = #tpu.dot_dimension_numbers<[1], [0], [0], [1], [0, 0, 1, 1], [], []>} : vector<48x160xf32>, vector<160x2048xf32>, vector<48x2048xf32> -> vector<48x2048xf32>
    %c0_3 = arith.constant 0 : index
    %c0_4 = arith.constant 0 : index
    %5 = vector.load %arg3[%c0_3, %c0_4] : memref<48x1xf32, #tpu.memory_space<vmem>>, vector<48x1xf32>
    %6 = vector.broadcast %5 : vector<48x1xf32> to vector<48x2048xf32>
    %7 = arith.addf %4, %6 : vector<48x2048xf32>
    %cst_5 = arith.constant 5.000000e-01 : f32
    %8 = vector.broadcast %cst_5 : f32 to vector<48x2048xf32>
    %9 = arith.mulf %8, %7 : vector<48x2048xf32>
    %cst_6 = arith.constant 4.471500e-02 : f32
    %10 = vector.broadcast %cst_6 : f32 to vector<48x2048xf32>
    %11 = arith.mulf %10, %7 : vector<48x2048xf32>
    %12 = arith.mulf %11, %7 : vector<48x2048xf32>
    %13 = arith.mulf %12, %7 : vector<48x2048xf32>
    %14 = arith.addf %7, %13 : vector<48x2048xf32>
    %cst_7 = arith.constant 0.797884583 : f32
    %15 = vector.broadcast %cst_7 : f32 to vector<48x2048xf32>
    %16 = arith.mulf %15, %14 : vector<48x2048xf32>
    %17 = math.tanh %16 : vector<48x2048xf32>
    %cst_8 = arith.constant 1.000000e+00 : f32
    %18 = vector.broadcast %cst_8 : f32 to vector<48x2048xf32>
    %19 = arith.addf %18, %17 : vector<48x2048xf32>
    %20 = arith.mulf %9, %19 : vector<48x2048xf32>
    %21 = arith.truncf %20 : vector<48x2048xf32> to vector<48x2048xbf16>
    %c0_9 = arith.constant 0 : index
    %c0_10 = arith.constant 0 : index
    %22 = vector.load %arg4[%c0_9, %c0_10] : memref<48x2048xbf16, #tpu.memory_space<vmem>>, vector<48x2048xbf16>
    tpu.vector_store %arg4[%c0_9, %c0_10], %21 {strides = array<i32>} : memref<48x2048xbf16, #tpu.memory_space<vmem>>, vector<48x2048xbf16>,
    return
  }
  func.func @transform_0(%arg0: i32) -> (i32, i32) {
    %c0_i32 = arith.constant 0 : i32
    %c0_i32_0 = arith.constant 0 : i32
    %c0_i32_1 = arith.constant 0 : i32
    return %c0_i32, %c0_i32_0 : i32, i32
  }
  func.func @transform_1(%arg0: i32) -> (i32, i32) {
    %c0_i32 = arith.constant 0 : i32
    %c0_i32_0 = arith.constant 0 : i32
    return %c0_i32, %arg0 : i32, i32
  }
  func.func @transform_2(%arg0: i32) -> (i32, i32) {
    %c0_i32 = arith.constant 0 : i32
    %c0_i32_0 = arith.constant 0 : i32
    %c0_i32_1 = arith.constant 0 : i32
    return %c0_i32, %c0_i32_0 : i32, i32
  }
  func.func @transform_3(%arg0: i32) -> (i32, i32) {
    %c0_i32 = arith.constant 0 : i32
    %c0_i32_0 = arith.constant 0 : i32
    return %c0_i32, %arg0 : i32, i32
  }
}

module attributes {stable_mosaic.version = 11 : i64} {
  func.func @conv_mm_gelu_kernel(%arg0: i32, %arg1: memref<48x1296xbf16, #tpu.memory_space<vmem>>, %arg2: memref<1296x512xbf16, #tpu.memory_space<vmem>>, %arg3: memref<48x1xf32, #tpu.memory_space<vmem>>, %arg4: memref<48x512xbf16, #tpu.memory_space<vmem>>) attributes {dimension_semantics = [#tpu.dimension_semantics<parallel>], iteration_bounds = array<i64: 2>, scalar_prefetch = 0 : i64, scratch_operands = 0 : i64, tpu.core_type = #tpu.core_type<tc>, window_params = [{pipeline_mode = #tpu.pipeline_mode<synchronous>, transform_indices = @transform_0, window_bounds = array<i64: 48, 1296>}, {transform_indices = @transform_1, window_bounds = array<i64: 1296, 512>}, {pipeline_mode = #tpu.pipeline_mode<synchronous>, transform_indices = @transform_2, window_bounds = array<i64: 48, 1>}, {transform_indices = @transform_3, window_bounds = array<i64: 48, 512>}]} {
    %c0 = arith.constant 0 : index
    %c0_0 = arith.constant 0 : index
    %0 = vector.load %arg1[%c0, %c0_0] : memref<48x1296xbf16, #tpu.memory_space<vmem>>, vector<48x1296xbf16>
    %1 = arith.extf %0 : vector<48x1296xbf16> to vector<48x1296xf32>
    %c0_1 = arith.constant 0 : index
    %c0_2 = arith.constant 0 : index
    %2 = vector.load %arg2[%c0_1, %c0_2] : memref<1296x512xbf16, #tpu.memory_space<vmem>>, vector<1296x512xbf16>
    %3 = arith.extf %2 : vector<1296x512xbf16> to vector<1296x512xf32>
    %cst = arith.constant dense<0.000000e+00> : vector<48x512xf32>
    %4 = tpu.matmul %1, %3, %cst {dimension_numbers = #tpu.dot_dimension_numbers<[1], [0], [0], [1], [0, 0, 1, 1], [], []>} : vector<48x1296xf32>, vector<1296x512xf32>, vector<48x512xf32> -> vector<48x512xf32>
    %c0_3 = arith.constant 0 : index
    %c0_4 = arith.constant 0 : index
    %5 = vector.load %arg3[%c0_3, %c0_4] : memref<48x1xf32, #tpu.memory_space<vmem>>, vector<48x1xf32>
    %6 = vector.broadcast %5 : vector<48x1xf32> to vector<48x512xf32>
    %7 = arith.addf %4, %6 : vector<48x512xf32>
    %cst_5 = arith.constant 5.000000e-01 : f32
    %8 = vector.broadcast %cst_5 : f32 to vector<48x512xf32>
    %9 = arith.mulf %8, %7 : vector<48x512xf32>
    %cst_6 = arith.constant 4.471500e-02 : f32
    %10 = vector.broadcast %cst_6 : f32 to vector<48x512xf32>
    %11 = arith.mulf %10, %7 : vector<48x512xf32>
    %12 = arith.mulf %11, %7 : vector<48x512xf32>
    %13 = arith.mulf %12, %7 : vector<48x512xf32>
    %14 = arith.addf %7, %13 : vector<48x512xf32>
    %cst_7 = arith.constant 0.797884583 : f32
    %15 = vector.broadcast %cst_7 : f32 to vector<48x512xf32>
    %16 = arith.mulf %15, %14 : vector<48x512xf32>
    %17 = math.tanh %16 : vector<48x512xf32>
    %cst_8 = arith.constant 1.000000e+00 : f32
    %18 = vector.broadcast %cst_8 : f32 to vector<48x512xf32>
    %19 = arith.addf %18, %17 : vector<48x512xf32>
    %20 = arith.mulf %9, %19 : vector<48x512xf32>
    %21 = arith.truncf %20 : vector<48x512xf32> to vector<48x512xbf16>
    %c0_9 = arith.constant 0 : index
    %c0_10 = arith.constant 0 : index
    %22 = vector.load %arg4[%c0_9, %c0_10] : memref<48x512xbf16, #tpu.memory_space<vmem>>, vector<48x512xbf16>
    tpu.vector_store %arg4[%c0_9, %c0_10], %21 {strides = array<i32>} : memref<48x512xbf16, #tpu.memory_space<vmem>>, vector<48x512xbf16>,
    return
  }
  func.func @transform_0(%arg0: i32) -> (i32, i32) {
    %c0_i32 = arith.constant 0 : i32
    %c0_i32_0 = arith.constant 0 : i32
    %c0_i32_1 = arith.constant 0 : i32
    return %c0_i32, %c0_i32_0 : i32, i32
  }
  func.func @transform_1(%arg0: i32) -> (i32, i32) {
    %c0_i32 = arith.constant 0 : i32
    %c0_i32_0 = arith.constant 0 : i32
    return %c0_i32, %arg0 : i32, i32
  }
  func.func @transform_2(%arg0: i32) -> (i32, i32) {
    %c0_i32 = arith.constant 0 : i32
    %c0_i32_0 = arith.constant 0 : i32
    %c0_i32_1 = arith.constant 0 : i32
    return %c0_i32, %c0_i32_0 : i32, i32
  }
  func.func @transform_3(%arg0: i32) -> (i32, i32) {
    %c0_i32 = arith.constant 0 : i32
    %c0_i32_0 = arith.constant 0 : i32
    return %c0_i32, %arg0 : i32, i32
  }
}

module attributes {stable_mosaic.version = 11 : i64} {
  func.func @conv_mm_gelu_kernel(%arg0: i32, %arg1: memref<64x1296xbf16, #tpu.memory_space<vmem>>, %arg2: memref<1296x128xbf16, #tpu.memory_space<vmem>>, %arg3: memref<64x1xf32, #tpu.memory_space<vmem>>, %arg4: memref<64x128xbf16, #tpu.memory_space<vmem>>) attributes {dimension_semantics = [#tpu.dimension_semantics<parallel>], iteration_bounds = array<i64: 1>, scalar_prefetch = 0 : i64, scratch_operands = 0 : i64, tpu.core_type = #tpu.core_type<tc>, window_params = [{pipeline_mode = #tpu.pipeline_mode<synchronous>, transform_indices = @transform_0, window_bounds = array<i64: 64, 1296>}, {transform_indices = @transform_1, window_bounds = array<i64: 1296, 128>}, {pipeline_mode = #tpu.pipeline_mode<synchronous>, transform_indices = @transform_2, window_bounds = array<i64: 64, 1>}, {transform_indices = @transform_3, window_bounds = array<i64: 64, 128>}]} {
    %c0 = arith.constant 0 : index
    %c0_0 = arith.constant 0 : index
    %0 = vector.load %arg1[%c0, %c0_0] : memref<64x1296xbf16, #tpu.memory_space<vmem>>, vector<64x1296xbf16>
    %1 = arith.extf %0 : vector<64x1296xbf16> to vector<64x1296xf32>
    %c0_1 = arith.constant 0 : index
    %c0_2 = arith.constant 0 : index
    %2 = vector.load %arg2[%c0_1, %c0_2] : memref<1296x128xbf16, #tpu.memory_space<vmem>>, vector<1296x128xbf16>
    %3 = arith.extf %2 : vector<1296x128xbf16> to vector<1296x128xf32>
    %cst = arith.constant dense<0.000000e+00> : vector<64x128xf32>
    %4 = tpu.matmul %1, %3, %cst {dimension_numbers = #tpu.dot_dimension_numbers<[1], [0], [0], [1], [0, 0, 1, 1], [], []>} : vector<64x1296xf32>, vector<1296x128xf32>, vector<64x128xf32> -> vector<64x128xf32>
    %c0_3 = arith.constant 0 : index
    %c0_4 = arith.constant 0 : index
    %5 = vector.load %arg3[%c0_3, %c0_4] : memref<64x1xf32, #tpu.memory_space<vmem>>, vector<64x1xf32>
    %6 = vector.broadcast %5 : vector<64x1xf32> to vector<64x128xf32>
    %7 = arith.addf %4, %6 : vector<64x128xf32>
    %cst_5 = arith.constant 5.000000e-01 : f32
    %8 = vector.broadcast %cst_5 : f32 to vector<64x128xf32>
    %9 = arith.mulf %8, %7 : vector<64x128xf32>
    %cst_6 = arith.constant 4.471500e-02 : f32
    %10 = vector.broadcast %cst_6 : f32 to vector<64x128xf32>
    %11 = arith.mulf %10, %7 : vector<64x128xf32>
    %12 = arith.mulf %11, %7 : vector<64x128xf32>
    %13 = arith.mulf %12, %7 : vector<64x128xf32>
    %14 = arith.addf %7, %13 : vector<64x128xf32>
    %cst_7 = arith.constant 0.797884583 : f32
    %15 = vector.broadcast %cst_7 : f32 to vector<64x128xf32>
    %16 = arith.mulf %15, %14 : vector<64x128xf32>
    %17 = math.tanh %16 : vector<64x128xf32>
    %cst_8 = arith.constant 1.000000e+00 : f32
    %18 = vector.broadcast %cst_8 : f32 to vector<64x128xf32>
    %19 = arith.addf %18, %17 : vector<64x128xf32>
    %20 = arith.mulf %9, %19 : vector<64x128xf32>
    %21 = arith.truncf %20 : vector<64x128xf32> to vector<64x128xbf16>
    %c0_9 = arith.constant 0 : index
    %c0_10 = arith.constant 0 : index
    %22 = vector.load %arg4[%c0_9, %c0_10] : memref<64x128xbf16, #tpu.memory_space<vmem>>, vector<64x128xbf16>
    tpu.vector_store %arg4[%c0_9, %c0_10], %21 {strides = array<i32>} : memref<64x128xbf16, #tpu.memory_space<vmem>>, vector<64x128xbf16>,
    return
  }
  func.func @transform_0(%arg0: i32) -> (i32, i32) {
    %c0_i32 = arith.constant 0 : i32
    %c0_i32_0 = arith.constant 0 : i32
    %c0_i32_1 = arith.constant 0 : i32
    return %c0_i32, %c0_i32_0 : i32, i32
  }
  func.func @transform_1(%arg0: i32) -> (i32, i32) {
    %c0_i32 = arith.constant 0 : i32
    %c0_i32_0 = arith.constant 0 : i32
    return %c0_i32, %arg0 : i32, i32
  }
  func.func @transform_2(%arg0: i32) -> (i32, i32) {
    %c0_i32 = arith.constant 0 : i32
    %c0_i32_0 = arith.constant 0 : i32
    %c0_i32_1 = arith.constant 0 : i32
    return %c0_i32, %c0_i32_0 : i32, i32
  }
  func.func @transform_3(%arg0: i32) -> (i32, i32) {
    %c0_i32 = arith.constant 0 : i32
    %c0_i32_0 = arith.constant 0 : i32
    return %c0_i32, %arg0 : i32, i32
  }
}

module attributes {stable_mosaic.version = 11 : i64} {
  func.func @conv_mm_gelu_kernel(%arg0: i32, %arg1: memref<96x1728xbf16, #tpu.memory_space<vmem>>, %arg2: memref<1728x128xbf16, #tpu.memory_space<vmem>>, %arg3: memref<96x1xf32, #tpu.memory_space<vmem>>, %arg4: memref<96x128xbf16, #tpu.memory_space<vmem>>) attributes {dimension_semantics = [#tpu.dimension_semantics<parallel>], iteration_bounds = array<i64: 1>, scalar_prefetch = 0 : i64, scratch_operands = 0 : i64, tpu.core_type = #tpu.core_type<tc>, window_params = [{pipeline_mode = #tpu.pipeline_mode<synchronous>, transform_indices = @transform_0, window_bounds = array<i64: 96, 1728>}, {transform_indices = @transform_1, window_bounds = array<i64: 1728, 128>}, {pipeline_mode = #tpu.pipeline_mode<synchronous>, transform_indices = @transform_2, window_bounds = array<i64: 96, 1>}, {transform_indices = @transform_3, window_bounds = array<i64: 96, 128>}]} {
    %c0 = arith.constant 0 : index
    %c0_0 = arith.constant 0 : index
    %0 = vector.load %arg1[%c0, %c0_0] : memref<96x1728xbf16, #tpu.memory_space<vmem>>, vector<96x1728xbf16>
    %1 = arith.extf %0 : vector<96x1728xbf16> to vector<96x1728xf32>
    %c0_1 = arith.constant 0 : index
    %c0_2 = arith.constant 0 : index
    %2 = vector.load %arg2[%c0_1, %c0_2] : memref<1728x128xbf16, #tpu.memory_space<vmem>>, vector<1728x128xbf16>
    %3 = arith.extf %2 : vector<1728x128xbf16> to vector<1728x128xf32>
    %cst = arith.constant dense<0.000000e+00> : vector<96x128xf32>
    %4 = tpu.matmul %1, %3, %cst {dimension_numbers = #tpu.dot_dimension_numbers<[1], [0], [0], [1], [0, 0, 1, 1], [], []>} : vector<96x1728xf32>, vector<1728x128xf32>, vector<96x128xf32> -> vector<96x128xf32>
    %c0_3 = arith.constant 0 : index
    %c0_4 = arith.constant 0 : index
    %5 = vector.load %arg3[%c0_3, %c0_4] : memref<96x1xf32, #tpu.memory_space<vmem>>, vector<96x1xf32>
    %6 = vector.broadcast %5 : vector<96x1xf32> to vector<96x128xf32>
    %7 = arith.addf %4, %6 : vector<96x128xf32>
    %cst_5 = arith.constant 5.000000e-01 : f32
    %8 = vector.broadcast %cst_5 : f32 to vector<96x128xf32>
    %9 = arith.mulf %8, %7 : vector<96x128xf32>
    %cst_6 = arith.constant 4.471500e-02 : f32
    %10 = vector.broadcast %cst_6 : f32 to vector<96x128xf32>
    %11 = arith.mulf %10, %7 : vector<96x128xf32>
    %12 = arith.mulf %11, %7 : vector<96x128xf32>
    %13 = arith.mulf %12, %7 : vector<96x128xf32>
    %14 = arith.addf %7, %13 : vector<96x128xf32>
    %cst_7 = arith.constant 0.797884583 : f32
    %15 = vector.broadcast %cst_7 : f32 to vector<96x128xf32>
    %16 = arith.mulf %15, %14 : vector<96x128xf32>
    %17 = math.tanh %16 : vector<96x128xf32>
    %cst_8 = arith.constant 1.000000e+00 : f32
    %18 = vector.broadcast %cst_8 : f32 to vector<96x128xf32>
    %19 = arith.addf %18, %17 : vector<96x128xf32>
    %20 = arith.mulf %9, %19 : vector<96x128xf32>
    %21 = arith.truncf %20 : vector<96x128xf32> to vector<96x128xbf16>
    %c0_9 = arith.constant 0 : index
    %c0_10 = arith.constant 0 : index
    %22 = vector.load %arg4[%c0_9, %c0_10] : memref<96x128xbf16, #tpu.memory_space<vmem>>, vector<96x128xbf16>
    tpu.vector_store %arg4[%c0_9, %c0_10], %21 {strides = array<i32>} : memref<96x128xbf16, #tpu.memory_space<vmem>>, vector<96x128xbf16>,
    return
  }
  func.func @transform_0(%arg0: i32) -> (i32, i32) {
    %c0_i32 = arith.constant 0 : i32
    %c0_i32_0 = arith.constant 0 : i32
    %c0_i32_1 = arith.constant 0 : i32
    return %c0_i32, %c0_i32_0 : i32, i32
  }
  func.func @transform_1(%arg0: i32) -> (i32, i32) {
    %c0_i32 = arith.constant 0 : i32
    %c0_i32_0 = arith.constant 0 : i32
    return %c0_i32, %arg0 : i32, i32
  }
  func.func @transform_2(%arg0: i32) -> (i32, i32) {
    %c0_i32 = arith.constant 0 : i32
    %c0_i32_0 = arith.constant 0 : i32
    %c0_i32_1 = arith.constant 0 : i32
    return %c0_i32, %c0_i32_0 : i32, i32
  }
  func.func @transform_3(%arg0: i32) -> (i32, i32) {
    %c0_i32 = arith.constant 0 : i32
    %c0_i32_0 = arith.constant 0 : i32
    return %c0_i32, %arg0 : i32, i32
  }
}

module attributes {stable_mosaic.version = 11 : i64} {
  func.func @mlp_head_kernel(%arg0: i32, %arg1: memref<2x96xf32, #tpu.memory_space<vmem>>, %arg2: memref<96x96xbf16, #tpu.memory_space<vmem>>, %arg3: memref<1x96xf32, #tpu.memory_space<vmem>>, %arg4: memref<96x64xbf16, #tpu.memory_space<vmem>>, %arg5: memref<1x64xf32, #tpu.memory_space<vmem>>, %arg6: memref<64x32xbf16, #tpu.memory_space<vmem>>, %arg7: memref<1x32xf32, #tpu.memory_space<vmem>>, %arg8: memref<32x6xbf16, #tpu.memory_space<vmem>>, %arg9: memref<1x6xf32, #tpu.memory_space<vmem>>, %arg10: memref<2x6xf32, #tpu.memory_space<vmem>>) attributes {dimension_semantics = [#tpu.dimension_semantics<arbitrary>], iteration_bounds = array<i64: 1>, scalar_prefetch = 0 : i64, scratch_operands = 0 : i64, tpu.core_type = #tpu.core_type<tc>, window_params = [{pipeline_mode = #tpu.pipeline_mode<synchronous>, transform_indices = @transform_0, window_bounds = array<i64: 2, 96>}, {pipeline_mode = #tpu.pipeline_mode<synchronous>, transform_indices = @transform_1, window_bounds = array<i64: 96, 96>}, {pipeline_mode = #tpu.pipeline_mode<synchronous>, transform_indices = @transform_2, window_bounds = array<i64: 1, 96>}, {pipeline_mode = #tpu.pipeline_mode<synchronous>, transform_indices = @transform_3, window_bounds = array<i64: 96, 64>}, {pipeline_mode = #tpu.pipeline_mode<synchronous>, transform_indices = @transform_4, window_bounds = array<i64: 1, 64>}, {pipeline_mode = #tpu.pipeline_mode<synchronous>, transform_indices = @transform_5, window_bounds = array<i64: 64, 32>}, {pipeline_mode = #tpu.pipeline_mode<synchronous>, transform_indices = @transform_6, window_bounds = array<i64: 1, 32>}, {pipeline_mode = #tpu.pipeline_mode<synchronous>, transform_indices = @transform_7, window_bounds = array<i64: 32, 6>}, {pipeline_mode = #tpu.pipeline_mode<synchronous>, transform_indices = @transform_8, window_bounds = array<i64: 1, 6>}, {pipeline_mode = #tpu.pipeline_mode<synchronous>, transform_indices = @transform_9, window_bounds = array<i64: 2, 6>}]} {
    %c0 = arith.constant 0 : index
    %c0_0 = arith.constant 0 : index
    %0 = vector.load %arg1[%c0, %c0_0] : memref<2x96xf32, #tpu.memory_space<vmem>>, vector<2x96xf32>
    %c0_1 = arith.constant 0 : index
    %c0_2 = arith.constant 0 : index
    %1 = vector.load %arg2[%c0_1, %c0_2] : memref<96x96xbf16, #tpu.memory_space<vmem>>, vector<96x96xbf16>
    %2 = arith.extf %1 : vector<96x96xbf16> to vector<96x96xf32>
    %c0_3 = arith.constant 0 : index
    %c0_4 = arith.constant 0 : index
    %3 = vector.load %arg3[%c0_3, %c0_4] : memref<1x96xf32, #tpu.memory_space<vmem>>, vector<1x96xf32>
    %cst = arith.constant dense<0.000000e+00> : vector<2x96xf32>
    %4 = tpu.matmul %0, %2, %cst {dimension_numbers = #tpu.dot_dimension_numbers<[1], [0], [0], [1], [0, 0, 1, 1], [], []>} : vector<2x96xf32>, vector<96x96xf32>, vector<2x96xf32> -> vector<2x96xf32>
    %5 = vector.broadcast %3 : vector<1x96xf32> to vector<2x96xf32>
    %6 = arith.addf %4, %5 : vector<2x96xf32>
    %cst_5 = arith.constant 5.000000e-01 : f32
    %7 = vector.broadcast %cst_5 : f32 to vector<2x96xf32>
    %8 = arith.mulf %7, %6 : vector<2x96xf32>
    %cst_6 = arith.constant 4.471500e-02 : f32
    %9 = vector.broadcast %cst_6 : f32 to vector<2x96xf32>
    %10 = arith.mulf %9, %6 : vector<2x96xf32>
    %11 = arith.mulf %10, %6 : vector<2x96xf32>
    %12 = arith.mulf %11, %6 : vector<2x96xf32>
    %13 = arith.addf %6, %12 : vector<2x96xf32>
    %cst_7 = arith.constant 0.797884583 : f32
    %14 = vector.broadcast %cst_7 : f32 to vector<2x96xf32>
    %15 = arith.mulf %14, %13 : vector<2x96xf32>
    %16 = math.tanh %15 : vector<2x96xf32>
    %cst_8 = arith.constant 1.000000e+00 : f32
    %17 = vector.broadcast %cst_8 : f32 to vector<2x96xf32>
    %18 = arith.addf %17, %16 : vector<2x96xf32>
    %19 = arith.mulf %8, %18 : vector<2x96xf32>
    %c0_9 = arith.constant 0 : index
    %c0_10 = arith.constant 0 : index
    %20 = vector.load %arg4[%c0_9, %c0_10] : memref<96x64xbf16, #tpu.memory_space<vmem>>, vector<96x64xbf16>
    %21 = arith.extf %20 : vector<96x64xbf16> to vector<96x64xf32>
    %c0_11 = arith.constant 0 : index
    %c0_12 = arith.constant 0 : index
    %22 = vector.load %arg5[%c0_11, %c0_12] : memref<1x64xf32, #tpu.memory_space<vmem>>, vector<1x64xf32>
    %cst_13 = arith.constant dense<0.000000e+00> : vector<2x64xf32>
    %23 = tpu.matmul %19, %21, %cst_13 {dimension_numbers = #tpu.dot_dimension_numbers<[1], [0], [0], [1], [0, 0, 1, 1], [], []>} : vector<2x96xf32>, vector<96x64xf32>, vector<2x64xf32> -> vector<2x64xf32>
    %24 = vector.broadcast %22 : vector<1x64xf32> to vector<2x64xf32>
    %25 = arith.addf %23, %24 : vector<2x64xf32>
    %cst_14 = arith.constant 5.000000e-01 : f32
    %26 = vector.broadcast %cst_14 : f32 to vector<2x64xf32>
    %27 = arith.mulf %26, %25 : vector<2x64xf32>
    %cst_15 = arith.constant 4.471500e-02 : f32
    %28 = vector.broadcast %cst_15 : f32 to vector<2x64xf32>
    %29 = arith.mulf %28, %25 : vector<2x64xf32>
    %30 = arith.mulf %29, %25 : vector<2x64xf32>
    %31 = arith.mulf %30, %25 : vector<2x64xf32>
    %32 = arith.addf %25, %31 : vector<2x64xf32>
    %cst_16 = arith.constant 0.797884583 : f32
    %33 = vector.broadcast %cst_16 : f32 to vector<2x64xf32>
    %34 = arith.mulf %33, %32 : vector<2x64xf32>
    %35 = math.tanh %34 : vector<2x64xf32>
    %cst_17 = arith.constant 1.000000e+00 : f32
    %36 = vector.broadcast %cst_17 : f32 to vector<2x64xf32>
    %37 = arith.addf %36, %35 : vector<2x64xf32>
    %38 = arith.mulf %27, %37 : vector<2x64xf32>
    %c0_18 = arith.constant 0 : index
    %c0_19 = arith.constant 0 : index
    %39 = vector.load %arg6[%c0_18, %c0_19] : memref<64x32xbf16, #tpu.memory_space<vmem>>, vector<64x32xbf16>
    %40 = arith.extf %39 : vector<64x32xbf16> to vector<64x32xf32>
    %c0_20 = arith.constant 0 : index
    %c0_21 = arith.constant 0 : index
    %41 = vector.load %arg7[%c0_20, %c0_21] : memref<1x32xf32, #tpu.memory_space<vmem>>, vector<1x32xf32>
    %cst_22 = arith.constant dense<0.000000e+00> : vector<2x32xf32>
    %42 = tpu.matmul %38, %40, %cst_22 {dimension_numbers = #tpu.dot_dimension_numbers<[1], [0], [0], [1], [0, 0, 1, 1], [], []>} : vector<2x64xf32>, vector<64x32xf32>, vector<2x32xf32> -> vector<2x32xf32>
    %43 = vector.broadcast %41 : vector<1x32xf32> to vector<2x32xf32>
    %44 = arith.addf %42, %43 : vector<2x32xf32>
    %cst_23 = arith.constant 5.000000e-01 : f32
    %45 = vector.broadcast %cst_23 : f32 to vector<2x32xf32>
    %46 = arith.mulf %45, %44 : vector<2x32xf32>
    %cst_24 = arith.constant 4.471500e-02 : f32
    %47 = vector.broadcast %cst_24 : f32 to vector<2x32xf32>
    %48 = arith.mulf %47, %44 : vector<2x32xf32>
    %49 = arith.mulf %48, %44 : vector<2x32xf32>
    %50 = arith.mulf %49, %44 : vector<2x32xf32>
    %51 = arith.addf %44, %50 : vector<2x32xf32>
    %cst_25 = arith.constant 0.797884583 : f32
    %52 = vector.broadcast %cst_25 : f32 to vector<2x32xf32>
    %53 = arith.mulf %52, %51 : vector<2x32xf32>
    %54 = math.tanh %53 : vector<2x32xf32>
    %cst_26 = arith.constant 1.000000e+00 : f32
    %55 = vector.broadcast %cst_26 : f32 to vector<2x32xf32>
    %56 = arith.addf %55, %54 : vector<2x32xf32>
    %57 = arith.mulf %46, %56 : vector<2x32xf32>
    %c0_27 = arith.constant 0 : index
    %c0_28 = arith.constant 0 : index
    %58 = vector.load %arg8[%c0_27, %c0_28] : memref<32x6xbf16, #tpu.memory_space<vmem>>, vector<32x6xbf16>
    %59 = arith.extf %58 : vector<32x6xbf16> to vector<32x6xf32>
    %c0_29 = arith.constant 0 : index
    %c0_30 = arith.constant 0 : index
    %60 = vector.load %arg9[%c0_29, %c0_30] : memref<1x6xf32, #tpu.memory_space<vmem>>, vector<1x6xf32>
    %cst_31 = arith.constant dense<0.000000e+00> : vector<2x6xf32>
    %61 = tpu.matmul %57, %59, %cst_31 {dimension_numbers = #tpu.dot_dimension_numbers<[1], [0], [0], [1], [0, 0, 1, 1], [], []>} : vector<2x32xf32>, vector<32x6xf32>, vector<2x6xf32> -> vector<2x6xf32>
    %62 = vector.broadcast %60 : vector<1x6xf32> to vector<2x6xf32>
    %63 = arith.addf %61, %62 : vector<2x6xf32>
    %64 = math.tanh %63 : vector<2x6xf32>
    %c0_32 = arith.constant 0 : index
    %c0_33 = arith.constant 0 : index
    %65 = vector.load %arg10[%c0_32, %c0_33] : memref<2x6xf32, #tpu.memory_space<vmem>>, vector<2x6xf32>
    tpu.vector_store %arg10[%c0_32, %c0_33], %64 {strides = array<i32>} : memref<2x6xf32, #tpu.memory_space<vmem>>, vector<2x6xf32>,
    return
  }
  func.func @transform_0(%arg0: i32) -> (i32, i32) {
    %c0_i32 = arith.constant 0 : i32
    %c0_i32_0 = arith.constant 0 : i32
    %c0_i32_1 = arith.constant 0 : i32
    return %c0_i32, %c0_i32_0 : i32, i32
  }
  func.func @transform_1(%arg0: i32) -> (i32, i32) {
    %c0_i32 = arith.constant 0 : i32
    %c0_i32_0 = arith.constant 0 : i32
    %c0_i32_1 = arith.constant 0 : i32
    return %c0_i32, %c0_i32_0 : i32, i32
  }
  func.func @transform_2(%arg0: i32) -> (i32, i32) {
    %c0_i32 = arith.constant 0 : i32
    %c0_i32_0 = arith.constant 0 : i32
    %c0_i32_1 = arith.constant 0 : i32
    return %c0_i32, %c0_i32_0 : i32, i32
  }
  func.func @transform_3(%arg0: i32) -> (i32, i32) {
    %c0_i32 = arith.constant 0 : i32
    %c0_i32_0 = arith.constant 0 : i32
    %c0_i32_1 = arith.constant 0 : i32
    return %c0_i32, %c0_i32_0 : i32, i32
  }
  func.func @transform_4(%arg0: i32) -> (i32, i32) {
    %c0_i32 = arith.constant 0 : i32
    %c0_i32_0 = arith.constant 0 : i32
    %c0_i32_1 = arith.constant 0 : i32
    return %c0_i32, %c0_i32_0 : i32, i32
  }
  func.func @transform_5(%arg0: i32) -> (i32, i32) {
    %c0_i32 = arith.constant 0 : i32
    %c0_i32_0 = arith.constant 0 : i32
    %c0_i32_1 = arith.constant 0 : i32
    return %c0_i32, %c0_i32_0 : i32, i32
  }
  func.func @transform_6(%arg0: i32) -> (i32, i32) {
    %c0_i32 = arith.constant 0 : i32
    %c0_i32_0 = arith.constant 0 : i32
    %c0_i32_1 = arith.constant 0 : i32
    return %c0_i32, %c0_i32_0 : i32, i32
  }
  func.func @transform_7(%arg0: i32) -> (i32, i32) {
    %c0_i32 = arith.constant 0 : i32
    %c0_i32_0 = arith.constant 0 : i32
    %c0_i32_1 = arith.constant 0 : i32
    return %c0_i32, %c0_i32_0 : i32, i32
  }
  func.func @transform_8(%arg0: i32) -> (i32, i32) {
    %c0_i32 = arith.constant 0 : i32
    %c0_i32_0 = arith.constant 0 : i32
    %c0_i32_1 = arith.constant 0 : i32
    return %c0_i32, %c0_i32_0 : i32, i32
  }
  func.func @transform_9(%arg0: i32) -> (i32, i32) {
    %c0_i32 = arith.constant 0 : i32
    %c0_i32_0 = arith.constant 0 : i32
    %c0_i32_1 = arith.constant 0 : i32
    return %c0_i32, %c0_i32_0 : i32, i32
  }
}

</mosaic_0001>

<bundles_post_ra>
// kernel: forward_pallas.5
= control target key start
LH: loop header
LB: loop body
LE: loop exit
PB: predicated region body
PF: predicated region fallthrough
CT: control target
= control target key end

     0   :  { %s4147_s12 = smov 0   ;;  %s4149_s13 = smov 0   ;;  %s6079_s0 = inlined_call_operand.vmem [shape: bf16[48,160], index: 0, kind: input, shape index: {}]   ;;  %s6080_s1 = inlined_call_operand.vmem [shape: bf16[160,8192], index: 1, kind: input, shape index: {}]   ;;  %s6081_s2 = inlined_call_operand.vmem [shape: f32[48,1], index: 2, kind: input, shape index: {}]   ;;  %s6082_s3 = inlined_call_operand.vmem [shape: bf16[48,8192], index: 3, kind: output, shape index: {}]  }
   0x1   :  { %s4151_s14 = smov 0  }
   0x2 LB: > { %s3243_s15 = sadd.s32 4294967295, %s4124_s14   ;;  %s4164_s16 = sadd.s32 1, %s4124_s14   ;;  %s4124_s14 = sphi %s4151_s14, %s6106_s14   ;;  %s4120_s13 = sphi %s4149_s13, %s6105_s13   ;;  %s4116_s12 = sphi %s4147_s12, %s6104_s12  }
   0x3   : > { %s38_s17 = ssub.s32 %s4124_s14, %s4164_s16  ;;  %s41_s18 = sadd.s32 1, %s4120_s13 }
   0x4   : > { %p39_p0 = scmp.eq.s32.totalorder %s38_s17, 0  ;;  %p48_p1 = scmp.ne.s32.totalorder %s4120_s13, %s4116_s12 }
   0x5   : > { %p49_p2 = scmp.eq.s32.totalorder %s4124_s14, 0  ;;  %p99_p3 = scmp.eq.s32.totalorder %s3243_s15, 3 }
   0x6   : > { %s4175_s19 = scalar_select %p39_p0, %s4120_s13, %s41_s18  }
   0x7   : > { %p50_p4 = por %p49_p2, %p48_p1  ;;  %p4177_p5 = por %p99_p3, %p48_p1 }
   0x8   : > { %p3246_p6 = scmp.ge.s32.totalorder %s4124_s14, 4 }
   0xa   : > { %127 = sbr.rel (%p3246_p6) target bundleno = 102 (0x66), region = 24 }
  0x11   : > { %130 = sbr.rel (!%p50_p4) target bundleno = 102 (0x66), region = 28  ;;  %s132_s21 = sand.u32 (%p50_p4), 1, %s4120_s13  }
  0x12   : > { %s3350_s22 = sshll.u32 (%p50_p4), %s4124_s14, 6  ;;  %s3880_s23 = smul.u32 (%p50_p4), 1280, %s132_s21 }
  0x13   : > { %s4187_s26 = scalar_lea.vmem (%p50_p4), %s6080_s1, %s3350_s22 }
  0x14   : > { %v150_v0 = vld [vmem:[%s4187_s26] sm:$0xff] (%p50_p4)  ;;  %v152_v1 = vld [vmem:[%s4187_s26 + $0x8] sm:$0xff] (%p50_p4)  ;;  %v154_v2 = vld [vmem:[%s4187_s26 + $0x10] sm:$0xff] (%p50_p4)  ;;  %s4195_s27 = scalar_lea.vmem (%p50_p4), [#allocation2], %s3880_s23 }
  0x15   : > { %v156_v3 = vld [vmem:[%s4187_s26 + $0x18] sm:$0xff] (%p50_p4)  ;;  %v158_v4 = vld [vmem:[%s4187_s26 + $0x20] sm:$0xff] (%p50_p4)  ;;  %v160_v5 = vld [vmem:[%s4187_s26 + $0x28] sm:$0xff] (%p50_p4)  ;;  %151 = vst [vmem:[%s4195_s27] sm:$0xff] (%p50_p4), %v150_v0 }
  0x16   : > { %153 = vst [vmem:[%s4195_s27 + $0x8] sm:$0xff] (%p50_p4), %v152_v1  ;;  %155 = vst [vmem:[%s4195_s27 + $0x10] sm:$0xff] (%p50_p4), %v154_v2  ;;  %v162_v6 = vld [vmem:[%s4187_s26 + $0x30] sm:$0xff] (%p50_p4)  ;;  %v164_v7 = vld [vmem:[%s4187_s26 + $0x38] sm:$0xff] (%p50_p4) }
  0x17   : > { %157 = vst [vmem:[%s4195_s27 + $0x18] sm:$0xff] (%p50_p4), %v156_v3  ;;  %159 = vst [vmem:[%s4195_s27 + $0x20] sm:$0xff] (%p50_p4), %v158_v4  ;;  %v166_v8 = vld [vmem:[%s4187_s26 + $0x100] sm:$0xff] (%p50_p4)  ;;  %v168_v9 = vld [vmem:[%s4187_s26 + $0x108] sm:$0xff] (%p50_p4) }
  0x18   : > { %161 = vst [vmem:[%s4195_s27 + $0x28] sm:$0xff] %v160_v5  ;;  %163 = vst [vmem:[%s4195_s27 + $0x30] sm:$0xff] %v162_v6  ;;  %v170_v10 = vld [vmem:[%s4187_s26 + $0x110] sm:$0xff]  ;;  %v172_v11 = vld [vmem:[%s4187_s26 + $0x118] sm:$0xff] }
  0x19   : > { %165 = vst [vmem:[%s4195_s27 + $0x38] sm:$0xff] %v164_v7  ;;  %167 = vst [vmem:[%s4195_s27 + $0x40] sm:$0xff] %v166_v8  ;;  %v174_v12 = vld [vmem:[%s4187_s26 + $0x120] sm:$0xff]  ;;  %v176_v13 = vld [vmem:[%s4187_s26 + $0x128] sm:$0xff] }
  0x1a   : > { %169 = vst [vmem:[%s4195_s27 + $0x48] sm:$0xff] %v168_v9  ;;  %171 = vst [vmem:[%s4195_s27 + $0x50] sm:$0xff] %v170_v10  ;;  %v178_v14 = vld [vmem:[%s4187_s26 + $0x130] sm:$0xff]  ;;  %v180_v15 = vld [vmem:[%s4187_s26 + $0x138] sm:$0xff] }
  0x1b   : > { %173 = vst [vmem:[%s4195_s27 + $0x58] sm:$0xff] %v172_v11  ;;  %175 = vst [vmem:[%s4195_s27 + $0x60] sm:$0xff] %v174_v12  ;;  %v182_v16 = vld [vmem:[%s4187_s26 + $0x200] sm:$0xff]  ;;  %v184_v17 = vld [vmem:[%s4187_s26 + $0x208] sm:$0xff] }
  0x1c   : > { %177 = vst [vmem:[%s4195_s27 + $0x68] sm:$0xff] %v176_v13  ;;  %179 = vst [vmem:[%s4195_s27 + $0x70] sm:$0xff] %v178_v14  ;;  %v186_v18 = vld [vmem:[%s4187_s26 + $0x210] sm:$0xff]  ;;  %v188_v19 = vld [vmem:[%s4187_s26 + $0x218] sm:$0xff] }
  0x1d   : > { %181 = vst [vmem:[%s4195_s27 + $0x78] sm:$0xff] %v180_v15  ;;  %183 = vst [vmem:[%s4195_s27 + $0x80] sm:$0xff] %v182_v16  ;;  %v190_v20 = vld [vmem:[%s4187_s26 + $0x220] sm:$0xff]  ;;  %v192_v21 = vld [vmem:[%s4187_s26 + $0x228] sm:$0xff] }
  0x1e   : > { %185 = vst [vmem:[%s4195_s27 + $0x88] sm:$0xff] %v184_v17  ;;  %187 = vst [vmem:[%s4195_s27 + $0x90] sm:$0xff] %v186_v18  ;;  %v194_v22 = vld [vmem:[%s4187_s26 + $0x230] sm:$0xff]  ;;  %v196_v23 = vld [vmem:[%s4187_s26 + $0x238] sm:$0xff] }
  0x1f   : > { %189 = vst [vmem:[%s4195_s27 + $0x98] sm:$0xff] %v188_v19  ;;  %191 = vst [vmem:[%s4195_s27 + $0xa0] sm:$0xff] %v190_v20  ;;  %v198_v24 = vld [vmem:[%s4187_s26 + $0x300] sm:$0xff]  ;;  %v200_v25 = vld [vmem:[%s4187_s26 + $0x308] sm:$0xff] }
  0x20   : > { %193 = vst [vmem:[%s4195_s27 + $0xa8] sm:$0xff] %v192_v21  ;;  %195 = vst [vmem:[%s4195_s27 + $0xb0] sm:$0xff] %v194_v22  ;;  %v202_v26 = vld [vmem:[%s4187_s26 + $0x310] sm:$0xff]  ;;  %v204_v27 = vld [vmem:[%s4187_s26 + $0x318] sm:$0xff] }
  0x21   : > { %197 = vst [vmem:[%s4195_s27 + $0xb8] sm:$0xff] %v196_v23  ;;  %199 = vst [vmem:[%s4195_s27 + $0xc0] sm:$0xff] %v198_v24  ;;  %v206_v28 = vld [vmem:[%s4187_s26 + $0x320] sm:$0xff]  ;;  %v208_v29 = vld [vmem:[%s4187_s26 + $0x328] sm:$0xff] }
  0x22   : > { %201 = vst [vmem:[%s4195_s27 + $0xc8] sm:$0xff] %v200_v25  ;;  %203 = vst [vmem:[%s4195_s27 + $0xd0] sm:$0xff] %v202_v26  ;;  %v210_v30 = vld [vmem:[%s4187_s26 + $0x330] sm:$0xff]  ;;  %v212_v31 = vld [vmem:[%s4187_s26 + $0x338] sm:$0xff] }
  0x23   : > { %205 = vst [vmem:[%s4195_s27 + $0xd8] sm:$0xff] %v204_v27  ;;  %207 = vst [vmem:[%s4195_s27 + $0xe0] sm:$0xff] %v206_v28  ;;  %v214_v32 = vld [vmem:[%s4187_s26 + $0x400] sm:$0xff]  ;;  %v216_v33 = vld [vmem:[%s4187_s26 + $0x408] sm:$0xff] }
  0x24   : > { %209 = vst [vmem:[%s4195_s27 + $0xe8] sm:$0xff] %v208_v29  ;;  %211 = vst [vmem:[%s4195_s27 + $0xf0] sm:$0xff] %v210_v30  ;;  %v218_v34 = vld [vmem:[%s4187_s26 + $0x410] sm:$0xff]  ;;  %v220_v35 = vld [vmem:[%s4187_s26 + $0x418] sm:$0xff] }
  0x25   : > { %213 = vst [vmem:[%s4195_s27 + $0xf8] sm:$0xff] %v212_v31  ;;  %215 = vst [vmem:[%s4195_s27 + $0x100] sm:$0xff] %v214_v32  ;;  %v222_v36 = vld [vmem:[%s4187_s26 + $0x420] sm:$0xff]  ;;  %v224_v37 = vld [vmem:[%s4187_s26 + $0x428] sm:$0xff] }
  0x26   : > { %217 = vst [vmem:[%s4195_s27 + $0x108] sm:$0xff] %v216_v33  ;;  %219 = vst [vmem:[%s4195_s27 + $0x110] sm:$0xff] %v218_v34  ;;  %v226_v38 = vld [vmem:[%s4187_s26 + $0x430] sm:$0xff]  ;;  %v228_v39 = vld [vmem:[%s4187_s26 + $0x438] sm:$0xff] }
  0x27   : > { %221 = vst [vmem:[%s4195_s27 + $0x118] sm:$0xff] %v220_v35  ;;  %223 = vst [vmem:[%s4195_s27 + $0x120] sm:$0xff] %v222_v36  ;;  %v230_v40 = vld [vmem:[%s4187_s26 + $0x500] sm:$0xff]  ;;  %v232_v41 = vld [vmem:[%s4187_s26 + $0x508] sm:$0xff] }
  0x28   : > { %225 = vst [vmem:[%s4195_s27 + $0x128] sm:$0xff] %v224_v37  ;;  %227 = vst [vmem:[%s4195_s27 + $0x130] sm:$0xff] %v226_v38  ;;  %v234_v42 = vld [vmem:[%s4187_s26 + $0x510] sm:$0xff]  ;;  %v236_v43 = vld [vmem:[%s4187_s26 + $0x518] sm:$0xff] }
  0x29   : > { %229 = vst [vmem:[%s4195_s27 + $0x138] sm:$0xff] %v228_v39  ;;  %231 = vst [vmem:[%s4195_s27 + $0x140] sm:$0xff] %v230_v40  ;;  %v238_v44 = vld [vmem:[%s4187_s26 + $0x520] sm:$0xff]  ;;  %v240_v45 = vld [vmem:[%s4187_s26 + $0x528] sm:$0xff] }
  0x2a   : > { %233 = vst [vmem:[%s4195_s27 + $0x148] sm:$0xff] %v232_v41  ;;  %235 = vst [vmem:[%s4195_s27 + $0x150] sm:$0xff] %v234_v42  ;;  %v242_v46 = vld [vmem:[%s4187_s26 + $0x530] sm:$0xff]  ;;  %v244_v47 = vld [vmem:[%s4187_s26 + $0x538] sm:$0xff] }
  0x2b   : > { %237 = vst [vmem:[%s4195_s27 + $0x158] sm:$0xff] %v236_v43  ;;  %239 = vst [vmem:[%s4195_s27 + $0x160] sm:$0xff] %v238_v44  ;;  %v246_v48 = vld [vmem:[%s4187_s26 + $0x600] sm:$0xff]  ;;  %v248_v49 = vld [vmem:[%s4187_s26 + $0x608] sm:$0xff] }
  0x2c   : > { %241 = vst [vmem:[%s4195_s27 + $0x168] sm:$0xff] %v240_v45  ;;  %243 = vst [vmem:[%s4195_s27 + $0x170] sm:$0xff] %v242_v46  ;;  %v250_v50 = vld [vmem:[%s4187_s26 + $0x610] sm:$0xff]  ;;  %v252_v51 = vld [vmem:[%s4187_s26 + $0x618] sm:$0xff] }
  0x2d   : > { %245 = vst [vmem:[%s4195_s27 + $0x178] sm:$0xff] %v244_v47  ;;  %247 = vst [vmem:[%s4195_s27 + $0x180] sm:$0xff] %v246_v48  ;;  %v254_v52 = vld [vmem:[%s4187_s26 + $0x620] sm:$0xff]  ;;  %v256_v53 = vld [vmem:[%s4187_s26 + $0x628] sm:$0xff] }
  0x2e   : > { %249 = vst [vmem:[%s4195_s27 + $0x188] sm:$0xff] %v248_v49  ;;  %251 = vst [vmem:[%s4195_s27 + $0x190] sm:$0xff] %v250_v50  ;;  %v258_v54 = vld [vmem:[%s4187_s26 + $0x630] sm:$0xff]  ;;  %v260_v55 = vld [vmem:[%s4187_s26 + $0x638] sm:$0xff] }
  0x2f   : > { %253 = vst [vmem:[%s4195_s27 + $0x198] sm:$0xff] %v252_v51  ;;  %255 = vst [vmem:[%s4195_s27 + $0x1a0] sm:$0xff] %v254_v52  ;;  %v262_v56 = vld [vmem:[%s4187_s26 + $0x700] sm:$0xff]  ;;  %v264_v57 = vld [vmem:[%s4187_s26 + $0x708] sm:$0xff] }
  0x30   : > { %257 = vst [vmem:[%s4195_s27 + $0x1a8] sm:$0xff] %v256_v53  ;;  %259 = vst [vmem:[%s4195_s27 + $0x1b0] sm:$0xff] %v258_v54  ;;  %v266_v58 = vld [vmem:[%s4187_s26 + $0x710] sm:$0xff]  ;;  %v268_v59 = vld [vmem:[%s4187_s26 + $0x718] sm:$0xff] }
  0x31   : > { %261 = vst [vmem:[%s4195_s27 + $0x1b8] sm:$0xff] %v260_v55  ;;  %263 = vst [vmem:[%s4195_s27 + $0x1c0] sm:$0xff] %v262_v56  ;;  %v270_v60 = vld [vmem:[%s4187_s26 + $0x720] sm:$0xff]  ;;  %v272_v61 = vld [vmem:[%s4187_s26 + $0x728] sm:$0xff] }
  0x32   : > { %265 = vst [vmem:[%s4195_s27 + $0x1c8] sm:$0xff] %v264_v57  ;;  %267 = vst [vmem:[%s4195_s27 + $0x1d0] sm:$0xff] %v266_v58  ;;  %v274_v62 = vld [vmem:[%s4187_s26 + $0x730] sm:$0xff]  ;;  %v276_v63 = vld [vmem:[%s4187_s26 + $0x738] sm:$0xff] }
  0x33   : > { %269 = vst [vmem:[%s4195_s27 + $0x1d8] sm:$0xff] %v268_v59  ;;  %271 = vst [vmem:[%s4195_s27 + $0x1e0] sm:$0xff] %v270_v60  ;;  %v278_v0 = vld [vmem:[%s4187_s26 + $0x800] sm:$0xff]  ;;  %v280_v1 = vld [vmem:[%s4187_s26 + $0x808] sm:$0xff] }
  0x34   : > { %273 = vst [vmem:[%s4195_s27 + $0x1e8] sm:$0xff] %v272_v61  ;;  %275 = vst [vmem:[%s4195_s27 + $0x1f0] sm:$0xff] %v274_v62  ;;  %v282_v2 = vld [vmem:[%s4187_s26 + $0x810] sm:$0xff]  ;;  %v284_v3 = vld [vmem:[%s4187_s26 + $0x818] sm:$0xff] }
  0x35   : > { %277 = vst [vmem:[%s4195_s27 + $0x1f8] sm:$0xff] %v276_v63  ;;  %279 = vst [vmem:[%s4195_s27 + $0x200] sm:$0xff] %v278_v0  ;;  %v286_v4 = vld [vmem:[%s4187_s26 + $0x820] sm:$0xff]  ;;  %v288_v5 = vld [vmem:[%s4187_s26 + $0x828] sm:$0xff] }
  0x36   : > { %281 = vst [vmem:[%s4195_s27 + $0x208] sm:$0xff] %v280_v1  ;;  %283 = vst [vmem:[%s4195_s27 + $0x210] sm:$0xff] %v282_v2  ;;  %v290_v6 = vld [vmem:[%s4187_s26 + $0x830] sm:$0xff]  ;;  %v292_v7 = vld [vmem:[%s4187_s26 + $0x838] sm:$0xff] }
  0x37   : > { %285 = vst [vmem:[%s4195_s27 + $0x218] sm:$0xff] %v284_v3  ;;  %287 = vst [vmem:[%s4195_s27 + $0x220] sm:$0xff] %v286_v4  ;;  %v294_v8 = vld [vmem:[%s4187_s26 + $0x900] sm:$0xff]  ;;  %v296_v9 = vld [vmem:[%s4187_s26 + $0x908] sm:$0xff] }
  0x38   : > { %289 = vst [vmem:[%s4195_s27 + $0x228] sm:$0xff] %v288_v5  ;;  %291 = vst [vmem:[%s4195_s27 + $0x230] sm:$0xff] %v290_v6  ;;  %v298_v10 = vld [vmem:[%s4187_s26 + $0x910] sm:$0xff]  ;;  %v300_v11 = vld [vmem:[%s4187_s26 + $0x918] sm:$0xff] }
  0x39   : > { %293 = vst [vmem:[%s4195_s27 + $0x238] sm:$0xff] %v292_v7  ;;  %295 = vst [vmem:[%s4195_s27 + $0x240] sm:$0xff] %v294_v8  ;;  %v302_v12 = vld [vmem:[%s4187_s26 + $0x920] sm:$0xff]  ;;  %v304_v13 = vld [vmem:[%s4187_s26 + $0x928] sm:$0xff] }
  0x3a   : > { %297 = vst [vmem:[%s4195_s27 + $0x248] sm:$0xff] %v296_v9  ;;  %299 = vst [vmem:[%s4195_s27 + $0x250] sm:$0xff] %v298_v10  ;;  %v306_v14 = vld [vmem:[%s4187_s26 + $0x930] sm:$0xff]  ;;  %v308_v15 = vld [vmem:[%s4187_s26 + $0x938] sm:$0xff] }
  0x3b   : > { %301 = vst [vmem:[%s4195_s27 + $0x258] sm:$0xff] %v300_v11  ;;  %303 = vst [vmem:[%s4195_s27 + $0x260] sm:$0xff] %v302_v12  ;;  %v310_v16 = vld [vmem:[%s4187_s26 + $0xa00] sm:$0xff]  ;;  %v312_v17 = vld [vmem:[%s4187_s26 + $0xa08] sm:$0xff] }
  0x3c   : > { %305 = vst [vmem:[%s4195_s27 + $0x268] sm:$0xff] %v304_v13  ;;  %307 = vst [vmem:[%s4195_s27 + $0x270] sm:$0xff] %v306_v14  ;;  %v314_v18 = vld [vmem:[%s4187_s26 + $0xa10] sm:$0xff]  ;;  %v316_v19 = vld [vmem:[%s4187_s26 + $0xa18] sm:$0xff] }
  0x3d   : > { %309 = vst [vmem:[%s4195_s27 + $0x278] sm:$0xff] %v308_v15  ;;  %311 = vst [vmem:[%s4195_s27 + $0x280] sm:$0xff] %v310_v16  ;;  %v318_v20 = vld [vmem:[%s4187_s26 + $0xa20] sm:$0xff]  ;;  %v320_v21 = vld [vmem:[%s4187_s26 + $0xa28] sm:$0xff] }
  0x3e   : > { %313 = vst [vmem:[%s4195_s27 + $0x288] sm:$0xff] %v312_v17  ;;  %315 = vst [vmem:[%s4195_s27 + $0x290] sm:$0xff] %v314_v18  ;;  %v322_v22 = vld [vmem:[%s4187_s26 + $0xa30] sm:$0xff]  ;;  %v324_v23 = vld [vmem:[%s4187_s26 + $0xa38] sm:$0xff] }
  0x3f   : > { %317 = vst [vmem:[%s4195_s27 + $0x298] sm:$0xff] %v316_v19  ;;  %319 = vst [vmem:[%s4195_s27 + $0x2a0] sm:$0xff] %v318_v20  ;;  %v326_v24 = vld [vmem:[%s4187_s26 + $0xb00] sm:$0xff]  ;;  %v328_v25 = vld [vmem:[%s4187_s26 + $0xb08] sm:$0xff] }
  0x40   : > { %321 = vst [vmem:[%s4195_s27 + $0x2a8] sm:$0xff] %v320_v21  ;;  %323 = vst [vmem:[%s4195_s27 + $0x2b0] sm:$0xff] %v322_v22  ;;  %v330_v26 = vld [vmem:[%s4187_s26 + $0xb10] sm:$0xff]  ;;  %v332_v27 = vld [vmem:[%s4187_s26 + $0xb18] sm:$0xff] }
  0x41   : > { %325 = vst [vmem:[%s4195_s27 + $0x2b8] sm:$0xff] %v324_v23  ;;  %327 = vst [vmem:[%s4195_s27 + $0x2c0] sm:$0xff] %v326_v24  ;;  %v334_v28 = vld [vmem:[%s4187_s26 + $0xb20] sm:$0xff]  ;;  %v336_v29 = vld [vmem:[%s4187_s26 + $0xb28] sm:$0xff] }
  0x42   : > { %329 = vst [vmem:[%s4195_s27 + $0x2c8] sm:$0xff] %v328_v25  ;;  %331 = vst [vmem:[%s4195_s27 + $0x2d0] sm:$0xff] %v330_v26  ;;  %v338_v30 = vld [vmem:[%s4187_s26 + $0xb30] sm:$0xff]  ;;  %v340_v31 = vld [vmem:[%s4187_s26 + $0xb38] sm:$0xff] }
  0x43   : > { %333 = vst [vmem:[%s4195_s27 + $0x2d8] sm:$0xff] %v332_v27  ;;  %335 = vst [vmem:[%s4195_s27 + $0x2e0] sm:$0xff] %v334_v28  ;;  %v342_v32 = vld [vmem:[%s4187_s26 + $0xc00] sm:$0xff]  ;;  %v344_v33 = vld [vmem:[%s4187_s26 + $0xc08] sm:$0xff] }
  0x44   : > { %337 = vst [vmem:[%s4195_s27 + $0x2e8] sm:$0xff] %v336_v29  ;;  %339 = vst [vmem:[%s4195_s27 + $0x2f0] sm:$0xff] %v338_v30  ;;  %v346_v34 = vld [vmem:[%s4187_s26 + $0xc10] sm:$0xff]  ;;  %v348_v35 = vld [vmem:[%s4187_s26 + $0xc18] sm:$0xff] }
  0x45   : > { %341 = vst [vmem:[%s4195_s27 + $0x2f8] sm:$0xff] %v340_v31  ;;  %343 = vst [vmem:[%s4195_s27 + $0x300] sm:$0xff] %v342_v32  ;;  %v350_v36 = vld [vmem:[%s4187_s26 + $0xc20] sm:$0xff]  ;;  %v352_v37 = vld [vmem:[%s4187_s26 + $0xc28] sm:$0xff] }
  0x46   : > { %345 = vst [vmem:[%s4195_s27 + $0x308] sm:$0xff] %v344_v33  ;;  %347 = vst [vmem:[%s4195_s27 + $0x310] sm:$0xff] %v346_v34  ;;  %v354_v38 = vld [vmem:[%s4187_s26 + $0xc30] sm:$0xff]  ;;  %v356_v39 = vld [vmem:[%s4187_s26 + $0xc38] sm:$0xff] }
  0x47   : > { %349 = vst [vmem:[%s4195_s27 + $0x318] sm:$0xff] %v348_v35  ;;  %351 = vst [vmem:[%s4195_s27 + $0x320] sm:$0xff] %v350_v36  ;;  %v358_v40 = vld [vmem:[%s4187_s26 + $0xd00] sm:$0xff]  ;;  %v360_v41 = vld [vmem:[%s4187_s26 + $0xd08] sm:$0xff] }
  0x48   : > { %353 = vst [vmem:[%s4195_s27 + $0x328] sm:$0xff] %v352_v37  ;;  %355 = vst [vmem:[%s4195_s27 + $0x330] sm:$0xff] %v354_v38  ;;  %v362_v42 = vld [vmem:[%s4187_s26 + $0xd10] sm:$0xff]  ;;  %v364_v43 = vld [vmem:[%s4187_s26 + $0xd18] sm:$0xff] }
  0x49   : > { %357 = vst [vmem:[%s4195_s27 + $0x338] sm:$0xff] %v356_v39  ;;  %359 = vst [vmem:[%s4195_s27 + $0x340] sm:$0xff] %v358_v40  ;;  %v366_v44 = vld [vmem:[%s4187_s26 + $0xd20] sm:$0xff]  ;;  %v368_v45 = vld [vmem:[%s4187_s26 + $0xd28] sm:$0xff] }
  0x4a   : > { %361 = vst [vmem:[%s4195_s27 + $0x348] sm:$0xff] %v360_v41  ;;  %363 = vst [vmem:[%s4195_s27 + $0x350] sm:$0xff] %v362_v42  ;;  %v370_v46 = vld [vmem:[%s4187_s26 + $0xd30] sm:$0xff]  ;;  %v372_v47 = vld [vmem:[%s4187_s26 + $0xd38] sm:$0xff] }
  0x4b   : > { %365 = vst [vmem:[%s4195_s27 + $0x358] sm:$0xff] %v364_v43  ;;  %367 = vst [vmem:[%s4195_s27 + $0x360] sm:$0xff] %v366_v44  ;;  %v374_v48 = vld [vmem:[%s4187_s26 + $0xe00] sm:$0xff]  ;;  %v376_v49 = vld [vmem:[%s4187_s26 + $0xe08] sm:$0xff] }
  0x4c   : > { %369 = vst [vmem:[%s4195_s27 + $0x368] sm:$0xff] %v368_v45  ;;  %371 = vst [vmem:[%s4195_s27 + $0x370] sm:$0xff] %v370_v46  ;;  %v378_v50 = vld [vmem:[%s4187_s26 + $0xe10] sm:$0xff]  ;;  %v380_v51 = vld [vmem:[%s4187_s26 + $0xe18] sm:$0xff] }
  0x4d   : > { %373 = vst [vmem:[%s4195_s27 + $0x378] sm:$0xff] %v372_v47  ;;  %375 = vst [vmem:[%s4195_s27 + $0x380] sm:$0xff] %v374_v48  ;;  %v382_v52 = vld [vmem:[%s4187_s26 + $0xe20] sm:$0xff]  ;;  %v384_v53 = vld [vmem:[%s4187_s26 + $0xe28] sm:$0xff] }
  0x4e   : > { %377 = vst [vmem:[%s4195_s27 + $0x388] sm:$0xff] %v376_v49  ;;  %379 = vst [vmem:[%s4195_s27 + $0x390] sm:$0xff] %v378_v50  ;;  %v386_v54 = vld [vmem:[%s4187_s26 + $0xe30] sm:$0xff]  ;;  %v388_v55 = vld [vmem:[%s4187_s26 + $0xe38] sm:$0xff] }
  0x4f   : > { %381 = vst [vmem:[%s4195_s27 + $0x398] sm:$0xff] %v380_v51  ;;  %383 = vst [vmem:[%s4195_s27 + $0x3a0] sm:$0xff] %v382_v52  ;;  %v390_v56 = vld [vmem:[%s4187_s26 + $0xf00] sm:$0xff]  ;;  %v392_v57 = vld [vmem:[%s4187_s26 + $0xf08] sm:$0xff] }
  0x50   : > { %385 = vst [vmem:[%s4195_s27 + $0x3a8] sm:$0xff] %v384_v53  ;;  %387 = vst [vmem:[%s4195_s27 + $0x3b0] sm:$0xff] %v386_v54  ;;  %v394_v58 = vld [vmem:[%s4187_s26 + $0xf10] sm:$0xff]  ;;  %v396_v59 = vld [vmem:[%s4187_s26 + $0xf18] sm:$0xff] }
  0x51   : > { %389 = vst [vmem:[%s4195_s27 + $0x3b8] sm:$0xff] %v388_v55  ;;  %391 = vst [vmem:[%s4195_s27 + $0x3c0] sm:$0xff] %v390_v56  ;;  %v398_v60 = vld [vmem:[%s4187_s26 + $0xf20] sm:$0xff]  ;;  %v400_v61 = vld [vmem:[%s4187_s26 + $0xf28] sm:$0xff] }
  0x52   : > { %393 = vst [vmem:[%s4195_s27 + $0x3c8] sm:$0xff] %v392_v57  ;;  %395 = vst [vmem:[%s4195_s27 + $0x3d0] sm:$0xff] %v394_v58  ;;  %v402_v62 = vld [vmem:[%s4187_s26 + $0xf30] sm:$0xff]  ;;  %v404_v63 = vld [vmem:[%s4187_s26 + $0xf38] sm:$0xff] }
  0x53   : > { %397 = vst [vmem:[%s4195_s27 + $0x3d8] sm:$0xff] %v396_v59  ;;  %399 = vst [vmem:[%s4195_s27 + $0x3e0] sm:$0xff] %v398_v60  ;;  %v406_v0 = vld [vmem:[%s4187_s26 + $0x1000] sm:$0xff]  ;;  %v408_v1 = vld [vmem:[%s4187_s26 + $0x1008] sm:$0xff] }
  0x54   : > { %401 = vst [vmem:[%s4195_s27 + $0x3e8] sm:$0xff] %v400_v61  ;;  %403 = vst [vmem:[%s4195_s27 + $0x3f0] sm:$0xff] %v402_v62  ;;  %v410_v2 = vld [vmem:[%s4187_s26 + $0x1010] sm:$0xff]  ;;  %v412_v3 = vld [vmem:[%s4187_s26 + $0x1018] sm:$0xff] }
  0x55   : > { %405 = vst [vmem:[%s4195_s27 + $0x3f8] sm:$0xff] %v404_v63  ;;  %407 = vst [vmem:[%s4195_s27 + $0x400] sm:$0xff] %v406_v0  ;;  %v414_v4 = vld [vmem:[%s4187_s26 + $0x1020] sm:$0xff]  ;;  %v416_v5 = vld [vmem:[%s4187_s26 + $0x1028] sm:$0xff] }
  0x56   : > { %409 = vst [vmem:[%s4195_s27 + $0x408] sm:$0xff] %v408_v1  ;;  %411 = vst [vmem:[%s4195_s27 + $0x410] sm:$0xff] %v410_v2  ;;  %v418_v6 = vld [vmem:[%s4187_s26 + $0x1030] sm:$0xff]  ;;  %v420_v7 = vld [vmem:[%s4187_s26 + $0x1038] sm:$0xff] }
  0x57   : > { %413 = vst [vmem:[%s4195_s27 + $0x418] sm:$0xff] %v412_v3  ;;  %415 = vst [vmem:[%s4195_s27 + $0x420] sm:$0xff] %v414_v4  ;;  %v422_v8 = vld [vmem:[%s4187_s26 + $0x1100] sm:$0xff]  ;;  %v424_v9 = vld [vmem:[%s4187_s26 + $0x1108] sm:$0xff] }
  0x58   : > { %417 = vst [vmem:[%s4195_s27 + $0x428] sm:$0xff] %v416_v5  ;;  %419 = vst [vmem:[%s4195_s27 + $0x430] sm:$0xff] %v418_v6  ;;  %v426_v10 = vld [vmem:[%s4187_s26 + $0x1110] sm:$0xff]  ;;  %v428_v11 = vld [vmem:[%s4187_s26 + $0x1118] sm:$0xff] }
  0x59   : > { %421 = vst [vmem:[%s4195_s27 + $0x438] sm:$0xff] %v420_v7  ;;  %423 = vst [vmem:[%s4195_s27 + $0x440] sm:$0xff] %v422_v8  ;;  %v430_v12 = vld [vmem:[%s4187_s26 + $0x1120] sm:$0xff]  ;;  %v432_v13 = vld [vmem:[%s4187_s26 + $0x1128] sm:$0xff] }
  0x5a   : > { %425 = vst [vmem:[%s4195_s27 + $0x448] sm:$0xff] %v424_v9  ;;  %427 = vst [vmem:[%s4195_s27 + $0x450] sm:$0xff] %v426_v10  ;;  %v434_v14 = vld [vmem:[%s4187_s26 + $0x1130] sm:$0xff]  ;;  %v436_v15 = vld [vmem:[%s4187_s26 + $0x1138] sm:$0xff] }
  0x5b   : > { %429 = vst [vmem:[%s4195_s27 + $0x458] sm:$0xff] %v428_v11  ;;  %431 = vst [vmem:[%s4195_s27 + $0x460] sm:$0xff] %v430_v12  ;;  %v438_v16 = vld [vmem:[%s4187_s26 + $0x1200] sm:$0xff]  ;;  %v440_v17 = vld [vmem:[%s4187_s26 + $0x1208] sm:$0xff] }
  0x5c   : > { %433 = vst [vmem:[%s4195_s27 + $0x468] sm:$0xff] %v432_v13  ;;  %435 = vst [vmem:[%s4195_s27 + $0x470] sm:$0xff] %v434_v14  ;;  %v442_v18 = vld [vmem:[%s4187_s26 + $0x1210] sm:$0xff]  ;;  %v444_v19 = vld [vmem:[%s4187_s26 + $0x1218] sm:$0xff] }
  0x5d   : > { %437 = vst [vmem:[%s4195_s27 + $0x478] sm:$0xff] %v436_v15  ;;  %439 = vst [vmem:[%s4195_s27 + $0x480] sm:$0xff] %v438_v16  ;;  %v446_v20 = vld [vmem:[%s4187_s26 + $0x1220] sm:$0xff]  ;;  %v448_v21 = vld [vmem:[%s4187_s26 + $0x1228] sm:$0xff] }
  0x5e   : > { %441 = vst [vmem:[%s4195_s27 + $0x488] sm:$0xff] %v440_v17  ;;  %443 = vst [vmem:[%s4195_s27 + $0x490] sm:$0xff] %v442_v18  ;;  %v450_v22 = vld [vmem:[%s4187_s26 + $0x1230] sm:$0xff]  ;;  %v452_v23 = vld [vmem:[%s4187_s26 + $0x1238] sm:$0xff] }
  0x5f   : > { %445 = vst [vmem:[%s4195_s27 + $0x498] sm:$0xff] %v444_v19  ;;  %447 = vst [vmem:[%s4195_s27 + $0x4a0] sm:$0xff] %v446_v20  ;;  %v454_v24 = vld [vmem:[%s4187_s26 + $0x1300] sm:$0xff]  ;;  %v456_v25 = vld [vmem:[%s4187_s26 + $0x1308] sm:$0xff] }
  0x60   : > { %449 = vst [vmem:[%s4195_s27 + $0x4a8] sm:$0xff] %v448_v21  ;;  %451 = vst [vmem:[%s4195_s27 + $0x4b0] sm:$0xff] %v450_v22  ;;  %v458_v26 = vld [vmem:[%s4187_s26 + $0x1310] sm:$0xff]  ;;  %v460_v27 = vld [vmem:[%s4187_s26 + $0x1318] sm:$0xff] }
  0x61   : > { %453 = vst [vmem:[%s4195_s27 + $0x4b8] sm:$0xff] %v452_v23  ;;  %455 = vst [vmem:[%s4195_s27 + $0x4c0] sm:$0xff] %v454_v24  ;;  %v462_v28 = vld [vmem:[%s4187_s26 + $0x1320] sm:$0xff]  ;;  %v464_v29 = vld [vmem:[%s4187_s26 + $0x1328] sm:$0xff] }
  0x62   : > { %457 = vst [vmem:[%s4195_s27 + $0x4c8] sm:$0xff] %v456_v25  ;;  %459 = vst [vmem:[%s4195_s27 + $0x4d0] sm:$0xff] %v458_v26  ;;  %v466_v30 = vld [vmem:[%s4187_s26 + $0x1330] sm:$0xff]  ;;  %v468_v31 = vld [vmem:[%s4187_s26 + $0x1338] sm:$0xff] }
  0x63   : > { %461 = vst [vmem:[%s4195_s27 + $0x4d8] sm:$0xff] %v460_v27  ;;  %463 = vst [vmem:[%s4195_s27 + $0x4e0] sm:$0xff] %v462_v28 }
  0x64   : > { %465 = vst [vmem:[%s4195_s27 + $0x4e8] sm:$0xff] %v464_v29  ;;  %467 = vst [vmem:[%s4195_s27 + $0x4f0] sm:$0xff] %v466_v30 }
  0x65   : > { %469 = vst [vmem:[%s4195_s27 + $0x4f8] sm:$0xff] %v468_v31 }
  0x66 PF: > { %p3249_p7 = scmp.ge.s32.totalorder %s4124_s14, 1  ;;  %p474_p8 = scmp.lt.s32.totalorder %s4124_s14, 5 }
  0x68   : > { %p475_p9 = pnand %p3249_p7, %p474_p8 }
  0x6a   : > { %478 = sbr.rel (%p475_p9) target bundleno = 651 (0x28b), region = 51 }
  0x71   : > { %s481_s28 = sand.u32 1, %s4116_s12   ;;  %v4517_v32 = vld [vmem:[%s6079_s0] sm:$0xff]  ;;  %vm1039_vm0 = vcmask 261120   ;;  %v4126_v43 = vmov 0  }
  0x72   : > { %s3881_s4 = smul.u32 1280, %s481_s28  ;;  %v4522_v33 = vunpack.c.h.bf16 %v4517_v32  ;;  %v1003_v34 = vld [vmem:[%s6081_s2] sm:$0xff]  ;;  %3908 = vset.pattern.permute.xlu0 %v4126_v43  ;;  %3909 = vset.pattern.permute.xlu1 %v4126_v43 }
  0x73   : > { %1011 = vperm.xlu0 %3908, %v1003_v34  }
  0x74   : > { %3250 = vmatprep.mubr.msk.f32.mxu0 %vm1039_vm0, %v4522_v33  ;;  %3256 = vmatprep.mubr.msk.f32.mxu1 %vm1039_vm0, %v4522_v33  ;;  %s4531_s7 = scalar_lea.vmem [#allocation2], %s3881_s4 }
  0x75   : > { %v523_v35 = vld [vmem:[%s4531_s7] sm:$0xff]  ;;  %v524_v37 = vld [vmem:[%s4531_s7 + $0x8] sm:$0xff] }
  0x76   : > { %v531_v36 = vld [vmem:[%s4531_s7 + $0x40] sm:$0xff]  ;;  %v532_v39 = vld [vmem:[%s4531_s7 + $0x48] sm:$0xff] }
  0x77   : > { %v3720_v38 = vcombine.high %v523_v35, %v531_v36  ;;  %v3721_v40 = vcombine.low %v523_v35, %v531_v36  ;;  %v539_v41 = vld [vmem:[%s4531_s7 + $0x80] sm:$0xff]  ;;  %v3740_v44 = vcombine.high %v524_v37, %v532_v39  ;;  %v3741_v45 = vcombine.low %v524_v37, %v532_v39  ;;  %v540_v47 = vld [vmem:[%s4531_s7 + $0x88] sm:$0xff] }
  0x78   : > { %v547_v42 = vld [vmem:[%s4531_s7 + $0xc0] sm:$0xff]  ;;  %v548_v48 = vld [vmem:[%s4531_s7 + $0xc8] sm:$0xff] }
  0x79   : > { %v3722_v46 = vcombine.high %v539_v41, %v547_v42  ;;  %v555_v49 = vld [vmem:[%s4531_s7 + $0x100] sm:$0xff]  ;;  %3401 = vmatprep.subr.bf16.mxu0 %v3720_v38  ;;  %v3742_v50 = vcombine.high %v540_v47, %v548_v48  ;;  %v556_v52 = vld [vmem:[%s4531_s7 + $0x108] sm:$0xff]  ;;  %3441 = vmatprep.subr.bf16.mxu1 %v3740_v44  ;;  %v3723_v54 = vcombine.low %v539_v41, %v547_v42 }
  0x7a   : > { %v563_v51 = vld [vmem:[%s4531_s7 + $0x140] sm:$0xff]  ;;  %v564_v53 = vld [vmem:[%s4531_s7 + $0x148] sm:$0xff]  ;;  %3403 = vmatpush1.bf16.msra.mxu0 %v3721_v40  ;;  %3443 = vmatpush1.bf16.msra.mxu1 %v3741_v45  ;;  %v3743_v55 = vcombine.low %v540_v47, %v548_v48 }
  0x7b   : > { %3405 = vmatprep.subr.bf16.mxu0 %v3722_v46  ;;  %v3724_v56 = vcombine.high %v555_v49, %v563_v51  ;;  %3445 = vmatprep.subr.bf16.mxu1 %v3742_v50  ;;  %v3744_v57 = vcombine.high %v556_v52, %v564_v53  ;;  %v571_v58 = vld [vmem:[%s4531_s7 + $0x180] sm:$0xff]  ;;  %v572_v60 = vld [vmem:[%s4531_s7 + $0x188] sm:$0xff]  ;;  %v3725_v62 = vcombine.low %v555_v49, %v563_v51 }
  0x7c   : > { %v579_v59 = vld [vmem:[%s4531_s7 + $0x1c0] sm:$0xff]  ;;  %v580_v61 = vld [vmem:[%s4531_s7 + $0x1c8] sm:$0xff]  ;;  %v3745_v63 = vcombine.low %v556_v52, %v564_v53  ;;  %v525_v52 = vld [vmem:[%s4531_s7 + $0x10] sm:$0xff] }
  0x7d   : > { %v3726_v0 = vcombine.high %v571_v58, %v579_v59  ;;  %v3746_v1 = vcombine.high %v572_v60, %v580_v61  ;;  %v587_v2 = vld [vmem:[%s4531_s7 + $0x200] sm:$0xff]  ;;  %v588_v4 = vld [vmem:[%s4531_s7 + $0x208] sm:$0xff]  ;;  %v3727_v6 = vcombine.low %v571_v58, %v579_v59  ;;  %v3747_v7 = vcombine.low %v572_v60, %v580_v61  ;;  %v533_v53 = vld [vmem:[%s4531_s7 + $0x50] sm:$0xff] }
  0x7e   : > { %3407 = vmatpush1.bf16.msra.mxu0 %v3723_v54  ;;  %3447 = vmatpush1.bf16.msra.mxu1 %v3743_v55  ;;  %v595_v3 = vld [vmem:[%s4531_s7 + $0x240] sm:$0xff]  ;;  %v596_v5 = vld [vmem:[%s4531_s7 + $0x248] sm:$0xff]  ;;  %v526_v54 = vld [vmem:[%s4531_s7 + $0x18] sm:$0xff]  ;;  %v3760_v58 = vcombine.high %v525_v52, %v533_v53  ;;  %v4581_v61 = vunpack.c.l.bf16 %v4517_v32 }
  0x7f   : > { %3409 = vmatprep.subr.bf16.mxu0 %v3724_v56  ;;  %3449 = vmatprep.subr.bf16.mxu1 %v3744_v57  ;;  %v3728_v8 = vcombine.high %v587_v2, %v595_v3  ;;  %v3748_v9 = vcombine.high %v588_v4, %v596_v5  ;;  %v603_v10 = vld [vmem:[%s4531_s7 + $0x280] sm:$0xff]  ;;  %v604_v12 = vld [vmem:[%s4531_s7 + $0x288] sm:$0xff]  ;;  %v3729_v14 = vcombine.low %v587_v2, %v595_v3  ;;  %v534_v55 = vld [vmem:[%s4531_s7 + $0x58] sm:$0xff] }
  0x80   : > { %v611_v11 = vld [vmem:[%s4531_s7 + $0x2c0] sm:$0xff]  ;;  %v612_v13 = vld [vmem:[%s4531_s7 + $0x2c8] sm:$0xff]  ;;  %v3749_v15 = vcombine.low %v588_v4, %v596_v5  ;;  %v3780_v59 = vcombine.high %v526_v54, %v534_v55  ;;  %v550_v2 = vld [vmem:[%s4531_s7 + $0xd8] sm:$0xff]  ;;  %v3781_v3 = vcombine.low %v526_v54, %v534_v55 }
  0x81   : > { %v3730_v16 = vcombine.high %v603_v10, %v611_v11  ;;  %v3750_v17 = vcombine.high %v604_v12, %v612_v13  ;;  %v619_v18 = vld [vmem:[%s4531_s7 + $0x300] sm:$0xff]  ;;  %v620_v20 = vld [vmem:[%s4531_s7 + $0x308] sm:$0xff]  ;;  %v3731_v22 = vcombine.low %v603_v10, %v611_v11  ;;  %v3751_v23 = vcombine.low %v604_v12, %v612_v13  ;;  %v507_v32 = vld [vmem:[%s6079_s0 + $0x10] sm:$0xff] }
  0x82   : > { %3411 = vmatpush1.bf16.msra.mxu0 %v3725_v62  ;;  %3451 = vmatpush1.bf16.msra.mxu1 %v3745_v63  ;;  %v627_v19 = vld [vmem:[%s4531_s7 + $0x340] sm:$0xff]  ;;  %v628_v21 = vld [vmem:[%s4531_s7 + $0x348] sm:$0xff]  ;;  %v541_v62 = vld [vmem:[%s4531_s7 + $0x90] sm:$0xff] }
  0x83   : > { %3413 = vmatprep.subr.bf16.mxu0 %v3726_v0  ;;  %3453 = vmatprep.subr.bf16.mxu1 %v3746_v1  ;;  %v3732_v24 = vcombine.high %v619_v18, %v627_v19  ;;  %v3752_v25 = vcombine.high %v620_v20, %v628_v21  ;;  %v635_v26 = vld [vmem:[%s4531_s7 + $0x380] sm:$0xff]  ;;  %v636_v28 = vld [vmem:[%s4531_s7 + $0x388] sm:$0xff]  ;;  %v3733_v30 = vcombine.low %v619_v18, %v627_v19  ;;  %v549_v63 = vld [vmem:[%s4531_s7 + $0xd0] sm:$0xff]  ;;  %v4613_v18 = vunpack.c.l.bf16 %v507_v32 }
  0x84   : > { %v643_v27 = vld [vmem:[%s4531_s7 + $0x3c0] sm:$0xff]  ;;  %v644_v29 = vld [vmem:[%s4531_s7 + $0x3c8] sm:$0xff]  ;;  %v3753_v31 = vcombine.low %v620_v20, %v628_v21  ;;  %v3761_v0 = vcombine.low %v525_v52, %v533_v53  ;;  %v542_v1 = vld [vmem:[%s4531_s7 + $0x98] sm:$0xff]  ;;  %v3762_v5 = vcombine.high %v541_v62, %v549_v63  ;;  %v3763_v11 = vcombine.low %v541_v62, %v549_v63 }
  0x85   : > { %v3734_v34 = vcombine.high %v635_v26, %v643_v27  ;;  %v3754_v35 = vcombine.high %v636_v28, %v644_v29  ;;  %v651_v36 = vld [vmem:[%s4531_s7 + $0x400] sm:$0xff]  ;;  %v652_v38 = vld [vmem:[%s4531_s7 + $0x408] sm:$0xff]  ;;  %v3735_v40 = vcombine.low %v635_v26, %v643_v27  ;;  %v3755_v41 = vcombine.low %v636_v28, %v644_v29  ;;  %v565_v10 = vld [vmem:[%s4531_s7 + $0x150] sm:$0xff] }
  0x86   : > { %3415 = vmatpush1.bf16.msra.mxu0 %v3727_v6  ;;  %3455 = vmatpush1.bf16.msra.mxu1 %v3747_v7  ;;  %v659_v37 = vld [vmem:[%s4531_s7 + $0x440] sm:$0xff]  ;;  %v660_v39 = vld [vmem:[%s4531_s7 + $0x448] sm:$0xff]  ;;  %v558_v12 = vld [vmem:[%s4531_s7 + $0x118] sm:$0xff] }
  0x87   : > { %3417 = vmatprep.subr.bf16.mxu0 %v3728_v8  ;;  %3457 = vmatprep.subr.bf16.mxu1 %v3748_v9  ;;  %v3736_v42 = vcombine.high %v651_v36, %v659_v37  ;;  %v3756_v43 = vcombine.high %v652_v38, %v660_v39  ;;  %v667_v44 = vld [vmem:[%s4531_s7 + $0x480] sm:$0xff]  ;;  %v668_v46 = vld [vmem:[%s4531_s7 + $0x488] sm:$0xff]  ;;  %v3737_v48 = vcombine.low %v651_v36, %v659_v37  ;;  %v557_v9 = vld [vmem:[%s4531_s7 + $0x110] sm:$0xff] }
  0x88   : > { %v675_v45 = vld [vmem:[%s4531_s7 + $0x4c0] sm:$0xff]  ;;  %v676_v47 = vld [vmem:[%s4531_s7 + $0x4c8] sm:$0xff]  ;;  %v3757_v49 = vcombine.low %v652_v38, %v660_v39  ;;  %v3782_v8 = vcombine.high %v542_v1, %v550_v2  ;;  %v566_v13 = vld [vmem:[%s4531_s7 + $0x158] sm:$0xff] }
  0x89   : > { %v3738_v50 = vcombine.high %v667_v44, %v675_v45  ;;  %v3758_v51 = vcombine.high %v668_v46, %v676_v47  ;;  %v3739_v56 = vcombine.low %v667_v44, %v675_v45  ;;  %v3759_v57 = vcombine.low %v668_v46, %v676_v47  ;;  %v506_v60 = vld [vmem:[%s6079_s0 + $0x8] sm:$0xff]  ;;  %v573_v20 = vld [vmem:[%s4531_s7 + $0x190] sm:$0xff]  ;;  %v509_v28 = vld [vmem:[%s6079_s0 + $0x20] sm:$0xff] }
  0x8a   : > { %3419 = vmatpush1.bf16.msra.mxu0 %v3729_v14  ;;  %3459 = vmatpush1.bf16.msra.mxu1 %v3749_v15  ;;  %v4587_v4 = vunpack.c.h.bf16 %v506_v60  ;;  %v1004_v6 = vld [vmem:[%s6081_s2 + $0x8] sm:$0xff]  ;;  %v4596_v7 = vunpack.c.l.bf16 %v506_v60  ;;  %v3783_v14 = vcombine.low %v542_v1, %v550_v2  ;;  %v4605_v15 = vunpack.c.h.bf16 %v507_v32  ;;  %v581_v21 = vld [vmem:[%s4531_s7 + $0x1d0] sm:$0xff]  ;;  %v590_v36 = vld [vmem:[%s4531_s7 + $0x218] sm:$0xff] }
  0x8b   : > { %3421 = vmatprep.subr.bf16.mxu0 %v3730_v16  ;;  %3461 = vmatprep.subr.bf16.mxu1 %v3750_v17  ;;  %v3764_v16 = vcombine.high %v557_v9, %v565_v10  ;;  %v508_v17 = vld [vmem:[%s6079_s0 + $0x18] sm:$0xff]  ;;  %v3784_v19 = vcombine.high %v558_v12, %v566_v13  ;;  %v3766_v27 = vcombine.high %v573_v20, %v581_v21  ;;  %v4639_v39 = vunpack.c.h.bf16 %v509_v28  ;;  %v605_v44 = vld [vmem:[%s4531_s7 + $0x290] sm:$0xff] }
  0x8c   : > { %1016 = vperm.xlu0 %3908, %v1004_v6   ;;  %v4622_v26 = vunpack.c.h.bf16 %v508_v17  ;;  %v4630_v29 = vunpack.c.l.bf16 %v508_v17  ;;  %v598_v37 = vld [vmem:[%s4531_s7 + $0x258] sm:$0xff]  ;;  %v613_v45 = vld [vmem:[%s4531_s7 + $0x2d0] sm:$0xff] }
  0x8d   : > { %v606_v47 = vld [vmem:[%s4531_s7 + $0x298] sm:$0xff]  ;;  %v621_v52 = vld [vmem:[%s4531_s7 + $0x310] sm:$0xff] }
  0x8e   : > { %3423 = vmatpush1.bf16.msra.mxu0 %v3731_v22  ;;  %3463 = vmatpush1.bf16.msra.mxu1 %v3751_v23  ;;  %v3765_v22 = vcombine.low %v557_v9, %v565_v10  ;;  %v574_v23 = vld [vmem:[%s4531_s7 + $0x198] sm:$0xff]  ;;  %v629_v53 = vld [vmem:[%s4531_s7 + $0x350] sm:$0xff] }
  0x8f   : > { %3425 = vmatprep.subr.bf16.mxu0 %v3732_v24  ;;  %3465 = vmatprep.subr.bf16.mxu1 %v3752_v25  ;;  %v582_v24 = vld [vmem:[%s4531_s7 + $0x1d8] sm:$0xff]  ;;  %v3785_v25 = vcombine.low %v558_v12, %v566_v13  ;;  %v3772_v60 = vcombine.high %v621_v52, %v629_v53  ;;  %v637_v63 = vld [vmem:[%s4531_s7 + $0x390] sm:$0xff] }
  0x90   : > { %v3787_v38 = vcombine.low %v574_v23, %v582_v24  ;;  %v638_v1 = vld [vmem:[%s4531_s7 + $0x398] sm:$0xff]  ;;  %v653_v10 = vld [vmem:[%s4531_s7 + $0x410] sm:$0xff] }
  0x91   : > { %v646_v2 = vld [vmem:[%s4531_s7 + $0x3d8] sm:$0xff] }
  0x92   : > { %3427 = vmatpush1.bf16.msra.mxu0 %v3733_v30  ;;  %3467 = vmatpush1.bf16.msra.mxu1 %v3753_v31  ;;  %v3786_v30 = vcombine.high %v574_v23, %v582_v24  ;;  %v589_v31 = vld [vmem:[%s4531_s7 + $0x210] sm:$0xff]  ;;  %v3794_v9 = vcombine.high %v638_v1, %v646_v2  ;;  %v654_v12 = vld [vmem:[%s4531_s7 + $0x418] sm:$0xff]  ;;  %v3795_v17 = vcombine.low %v638_v1, %v646_v2  ;;  %v576_v2 = vld [vmem:[%s4531_s7 + $0x1a8] sm:$0xff] }
  0x93   : > { %3429 = vmatprep.subr.bf16.mxu0 %v3734_v34  ;;  %3469 = vmatprep.subr.bf16.mxu1 %v3754_v35  ;;  %v597_v34 = vld [vmem:[%s4531_s7 + $0x250] sm:$0xff]  ;;  %v3767_v35 = vcombine.low %v573_v20, %v581_v21  ;;  %v662_v13 = vld [vmem:[%s4531_s7 + $0x458] sm:$0xff] }
  0x94   : > { %v3769_v46 = vcombine.low %v589_v31, %v597_v34  ;;  %v3796_v20 = vcombine.high %v654_v12, %v662_v13  ;;  %v669_v21 = vld [vmem:[%s4531_s7 + $0x490] sm:$0xff]  ;;  %v670_v23 = vld [vmem:[%s4531_s7 + $0x498] sm:$0xff] }
  0x95   : > { %v678_v24 = vld [vmem:[%s4531_s7 + $0x4d8] sm:$0xff] }
  0x96   : > { %3431 = vmatpush1.bf16.msra.mxu0 %v3735_v40  ;;  %3471 = vmatpush1.bf16.msra.mxu1 %v3755_v41  ;;  %v3768_v40 = vcombine.high %v589_v31, %v597_v34  ;;  %v510_v41 = vld [vmem:[%s6079_s0 + $0x28] sm:$0xff]  ;;  %v3798_v31 = vcombine.high %v670_v23, %v678_v24  ;;  %v527_v34 = vld [vmem:[%s4531_s7 + $0x20] sm:$0xff] }
  0x97   : > { %3433 = vmatprep.subr.bf16.mxu0 %v3736_v42  ;;  %3473 = vmatprep.subr.bf16.mxu1 %v3756_v43  ;;  %v4647_v42 = vunpack.c.l.bf16 %v509_v28  ;;  %v3788_v43 = vcombine.high %v590_v36, %v598_v37  ;;  %v4663_v54 = vunpack.c.l.bf16 %v510_v41  ;;  %v3797_v28 = vcombine.low %v654_v12, %v662_v13  ;;  %v600_v12 = vld [vmem:[%s4531_s7 + $0x268] sm:$0xff] }
  0x9a   : > { %3435 = vmatpush1.bf16.msra.mxu0 %v3737_v48  ;;  %3475 = vmatpush1.bf16.msra.mxu1 %v3757_v49  ;;  %v614_v48 = vld [vmem:[%s4531_s7 + $0x2d8] sm:$0xff]  ;;  %v3789_v49 = vcombine.low %v590_v36, %v598_v37  ;;  %v528_v36 = vld [vmem:[%s4531_s7 + $0x28] sm:$0xff] }
  0x9b   : > { %3437 = vmatprep.subr.bf16.mxu0 %v3738_v50  ;;  %3477 = vmatprep.subr.bf16.mxu1 %v3758_v51  ;;  %v4656_v50 = vunpack.c.h.bf16 %v510_v41  ;;  %v3770_v51 = vcombine.high %v605_v44, %v613_v45  ;;  %v3790_v55 = vcombine.high %v606_v47, %v614_v48  ;;  %v536_v37 = vld [vmem:[%s4531_s7 + $0x68] sm:$0xff] }
  0x9e   : > { %3439 = vmatpush1.bf16.msra.mxu0 %v3739_v56  ;;  %3479 = vmatpush1.bf16.msra.mxu1 %v3759_v57  ;;  %v622_v56 = vld [vmem:[%s4531_s7 + $0x318] sm:$0xff] }
  0x9f   : > { %3481 = vmatprep.subr.bf16.mxu0 %v3760_v58  ;;  %3521 = vmatprep.subr.bf16.mxu1 %v3780_v59  ;;  %v630_v57 = vld [vmem:[%s4531_s7 + $0x358] sm:$0xff]  ;;  %v3771_v58 = vcombine.low %v605_v44, %v613_v45  ;;  %v3791_v59 = vcombine.low %v606_v47, %v614_v48  ;;  %v543_v44 = vld [vmem:[%s4531_s7 + $0xa0] sm:$0xff]  ;;  %v544_v47 = vld [vmem:[%s4531_s7 + $0xa8] sm:$0xff] }
  0xa0   : > { %v3792_v62 = vcombine.high %v622_v56, %v630_v57  ;;  %v3793_v32 = vcombine.low %v622_v56, %v630_v57  ;;  %v551_v45 = vld [vmem:[%s4531_s7 + $0xe0] sm:$0xff]  ;;  %v552_v48 = vld [vmem:[%s4531_s7 + $0xe8] sm:$0xff] }
  0xa1   : > { %1123 = vmatmul.mubr.f32.vlgmr.msra.gmra.mrb[0].mxu0 %v4581_v61  ;;  %1224 = vmatmul.mubr.f32.vlgmr.msra.gmra.mrb[0].mxu1 %v4581_v61  ;;  %v3803_v56 = vcombine.low %v543_v44, %v551_v45  ;;  %v560_v57 = vld [vmem:[%s4531_s7 + $0x128] sm:$0xff] }
  0xa2   : > { %3483 = vmatpush1.bf16.msra.mxu0 %v3761_v0  ;;  %3523 = vmatpush1.bf16.msra.mxu1 %v3781_v3  ;;  %v645_v0 = vld [vmem:[%s4531_s7 + $0x3d0] sm:$0xff]  ;;  %v3773_v3 = vcombine.low %v621_v52, %v629_v53  ;;  %v3822_v52 = vcombine.high %v544_v47, %v552_v48  ;;  %v559_v53 = vld [vmem:[%s4531_s7 + $0x120] sm:$0xff] }
  0xa3   : > { %3251 = vmatprep.mubr.msk.f32.mxu0 %vm1039_vm0, %v4587_v4  ;;  %3257 = vmatprep.mubr.msk.f32.mxu1 %vm1039_vm0, %v4587_v4  ;;  %v3774_v6 = vcombine.high %v637_v63, %v645_v0 }
  0xa4   : > { %3485 = vmatprep.subr.bf16.mxu0 %v3762_v5  ;;  %3525 = vmatprep.subr.bf16.mxu1 %v3782_v8  ;;  %v1005_v5 = vld [vmem:[%s6081_s2 + $0x10] sm:$0xff]  ;;  %v1007_v8 = vld [vmem:[%s6081_s2 + $0x20] sm:$0xff] }
  0xa5   : > { %1129 = vmatmul.mubr.f32.gmra.mrb[2].mxu0 %v4596_v7  ;;  %1230 = vmatmul.mubr.f32.gmra.mrb[2].mxu1 %v4596_v7 }
  0xa6   : > { %3487 = vmatpush1.bf16.msra.mxu0 %v3763_v11  ;;  %3527 = vmatpush1.bf16.msra.mxu1 %v3783_v14  ;;  %v661_v11 = vld [vmem:[%s4531_s7 + $0x450] sm:$0xff]  ;;  %v3775_v14 = vcombine.low %v637_v63, %v645_v0  ;;  %v575_v63 = vld [vmem:[%s4531_s7 + $0x1a0] sm:$0xff] }
  0xa7   : > { %3252 = vmatprep.mubr.msk.f32.mxu0 %vm1039_vm0, %v4605_v15  ;;  %3258 = vmatprep.mubr.msk.f32.mxu1 %vm1039_vm0, %v4605_v15  ;;  %v583_v0 = vld [vmem:[%s4531_s7 + $0x1e0] sm:$0xff] }
  0xa8   : > { %3489 = vmatprep.subr.bf16.mxu0 %v3764_v16  ;;  %3529 = vmatprep.subr.bf16.mxu1 %v3784_v19  ;;  %v1006_v16 = vld [vmem:[%s6081_s2 + $0x18] sm:$0xff]  ;;  %v3776_v19 = vcombine.high %v653_v10, %v661_v11 }
  0xa9   : > { %1135 = vmatmul.mubr.f32.gmra.mrb[4].mxu0 %v4613_v18  ;;  %1236 = vmatmul.mubr.f32.gmra.mrb[4].mxu1 %v4613_v18 }
  0xaa   : > { %3491 = vmatpush1.bf16.msra.mxu0 %v3765_v22  ;;  %3531 = vmatpush1.bf16.msra.mxu1 %v3785_v25  ;;  %v677_v22 = vld [vmem:[%s4531_s7 + $0x4d0] sm:$0xff]  ;;  %v3777_v25 = vcombine.low %v653_v10, %v661_v11  ;;  %v3807_v10 = vcombine.low %v575_v63, %v583_v0  ;;  %v592_v11 = vld [vmem:[%s4531_s7 + $0x228] sm:$0xff] }
  0xab   : > { %3253 = vmatprep.mubr.msk.f32.mxu0 %vm1039_vm0, %v4622_v26  ;;  %3259 = vmatprep.mubr.msk.f32.mxu1 %vm1039_vm0, %v4622_v26 }
  0xac   : > { %3493 = vmatprep.subr.bf16.mxu0 %v3766_v27  ;;  %3533 = vmatprep.subr.bf16.mxu1 %v3786_v30  ;;  %v1008_v27 = vld [vmem:[%s6081_s2 + $0x28] sm:$0xff]  ;;  %v3778_v30 = vcombine.high %v669_v21, %v677_v22 }
  0xad   : > { %1141 = vmatmul.mubr.f32.gmra.mrb[6].mxu0 %v4630_v29  ;;  %1242 = vmatmul.mubr.f32.gmra.mrb[6].mxu1 %v4630_v29 }
  0xae   : > { %3495 = vmatpush1.bf16.msra.mxu0 %v3767_v35  ;;  %3535 = vmatpush1.bf16.msra.mxu1 %v3787_v38  ;;  %v535_v35 = vld [vmem:[%s4531_s7 + $0x60] sm:$0xff]  ;;  %v3779_v38 = vcombine.low %v669_v21, %v677_v22  ;;  %v608_v21 = vld [vmem:[%s4531_s7 + $0x2a8] sm:$0xff] }
  0xaf   : > { %3254 = vmatprep.mubr.msk.f32.mxu0 %vm1039_vm0, %v4639_v39  ;;  %3260 = vmatprep.mubr.msk.f32.mxu1 %vm1039_vm0, %v4639_v39  ;;  %v3800_v41 = vcombine.high %v527_v34, %v535_v35  ;;  %v616_v22 = vld [vmem:[%s4531_s7 + $0x2e8] sm:$0xff] }
  0xb0   : > { %3497 = vmatprep.subr.bf16.mxu0 %v3768_v40  ;;  %3537 = vmatprep.subr.bf16.mxu1 %v3788_v43  ;;  %v3799_v40 = vcombine.low %v670_v23, %v678_v24  ;;  %v3820_v43 = vcombine.high %v528_v36, %v536_v37  ;;  %v3829_v23 = vcombine.low %v592_v11, %v600_v12 }
  0xb1   : > { %1147 = vmatmul.mubr.f32.gmra.mrb[8].mxu0 %v4647_v42  ;;  %1248 = vmatmul.mubr.f32.gmra.mrb[8].mxu1 %v4647_v42 }
  0xb2   : > { %3499 = vmatpush1.bf16.msra.mxu0 %v3769_v46  ;;  %3539 = vmatpush1.bf16.msra.mxu1 %v3789_v49  ;;  %v3801_v46 = vcombine.low %v527_v34, %v535_v35  ;;  %v3821_v49 = vcombine.low %v528_v36, %v536_v37  ;;  %v3831_v35 = vcombine.low %v608_v21, %v616_v22 }
  0xb3   : > { %3255 = vmatprep.mubr.msk.f32.mxu0 %vm1039_vm0, %v4656_v50  ;;  %3261 = vmatprep.mubr.msk.f32.mxu1 %vm1039_vm0, %v4656_v50 }
  0xb4   : > { %3501 = vmatprep.subr.bf16.mxu0 %v3770_v51  ;;  %3541 = vmatprep.subr.bf16.mxu1 %v3790_v55  ;;  %v3802_v51 = vcombine.high %v543_v44, %v551_v45  ;;  %v567_v55 = vld [vmem:[%s4531_s7 + $0x160] sm:$0xff] }
  0xb5   : > { %1153 = vmatmul.mubr.f32.gmra.mrb[10].mxu0 %v4663_v54  ;;  %1254 = vmatmul.mubr.f32.gmra.mrb[10].mxu1 %v4663_v54  ;;  %v3805_v1 = vcombine.low %v559_v53, %v567_v55 }
  0xb6   : > { %3503 = vmatpush1.bf16.msra.mxu0 %v3771_v58  ;;  %3543 = vmatpush1.bf16.msra.mxu1 %v3791_v59  ;;  %v568_v58 = vld [vmem:[%s4531_s7 + $0x168] sm:$0xff]  ;;  %v3823_v59 = vcombine.low %v544_v47, %v552_v48  ;;  %v655_v48 = vld [vmem:[%s4531_s7 + $0x420] sm:$0xff] }
  0xb7   : > { %3505 = vmatprep.subr.bf16.mxu0 %v3772_v60  ;;  %3545 = vmatprep.subr.bf16.mxu1 %v3792_v62  ;;  %v3804_v60 = vcombine.high %v559_v53, %v567_v55  ;;  %v3824_v62 = vcombine.high %v560_v57, %v568_v58 }
  0xb8   : > { %3262 = vmatprep.mubr.msk.f32.mxu0 %vm1039_vm0, %v4522_v33  ;;  %3268 = vmatprep.mubr.msk.f32.mxu1 %vm1039_vm0, %v4522_v33 }
  0xb9   : > { %1021 = vperm.xlu1 %3909, %v1005_v5   ;;  %1031 = vperm.xlu0 %3908, %v1007_v8   ;;  %v3825_v5 = vcombine.low %v560_v57, %v568_v58  ;;  %v591_v8 = vld [vmem:[%s4531_s7 + $0x220] sm:$0xff] }
  0xba   : > { %3507 = vmatpush1.bf16.msra.mxu0 %v3773_v3  ;;  %3547 = vmatpush1.bf16.msra.mxu1 %v3793_v32  ;;  %v584_v3 = vld [vmem:[%s4531_s7 + $0x1e8] sm:$0xff]  ;;  %v3806_v32 = vcombine.high %v575_v63, %v583_v0  ;;  %v671_v58 = vld [vmem:[%s4531_s7 + $0x4a0] sm:$0xff] }
  0xbb   : > { %3509 = vmatprep.subr.bf16.mxu0 %v3774_v6  ;;  %3549 = vmatprep.subr.bf16.mxu1 %v3794_v9  ;;  %v3826_v6 = vcombine.high %v576_v2, %v584_v3  ;;  %v599_v9 = vld [vmem:[%s4531_s7 + $0x260] sm:$0xff]  ;;  %v3827_v13 = vcombine.low %v576_v2, %v584_v3  ;;  %v529_v3 = vld [vmem:[%s4531_s7 + $0x30] sm:$0xff] }
  0xbd   : > { %1026 = vperm.xlu1 %3909, %v1006_v16   ;;  %v3828_v16 = vcombine.high %v592_v11, %v600_v12  ;;  %v545_v12 = vld [vmem:[%s4531_s7 + $0xb0] sm:$0xff] }
  0xbe   : > { %3511 = vmatpush1.bf16.msra.mxu0 %v3775_v14  ;;  %3551 = vmatpush1.bf16.msra.mxu1 %v3795_v17  ;;  %v3808_v14 = vcombine.high %v591_v8, %v599_v9  ;;  %v607_v17 = vld [vmem:[%s4531_s7 + $0x2a0] sm:$0xff] }
  0xbf   : > { %3513 = vmatprep.subr.bf16.mxu0 %v3776_v19  ;;  %3553 = vmatprep.subr.bf16.mxu1 %v3796_v20  ;;  %v615_v19 = vld [vmem:[%s4531_s7 + $0x2e0] sm:$0xff]  ;;  %v3809_v20 = vcombine.low %v591_v8, %v599_v9 }
  0xc0   : > { %v3810_v24 = vcombine.high %v607_v17, %v615_v19  ;;  %v3811_v34 = vcombine.low %v607_v17, %v615_v19  ;;  %v554_v17 = vld [vmem:[%s4531_s7 + $0xf8] sm:$0xff] }
  0xc1   : > { %1036 = vperm.xlu1 %3909, %v1008_v27   ;;  %v631_v27 = vld [vmem:[%s4531_s7 + $0x360] sm:$0xff] }
  0xc2   : > { %3515 = vmatpush1.bf16.msra.mxu0 %v3777_v25  ;;  %3555 = vmatpush1.bf16.msra.mxu1 %v3797_v28  ;;  %v623_v25 = vld [vmem:[%s4531_s7 + $0x320] sm:$0xff]  ;;  %v3830_v28 = vcombine.high %v608_v21, %v616_v22  ;;  %v561_v22 = vld [vmem:[%s4531_s7 + $0x130] sm:$0xff] }
  0xc3   : > { %3517 = vmatprep.subr.bf16.mxu0 %v3778_v30  ;;  %3557 = vmatprep.subr.bf16.mxu1 %v3798_v31  ;;  %v624_v30 = vld [vmem:[%s4531_s7 + $0x328] sm:$0xff]  ;;  %v3812_v36 = vcombine.high %v623_v25, %v631_v27  ;;  %v3813_v44 = vcombine.low %v623_v25, %v631_v27  ;;  %v562_v25 = vld [vmem:[%s4531_s7 + $0x138] sm:$0xff] }
  0xc4   : > { %v632_v31 = vld [vmem:[%s4531_s7 + $0x368] sm:$0xff]  ;;  %v570_v27 = vld [vmem:[%s4531_s7 + $0x178] sm:$0xff] }
  0xc5   : > { %v3832_v37 = vcombine.high %v624_v30, %v632_v31  ;;  %v3833_v45 = vcombine.low %v624_v30, %v632_v31  ;;  %v3864_v31 = vcombine.high %v562_v25, %v570_v27 }
  0xc6   : > { %3519 = vmatpush1.bf16.msra.mxu0 %v3779_v38  ;;  %3559 = vmatpush1.bf16.msra.mxu1 %v3799_v40  ;;  %v639_v38 = vld [vmem:[%s4531_s7 + $0x3a0] sm:$0xff] }
  0xc7   : > { %3561 = vmatprep.subr.bf16.mxu0 %v3800_v41  ;;  %3601 = vmatprep.subr.bf16.mxu1 %v3820_v43  ;;  %v647_v40 = vld [vmem:[%s4531_s7 + $0x3e0] sm:$0xff]  ;;  %v640_v41 = vld [vmem:[%s4531_s7 + $0x3a8] sm:$0xff] }
  0xc8   : > { %v648_v43 = vld [vmem:[%s4531_s7 + $0x3e8] sm:$0xff]  ;;  %v3815_v53 = vcombine.low %v639_v38, %v647_v40 }
  0xc9   : > { %1325 = vmatmul.mubr.f32.vlgmr.msra.gmra.mrb[12].mxu0 %v4581_v61  ;;  %1426 = vmatmul.mubr.f32.vlgmr.msra.gmra.mrb[12].mxu1 %v4581_v61  ;;  %v3834_v47 = vcombine.high %v640_v41, %v648_v43  ;;  %v3835_v55 = vcombine.low %v640_v41, %v648_v43 }
  0xca   : > { %3563 = vmatpush1.bf16.msra.mxu0 %v3801_v46  ;;  %3603 = vmatpush1.bf16.msra.mxu1 %v3821_v49  ;;  %v3814_v46 = vcombine.high %v639_v38, %v647_v40  ;;  %v663_v49 = vld [vmem:[%s4531_s7 + $0x460] sm:$0xff]  ;;  %v586_v38 = vld [vmem:[%s4531_s7 + $0x1f8] sm:$0xff]  ;;  %v3865_v40 = vcombine.low %v562_v25, %v570_v27  ;;  %v673_v27 = vld [vmem:[%s4531_s7 + $0x4b0] sm:$0xff] }
  0xcb   : > { %3263 = vmatprep.mubr.msk.f32.mxu0 %vm1039_vm0, %v4587_v4  ;;  %3269 = vmatprep.mubr.msk.f32.mxu1 %vm1039_vm0, %v4587_v4  ;;  %v3817_v63 = vcombine.low %v655_v48, %v663_v49 }
  0xcc   : > { %3565 = vmatprep.subr.bf16.mxu0 %v3802_v51  ;;  %3605 = vmatprep.subr.bf16.mxu1 %v3822_v52  ;;  %v656_v51 = vld [vmem:[%s4531_s7 + $0x428] sm:$0xff] }
  0xcd   : > { %1331 = vmatmul.mubr.f32.gmra.mrb[14].mxu0 %v4596_v7  ;;  %1432 = vmatmul.mubr.f32.gmra.mrb[14].mxu1 %v4596_v7  ;;  %v664_v52 = vld [vmem:[%s4531_s7 + $0x468] sm:$0xff] }
  0xce   : > { %3567 = vmatpush1.bf16.msra.mxu0 %v3803_v56  ;;  %3607 = vmatpush1.bf16.msra.mxu1 %v3823_v59  ;;  %v3816_v56 = vcombine.high %v655_v48, %v663_v49  ;;  %v3836_v57 = vcombine.high %v656_v51, %v664_v52  ;;  %v679_v59 = vld [vmem:[%s4531_s7 + $0x4e0] sm:$0xff]  ;;  %v3837_v0 = vcombine.low %v656_v51, %v664_v52  ;;  %v602_v48 = vld [vmem:[%s4531_s7 + $0x278] sm:$0xff] }
  0xcf   : > { %3264 = vmatprep.mubr.msk.f32.mxu0 %vm1039_vm0, %v4605_v15  ;;  %3270 = vmatprep.mubr.msk.f32.mxu1 %vm1039_vm0, %v4605_v15  ;;  %v3819_v8 = vcombine.low %v671_v58, %v679_v59 }
  0xd0   : > { %3569 = vmatprep.subr.bf16.mxu0 %v3804_v60  ;;  %3609 = vmatprep.subr.bf16.mxu1 %v3824_v62  ;;  %v672_v60 = vld [vmem:[%s4531_s7 + $0x4a8] sm:$0xff] }
  0xd1   : > { %1337 = vmatmul.mubr.f32.gmra.mrb[16].mxu0 %v4613_v18  ;;  %1438 = vmatmul.mubr.f32.gmra.mrb[16].mxu1 %v4613_v18  ;;  %v680_v62 = vld [vmem:[%s4531_s7 + $0x4e8] sm:$0xff] }
  0xd2   : > { %3571 = vmatpush1.bf16.msra.mxu0 %v3805_v1  ;;  %3611 = vmatpush1.bf16.msra.mxu1 %v3825_v5  ;;  %v3818_v1 = vcombine.high %v671_v58, %v679_v59  ;;  %v3838_v2 = vcombine.high %v672_v60, %v680_v62  ;;  %v537_v5 = vld [vmem:[%s4531_s7 + $0x70] sm:$0xff]  ;;  %v3839_v9 = vcombine.low %v672_v60, %v680_v62  ;;  %v618_v58 = vld [vmem:[%s4531_s7 + $0x2f8] sm:$0xff] }
  0xd3   : > { %3265 = vmatprep.mubr.msk.f32.mxu0 %vm1039_vm0, %v4622_v26  ;;  %3271 = vmatprep.mubr.msk.f32.mxu1 %vm1039_vm0, %v4622_v26  ;;  %v625_v62 = vld [vmem:[%s4531_s7 + $0x330] sm:$0xff] }
  0xd4   : > { %3573 = vmatprep.subr.bf16.mxu0 %v3806_v32  ;;  %3613 = vmatprep.subr.bf16.mxu1 %v3826_v6  ;;  %v530_v32 = vld [vmem:[%s4531_s7 + $0x38] sm:$0xff] }
  0xd5   : > { %1343 = vmatmul.mubr.f32.gmra.mrb[18].mxu0 %v4630_v29  ;;  %1444 = vmatmul.mubr.f32.gmra.mrb[18].mxu1 %v4630_v29  ;;  %v538_v6 = vld [vmem:[%s4531_s7 + $0x78] sm:$0xff] }
  0xd6   : > { %3575 = vmatpush1.bf16.msra.mxu0 %v3807_v10  ;;  %3615 = vmatpush1.bf16.msra.mxu1 %v3827_v13  ;;  %v3840_v10 = vcombine.high %v529_v3, %v537_v5  ;;  %v3860_v11 = vcombine.high %v530_v32, %v538_v6  ;;  %v553_v13 = vld [vmem:[%s4531_s7 + $0xf0] sm:$0xff]  ;;  %v3861_v19 = vcombine.low %v530_v32, %v538_v6 }
  0xd7   : > { %3266 = vmatprep.mubr.msk.f32.mxu0 %vm1039_vm0, %v4639_v39  ;;  %3272 = vmatprep.mubr.msk.f32.mxu1 %vm1039_vm0, %v4639_v39 }
  0xd8   : > { %3577 = vmatprep.subr.bf16.mxu0 %v3808_v14  ;;  %3617 = vmatprep.subr.bf16.mxu1 %v3828_v16  ;;  %v3841_v14 = vcombine.low %v529_v3, %v537_v5  ;;  %v546_v16 = vld [vmem:[%s4531_s7 + $0xb8] sm:$0xff] }
  0xd9   : > { %1349 = vmatmul.mubr.f32.gmra.mrb[20].mxu0 %v4647_v42  ;;  %1450 = vmatmul.mubr.f32.gmra.mrb[20].mxu1 %v4647_v42  ;;  %v3862_v21 = vcombine.high %v546_v16, %v554_v17 }
  0xda   : > { %3579 = vmatpush1.bf16.msra.mxu0 %v3809_v20  ;;  %3619 = vmatpush1.bf16.msra.mxu1 %v3829_v23  ;;  %v3842_v20 = vcombine.high %v545_v12, %v553_v13  ;;  %v569_v23 = vld [vmem:[%s4531_s7 + $0x170] sm:$0xff] }
  0xdb   : > { %3267 = vmatprep.mubr.msk.f32.mxu0 %vm1039_vm0, %v4656_v50  ;;  %3273 = vmatprep.mubr.msk.f32.mxu1 %vm1039_vm0, %v4656_v50  ;;  %v3844_v30 = vcombine.high %v561_v22, %v569_v23 }
  0xdc   : > { %3581 = vmatprep.subr.bf16.mxu0 %v3810_v24  ;;  %3621 = vmatprep.subr.bf16.mxu1 %v3830_v28  ;;  %v3843_v24 = vcombine.low %v545_v12, %v553_v13  ;;  %v3863_v28 = vcombine.low %v546_v16, %v554_v17  ;;  %v657_v17 = vld [vmem:[%s4531_s7 + $0x430] sm:$0xff] }
  0xdd   : > { %1355 = vmatmul.mubr.f32.gmra.mrb[22].mxu0 %v4663_v54  ;;  %1456 = vmatmul.mubr.f32.gmra.mrb[22].mxu1 %v4663_v54 }
  0xde   : > { %3583 = vmatpush1.bf16.msra.mxu0 %v3811_v34  ;;  %3623 = vmatpush1.bf16.msra.mxu1 %v3831_v35  ;;  %v577_v34 = vld [vmem:[%s4531_s7 + $0x1b0] sm:$0xff] }
  0xdf   : > { %3585 = vmatprep.subr.bf16.mxu0 %v3812_v36  ;;  %3625 = vmatprep.subr.bf16.mxu1 %v3832_v37  ;;  %v585_v35 = vld [vmem:[%s4531_s7 + $0x1f0] sm:$0xff]  ;;  %v3845_v36 = vcombine.low %v561_v22, %v569_v23  ;;  %v578_v37 = vld [vmem:[%s4531_s7 + $0x1b8] sm:$0xff] }
  0xe0   : > { %3274 = vmatprep.mubr.msk.f32.mxu0 %vm1039_vm0, %v4522_v33  ;;  %3280 = vmatprep.mubr.msk.f32.mxu1 %vm1039_vm0, %v4522_v33  ;;  %v3846_v41 = vcombine.high %v577_v34, %v585_v35  ;;  %v3866_v43 = vcombine.high %v578_v37, %v586_v38  ;;  %v3867_v49 = vcombine.low %v578_v37, %v586_v38 }
  0xe2   : > { %3587 = vmatpush1.bf16.msra.mxu0 %v3813_v44  ;;  %3627 = vmatpush1.bf16.msra.mxu1 %v3833_v45  ;;  %v593_v44 = vld [vmem:[%s4531_s7 + $0x230] sm:$0xff] }
  0xe3   : > { %3589 = vmatprep.subr.bf16.mxu0 %v3814_v46  ;;  %3629 = vmatprep.subr.bf16.mxu1 %v3834_v47  ;;  %v601_v45 = vld [vmem:[%s4531_s7 + $0x270] sm:$0xff]  ;;  %v3847_v46 = vcombine.low %v577_v34, %v585_v35  ;;  %v594_v47 = vld [vmem:[%s4531_s7 + $0x238] sm:$0xff] }
  0xe4   : > { %v3848_v51 = vcombine.high %v593_v44, %v601_v45  ;;  %v3868_v52 = vcombine.high %v594_v47, %v602_v48  ;;  %v3869_v59 = vcombine.low %v594_v47, %v602_v48 }
  0xe6   : > { %3591 = vmatpush1.bf16.msra.mxu0 %v3815_v53  ;;  %3631 = vmatpush1.bf16.msra.mxu1 %v3835_v55  ;;  %v609_v53 = vld [vmem:[%s4531_s7 + $0x2b0] sm:$0xff] }
  0xe7   : > { %3593 = vmatprep.subr.bf16.mxu0 %v3816_v56  ;;  %3633 = vmatprep.subr.bf16.mxu1 %v3836_v57  ;;  %v617_v55 = vld [vmem:[%s4531_s7 + $0x2f0] sm:$0xff]  ;;  %v3849_v56 = vcombine.low %v593_v44, %v601_v45  ;;  %v610_v57 = vld [vmem:[%s4531_s7 + $0x2b8] sm:$0xff] }
  0xe8   : > { %v3850_v60 = vcombine.high %v609_v53, %v617_v55  ;;  %v3851_v3 = vcombine.low %v609_v53, %v617_v55  ;;  %v3871_v5 = vcombine.low %v610_v57, %v618_v58 }
  0xea   : > { %3595 = vmatpush1.bf16.msra.mxu0 %v3817_v63  ;;  %3635 = vmatpush1.bf16.msra.mxu1 %v3837_v0  ;;  %v633_v63 = vld [vmem:[%s4531_s7 + $0x370] sm:$0xff]  ;;  %v3870_v0 = vcombine.high %v610_v57, %v618_v58 }
  0xeb   : > { %3597 = vmatprep.subr.bf16.mxu0 %v3818_v1  ;;  %3637 = vmatprep.subr.bf16.mxu1 %v3838_v2  ;;  %v626_v1 = vld [vmem:[%s4531_s7 + $0x338] sm:$0xff]  ;;  %v3852_v32 = vcombine.high %v625_v62, %v633_v63  ;;  %v3853_v12 = vcombine.low %v625_v62, %v633_v63 }
  0xec   : > { %v634_v2 = vld [vmem:[%s4531_s7 + $0x378] sm:$0xff] }
  0xed   : > { %v3872_v6 = vcombine.high %v626_v1, %v634_v2  ;;  %v3873_v13 = vcombine.low %v626_v1, %v634_v2 }
  0xee   : > { %3599 = vmatpush1.bf16.msra.mxu0 %v3819_v8  ;;  %3639 = vmatpush1.bf16.msra.mxu1 %v3839_v9  ;;  %v641_v8 = vld [vmem:[%s4531_s7 + $0x3b0] sm:$0xff] }
  0xef   : > { %3641 = vmatprep.subr.bf16.mxu0 %v3840_v10  ;;  %3681 = vmatprep.subr.bf16.mxu1 %v3860_v11  ;;  %v649_v9 = vld [vmem:[%s4531_s7 + $0x3f0] sm:$0xff]  ;;  %v642_v10 = vld [vmem:[%s4531_s7 + $0x3b8] sm:$0xff] }
  0xf0   : > { %v650_v11 = vld [vmem:[%s4531_s7 + $0x3f8] sm:$0xff]  ;;  %v3855_v22 = vcombine.low %v641_v8, %v649_v9 }
  0xf1   : > { %1527 = vmatmul.mubr.f32.vlgmr.msra.gmra.mrb[24].mxu0 %v4581_v61  ;;  %1628 = vmatmul.mubr.f32.vlgmr.msra.gmra.mrb[24].mxu1 %v4581_v61  ;;  %v3874_v16 = vcombine.high %v642_v10, %v650_v11  ;;  %v3875_v23 = vcombine.low %v642_v10, %v650_v11 }
  0xf2   : > { %3643 = vmatpush1.bf16.msra.mxu0 %v3841_v14  ;;  %3683 = vmatpush1.bf16.msra.mxu1 %v3861_v19  ;;  %v3854_v14 = vcombine.high %v641_v8, %v649_v9  ;;  %v665_v19 = vld [vmem:[%s4531_s7 + $0x470] sm:$0xff] }
  0xf3   : > { %3275 = vmatprep.mubr.msk.f32.mxu0 %vm1039_vm0, %v4587_v4  ;;  %3281 = vmatprep.mubr.msk.f32.mxu1 %vm1039_vm0, %v4587_v4  ;;  %v3857_v34 = vcombine.low %v657_v17, %v665_v19 }
  0xf4   : > { %3645 = vmatprep.subr.bf16.mxu0 %v3842_v20  ;;  %3685 = vmatprep.subr.bf16.mxu1 %v3862_v21  ;;  %v658_v20 = vld [vmem:[%s4531_s7 + $0x438] sm:$0xff] }
  0xf5   : > { %1533 = vmatmul.mubr.f32.gmra.mrb[26].mxu0 %v4596_v7  ;;  %1634 = vmatmul.mubr.f32.gmra.mrb[26].mxu1 %v4596_v7  ;;  %v666_v21 = vld [vmem:[%s4531_s7 + $0x478] sm:$0xff] }
  0xf6   : > { %3647 = vmatpush1.bf16.msra.mxu0 %v3843_v24  ;;  %3687 = vmatpush1.bf16.msra.mxu1 %v3863_v28  ;;  %v3856_v24 = vcombine.high %v657_v17, %v665_v19  ;;  %v3876_v25 = vcombine.high %v658_v20, %v666_v21  ;;  %v681_v28 = vld [vmem:[%s4531_s7 + $0x4f0] sm:$0xff]  ;;  %v3877_v35 = vcombine.low %v658_v20, %v666_v21 }
  0xf7   : > { %3276 = vmatprep.mubr.msk.f32.mxu0 %vm1039_vm0, %v4605_v15  ;;  %3282 = vmatprep.mubr.msk.f32.mxu1 %vm1039_vm0, %v4605_v15  ;;  %v3859_v37 = vcombine.low %v673_v27, %v681_v28 }
  0xf8   : > { %3649 = vmatprep.subr.bf16.mxu0 %v3844_v30  ;;  %3689 = vmatprep.subr.bf16.mxu1 %v3864_v31  ;;  %v674_v30 = vld [vmem:[%s4531_s7 + $0x4b8] sm:$0xff] }
  0xf9   : > { %1539 = vmatmul.mubr.f32.gmra.mrb[28].mxu0 %v4613_v18  ;;  %1640 = vmatmul.mubr.f32.gmra.mrb[28].mxu1 %v4613_v18  ;;  %v682_v31 = vld [vmem:[%s4531_s7 + $0x4f8] sm:$0xff]  ;;  %s4996_s7 = smul.u32 384, %s481_s28  ;;  %s3399_s28 = sshll.u32 (%p4177_p5), %s3243_s15, 6 }
  0xfa   : > { %3651 = vmatpush1.bf16.msra.mxu0 %v3845_v36  ;;  %3691 = vmatpush1.bf16.msra.mxu1 %v3865_v40  ;;  %v3858_v36 = vcombine.high %v673_v27, %v681_v28  ;;  %v3879_v38 = vcombine.low %v674_v30, %v682_v31  ;;  %s5974_s20 = scalar_lea.vmem (%p4177_p5), %s6082_s3, %s3399_s28 }
  0xfb   : > { %3277 = vmatprep.mubr.msk.f32.mxu0 %vm1039_vm0, %v4622_v26  ;;  %3283 = vmatprep.mubr.msk.f32.mxu1 %vm1039_vm0, %v4622_v26  ;;  %s5020_s12 = scalar_lea.vmem [#allocation3], %s4996_s7 }
  0xfc   : > { %3653 = vmatprep.subr.bf16.mxu0 %v3846_v41  ;;  %3693 = vmatprep.subr.bf16.mxu1 %v3866_v43 }
  0xfd   : > { %1545 = vmatmul.mubr.f32.gmra.mrb[30].mxu0 %v4630_v29  ;;  %1646 = vmatmul.mubr.f32.gmra.mrb[30].mxu1 %v4630_v29 }
  0xfe   : > { %3655 = vmatpush1.bf16.msra.mxu0 %v3847_v46  ;;  %3695 = vmatpush1.bf16.msra.mxu1 %v3867_v49 }
  0xff   : > { %3278 = vmatprep.mubr.msk.f32.mxu0 %vm1039_vm0, %v4639_v39  ;;  %3284 = vmatprep.mubr.msk.f32.mxu1 %vm1039_vm0, %v4639_v39 }
 0x100   : > { %3657 = vmatprep.subr.bf16.mxu0 %v3848_v51  ;;  %3697 = vmatprep.subr.bf16.mxu1 %v3868_v52 }
 0x101   : > { %1551 = vmatmul.mubr.f32.gmra.mrb[32].mxu0 %v4647_v42  ;;  %1652 = vmatmul.mubr.f32.gmra.mrb[32].mxu1 %v4647_v42 }
 0x102   : > { %3659 = vmatpush1.bf16.msra.mxu0 %v3849_v56  ;;  %3699 = vmatpush1.bf16.msra.mxu1 %v3869_v59 }
 0x103   : > { %3279 = vmatprep.mubr.msk.f32.mxu0 %vm1039_vm0, %v4656_v50  ;;  %3285 = vmatprep.mubr.msk.f32.mxu1 %vm1039_vm0, %v4656_v50 }
 0x104   : > { %3661 = vmatprep.subr.bf16.mxu0 %v3850_v60  ;;  %3701 = vmatprep.subr.bf16.mxu1 %v3870_v0 }
 0x105   : > { %1557 = vmatmul.mubr.f32.gmra.mrb[34].mxu0 %v4663_v54  ;;  %1658 = vmatmul.mubr.f32.gmra.mrb[34].mxu1 %v4663_v54 }
 0x106   : > { %3663 = vmatpush1.bf16.msra.mxu0 %v3851_v3  ;;  %3703 = vmatpush1.bf16.msra.mxu1 %v3871_v5 }
 0x107   : > { %3665 = vmatprep.subr.bf16.mxu0 %v3852_v32  ;;  %3705 = vmatprep.subr.bf16.mxu1 %v3872_v6 }
 0x108   : > { %3286 = vmatprep.mubr.msk.f32.mxu0 %vm1039_vm0, %v4522_v33  ;;  %3292 = vmatprep.mubr.msk.f32.mxu1 %vm1039_vm0, %v4522_v33  ;;  %v3878_v33 = vcombine.high %v674_v30, %v682_v31 }
 0x10a   : > { %3667 = vmatpush1.bf16.msra.mxu0 %v3853_v12  ;;  %3707 = vmatpush1.bf16.msra.mxu1 %v3873_v13 }
 0x10b   : > { %3669 = vmatprep.subr.bf16.mxu0 %v3854_v14  ;;  %3709 = vmatprep.subr.bf16.mxu1 %v3874_v16 }
 0x10e   : > { %3671 = vmatpush1.bf16.msra.mxu0 %v3855_v22  ;;  %3711 = vmatpush1.bf16.msra.mxu1 %v3875_v23 }
 0x10f   : > { %3673 = vmatprep.subr.bf16.mxu0 %v3856_v24  ;;  %3713 = vmatprep.subr.bf16.mxu1 %v3876_v25 }
 0x112   : > { %3675 = vmatpush1.bf16.msra.mxu0 %v3857_v34  ;;  %3715 = vmatpush1.bf16.msra.mxu1 %v3877_v35 }
 0x113   : > { %3677 = vmatprep.subr.bf16.mxu0 %v3858_v36  ;;  %3717 = vmatprep.subr.bf16.mxu1 %v3878_v33 }
 0x116   : > { %3679 = vmatpush1.bf16.msra.mxu0 %v3859_v37  ;;  %3719 = vmatpush1.bf16.msra.mxu1 %v3879_v38 }
 0x119   : > { %1729 = vmatmul.mubr.f32.vlgmr.msra.gmra.mrb[36].mxu0 %v4581_v61  ;;  %1830 = vmatmul.mubr.f32.vlgmr.msra.gmra.mrb[36].mxu1 %v4581_v61  ;;  %v4886_v61 = vpop.permute.xlu0 %1011 }
 0x11a   : > { %3287 = vmatprep.mubr.msk.f32.mxu0 %vm1039_vm0, %v4587_v4  ;;  %3293 = vmatprep.mubr.msk.f32.mxu1 %vm1039_vm0, %v4587_v4 }
 0x11d   : > { %1735 = vmatmul.mubr.f32.gmra.mrb[38].mxu0 %v4596_v7  ;;  %1836 = vmatmul.mubr.f32.gmra.mrb[38].mxu1 %v4596_v7 }
 0x11e   : > { %3288 = vmatprep.mubr.msk.f32.mxu0 %vm1039_vm0, %v4605_v15  ;;  %3294 = vmatprep.mubr.msk.f32.mxu1 %vm1039_vm0, %v4605_v15 }
 0x121   : > { %1741 = vmatmul.mubr.f32.gmra.mrb[40].mxu0 %v4613_v18  ;;  %1842 = vmatmul.mubr.f32.gmra.mrb[40].mxu1 %v4613_v18 }
 0x122   : > { %3289 = vmatprep.mubr.msk.f32.mxu0 %vm1039_vm0, %v4622_v26  ;;  %3295 = vmatprep.mubr.msk.f32.mxu1 %vm1039_vm0, %v4622_v26 }
 0x125   : > { %1747 = vmatmul.mubr.f32.gmra.mrb[42].mxu0 %v4630_v29  ;;  %1848 = vmatmul.mubr.f32.gmra.mrb[42].mxu1 %v4630_v29 }
 0x126   : > { %3290 = vmatprep.mubr.msk.f32.mxu0 %vm1039_vm0, %v4639_v39  ;;  %3296 = vmatprep.mubr.msk.f32.mxu1 %vm1039_vm0, %v4639_v39 }
 0x129   : > { %1753 = vmatmul.mubr.f32.gmra.mrb[44].mxu0 %v4647_v42  ;;  %1854 = vmatmul.mubr.f32.gmra.mrb[44].mxu1 %v4647_v42 }
 0x12a   : > { %3291 = vmatprep.mubr.msk.f32.mxu0 %vm1039_vm0, %v4656_v50  ;;  %3297 = vmatprep.mubr.msk.f32.mxu1 %vm1039_vm0, %v4656_v50  ;;  %v4892_v50 = vpop.permute.xlu0 %1016 }
 0x12d   : > { %1759 = vmatmul.mubr.f32.gmra.mrb[46].mxu0 %v4663_v54  ;;  %1860 = vmatmul.mubr.f32.gmra.mrb[46].mxu1 %v4663_v54 }
 0x138   : > { %v4913_v16 = vpop.permute.xlu1 %1021 }
 0x174   : > { %v1124_v4 = vpop.f32.mrb[0].mxu0  ;;  %v1225_v15 = vpop.f32.mrb[0].mxu1 }
 0x175   : > { %v1125_v7 = vadd.f32 %v1124_v4, %v4886_v61  ;;  %v1126_v18 = vpop.f32.mrb[1].mxu0  ;;  %v1226_v26 = vadd.f32 %v1225_v15, %v4886_v61  ;;  %v1227_v39 = vpop.f32.mrb[1].mxu1 }
 0x176   : > { %v1127_v29 = vadd.f32 %v1126_v18, %v4886_v61  ;;  %v1228_v40 = vadd.f32 %v1227_v39, %v4886_v61 }
 0x177   : > { %v1962_v42 = vmul.f32 0.044715, %v1125_v7  ;;  %v1964_v41 = vmul.f32 0.044715, %v1226_v26  ;;  %v4904_v63 = vmul.f32 0.5, %v1125_v7  ;;  %v4915_v17 = vmul.f32 0.5, %v1226_v26 }
 0x178   : > { %v1963_v43 = vmul.f32 0.044715, %v1127_v29  ;;  %v1965_v44 = vmul.f32 0.044715, %v1228_v40  ;;  %v1130_v45 = vpop.f32.mrb[2].mxu0  ;;  %v1231_v46 = vpop.f32.mrb[2].mxu1 }
 0x179   : > { %v2058_v54 = vmul.f32 %v1962_v42, %v1125_v7  ;;  %v2060_v47 = vmul.f32 %v1964_v41, %v1226_v26  ;;  %v4895_v49 = vadd.f32 %v1130_v45, %v4892_v50  ;;  %v4898_v51 = vadd.f32 %v1231_v46, %v4892_v50  ;;  %v1132_v52 = vpop.f32.mrb[3].mxu0  ;;  %v1233_v53 = vpop.f32.mrb[3].mxu1 }
 0x17a   : > { %v2059_v48 = vmul.f32 %v1963_v43, %v1127_v29  ;;  %v2061_v56 = vmul.f32 %v1965_v44, %v1228_v40  ;;  %v4901_v57 = vadd.f32 %v1132_v52, %v4892_v50  ;;  %v4909_v9 = vadd.f32 %v1233_v53, %v4892_v50 }
 0x17b   : > { %v2154_v55 = vmul.f32 %v2058_v54, %v1125_v7  ;;  %v2156_v58 = vmul.f32 %v2060_v47, %v1226_v26  ;;  %v1978_v60 = vmul.f32 0.044715, %v4895_v49  ;;  %v1980_v2 = vmul.f32 0.044715, %v4898_v51 }
 0x17c   : > { %v2155_v59 = vmul.f32 %v2059_v48, %v1127_v29  ;;  %v1136_v62 = vpop.f32.mrb[4].mxu0  ;;  %v2157_v1 = vmul.f32 %v2061_v56, %v1228_v40  ;;  %v1237_v3 = vpop.f32.mrb[4].mxu1  ;;  %v1979_v14 = vmul.f32 0.044715, %v4901_v57  ;;  %v1981_v31 = vmul.f32 0.044715, %v4909_v9 }
 0x17d   : > { %v2250_v0 = vadd.f32 %v2154_v55, %v1125_v7  ;;  %v1138_v5 = vpop.f32.mrb[5].mxu0  ;;  %v2252_v32 = vadd.f32 %v2156_v58, %v1226_v26  ;;  %v2074_v8 = vmul.f32 %v1978_v60, %v4895_v49  ;;  %v1239_v10 = vpop.f32.mrb[5].mxu1  ;;  %v2076_v13 = vmul.f32 %v1980_v2, %v4898_v51 }
 0x17e   : > { %v2251_v6 = vadd.f32 %v2155_v59, %v1127_v29  ;;  %v2253_v12 = vadd.f32 %v2157_v1, %v1228_v40  ;;  %v2075_v25 = vmul.f32 %v1979_v14, %v4901_v57  ;;  %v4927_v34 = vadd.f32 %v1136_v62, %v4913_v16  ;;  %v4966_v56 = vpop.permute.xlu1 %1026 }
 0x17f   : > { %v2346_v11 = vmul.f32 0.7978846, %v2250_v0  ;;  %v2348_v19 = vmul.f32 0.7978846, %v2252_v32  ;;  %v2170_v21 = vmul.f32 %v2074_v8, %v4895_v49  ;;  %v2172_v24 = vmul.f32 %v2076_v13, %v4898_v51 }
 0x180   : > { %v2347_v20 = vmul.f32 0.7978846, %v2251_v6  ;;  %v1142_v22 = vpop.f32.mrb[6].mxu0  ;;  %v2349_v23 = vmul.f32 0.7978846, %v2253_v12  ;;  %v4920_v27 = vpop.f32.mrb[6].mxu1  ;;  %v2171_v33 = vmul.f32 %v2075_v25, %v4901_v57  ;;  %v4934_v37 = vadd.f32 %v1237_v3, %v4913_v16 }
 0x181   : > { %3910 = vtanh.f32 %v2346_v11  ;;  %v4922_v28 = vpop.f32.mrb[7].mxu0  ;;  %v2266_v30 = vadd.f32 %v2170_v21, %v4895_v49  ;;  %v4929_v35 = vpop.f32.mrb[7].mxu1  ;;  %v2268_v36 = vadd.f32 %v2172_v24, %v4898_v51  ;;  %v4936_v38 = vmul.f32 0.5, %v1127_v29 }
 0x182   : > { %3912 = vtanh.f32 %v2348_v19  ;;  %v2077_v7 = vmul.f32 %v1981_v31, %v4909_v9  ;;  %v4941_v18 = vmul.f32 0.5, %v1228_v40  ;;  %v2267_v39 = vadd.f32 %v2171_v33, %v4901_v57 }
 0x183   : > { %3914 = vtanh.f32 %v2347_v20  ;;  %v2362_v4 = vmul.f32 0.7978846, %v2266_v30  ;;  %v2364_v26 = vmul.f32 0.7978846, %v2268_v36  ;;  %v1994_v42 = vmul.f32 0.044715, %v4927_v34 }
 0x184   : > { %3916 = vtanh.f32 %v2349_v23  ;;  %v4939_v15 = vpop.f32.mrb[8].mxu0  ;;  %v4945_v41 = vpop.f32.mrb[8].mxu1  ;;  %v2173_v43 = vmul.f32 %v2077_v7, %v4909_v9  ;;  %v1996_v29 = vmul.f32 0.044715, %v4934_v37  ;;  %v4950_v54 = vadd.f32 %v1138_v5, %v4913_v16 }
 0x185   : > { %3918 = vtanh.f32 %v2362_v4  ;;  %v4952_v44 = vpop.f32.mrb[9].mxu0  ;;  %v4954_v45 = vpop.f32.mrb[9].mxu1  ;;  %v2363_v40 = vmul.f32 0.7978846, %v2267_v39  ;;  %v2090_v46 = vmul.f32 %v1994_v42, %v4927_v34  ;;  %v4958_v47 = vadd.f32 %v1239_v10, %v4913_v16 }
 0x186   : > { %3920 = vtanh.f32 %v2364_v26  ;;  %v4961_v48 = vmul.f32 0.5, %v4895_v49  ;;  %v2269_v52 = vadd.f32 %v2173_v43, %v4909_v9  ;;  %v2092_v53 = vmul.f32 %v1996_v29, %v4934_v37 }
 0x187   : > { %v1995_v55 = vmul.f32 0.044715, %v4950_v54  ;;  %v4971_v59 = vmul.f32 0.5, %v4898_v51  ;;  %3922 = vtanh.f32 %v2363_v40  ;;  %v2186_v60 = vmul.f32 %v2090_v46, %v4927_v34 }
 0x188   : > { %v4968_v58 = vpop.f32.mrb[10].mxu0  ;;  %v1997_v62 = vmul.f32 0.044715, %v4958_v47  ;;  %v4975_v49 = vpop.f32.mrb[10].mxu1  ;;  %v1883_v1 = vmul.f32 0.5, %v4901_v57  ;;  %v2188_v3 = vmul.f32 %v2092_v53, %v4934_v37  ;;  %v4985_v6 = vmul.f32 0.5, %v4909_v9 }
 0x189   : > { %v4977_v0 = vpop.f32.mrb[11].mxu0  ;;  %v2365_v2 = vmul.f32 0.7978846, %v2269_v52  ;;  %v2091_v5 = vmul.f32 %v1995_v55, %v4950_v54  ;;  %v4982_v32 = vpop.f32.mrb[11].mxu1  ;;  %v2282_v8 = vadd.f32 %v2186_v60, %v4927_v34  ;;  %v4990_v11 = vadd.f32 %v1142_v22, %v4966_v56 }
 0x18a   : > { %v2093_v10 = vmul.f32 %v1997_v62, %v4958_v47  ;;  %v2284_v13 = vadd.f32 %v2188_v3, %v4934_v37  ;;  %v5001_v23 = vadd.f32 %v4920_v27, %v4966_v56  ;;  %v1898_v46 = vmul.f32 0.5, %v4927_v34  ;;  %v5016_v52 = vpop.permute.xlu0 %1031 }
 0x18b   : > { %v3911_v51 = vpop.eup %3910  ;;  %3924 = vtanh.f32 %v2365_v2  ;;  %v2187_v14 = vmul.f32 %v2091_v5, %v4950_v54  ;;  %v2378_v9 = vmul.f32 0.7978846, %v2282_v8  ;;  %v2010_v27 = vmul.f32 0.044715, %v4990_v11 }
 0x18c   : > { %v3913_v57 = vpop.eup %3912  ;;  %v2538_v12 = vadd.f32 1.0, %v3911_v51  ;;  %v2189_v21 = vmul.f32 %v2093_v10, %v4958_v47  ;;  %v2380_v30 = vmul.f32 0.7978846, %v2284_v13  ;;  %v1900_v34 = vmul.f32 0.5, %v4934_v37 }
 0x18d   : > { %v3915_v19 = vpop.eup %3914  ;;  %v2540_v20 = vadd.f32 1.0, %v3913_v57  ;;  %v2283_v31 = vadd.f32 %v2187_v14, %v4950_v54  ;;  %3926 = vtanh.f32 %v2378_v9  ;;  %v5031_v51 = vadd.f32 %v4929_v35, %v4966_v56 }
 0x18e   : > { %v3917_v22 = vpop.eup %3916  ;;  %v2634_v24 = vmul.f32 %v2538_v12, %v4904_v63  ;;  %v2539_v25 = vadd.f32 1.0, %v3915_v19  ;;  %v2285_v4 = vadd.f32 %v2189_v21, %v4958_v47  ;;  %3928 = vtanh.f32 %v2380_v30 }
 0x18f   : > { %v2636_v36 = vmul.f32 %v2540_v20, %v4915_v17  ;;  %v2541_v33 = vadd.f32 1.0, %v3917_v22  ;;  %v3919_v7 = vpop.eup %3918  ;;  %v2379_v39 = vmul.f32 0.7978846, %v2283_v31  ;;  %v5012_v17 = vadd.f32 %v4922_v28, %v4966_v56 }
 0x190   : > { %v2635_v26 = vmul.f32 %v2539_v25, %v4936_v38  ;;  %v3921_v42 = vpop.eup %3920  ;;  %v2554_v43 = vadd.f32 1.0, %v3919_v7  ;;  %v2381_v29 = vmul.f32 0.7978846, %v2285_v4  ;;  %v2106_v38 = vmul.f32 %v2010_v27, %v4990_v11 }
 0x191   : > { %v2637_v63 = vmul.f32 %v2541_v33, %v4941_v18  ;;  %3930 = vtanh.f32 %v2379_v39  ;;  %v3923_v53 = vpop.eup %3922  ;;  %v2556_v60 = vadd.f32 1.0, %v3921_v42  ;;  %v2012_v18 = vmul.f32 0.044715, %v5001_v23 }
 0x192   : > { %v3351_v40 = vpack.c.bf16 %v2635_v26, %v2634_v24  ;;  %3932 = vtanh.f32 %v2381_v29  ;;  %v2650_v28 = vmul.f32 %v2554_v43, %v4961_v48  ;;  %v2555_v62 = vadd.f32 1.0, %v3923_v53 }
 0x193   : > { %v3352_v55 = vpack.c.bf16 %v2637_v63, %v2636_v36  ;;  %v2202_v2 = vmul.f32 %v2106_v38, %v4990_v11  ;;  %v2108_v3 = vmul.f32 %v2012_v18, %v5001_v23  ;;  %v2011_v5 = vmul.f32 0.044715, %v5012_v17  ;;  %v5072_v18 = vpop.permute.xlu1 %1036 }
 0x194   : > { %3018 = vst [vmem:[%s5020_s12] sm:$0xff] %v3351_v40  ;;  %v5035_v8 = vadd.f32 %v4939_v15, %v5016_v52  ;;  %v2651_v48 = vmul.f32 %v2555_v62, %v1883_v1  ;;  %v1899_v57 = vmul.f32 0.5, %v4950_v54  ;;  %v1901_v37 = vmul.f32 0.5, %v4958_v47 }
 0x195   : > { %3019 = vst [vmem:[%s5020_s12 + $0x8] sm:$0xff] %v3352_v55  ;;  %v3925_v10 = vpop.eup %3924  ;;  %v2298_v12 = vadd.f32 %v2202_v2, %v4990_v11  ;;  %v2652_v13 = vmul.f32 %v2556_v60, %v4971_v59  ;;  %v2204_v19 = vmul.f32 %v2108_v3, %v5001_v23  ;;  %v2107_v35 = vmul.f32 %v2011_v5, %v5012_v17 }
 0x196   : > { %v2557_v14 = vadd.f32 1.0, %v3925_v10  ;;  %v3359_v20 = vpack.c.bf16 %v2651_v48, %v2650_v28  ;;  %v2013_v15 = vmul.f32 0.044715, %v5031_v51  ;;  %v5046_v1 = vadd.f32 %v4945_v41, %v5016_v52 }
 0x197   : > { %v2394_v9 = vmul.f32 0.7978846, %v2298_v12  ;;  %v3927_v54 = vpop.eup %3926  ;;  %v2300_v21 = vadd.f32 %v2204_v19, %v5001_v23  ;;  %v2203_v59 = vmul.f32 %v2107_v35, %v5012_v17  ;;  %v2026_v22 = vmul.f32 0.044715, %v5035_v8 }
 0x198   : > { %v2653_v47 = vmul.f32 %v2557_v14, %v4985_v6  ;;  %v3929_v24 = vpop.eup %3928  ;;  %3026 = vst [vmem:[%s5020_s12 + $0x40] sm:$0xff] %v3359_v20  ;;  %v2570_v25 = vadd.f32 1.0, %v3927_v54  ;;  %v2109_v30 = vmul.f32 %v2013_v15, %v5031_v51  ;;  %v5056_v41 = vadd.f32 %v4952_v44, %v5016_v52 }
 0x199   : > { %3934 = vtanh.f32 %v2394_v9  ;;  %v2572_v36 = vadd.f32 1.0, %v3929_v24  ;;  %v2396_v6 = vmul.f32 0.7978846, %v2300_v21  ;;  %v2299_v33 = vadd.f32 %v2203_v59, %v5012_v17 }
 0x19a   : > { %v3360_v31 = vpack.c.bf16 %v2653_v47, %v2652_v13  ;;  %v2666_v7 = vmul.f32 %v2570_v25, %v1898_v46  ;;  %v2205_v26 = vmul.f32 %v2109_v30, %v5031_v51  ;;  %v2122_v39 = vmul.f32 %v2026_v22, %v5035_v8 }
 0x19b   : > { %v3931_v4 = vpop.eup %3930  ;;  %v2028_v27 = vmul.f32 0.044715, %v5046_v1  ;;  %v2668_v43 = vmul.f32 %v2572_v36, %v1900_v34  ;;  %3936 = vtanh.f32 %v2396_v6  ;;  %v2395_v29 = vmul.f32 0.7978846, %v2299_v33 }
 0x19c   : > { %v5062_v42 = vpop.f32.mrb[12].mxu0  ;;  %v3933_v63 = vpop.eup %3932  ;;  %3027 = vst [vmem:[%s5020_s12 + $0x48] sm:$0xff] %v3360_v31  ;;  %v2571_v44 = vadd.f32 1.0, %v3931_v4  ;;  %v2301_v46 = vadd.f32 %v2205_v26, %v5031_v51  ;;  %v2218_v55 = vmul.f32 %v2122_v39, %v5035_v8  ;;  %v2027_v34 = vmul.f32 0.044715, %v5056_v41 }
 0x19d   : > { %v5065_v40 = vpop.f32.mrb[12].mxu1  ;;  %v5067_v38 = vpop.f32.mrb[13].mxu0  ;;  %v2573_v53 = vadd.f32 1.0, %v3933_v63  ;;  %v2124_v60 = vmul.f32 %v2028_v27, %v5046_v1  ;;  %3938 = vtanh.f32 %v2395_v29  ;;  %v5084_v14 = vadd.f32 %v4954_v45, %v5016_v52 }
 0x19e   : > { %v5074_v28 = vpop.f32.mrb[13].mxu1  ;;  %v2667_v62 = vmul.f32 %v2571_v44, %v1899_v57  ;;  %v2397_v3 = vmul.f32 0.7978846, %v2301_v46  ;;  %v2314_v5 = vadd.f32 %v2218_v55, %v5035_v8  ;;  %v2123_v13 = vmul.f32 %v2027_v34, %v5056_v41 }
 0x19f   : > { %v2669_v2 = vmul.f32 %v2573_v53, %v1901_v37  ;;  %v2220_v10 = vmul.f32 %v2124_v60, %v5046_v1  ;;  %v5088_v57 = vadd.f32 %v4968_v58, %v5072_v18  ;;  %v1914_v54 = vmul.f32 0.5, %v4990_v11 }
 0x1a0   : > { %v5079_v48 = vpop.f32.mrb[14].mxu0  ;;  %v3367_v12 = vpack.c.bf16 %v2667_v62, %v2666_v7  ;;  %v5090_v37 = vpop.f32.mrb[14].mxu1  ;;  %3940 = vtanh.f32 %v2397_v3  ;;  %v2410_v20 = vmul.f32 0.7978846, %v2314_v5  ;;  %v1916_v45 = vmul.f32 0.5, %v5001_v23 }
 0x1a1   : > { %v5092_v19 = vpop.f32.mrb[15].mxu0  ;;  %v3368_v35 = vpack.c.bf16 %v2669_v2, %v2668_v43  ;;  %v2316_v9 = vadd.f32 %v2220_v10, %v5046_v1  ;;  %v5095_v15 = vpop.f32.mrb[15].mxu1  ;;  %v2219_v47 = vmul.f32 %v2123_v13, %v5056_v41  ;;  %v2029_v58 = vmul.f32 0.044715, %v5084_v14 }
 0x1a2   : > { %3034 = vst [vmem:[%s5020_s12 + $0x80] sm:$0xff] %v3367_v12  ;;  %3942 = vtanh.f32 %v2410_v20  ;;  %v2042_v22 = vmul.f32 0.044715, %v5088_v57  ;;  %v5106_v24 = vadd.f32 %v4975_v49, %v5072_v18  ;;  %v5114_v31 = vadd.f32 %v4977_v0, %v5072_v18 }
 0x1a3   : > { %v3935_v21 = vpop.eup %3934  ;;  %3035 = vst [vmem:[%s5020_s12 + $0x88] sm:$0xff] %v3368_v35  ;;  %v2412_v59 = vmul.f32 0.7978846, %v2316_v9  ;;  %v2315_v11 = vadd.f32 %v2219_v47, %v5056_v41  ;;  %v2125_v23 = vmul.f32 %v2029_v58, %v5084_v14  ;;  %v1915_v33 = vmul.f32 0.5, %v5012_v17 }
 0x1a4   : > { %v5108_v25 = vpop.f32.mrb[16].mxu0  ;;  %v2586_v30 = vadd.f32 1.0, %v3935_v21  ;;  %v5116_v36 = vpop.f32.mrb[16].mxu1  ;;  %v2138_v49 = vmul.f32 %v2042_v22, %v5088_v57  ;;  %v2044_v4 = vmul.f32 0.044715, %v5106_v24  ;;  %v1917_v39 = vmul.f32 0.5, %v5031_v51 }
 0x1a5   : > { %v5118_v6 = vpop.f32.mrb[17].mxu0  ;;  %3944 = vtanh.f32 %v2412_v59  ;;  %v5123_v7 = vpop.f32.mrb[17].mxu1  ;;  %v5127_v27 = vmul.f32 0.5, %v5035_v8  ;;  %v2411_v0 = vmul.f32 0.7978846, %v2315_v11  ;;  %v2221_v63 = vmul.f32 %v2125_v23, %v5084_v14 }
 0x1a6   : > { %v3937_v26 = vpop.eup %3936  ;;  %v2234_v44 = vmul.f32 %v2138_v49, %v5088_v57  ;;  %v2140_v17 = vmul.f32 %v2044_v4, %v5106_v24  ;;  %v2043_v29 = vmul.f32 0.044715, %v5114_v31  ;;  %v2682_v55 = vmul.f32 %v2586_v30, %v1914_v54 }
 0x1a7   : > { %v2588_v43 = vadd.f32 1.0, %v3937_v26  ;;  %v3939_v46 = vpop.eup %3938  ;;  %3946 = vtanh.f32 %v2411_v0  ;;  %v2317_v51 = vadd.f32 %v2221_v63, %v5084_v14  ;;  %v5138_v8 = vadd.f32 %v4982_v32, %v5072_v18 }
 0x1a8   : > { %v5133_v53 = vpop.f32.mrb[18].mxu0  ;;  %v5140_v60 = vpop.f32.mrb[18].mxu1  ;;  %v2587_v34 = vadd.f32 1.0, %v3939_v46  ;;  %v2330_v2 = vadd.f32 %v2234_v44, %v5088_v57  ;;  %v2236_v3 = vmul.f32 %v2140_v17, %v5106_v24  ;;  %v5148_v5 = vadd.f32 %v5062_v42, %v4886_v61 }
 0x1a9   : > { %v5142_v62 = vpop.f32.mrb[19].mxu0  ;;  %v5150_v10 = vpop.f32.mrb[19].mxu1  ;;  %v5153_v12 = vmul.f32 0.5, %v5046_v1  ;;  %v2413_v32 = vmul.f32 0.7978846, %v2317_v51  ;;  %v2139_v13 = vmul.f32 %v2043_v29, %v5114_v31  ;;  %v2684_v9 = vmul.f32 %v2588_v43, %v1916_v45 }
 0x1aa   : > { %v2045_v35 = vmul.f32 0.044715, %v5138_v8  ;;  %v3941_v20 = vpop.eup %3940  ;;  %v2683_v54 = vmul.f32 %v2587_v34, %v1915_v33  ;;  %v2426_v47 = vmul.f32 0.7978846, %v2330_v2  ;;  %v2332_v58 = vadd.f32 %v2236_v3, %v5106_v24 }
 0x1ab   : > { %v2589_v42 = vadd.f32 1.0, %v3941_v20  ;;  %3948 = vtanh.f32 %v2413_v32  ;;  %v2235_v59 = vmul.f32 %v2139_v13, %v5114_v31  ;;  %v1966_v33 = vmul.f32 0.044715, %v5148_v5 }
 0x1ac   : > { %v5158_v21 = vpop.f32.mrb[20].mxu0  ;;  %v2141_v1 = vmul.f32 %v2045_v35, %v5138_v8  ;;  %v5162_v22 = vpop.f32.mrb[20].mxu1  ;;  %v3375_v23 = vpack.c.bf16 %v2683_v54, %v2682_v55  ;;  %3950 = vtanh.f32 %v2426_v47  ;;  %v2428_v45 = vmul.f32 0.7978846, %v2332_v58 }
 0x1ad   : > { %v5164_v30 = vpop.f32.mrb[21].mxu0  ;;  %v3943_v11 = vpop.eup %3942  ;;  %v2685_v4 = vmul.f32 %v2589_v42, %v1917_v39  ;;  %v2331_v0 = vadd.f32 %v2235_v59, %v5114_v31  ;;  %v2062_v44 = vmul.f32 %v1966_v33, %v5148_v5  ;;  %v5175_v17 = vadd.f32 %v5065_v40, %v4886_v61 }
 0x1ae   : > { %v5167_v49 = vpop.f32.mrb[21].mxu1  ;;  %v2602_v26 = vadd.f32 1.0, %v3943_v11  ;;  %v2237_v63 = vmul.f32 %v2141_v1, %v5138_v8  ;;  %3042 = vst [vmem:[%s5020_s12 + $0xc0] sm:$0xff] %v3375_v23  ;;  %3952 = vtanh.f32 %v2428_v45  ;;  %v5179_v29 = vadd.f32 %v5067_v38, %v4886_v61 }
 0x1af   : > { %v3945_v43 = vpop.eup %3944  ;;  %v3376_v46 = vpack.c.bf16 %v2685_v4, %v2684_v9  ;;  %v1931_v55 = vmul.f32 0.5, %v5056_v41  ;;  %v1933_v51 = vmul.f32 0.5, %v5084_v14  ;;  %v2427_v34 = vmul.f32 0.7978846, %v2331_v0 }
 0x1b0   : > { %v5181_v39 = vpop.f32.mrb[22].mxu0  ;;  %v5185_v2 = vpop.f32.mrb[22].mxu1  ;;  %v1946_v32 = vmul.f32 0.5, %v5088_v57  ;;  %v2333_v40 = vadd.f32 %v2237_v63, %v5138_v8  ;;  %v2158_v13 = vmul.f32 %v2062_v44, %v5148_v5  ;;  %v1968_v38 = vmul.f32 0.044715, %v5175_v17 }
 0x1b1   : > { %v5187_v3 = vpop.f32.mrb[23].mxu0  ;;  %v5193_v35 = vpop.f32.mrb[23].mxu1  ;;  %3043 = vst [vmem:[%s5020_s12 + $0xc8] sm:$0xff] %v3376_v46  ;;  %v2698_v41 = vmul.f32 %v2602_v26, %v5127_v27  ;;  %v2604_v14 = vadd.f32 1.0, %v3945_v43  ;;  %3954 = vtanh.f32 %v2427_v34  ;;  %v1967_v9 = vmul.f32 0.044715, %v5179_v29 }
 0x1b2   : > { %v3947_v20 = vpop.eup %3946  ;;  %v2429_v47 = vmul.f32 0.7978846, %v2333_v40  ;;  %v2254_v57 = vadd.f32 %v2158_v13, %v5148_v5  ;;  %v2064_v58 = vmul.f32 %v1968_v38, %v5175_v17  ;;  %v5203_v59 = vadd.f32 %v5074_v28, %v4886_v61 }
 0x1b3   : > { %v2603_v54 = vadd.f32 1.0, %v3947_v20  ;;  %v2063_v42 = vmul.f32 %v1967_v9, %v5179_v29  ;;  %v5207_v1 = vadd.f32 %v5079_v48, %v4892_v50  ;;  %v5211_v27 = vadd.f32 %v5090_v37, %v4892_v50 }
 0x1b4   : > { %3956 = vtanh.f32 %v2429_v47  ;;  %v2350_v23 = vmul.f32 0.7978846, %v2254_v57  ;;  %v2160_v45 = vmul.f32 %v2064_v58, %v5175_v17  ;;  %v2700_v4 = vmul.f32 %v2604_v14, %v5153_v12 }
 0x1b5   : > { %v2699_v11 = vmul.f32 %v2603_v54, %v1931_v55  ;;  %v3949_v33 = vpop.eup %3948  ;;  %v1948_v28 = vmul.f32 0.5, %v5106_v24  ;;  %v2159_v26 = vmul.f32 %v2063_v42, %v5179_v29  ;;  %v1969_v48 = vmul.f32 0.044715, %v5203_v59 }
 0x1b6   : > { %v3951_v0 = vpop.eup %3950  ;;  %v2605_v43 = vadd.f32 1.0, %v3949_v33  ;;  %3958 = vtanh.f32 %v2350_v23  ;;  %v2256_v37 = vadd.f32 %v2160_v45, %v5175_v17  ;;  %v1982_v34 = vmul.f32 0.044715, %v5207_v1 }
 0x1b7   : > { %v3383_v63 = vpack.c.bf16 %v2699_v11, %v2698_v41  ;;  %v2618_v44 = vadd.f32 1.0, %v3951_v0  ;;  %v2255_v46 = vadd.f32 %v2159_v26, %v5179_v29  ;;  %v2065_v55 = vmul.f32 %v1969_v48, %v5203_v59 }
 0x1b8   : > { %v3953_v12 = vpop.eup %3952  ;;  %v2701_v24 = vmul.f32 %v2605_v43, %v1933_v51  ;;  %v1947_v40 = vmul.f32 0.5, %v5114_v31  ;;  %v2352_v13 = vmul.f32 0.7978846, %v2256_v37  ;;  %v1984_v38 = vmul.f32 0.044715, %v5211_v27 }
 0x1b9   : > { %3050 = vst [vmem:[%s5020_s12 + $0x100] sm:$0xff] %v3383_v63  ;;  %v2620_v20 = vadd.f32 1.0, %v3953_v12  ;;  %v1949_v41 = vmul.f32 0.5, %v5138_v8  ;;  %v2351_v14 = vmul.f32 0.7978846, %v2255_v46  ;;  %v2161_v9 = vmul.f32 %v2065_v55, %v5203_v59 }
 0x1ba   : > { %v3384_v54 = vpack.c.bf16 %v2701_v24, %v2700_v4  ;;  %3960 = vtanh.f32 %v2352_v13  ;;  %v2078_v47 = vmul.f32 %v1982_v34, %v5207_v1  ;;  %v2080_v57 = vmul.f32 %v1984_v38, %v5211_v27 }
 0x1bb   : > { %v3955_v58 = vpop.eup %3954  ;;  %v2714_v51 = vmul.f32 %v2618_v44, %v1946_v32  ;;  %3962 = vtanh.f32 %v2351_v14  ;;  %v2257_v31 = vadd.f32 %v2161_v9, %v5203_v59  ;;  %v5232_v42 = vadd.f32 %v5092_v19, %v4892_v50 }
 0x1bc   : > { %3051 = vst [vmem:[%s5020_s12 + $0x108] sm:$0xff] %v3384_v54  ;;  %v2619_v8 = vadd.f32 1.0, %v3955_v58  ;;  %v2174_v11 = vmul.f32 %v2078_v47, %v5207_v1  ;;  %v2176_v23 = vmul.f32 %v2080_v57, %v5211_v27  ;;  %v5239_v45 = vadd.f32 %v5095_v15, %v4892_v50 }
 0x1bd   : > { %v2716_v33 = vmul.f32 %v2620_v20, %v1948_v28  ;;  %v1870_v32 = vmul.f32 0.5, %v5148_v5  ;;  %v2353_v4 = vmul.f32 0.7978846, %v2257_v31  ;;  %v1983_v26 = vmul.f32 0.044715, %v5232_v42 }
 0x1be   : > { %v3957_v48 = vpop.eup %3956  ;;  %v2715_v0 = vmul.f32 %v2619_v8, %v1947_v40  ;;  %v2270_v19 = vadd.f32 %v2174_v11, %v5207_v1  ;;  %v2272_v63 = vadd.f32 %v2176_v23, %v5211_v27  ;;  %v5247_v43 = vadd.f32 %v5108_v25, %v4913_v16 }
 0x1bf   : > { %v2621_v37 = vadd.f32 1.0, %v3957_v48  ;;  %3964 = vtanh.f32 %v2353_v4  ;;  %v2079_v15 = vmul.f32 %v1983_v26, %v5232_v42  ;;  %v1985_v5 = vmul.f32 0.044715, %v5239_v45 }
 0x1c0   : > { %v3959_v28 = vpop.eup %3958  ;;  %v3391_v44 = vpack.c.bf16 %v2715_v0, %v2714_v51  ;;  %v1872_v46 = vmul.f32 0.5, %v5175_v17  ;;  %v2366_v55 = vmul.f32 0.7978846, %v2270_v19  ;;  %v2368_v34 = vmul.f32 0.7978846, %v2272_v63 }
 0x1c1   : > { %v2717_v12 = vmul.f32 %v2621_v37, %v1949_v41  ;;  %v2542_v24 = vadd.f32 1.0, %v3959_v28  ;;  %v2175_v40 = vmul.f32 %v2079_v15, %v5232_v42  ;;  %v2081_v13 = vmul.f32 %v1985_v5, %v5239_v45 }
 0x1c2   : > { %3058 = vst [vmem:[%s5020_s12 + $0x140] sm:$0xff] %v3391_v44  ;;  %3966 = vtanh.f32 %v2366_v55  ;;  %v1998_v25 = vmul.f32 0.044715, %v5247_v43  ;;  %v5258_v38 = vadd.f32 %v5116_v36, %v4913_v16  ;;  %v5262_v17 = vadd.f32 %v5118_v6, %v4913_v16 }
 0x1c3   : > { %v3392_v41 = vpack.c.bf16 %v2717_v12, %v2716_v33  ;;  %v1871_v14 = vmul.f32 0.5, %v5179_v29  ;;  %3968 = vtanh.f32 %v2368_v34  ;;  %v2271_v9 = vadd.f32 %v2175_v40, %v5232_v42 }
 0x1c4   : > { %v5264_v20 = vpop.f32.mrb[24].mxu0  ;;  %v5268_v54 = vpop.f32.mrb[24].mxu1  ;;  %v1873_v36 = vmul.f32 0.5, %v5203_v59  ;;  %v2177_v58 = vmul.f32 %v2081_v13, %v5239_v45  ;;  %v2094_v6 = vmul.f32 %v1998_v25, %v5247_v43  ;;  %v2000_v51 = vmul.f32 0.044715, %v5258_v38 }
 0x1c5   : > { %v5270_v47 = vpop.f32.mrb[25].mxu0  ;;  %v3961_v57 = vpop.eup %3960  ;;  %3059 = vst [vmem:[%s5020_s12 + $0x148] sm:$0xff] %v3392_v41  ;;  %v2638_v29 = vmul.f32 %v2542_v24, %v1870_v32  ;;  %v2367_v23 = vmul.f32 0.7978846, %v2271_v9  ;;  %v1999_v33 = vmul.f32 0.044715, %v5262_v17  ;;  %v5289_v32 = vadd.f32 %v5123_v7, %v4913_v16 }
 0x1c6   : > { %v5276_v31 = vpop.f32.mrb[25].mxu1  ;;  %v3963_v8 = vpop.eup %3962  ;;  %v2544_v11 = vadd.f32 1.0, %v3961_v57  ;;  %v2273_v26 = vadd.f32 %v2177_v58, %v5239_v45  ;;  %v2190_v59 = vmul.f32 %v2094_v6, %v5247_v43  ;;  %v2096_v48 = vmul.f32 %v2000_v51, %v5258_v38 }
 0x1c7   : > { %v2543_v4 = vadd.f32 1.0, %v3963_v8  ;;  %v1886_v19 = vmul.f32 0.5, %v5207_v1  ;;  %3970 = vtanh.f32 %v2367_v23  ;;  %v2095_v63 = vmul.f32 %v1999_v33, %v5262_v17 }
 0x1c8   : > { %v5283_v0 = vpop.f32.mrb[26].mxu0  ;;  %v5291_v37 = vpop.f32.mrb[26].mxu1  ;;  %v2369_v28 = vmul.f32 0.7978846, %v2273_v26  ;;  %v2286_v44 = vadd.f32 %v2190_v59, %v5247_v43  ;;  %v2192_v55 = vmul.f32 %v2096_v48, %v5258_v38  ;;  %v2640_v12 = vmul.f32 %v2544_v11, %v1872_v46 }
 0x1c9   : > { %v5293_v15 = vpop.f32.mrb[27].mxu0  ;;  %v2639_v5 = vmul.f32 %v2543_v4, %v1871_v14  ;;  %v5297_v34 = vpop.f32.mrb[27].mxu1  ;;  %v2191_v24 = vmul.f32 %v2095_v63, %v5262_v17  ;;  %v2001_v7 = vmul.f32 0.044715, %v5289_v32  ;;  %v5303_v40 = vadd.f32 %v5133_v53, %v4966_v56 }
 0x1ca   : > { %v3965_v1 = vpop.eup %3964  ;;  %3972 = vtanh.f32 %v2369_v28  ;;  %v2382_v41 = vmul.f32 0.7978846, %v2286_v44  ;;  %v1888_v9 = vmul.f32 0.5, %v5211_v27  ;;  %v2288_v57 = vadd.f32 %v2192_v55, %v5258_v38 }
 0x1cb   : > { %v3353_v13 = vpack.c.bf16 %v2639_v5, %v2638_v29  ;;  %v2545_v25 = vadd.f32 1.0, %v3965_v1  ;;  %v2287_v46 = vadd.f32 %v2191_v24, %v5262_v17  ;;  %v2097_v58 = vmul.f32 %v2001_v7, %v5289_v32 }
 0x1cc   : > { %v5305_v14 = vpop.f32.mrb[28].mxu0  ;;  %v5311_v6 = vpop.f32.mrb[28].mxu1  ;;  %3974 = vtanh.f32 %v2382_v41  ;;  %v2014_v29 = vmul.f32 0.044715, %v5303_v40  ;;  %v5319_v11 = vadd.f32 %v5140_v60, %v4966_v56  ;;  %v1887_v33 = vmul.f32 0.5, %v5232_v42 }
 0x1cd   : > { %v5313_v51 = vpop.f32.mrb[29].mxu0  ;;  %v3967_v53 = vpop.eup %3966  ;;  %3020 = vst [vmem:[%s5020_s12 + $0x10] sm:$0xff] %v3353_v13  ;;  %v2641_v8 = vmul.f32 %v2545_v25, %v1873_v36  ;;  %v2384_v4 = vmul.f32 0.7978846, %v2288_v57  ;;  %v2383_v26 = vmul.f32 0.7978846, %v2287_v46  ;;  %v2193_v59 = vmul.f32 %v2097_v58, %v5289_v32 }
 0x1ce   : > { %v5321_v27 = vpop.f32.mrb[29].mxu1  ;;  %v3969_v23 = vpop.eup %3968  ;;  %v2558_v63 = vadd.f32 1.0, %v3967_v53  ;;  %v1889_v36 = vmul.f32 0.5, %v5239_v45  ;;  %v2110_v5 = vmul.f32 %v2014_v29, %v5303_v40  ;;  %v1902_v60 = vmul.f32 0.5, %v5247_v43 }
 0x1cf   : > { %v3354_v48 = vpack.c.bf16 %v2641_v8, %v2640_v12  ;;  %3976 = vtanh.f32 %v2384_v4  ;;  %v2289_v44 = vadd.f32 %v2193_v59, %v5289_v32  ;;  %v2016_v55 = vmul.f32 0.044715, %v5319_v11 }
 0x1d0   : > { %v5327_v28 = vpop.f32.mrb[30].mxu0  ;;  %v5332_v42 = vpop.f32.mrb[30].mxu1  ;;  %v2560_v12 = vadd.f32 1.0, %v3969_v23  ;;  %3978 = vtanh.f32 %v2383_v26  ;;  %v2206_v45 = vmul.f32 %v2110_v5, %v5303_v40  ;;  %v5340_v24 = vadd.f32 %v5142_v62, %v4966_v56 }
 0x1d1   : > { %v5334_v1 = vpop.f32.mrb[31].mxu0  ;;  %3021 = vst [vmem:[%s5020_s12 + $0x18] sm:$0xff] %v3354_v48  ;;  %v5342_v7 = vpop.f32.mrb[31].mxu1  ;;  %v2385_v13 = vmul.f32 0.7978846, %v2289_v44  ;;  %v2112_v25 = vmul.f32 %v2016_v55, %v5319_v11  ;;  %v5347_v41 = vadd.f32 %v5150_v10, %v4966_v56  ;;  %v5351_v57 = vadd.f32 %v5158_v21, %v5016_v52 }
 0x1d2   : > { %v3971_v43 = vpop.eup %3970  ;;  %v2654_v46 = vmul.f32 %v2558_v63, %v1886_v19  ;;  %v2302_v53 = vadd.f32 %v2206_v45, %v5303_v40  ;;  %v2015_v62 = vmul.f32 0.044715, %v5340_v24  ;;  %v1904_v29 = vmul.f32 0.5, %v5258_v38 }
 0x1d3   : > { %v2559_v58 = vadd.f32 1.0, %v3971_v43  ;;  %3980 = vtanh.f32 %v2385_v13  ;;  %v2208_v23 = vmul.f32 %v2112_v25, %v5319_v11  ;;  %v2017_v10 = vmul.f32 0.044715, %v5347_v41 }
 0x1d4   : > { %v5355_v8 = vpop.f32.mrb[32].mxu0  ;;  %v5360_v4 = vpop.f32.mrb[32].mxu1  ;;  %v2656_v19 = vmul.f32 %v2560_v12, %v1888_v9  ;;  %v2398_v48 = vmul.f32 0.7978846, %v2302_v53  ;;  %v2111_v63 = vmul.f32 %v2015_v62, %v5340_v24  ;;  %v2030_v45 = vmul.f32 0.044715, %v5351_v57 }
 0x1d5   : > { %v5362_v26 = vpop.f32.mrb[33].mxu0  ;;  %v3973_v21 = vpop.eup %3972  ;;  %v2655_v59 = vmul.f32 %v2559_v58, %v1887_v33  ;;  %v2304_v38 = vadd.f32 %v2208_v23, %v5319_v11  ;;  %v2113_v55 = vmul.f32 %v2017_v10, %v5347_v41  ;;  %v5373_v9 = vadd.f32 %v5162_v22, %v5016_v52 }
 0x1d6   : > { %v5365_v5 = vpop.f32.mrb[33].mxu1  ;;  %v2561_v44 = vadd.f32 1.0, %v3973_v21  ;;  %v3975_v43 = vpop.eup %3974  ;;  %3982 = vtanh.f32 %v2398_v48  ;;  %v2207_v25 = vmul.f32 %v2111_v63, %v5340_v24  ;;  %v2126_v22 = vmul.f32 %v2030_v45, %v5351_v57 }
 0x1d7   : > { %v3361_v13 = vpack.c.bf16 %v2655_v59, %v2654_v46  ;;  %v2574_v58 = vadd.f32 1.0, %v3975_v43  ;;  %v2400_v53 = vmul.f32 0.7978846, %v2304_v38  ;;  %v2209_v62 = vmul.f32 %v2113_v55, %v5347_v41 }
 0x1d8   : > { %v5375_v33 = vpop.f32.mrb[34].mxu0  ;;  %v2657_v12 = vmul.f32 %v2561_v44, %v1889_v36  ;;  %v5378_v23 = vpop.f32.mrb[34].mxu1  ;;  %v1903_v46 = vmul.f32 0.5, %v5262_v17  ;;  %v2303_v21 = vadd.f32 %v2207_v25, %v5340_v24  ;;  %v2032_v59 = vmul.f32 0.044715, %v5373_v9 }
 0x1d9   : > { %6084 = vst [vmem:[#allocation4_spill] sm:$0xff] %v5378_v23  ;;  %v5380_v10 = vpop.f32.mrb[35].mxu0  ;;  %3028 = vst [vmem:[%s5020_s12 + $0x50] sm:$0xff] %v3361_v13  ;;  %v5387_v48 = vpop.f32.mrb[35].mxu1  ;;  %v2670_v44 = vmul.f32 %v2574_v58, %v1902_v60  ;;  %3984 = vtanh.f32 %v2400_v53  ;;  %v2305_v38 = vadd.f32 %v2209_v62, %v5347_v41  ;;  %v5395_v23 = vadd.f32 %v5164_v30, %v5016_v52 }
 0x1da   : > { %6085 = vst [vmem:[#allocation5_spill] sm:$0xff] %v5380_v10  ;;  %v3977_v36 = vpop.eup %3976  ;;  %v3362_v63 = vpack.c.bf16 %v2657_v12, %v2656_v19  ;;  %v2399_v13 = vmul.f32 0.7978846, %v2303_v21  ;;  %v2222_v10 = vmul.f32 %v2126_v22, %v5351_v57  ;;  %v2128_v17 = vmul.f32 %v2032_v59, %v5373_v9 }
 0x1db   : > { %v3979_v55 = vpop.eup %3978  ;;  %v2576_v43 = vadd.f32 1.0, %v3977_v36  ;;  %v2401_v45 = vmul.f32 0.7978846, %v2305_v38  ;;  %v5399_v60 = vadd.f32 %v5167_v49, %v5016_v52  ;;  %v1905_v19 = vmul.f32 0.5, %v5289_v32 }
 0x1dc   : > { %3029 = vst [vmem:[%s5020_s12 + $0x58] sm:$0xff] %v3362_v63  ;;  %v2575_v25 = vadd.f32 1.0, %v3979_v55  ;;  %3986 = vtanh.f32 %v2399_v13  ;;  %v2318_v12 = vadd.f32 %v2222_v10, %v5351_v57  ;;  %v2224_v58 = vmul.f32 %v2128_v17, %v5373_v9 }
 0x1dd   : > { %v3981_v53 = vpop.eup %3980  ;;  %v1918_v21 = vmul.f32 0.5, %v5303_v40  ;;  %3988 = vtanh.f32 %v2401_v45  ;;  %v2031_v30 = vmul.f32 0.044715, %v5395_v23  ;;  %v2672_v22 = vmul.f32 %v2576_v43, %v1904_v29 }
 0x1de   : > { %v2671_v62 = vmul.f32 %v2575_v25, %v1903_v46  ;;  %v2577_v59 = vadd.f32 1.0, %v3981_v53  ;;  %v2414_v36 = vmul.f32 0.7978846, %v2318_v12  ;;  %v2320_v49 = vadd.f32 %v2224_v58, %v5373_v9 }
 0x1df   : > { %v2127_v32 = vmul.f32 %v2031_v30, %v5395_v23  ;;  %v2033_v10 = vmul.f32 0.044715, %v5399_v60  ;;  %v5411_v38 = vadd.f32 %v5181_v39, %v5072_v18  ;;  %v5415_v29 = vadd.f32 %v5185_v2, %v5072_v18 }
 0x1e0   : > { %v3369_v63 = vpack.c.bf16 %v2671_v62, %v2670_v44  ;;  %v3983_v46 = vpop.eup %3982  ;;  %v2673_v40 = vmul.f32 %v2577_v59, %v1905_v19  ;;  %3990 = vtanh.f32 %v2414_v36  ;;  %v2416_v55 = vmul.f32 0.7978846, %v2320_v49 }
 0x1e1   : > { %v1920_v44 = vmul.f32 0.5, %v5319_v11  ;;  %v1919_v43 = vmul.f32 0.5, %v5340_v24  ;;  %v2223_v13 = vmul.f32 %v2127_v32, %v5395_v23  ;;  %v2129_v17 = vmul.f32 %v2033_v10, %v5399_v60 }
 0x1e2   : > { %3036 = vst [vmem:[%s5020_s12 + $0x90] sm:$0xff] %v3369_v63  ;;  %v3370_v39 = vpack.c.bf16 %v2673_v40, %v2672_v22  ;;  %v2590_v25 = vadd.f32 1.0, %v3983_v46  ;;  %3992 = vtanh.f32 %v2416_v55  ;;  %v2046_v45 = vmul.f32 0.044715, %v5411_v38 }
 0x1e3   : > { %v3985_v19 = vpop.eup %3984  ;;  %v1921_v12 = vmul.f32 0.5, %v5347_v41  ;;  %v2319_v2 = vadd.f32 %v2223_v13, %v5395_v23  ;;  %v2225_v58 = vmul.f32 %v2129_v17, %v5399_v60  ;;  %v2048_v11 = vmul.f32 0.044715, %v5415_v29 }
 0x1e4   : > { %3037 = vst [vmem:[%s5020_s12 + $0x98] sm:$0xff] %v3370_v39  ;;  %v2592_v24 = vadd.f32 1.0, %v3985_v19  ;;  %v5429_v53 = vmul.f32 0.5, %v5351_v57  ;;  %v2142_v62 = vmul.f32 %v2046_v45, %v5411_v38  ;;  %v5434_v30 = vadd.f32 %v5187_v3, %v5072_v18 }
 0x1e5   : > { %v2415_v22 = vmul.f32 0.7978846, %v2319_v2  ;;  %v2321_v41 = vadd.f32 %v2225_v58, %v5399_v60  ;;  %v2144_v59 = vmul.f32 %v2048_v11, %v5415_v29  ;;  %v5440_v36 = vadd.f32 %v5193_v35, %v5072_v18 }
 0x1e6   : > { %v3987_v49 = vpop.eup %3986  ;;  %v2686_v63 = vmul.f32 %v2590_v25, %v1918_v21  ;;  %v2238_v57 = vmul.f32 %v2142_v62, %v5411_v38  ;;  %v2047_v32 = vmul.f32 0.044715, %v5434_v30  ;;  %v5446_v10 = vadd.f32 %v5264_v20, %v4886_v61 }
 0x1e7   : > { %v3989_v3 = vpop.eup %3988  ;;  %v2591_v46 = vadd.f32 1.0, %v3987_v49  ;;  %3994 = vtanh.f32 %v2415_v22  ;;  %v2417_v40 = vmul.f32 0.7978846, %v2321_v41  ;;  %v2240_v55 = vmul.f32 %v2144_v59, %v5415_v29 }
 0x1e8   : > { %v2688_v13 = vmul.f32 %v2592_v24, %v1920_v44  ;;  %v2593_v17 = vadd.f32 1.0, %v3989_v3  ;;  %v2334_v35 = vadd.f32 %v2238_v57, %v5411_v38  ;;  %v2143_v21 = vmul.f32 %v2047_v32, %v5434_v30 }
 0x1e9   : > { %v2687_v39 = vmul.f32 %v2591_v46, %v1919_v43  ;;  %3996 = vtanh.f32 %v2417_v40  ;;  %v2336_v25 = vadd.f32 %v2240_v55, %v5415_v29  ;;  %v2049_v45 = vmul.f32 0.044715, %v5440_v36 }
 0x1ea   : > { %v3991_v20 = vpop.eup %3990  ;;  %v2689_v19 = vmul.f32 %v2593_v17, %v1921_v12  ;;  %v1936_v2 = vmul.f32 0.5, %v5373_v9  ;;  %v2430_v58 = vmul.f32 0.7978846, %v2334_v35  ;;  %v2239_v11 = vmul.f32 %v2143_v21, %v5434_v30 }
 0x1eb   : > { %v3377_v24 = vpack.c.bf16 %v2687_v39, %v2686_v63  ;;  %v1935_v62 = vmul.f32 0.5, %v5395_v23  ;;  %v2432_v43 = vmul.f32 0.7978846, %v2336_v25  ;;  %v2145_v22 = vmul.f32 %v2049_v45, %v5440_v36 }
 0x1ec   : > { %v5455_v44 = vpop.f32.mrb[36].mxu0  ;;  %v5459_v41 = vpop.f32.mrb[36].mxu1  ;;  %v3378_v49 = vpack.c.bf16 %v2689_v19, %v2688_v13  ;;  %3998 = vtanh.f32 %v2430_v58  ;;  %v2335_v9 = vadd.f32 %v2239_v11, %v5434_v30  ;;  %v1970_v57 = vmul.f32 0.044715, %v5446_v10 }
 0x1ed   : > { %v5461_v59 = vpop.f32.mrb[37].mxu0  ;;  %v3993_v12 = vpop.eup %3992  ;;  %3044 = vst [vmem:[%s5020_s12 + $0xd0] sm:$0xff] %v3377_v24  ;;  %v2606_v63 = vadd.f32 1.0, %v3991_v20  ;;  %v1937_v23 = vmul.f32 0.5, %v5399_v60  ;;  %4000 = vtanh.f32 %v2432_v43  ;;  %v2241_v3 = vmul.f32 %v2145_v22, %v5440_v36 }
 0x1ee   : > { %v5465_v32 = vpop.f32.mrb[37].mxu1  ;;  %3045 = vst [vmem:[%s5020_s12 + $0xd8] sm:$0xff] %v3378_v49  ;;  %v2431_v46 = vmul.f32 0.7978846, %v2335_v9  ;;  %v2066_v40 = vmul.f32 %v1970_v57, %v5446_v10  ;;  %v5474_v55 = vadd.f32 %v5268_v54, %v4886_v61  ;;  %v5478_v13 = vadd.f32 %v5270_v47, %v4886_v61 }
 0x1ef   : > { %v2608_v35 = vadd.f32 1.0, %v3993_v12  ;;  %v2337_v60 = vadd.f32 %v2241_v3, %v5440_v36  ;;  %v5485_v21 = vadd.f32 %v5276_v31, %v4886_v61  ;;  %v5489_v39 = vadd.f32 %v5283_v0, %v4892_v50 }
 0x1f0   : > { %v5480_v17 = vpop.f32.mrb[38].mxu0  ;;  %v5491_v25 = vpop.f32.mrb[38].mxu1  ;;  %v1950_v47 = vmul.f32 0.5, %v5411_v38  ;;  %4002 = vtanh.f32 %v2431_v46  ;;  %v2162_v45 = vmul.f32 %v2066_v40, %v5446_v10  ;;  %v1972_v20 = vmul.f32 0.044715, %v5474_v55 }
 0x1f1   : > { %v5493_v54 = vpop.f32.mrb[39].mxu0  ;;  %v5498_v19 = vpop.f32.mrb[39].mxu1  ;;  %v2702_v31 = vmul.f32 %v2606_v63, %v5429_v53  ;;  %v5502_v11 = vmul.f32 0.5, %v5415_v29  ;;  %v2433_v0 = vmul.f32 0.7978846, %v2337_v60  ;;  %v2704_v57 = vmul.f32 %v2608_v35, %v1936_v2 }
 0x1f2   : > { %v3995_v58 = vpop.eup %3994  ;;  %v1971_v24 = vmul.f32 0.044715, %v5478_v13  ;;  %v2258_v22 = vadd.f32 %v2162_v45, %v5446_v10  ;;  %v2068_v38 = vmul.f32 %v1972_v20, %v5474_v55  ;;  %v1973_v12 = vmul.f32 0.044715, %v5485_v21 }
 0x1f3   : > { %v2607_v43 = vadd.f32 1.0, %v3995_v58  ;;  %v3997_v9 = vpop.eup %3996  ;;  %4004 = vtanh.f32 %v2433_v0  ;;  %v1986_v29 = vmul.f32 0.044715, %v5489_v39  ;;  %v5524_v0 = vadd.f32 %v5291_v37, %v4892_v50 }
 0x1f4   : > { %v5508_v49 = vpop.f32.mrb[40].mxu0  ;;  %v2067_v53 = vmul.f32 %v1971_v24, %v5478_v13  ;;  %v5512_v63 = vpop.f32.mrb[40].mxu1  ;;  %v2609_v40 = vadd.f32 1.0, %v3997_v9  ;;  %v2354_v60 = vmul.f32 0.7978846, %v2258_v22  ;;  %v2164_v45 = vmul.f32 %v2068_v38, %v5474_v55 }
 0x1f5   : > { %v5514_v3 = vpop.f32.mrb[41].mxu0  ;;  %v2703_v46 = vmul.f32 %v2607_v43, %v1935_v62  ;;  %v5517_v20 = vpop.f32.mrb[41].mxu1  ;;  %v2069_v2 = vmul.f32 %v1973_v12, %v5485_v21  ;;  %v2082_v35 = vmul.f32 %v1986_v29, %v5489_v39 }
 0x1f6   : > { %6086 = vst [vmem:[#allocation6_spill] sm:$0xff] %v5514_v3  ;;  %6087 = vst [vmem:[#allocation7_spill] sm:$0xff] %v5517_v20  ;;  %v2163_v58 = vmul.f32 %v2067_v53, %v5478_v13  ;;  %v3999_v24 = vpop.eup %3998  ;;  %v2705_v62 = vmul.f32 %v2609_v40, %v1937_v23  ;;  %4006 = vtanh.f32 %v2354_v60  ;;  %v2260_v43 = vadd.f32 %v2164_v45, %v5474_v55 }
 0x1f7   : > { %v3385_v3 = vpack.c.bf16 %v2703_v46, %v2702_v31  ;;  %v4001_v38 = vpop.eup %4000  ;;  %v2622_v9 = vadd.f32 1.0, %v3999_v24  ;;  %v2165_v12 = vmul.f32 %v2069_v2, %v5485_v21  ;;  %v2178_v29 = vmul.f32 %v2082_v35, %v5489_v39 }
 0x1f8   : > { %v5527_v22 = vpop.f32.mrb[42].mxu0  ;;  %v2259_v53 = vadd.f32 %v2163_v58, %v5478_v13  ;;  %v5532_v20 = vpop.f32.mrb[42].mxu1  ;;  %v3386_v23 = vpack.c.bf16 %v2705_v62, %v2704_v57  ;;  %v1951_v31 = vmul.f32 0.5, %v5434_v30  ;;  %v1953_v46 = vmul.f32 0.5, %v5440_v36 }
 0x1f9   : > { %6088 = vst [vmem:[#allocation8_spill] sm:$0xff] %v5532_v20  ;;  %v5534_v37 = vpop.f32.mrb[43].mxu0  ;;  %3052 = vst [vmem:[%s5020_s12 + $0x110] sm:$0xff] %v3385_v3  ;;  %v2356_v40 = vmul.f32 0.7978846, %v2260_v43  ;;  %v5539_v60 = vpop.f32.mrb[43].mxu1  ;;  %v2261_v24 = vadd.f32 %v2165_v12, %v5485_v21  ;;  %v2274_v2 = vadd.f32 %v2178_v29, %v5489_v39  ;;  %v2718_v20 = vmul.f32 %v2622_v9, %v1950_v47 }
 0x1fa   : > { %v2624_v45 = vadd.f32 1.0, %v4001_v38  ;;  %v2355_v58 = vmul.f32 0.7978846, %v2259_v53  ;;  %v4003_v35 = vpop.eup %4002  ;;  %3053 = vst [vmem:[%s5020_s12 + $0x118] sm:$0xff] %v3386_v23  ;;  %v1988_v3 = vmul.f32 0.044715, %v5524_v0  ;;  %v5547_v30 = vadd.f32 %v5293_v15, %v4892_v50 }
 0x1fb   : > { %4008 = vtanh.f32 %v2356_v40  ;;  %v2623_v57 = vadd.f32 1.0, %v4003_v35  ;;  %v2357_v62 = vmul.f32 0.7978846, %v2261_v24  ;;  %v2370_v43 = vmul.f32 0.7978846, %v2274_v2 }
 0x1fc   : > { %v5549_v36 = vpop.f32.mrb[44].mxu0  ;;  %4010 = vtanh.f32 %v2355_v58  ;;  %v5551_v38 = vpop.f32.mrb[44].mxu1  ;;  %v1874_v53 = vmul.f32 0.5, %v5446_v10  ;;  %v2084_v12 = vmul.f32 %v1988_v3, %v5524_v0  ;;  %v1987_v47 = vmul.f32 0.044715, %v5547_v30 }
 0x1fd   : > { %v5558_v9 = vadd.f32 %v5297_v34, %v4892_v50  ;;  %v5560_v15 = vpop.f32.mrb[45].mxu0  ;;  %v5562_v29 = vpop.f32.mrb[45].mxu1  ;;  %v2719_v40 = vmul.f32 %v2623_v57, %v1951_v31  ;;  %4012 = vtanh.f32 %v2357_v62  ;;  %v5566_v58 = vadd.f32 %v5305_v14, %v4913_v16 }
 0x1fe   : > { %6089 = vst [vmem:[#allocation9_spill] sm:$0xff] %v5562_v29  ;;  %v4005_v23 = vpop.eup %4004  ;;  %v5570_v10 = vadd.f32 %v5311_v6, %v4913_v16  ;;  %v2720_v24 = vmul.f32 %v2624_v45, %v5502_v11  ;;  %v2180_v34 = vmul.f32 %v2084_v12, %v5524_v0  ;;  %v2083_v35 = vmul.f32 %v1987_v47, %v5547_v30 }
 0x1ff   : > { %v2625_v2 = vadd.f32 1.0, %v4005_v23  ;;  %v3393_v31 = vpack.c.bf16 %v2719_v40, %v2718_v20  ;;  %v1876_v57 = vmul.f32 0.5, %v5474_v55  ;;  %4014 = vtanh.f32 %v2370_v43 }
 0x200   : > { %v5575_v3 = vpop.f32.mrb[46].mxu0  ;;  %v1989_v14 = vmul.f32 0.044715, %v5558_v9  ;;  %v5579_v62 = vpop.f32.mrb[46].mxu1  ;;  %v2276_v45 = vadd.f32 %v2180_v34, %v5524_v0  ;;  %v2179_v12 = vmul.f32 %v2083_v35, %v5547_v30  ;;  %v2002_v47 = vmul.f32 0.044715, %v5566_v58 }
 0x201   : > { %6090 = vst [vmem:[#allocation10_spill] sm:$0xff] %v5575_v3  ;;  %6091 = vst [vmem:[#allocation11_spill] sm:$0xff] %v5579_v62  ;;  %v5581_v6 = vpop.f32.mrb[47].mxu0  ;;  %v4007_v29 = vpop.eup %4006  ;;  %v2721_v11 = vmul.f32 %v2625_v2, %v1953_v46  ;;  %v1875_v20 = vmul.f32 0.5, %v5478_v13  ;;  %v2004_v40 = vmul.f32 0.044715, %v5570_v10 }
 0x202   : > { %6092 = vst [vmem:[#allocation12_spill] sm:$0xff] %v5581_v6  ;;  %v5586_v23 = vpop.f32.mrb[47].mxu1  ;;  %3060 = vst [vmem:[%s5020_s12 + $0x150] sm:$0xff] %v3393_v31  ;;  %v2546_v55 = vadd.f32 1.0, %v4007_v29  ;;  %v2085_v43 = vmul.f32 %v1989_v14, %v5558_v9  ;;  %v2372_v62 = vmul.f32 0.7978846, %v2276_v45  ;;  %v2275_v46 = vadd.f32 %v2179_v12, %v5547_v30 }
 0x203   : > { %6093 = vst [vmem:[#allocation13_spill] sm:$0xff] %v5586_v23  ;;  %v3394_v6 = vpack.c.bf16 %v2721_v11, %v2720_v24  ;;  %v2098_v2 = vmul.f32 %v2002_v47, %v5566_v58  ;;  %v1877_v34 = vmul.f32 0.5, %v5485_v21  ;;  %v2100_v23 = vmul.f32 %v2004_v40, %v5570_v10 }
 0x204   : > { %v2181_v35 = vmul.f32 %v2085_v43, %v5558_v9  ;;  %v5599_v29 = vadd.f32 %v5313_v51, %v4913_v16  ;;  %v2642_v31 = vmul.f32 %v2546_v55, %v1874_v53  ;;  %4016 = vtanh.f32 %v2372_v62 }
 0x205   : > { %v4009_v13 = vpop.eup %4008  ;;  %3061 = vst [vmem:[%s5020_s12 + $0x158] sm:$0xff] %v3394_v6  ;;  %v2371_v24 = vmul.f32 0.7978846, %v2275_v46  ;;  %v2194_v14 = vmul.f32 %v2098_v2, %v5566_v58  ;;  %v2196_v21 = vmul.f32 %v2100_v23, %v5570_v10  ;;  %v5607_v47 = vadd.f32 %v5321_v27, %v4913_v16 }
 0x206   : > { %v4011_v11 = vpop.eup %4010  ;;  %v2548_v45 = vadd.f32 1.0, %v4009_v13  ;;  %v2277_v12 = vadd.f32 %v2181_v35, %v5558_v9  ;;  %v2003_v53 = vmul.f32 0.044715, %v5599_v29  ;;  %v1890_v55 = vmul.f32 0.5, %v5489_v39 }
 0x207   : > { %v2547_v43 = vadd.f32 1.0, %v4011_v11  ;;  %4018 = vtanh.f32 %v2371_v24  ;;  %v2290_v51 = vadd.f32 %v2194_v14, %v5566_v58  ;;  %v4013_v62 = vpop.eup %4012  ;;  %v2292_v46 = vadd.f32 %v2196_v21, %v5570_v10 }
 0x208   : > { %v2644_v6 = vmul.f32 %v2548_v45, %v1876_v57  ;;  %v2373_v40 = vmul.f32 0.7978846, %v2277_v12  ;;  %v2549_v35 = vadd.f32 1.0, %v4013_v62  ;;  %v2099_v27 = vmul.f32 %v2003_v53, %v5599_v29 }
 0x209   : > { %v2643_v2 = vmul.f32 %v2547_v43, %v1875_v20  ;;  %v2386_v23 = vmul.f32 0.7978846, %v2290_v51  ;;  %v4015_v13 = vpop.eup %4014  ;;  %v1892_v24 = vmul.f32 0.5, %v5524_v0  ;;  %v2388_v14 = vmul.f32 0.7978846, %v2292_v46 }
 0x20a   : > { %4020 = vtanh.f32 %v2373_v40  ;;  %v2005_v11 = vmul.f32 0.044715, %v5607_v47  ;;  %v2645_v57 = vmul.f32 %v2549_v35, %v1877_v34  ;;  %v2195_v39 = vmul.f32 %v2099_v27, %v5599_v29 }
 0x20b   : > { %v3355_v3 = vpack.c.bf16 %v2643_v2, %v2642_v31  ;;  %4022 = vtanh.f32 %v2386_v23  ;;  %v1891_v20 = vmul.f32 0.5, %v5547_v30  ;;  %v5621_v12 = vadd.f32 %v5327_v28, %v4966_v56 }
 0x20c   : > { %4024 = vtanh.f32 %v2388_v14  ;;  %v2101_v45 = vmul.f32 %v2005_v11, %v5607_v47  ;;  %v3356_v0 = vpack.c.bf16 %v2645_v57, %v2644_v6  ;;  %v2291_v21 = vadd.f32 %v2195_v39, %v5599_v29 }
 0x20d   : > { %3022 = vst [vmem:[%s5020_s12 + $0x20] sm:$0xff] %v3355_v3  ;;  %v5627_v34 = vadd.f32 %v5332_v42, %v4966_v56  ;;  %v5631_v31 = vadd.f32 %v5334_v1, %v4966_v56  ;;  %v2562_v30 = vadd.f32 1.0, %v4015_v13  ;;  %v2018_v51 = vmul.f32 0.044715, %v5621_v12 }
 0x20e   : > { %v2197_v43 = vmul.f32 %v2101_v45, %v5607_v47  ;;  %v5637_v28 = vadd.f32 %v5342_v7, %v4966_v56  ;;  %v4017_v3 = vpop.eup %4016  ;;  %3023 = vst [vmem:[%s5020_s12 + $0x28] sm:$0xff] %v3356_v0  ;;  %v1893_v53 = vmul.f32 0.5, %v5558_v9  ;;  %v1906_v42 = vmul.f32 0.5, %v5566_v58 }
 0x20f   : > { %v2387_v62 = vmul.f32 0.7978846, %v2291_v21  ;;  %v2020_v6 = vmul.f32 0.044715, %v5627_v34  ;;  %v2564_v1 = vadd.f32 1.0, %v4017_v3  ;;  %v2114_v46 = vmul.f32 %v2018_v51, %v5621_v12 }
 0x210   : > { %v2293_v40 = vadd.f32 %v2197_v43, %v5607_v47  ;;  %v2019_v2 = vmul.f32 0.044715, %v5631_v31  ;;  %v1908_v7 = vmul.f32 0.5, %v5570_v10  ;;  %v2021_v9 = vmul.f32 0.044715, %v5637_v28 }
 0x211   : > { %v4019_v35 = vpop.eup %4018  ;;  %4026 = vtanh.f32 %v2387_v62  ;;  %v2116_v23 = vmul.f32 %v2020_v6, %v5627_v34  ;;  %v2658_v27 = vmul.f32 %v2562_v30, %v1890_v55  ;;  %v2210_v14 = vmul.f32 %v2114_v46, %v5621_v12 }
 0x212   : > { %v2563_v58 = vadd.f32 1.0, %v4019_v35  ;;  %v2389_v13 = vmul.f32 0.7978846, %v2293_v40  ;;  %v2660_v11 = vmul.f32 %v2564_v1, %v1892_v24  ;;  %v2115_v39 = vmul.f32 %v2019_v2, %v5631_v31 }
 0x213   : > { %v2212_v57 = vmul.f32 %v2116_v23, %v5627_v34  ;;  %v2117_v45 = vmul.f32 %v2021_v9, %v5637_v28  ;;  %v2306_v10 = vadd.f32 %v2210_v14, %v5621_v12  ;;  %v5656_v55 = vadd.f32 %v5355_v8, %v5016_v52 }
 0x214   : > { %v4021_v0 = vpop.eup %4020  ;;  %v2659_v21 = vmul.f32 %v2563_v58, %v1891_v20  ;;  %4028 = vtanh.f32 %v2389_v13  ;;  %v2211_v51 = vmul.f32 %v2115_v39, %v5631_v31  ;;  %v5663_v40 = vadd.f32 %v5360_v4, %v5016_v52 }
 0x215   : > { %v4023_v30 = vpop.eup %4022  ;;  %v2565_v43 = vadd.f32 1.0, %v4021_v0  ;;  %v2308_v24 = vadd.f32 %v2212_v57, %v5627_v34  ;;  %v2213_v3 = vmul.f32 %v2117_v45, %v5637_v28  ;;  %v2402_v20 = vmul.f32 0.7978846, %v2306_v10 }
 0x216   : > { %v4025_v62 = vpop.eup %4024  ;;  %v3363_v6 = vpack.c.bf16 %v2659_v21, %v2658_v27  ;;  %v2578_v1 = vadd.f32 1.0, %v4023_v30  ;;  %v1907_v8 = vmul.f32 0.5, %v5599_v29  ;;  %v2307_v35 = vadd.f32 %v2211_v51, %v5631_v31 }
 0x217   : > { %v2661_v46 = vmul.f32 %v2565_v43, %v1893_v53  ;;  %v2404_v2 = vmul.f32 0.7978846, %v2308_v24  ;;  %v1909_v23 = vmul.f32 0.5, %v5607_v47  ;;  %4030 = vtanh.f32 %v2402_v20 }
 0x218   : > { %3030 = vst [vmem:[%s5020_s12 + $0x60] sm:$0xff] %v3363_v6  ;;  %v2309_v9 = vadd.f32 %v2213_v3, %v5637_v28  ;;  %v2034_v27 = vmul.f32 0.044715, %v5656_v55  ;;  %v2580_v13 = vadd.f32 1.0, %v4025_v62  ;;  %v2403_v4 = vmul.f32 0.7978846, %v2307_v35 }
 0x219   : > { %v3364_v58 = vpack.c.bf16 %v2661_v46, %v2660_v11  ;;  %4032 = vtanh.f32 %v2404_v2  ;;  %v2674_v14 = vmul.f32 %v2578_v1, %v1906_v42  ;;  %v2036_v57 = vmul.f32 0.044715, %v5663_v40  ;;  %v6094_v2 = vld [vmem:[#allocation4_spill] sm:$0xff] }
 0x21a   : > { %v2405_v53 = vmul.f32 0.7978846, %v2309_v9  ;;  %v2130_v29 = vmul.f32 %v2034_v27, %v5656_v55  ;;  %4034 = vtanh.f32 %v2403_v4  ;;  %v5676_v47 = vadd.f32 %v5362_v26, %v5016_v52 }
 0x21b   : > { %v4027_v39 = vpop.eup %4026  ;;  %3031 = vst [vmem:[%s5020_s12 + $0x68] sm:$0xff] %v3364_v58  ;;  %v5680_v45 = vadd.f32 %v5365_v5, %v5016_v52  ;;  %v5684_v11 = vadd.f32 %v5375_v33, %v5072_v18  ;;  %v2132_v21 = vmul.f32 %v2036_v57, %v5663_v40  ;;  %v1922_v10 = vmul.f32 0.5, %v5621_v12 }
 0x21c   : > { %v2579_v42 = vadd.f32 1.0, %v4027_v39  ;;  %4036 = vtanh.f32 %v2405_v53  ;;  %v2226_v0 = vmul.f32 %v2130_v29, %v5656_v55  ;;  %v1924_v30 = vmul.f32 0.5, %v5627_v34 }
 0x21d   : > { %v2035_v26 = vmul.f32 0.044715, %v5676_v47  ;;  %v2037_v43 = vmul.f32 0.044715, %v5680_v45  ;;  %v2676_v24 = vmul.f32 %v2580_v13, %v1908_v7  ;;  %v2228_v3 = vmul.f32 %v2132_v21, %v5663_v40 }
 0x21e   : > { %v4029_v5 = vpop.eup %4028  ;;  %v2675_v51 = vmul.f32 %v2579_v42, %v1907_v8  ;;  %v2322_v33 = vadd.f32 %v2226_v0, %v5656_v55  ;;  %v2050_v12 = vmul.f32 0.044715, %v5684_v11  ;;  %v5700_v7 = vadd.f32 %v6094_v2, %v5072_v18 }
 0x21f   : > { %v2581_v62 = vadd.f32 1.0, %v4029_v5  ;;  %v2131_v6 = vmul.f32 %v2035_v26, %v5676_v47  ;;  %v2133_v1 = vmul.f32 %v2037_v43, %v5680_v45  ;;  %v2324_v46 = vadd.f32 %v2228_v3, %v5663_v40 }
 0x220   : > { %v3371_v34 = vpack.c.bf16 %v2675_v51, %v2674_v14  ;;  %v2418_v20 = vmul.f32 0.7978846, %v2322_v33  ;;  %v2146_v27 = vmul.f32 %v2050_v12, %v5684_v11  ;;  %v1923_v13 = vmul.f32 0.5, %v5631_v31  ;;  %v6095_v51 = vld [vmem:[#allocation5_spill] sm:$0xff] }
 0x221   : > { %v2677_v8 = vmul.f32 %v2581_v62, %v1909_v23  ;;  %v2227_v35 = vmul.f32 %v2131_v6, %v5676_v47  ;;  %v2229_v9 = vmul.f32 %v2133_v1, %v5680_v45  ;;  %v4031_v58 = vpop.eup %4030  ;;  %v2420_v4 = vmul.f32 0.7978846, %v2324_v46 }
 0x222   : > { %3038 = vst [vmem:[%s5020_s12 + $0xa0] sm:$0xff] %v3371_v34  ;;  %4038 = vtanh.f32 %v2418_v20  ;;  %v2052_v14 = vmul.f32 0.044715, %v5700_v7  ;;  %v2594_v57 = vadd.f32 1.0, %v4031_v58  ;;  %v2242_v0 = vmul.f32 %v2146_v27, %v5684_v11 }
 0x223   : > { %v4033_v53 = vpop.eup %4032  ;;  %v3372_v29 = vpack.c.bf16 %v2677_v8, %v2676_v24  ;;  %v2323_v23 = vadd.f32 %v2227_v35, %v5676_v47  ;;  %v2325_v39 = vadd.f32 %v2229_v9, %v5680_v45  ;;  %4040 = vtanh.f32 %v2420_v4 }
 0x224   : > { %v2596_v42 = vadd.f32 1.0, %v4033_v53  ;;  %v2148_v21 = vmul.f32 %v2052_v14, %v5700_v7  ;;  %v4035_v26 = vpop.eup %4034  ;;  %v1925_v31 = vmul.f32 0.5, %v5637_v28  ;;  %v5716_v24 = vadd.f32 %v6095_v51, %v5072_v18 }
 0x225   : > { %3039 = vst [vmem:[%s5020_s12 + $0xa8] sm:$0xff] %v3372_v29  ;;  %v2419_v43 = vmul.f32 0.7978846, %v2323_v23  ;;  %v2421_v5 = vmul.f32 0.7978846, %v2325_v39  ;;  %v2690_v3 = vmul.f32 %v2594_v57, %v1922_v10  ;;  %v2595_v62 = vadd.f32 1.0, %v4035_v26 }
 0x226   : > { %v4037_v33 = vpop.eup %4036  ;;  %v2338_v6 = vadd.f32 %v2242_v0, %v5684_v11  ;;  %v2244_v1 = vmul.f32 %v2148_v21, %v5700_v7  ;;  %v2692_v12 = vmul.f32 %v2596_v42, %v1924_v30  ;;  %v2051_v20 = vmul.f32 0.044715, %v5716_v24 }
 0x227   : > { %v2597_v34 = vadd.f32 1.0, %v4037_v33  ;;  %4042 = vtanh.f32 %v2419_v43  ;;  %v2691_v46 = vmul.f32 %v2595_v62, %v1923_v13  ;;  %v1662_v10 = vadd.f32 %v5387_v48, %v5072_v18 }
 0x228   : > { %4044 = vtanh.f32 %v2421_v5  ;;  %v2434_v28 = vmul.f32 0.7978846, %v2338_v6  ;;  %v2340_v2 = vadd.f32 %v2244_v1, %v5700_v7  ;;  %v2147_v35 = vmul.f32 %v2051_v20, %v5716_v24 }
 0x229   : > { %v2693_v8 = vmul.f32 %v2597_v34, %v1925_v31  ;;  %v5727_v30 = vadd.f32 %v5455_v44, %v4886_v61  ;;  %v3379_v9 = vpack.c.bf16 %v2691_v46, %v2690_v3  ;;  %v5731_v58 = vadd.f32 %v5459_v41, %v4886_v61 }
 0x22a   : > { %4046 = vtanh.f32 %v2434_v28  ;;  %v2436_v27 = vmul.f32 0.7978846, %v2340_v2  ;;  %v1938_v4 = vmul.f32 0.5, %v5656_v55  ;;  %v2243_v14 = vmul.f32 %v2147_v35, %v5716_v24 }
 0x22b   : > { %v3380_v13 = vpack.c.bf16 %v2693_v8, %v2692_v12  ;;  %v2053_v53 = vmul.f32 0.044715, %v1662_v10  ;;  %3046 = vst [vmem:[%s5020_s12 + $0xe0] sm:$0xff] %v3379_v9  ;;  %v1940_v48 = vmul.f32 0.5, %v5663_v40  ;;  %v1939_v44 = vmul.f32 0.5, %v5676_v47 }
 0x22c   : > { %v4039_v29 = vpop.eup %4038  ;;  %v1941_v57 = vmul.f32 0.5, %v5680_v45  ;;  %v1974_v23 = vmul.f32 0.044715, %v5727_v30  ;;  %v2339_v41 = vadd.f32 %v2243_v14, %v5716_v24  ;;  %v1976_v55 = vmul.f32 0.044715, %v5731_v58 }
 0x22d   : > { %3047 = vst [vmem:[%s5020_s12 + $0xe8] sm:$0xff] %v3380_v13  ;;  %v2610_v39 = vadd.f32 1.0, %v4039_v29  ;;  %v2149_v42 = vmul.f32 %v2053_v53, %v1662_v10  ;;  %v4041_v0 = vpop.eup %4040  ;;  %v1954_v21 = vmul.f32 0.5, %v5684_v11  ;;  %4048 = vtanh.f32 %v2436_v27 }
 0x22e   : > { %v2070_v26 = vmul.f32 %v1974_v23, %v5727_v30  ;;  %v5747_v40 = vadd.f32 %v5461_v59, %v4886_v61  ;;  %v2612_v47 = vadd.f32 1.0, %v4041_v0  ;;  %v2435_v45 = vmul.f32 0.7978846, %v2339_v41 }
 0x22f   : > { %v2245_v31 = vmul.f32 %v2149_v42, %v1662_v10  ;;  %v5751_v43 = vadd.f32 %v5465_v32, %v4886_v61  ;;  %v5754_v5 = vmul.f32 0.5, %v5700_v7  ;;  %v2072_v11 = vmul.f32 %v1976_v55, %v5731_v58 }
 0x230   : > { %v2166_v51 = vmul.f32 %v2070_v26, %v5727_v30  ;;  %v1975_v33 = vmul.f32 0.044715, %v5747_v40  ;;  %v2706_v62 = vmul.f32 %v2610_v39, %v1938_v4  ;;  %4050 = vtanh.f32 %v2435_v45 }
 0x231   : > { %v4043_v3 = vpop.eup %4042  ;;  %v2341_v59 = vadd.f32 %v2245_v31, %v1662_v10  ;;  %v5761_v6 = vadd.f32 %v5480_v17, %v4892_v50  ;;  %v2168_v7 = vmul.f32 %v2072_v11, %v5731_v58  ;;  %v2708_v34 = vmul.f32 %v2612_v47, %v1940_v48 }
 0x232   : > { %v4045_v1 = vpop.eup %4044  ;;  %v2611_v61 = vadd.f32 1.0, %v4043_v3  ;;  %v2262_v32 = vadd.f32 %v2166_v51, %v5727_v30  ;;  %v2071_v12 = vmul.f32 %v1975_v33, %v5747_v40  ;;  %v1977_v28 = vmul.f32 0.044715, %v5751_v43 }
 0x233   : > { %v2613_v20 = vadd.f32 1.0, %v4045_v1  ;;  %v2437_v46 = vmul.f32 0.7978846, %v2341_v59  ;;  %v2264_v17 = vadd.f32 %v2168_v7, %v5731_v58  ;;  %v1955_v13 = vmul.f32 0.5, %v5716_v24 }
 0x234   : > { %v4047_v2 = vpop.eup %4046  ;;  %v2707_v8 = vmul.f32 %v2611_v61, %v1939_v44  ;;  %v2358_v35 = vmul.f32 0.7978846, %v2262_v32  ;;  %v2167_v9 = vmul.f32 %v2071_v12, %v5747_v40  ;;  %v2073_v4 = vmul.f32 %v1977_v28, %v5751_v43 }
 0x235   : > { %v2709_v27 = vmul.f32 %v2613_v20, %v1941_v57  ;;  %4052 = vtanh.f32 %v2437_v46  ;;  %v2360_v53 = vmul.f32 0.7978846, %v2264_v17  ;;  %v2626_v44 = vadd.f32 1.0, %v4047_v2 }
 0x236   : > { %v3387_v14 = vpack.c.bf16 %v2707_v8, %v2706_v62  ;;  %4054 = vtanh.f32 %v2358_v35  ;;  %v2263_v29 = vadd.f32 %v2167_v9, %v5747_v40  ;;  %v1957_v23 = vmul.f32 0.5, %v1662_v10 }
 0x237   : > { %v3388_v48 = vpack.c.bf16 %v2709_v27, %v2708_v34  ;;  %v2169_v39 = vmul.f32 %v2073_v4, %v5751_v43  ;;  %v4049_v41 = vpop.eup %4048  ;;  %4056 = vtanh.f32 %v2360_v53  ;;  %v1990_v24 = vmul.f32 0.044715, %v5761_v6 }
 0x238   : > { %3054 = vst [vmem:[%s5020_s12 + $0x120] sm:$0xff] %v3387_v14  ;;  %v2359_v57 = vmul.f32 0.7978846, %v2263_v29  ;;  %v5777_v42 = vadd.f32 %v5491_v25, %v4892_v50  ;;  %v1878_v55 = vmul.f32 0.5, %v5727_v30  ;;  %v5784_v10 = vadd.f32 %v5493_v54, %v4892_v50 }
 0x239   : > { %3055 = vst [vmem:[%s5020_s12 + $0x128] sm:$0xff] %v3388_v48  ;;  %v2265_v0 = vadd.f32 %v2169_v39, %v5751_v43  ;;  %v5788_v26 = vadd.f32 %v5498_v19, %v4892_v50  ;;  %v1880_v47 = vmul.f32 0.5, %v5731_v58  ;;  %v2086_v45 = vmul.f32 %v1990_v24, %v5761_v6 }
 0x23a   : > { %4058 = vtanh.f32 %v2359_v57  ;;  %v1992_v25 = vmul.f32 0.044715, %v5777_v42  ;;  %v4051_v31 = vpop.eup %4050  ;;  %v2722_v51 = vmul.f32 %v2626_v44, %v1954_v21  ;;  %v2628_v30 = vadd.f32 1.0, %v4049_v41 }
 0x23b   : > { %v2361_v11 = vmul.f32 0.7978846, %v2265_v0  ;;  %v1991_v33 = vmul.f32 0.044715, %v5784_v10  ;;  %v2627_v3 = vadd.f32 1.0, %v4051_v31  ;;  %v2182_v54 = vmul.f32 %v2086_v45, %v5761_v6 }
 0x23c   : > { %v2088_v62 = vmul.f32 %v1992_v25, %v5777_v42  ;;  %v1993_v50 = vmul.f32 0.044715, %v5788_v26  ;;  %v5800_v58 = vadd.f32 %v5508_v49, %v4913_v16  ;;  %v5804_v21 = vadd.f32 %v5512_v63, %v4913_v16 }
 0x23d   : > { %4060 = vtanh.f32 %v2361_v11  ;;  %v2087_v19 = vmul.f32 %v1991_v33, %v5784_v10  ;;  %v2723_v59 = vmul.f32 %v2627_v3, %v1955_v13  ;;  %v2278_v1 = vadd.f32 %v2182_v54, %v5761_v6 }
 0x23e   : > { %v2184_v61 = vmul.f32 %v2088_v62, %v5777_v42  ;;  %v2089_v32 = vmul.f32 %v1993_v50, %v5788_v26  ;;  %v2724_v12 = vmul.f32 %v2628_v30, %v5754_v5  ;;  %v1879_v34 = vmul.f32 0.5, %v5747_v40 }
 0x23f   : > { %v4053_v7 = vpop.eup %4052  ;;  %v2183_v49 = vmul.f32 %v2087_v19, %v5784_v10  ;;  %v2006_v20 = vmul.f32 0.044715, %v5800_v58  ;;  %v3395_v63 = vpack.c.bf16 %v2723_v59, %v2722_v51  ;;  %v2374_v2 = vmul.f32 0.7978846, %v2278_v1  ;;  %v6097_v51 = vld [vmem:[#allocation7_spill] sm:$0xff]  ;;  %v6098_v19 = vld [vmem:[#allocation8_spill] sm:$0xff] }
 0x240   : > { %v4055_v46 = vpop.eup %4054  ;;  %v2629_v28 = vadd.f32 1.0, %v4053_v7  ;;  %v2280_v8 = vadd.f32 %v2184_v61, %v5777_v42  ;;  %v2185_v9 = vmul.f32 %v2089_v32, %v5788_v26  ;;  %v2008_v4 = vmul.f32 0.044715, %v5804_v21 }
 0x241   : > { %v2550_v35 = vadd.f32 1.0, %v4055_v46  ;;  %v2279_v17 = vadd.f32 %v2183_v49, %v5784_v10  ;;  %v2102_v27 = vmul.f32 %v2006_v20, %v5800_v58  ;;  %v4057_v5 = vpop.eup %4056  ;;  %3062 = vst [vmem:[%s5020_s12 + $0x160] sm:$0xff] %v3395_v63  ;;  %4062 = vtanh.f32 %v2374_v2 }
 0x242   : > { %v2725_v40 = vmul.f32 %v2629_v28, %v1957_v23  ;;  %v2376_v13 = vmul.f32 0.7978846, %v2280_v8  ;;  %v2552_v14 = vadd.f32 1.0, %v4057_v5  ;;  %v1881_v53 = vmul.f32 0.5, %v5751_v43  ;;  %v6096_v43 = vld [vmem:[#allocation6_spill] sm:$0xff] }
 0x243   : > { %v2375_v29 = vmul.f32 0.7978846, %v2279_v17  ;;  %v2281_v48 = vadd.f32 %v2185_v9, %v5788_v26  ;;  %v2198_v41 = vmul.f32 %v2102_v27, %v5800_v58  ;;  %v2104_v57 = vmul.f32 %v2008_v4, %v5804_v21 }
 0x244   : > { %v4059_v44 = vpop.eup %4058  ;;  %v3396_v39 = vpack.c.bf16 %v2725_v40, %v2724_v12  ;;  %4064 = vtanh.f32 %v2376_v13  ;;  %v2646_v24 = vmul.f32 %v2550_v35, %v1878_v55  ;;  %v5828_v31 = vadd.f32 %v6096_v43, %v4913_v16 }
 0x245   : > { %v2551_v23 = vadd.f32 1.0, %v4059_v44  ;;  %4066 = vtanh.f32 %v2375_v29  ;;  %v2377_v0 = vmul.f32 0.7978846, %v2281_v48  ;;  %v2294_v45 = vadd.f32 %v2198_v41, %v5800_v58 }
 0x246   : > { %3063 = vst [vmem:[%s5020_s12 + $0x168] sm:$0xff] %v3396_v39  ;;  %v2200_v25 = vmul.f32 %v2104_v57, %v5804_v21  ;;  %v5832_v30 = vadd.f32 %v6097_v51, %v4913_v16  ;;  %v2648_v33 = vmul.f32 %v2552_v14, %v1880_v47  ;;  %v5836_v3 = vadd.f32 %v5527_v22, %v4966_v56 }
 0x247   : > { %v4061_v11 = vpop.eup %4060  ;;  %v2647_v55 = vmul.f32 %v2551_v23, %v1879_v34  ;;  %4068 = vtanh.f32 %v2377_v0  ;;  %v2390_v62 = vmul.f32 0.7978846, %v2294_v45  ;;  %v5841_v59 = vadd.f32 %v6098_v19, %v4966_v56 }
 0x248   : > { %v2553_v54 = vadd.f32 1.0, %v4061_v11  ;;  %v2296_v50 = vadd.f32 %v2200_v25, %v5804_v21  ;;  %v2007_v16 = vmul.f32 0.044715, %v5828_v31  ;;  %v2009_v61 = vmul.f32 0.044715, %v5832_v30 }
 0x249   : > { %v3357_v1 = vpack.c.bf16 %v2647_v55, %v2646_v24  ;;  %v1894_v32 = vmul.f32 0.5, %v5761_v6  ;;  %4070 = vtanh.f32 %v2390_v62  ;;  %v1896_v22 = vmul.f32 0.5, %v5777_v42 }
 0x24a   : > { %v2649_v47 = vmul.f32 %v2553_v54, %v1881_v53  ;;  %v2392_v7 = vmul.f32 0.7978846, %v2296_v50  ;;  %v2103_v12 = vmul.f32 %v2007_v16, %v5828_v31  ;;  %v2105_v34 = vmul.f32 %v2009_v61, %v5832_v30 }
 0x24b   : > { %3024 = vst [vmem:[%s5020_s12 + $0x30] sm:$0xff] %v3357_v1  ;;  %v2022_v49 = vmul.f32 0.044715, %v5836_v3  ;;  %v4063_v20 = vpop.eup %4062  ;;  %v2024_v63 = vmul.f32 0.044715, %v5841_v59  ;;  %v5854_v6 = vadd.f32 %v5534_v37, %v4966_v56  ;;  %v1895_v17 = vmul.f32 0.5, %v5784_v10 }
 0x24c   : > { %v3358_v46 = vpack.c.bf16 %v2649_v47, %v2648_v33  ;;  %4072 = vtanh.f32 %v2392_v7  ;;  %v2566_v28 = vadd.f32 1.0, %v4063_v20  ;;  %v2199_v2 = vmul.f32 %v2103_v12, %v5828_v31 }
 0x24d   : > { %v2201_v42 = vmul.f32 %v2105_v34, %v5832_v30  ;;  %v2118_v8 = vmul.f32 %v2022_v49, %v5836_v3  ;;  %v2120_v9 = vmul.f32 %v2024_v63, %v5841_v59  ;;  %v2023_v27 = vmul.f32 0.044715, %v5854_v6  ;;  %v6099_v34 = vld [vmem:[#allocation9_spill] sm:$0xff]  ;;  %v6100_v49 = vld [vmem:[#allocation10_spill] sm:$0xff] }
 0x24e   : > { %v4065_v35 = vpop.eup %4064  ;;  %3025 = vst [vmem:[%s5020_s12 + $0x38] sm:$0xff] %v3358_v46  ;;  %v5865_v5 = vadd.f32 %v5539_v60, %v4966_v56  ;;  %v2662_v40 = vmul.f32 %v2566_v28, %v1894_v32  ;;  %v2295_v4 = vadd.f32 %v2199_v2, %v5828_v31  ;;  %v1897_v41 = vmul.f32 0.5, %v5788_v26 }
 0x24f   : > { %v4067_v37 = vpop.eup %4066  ;;  %v2568_v13 = vadd.f32 1.0, %v4065_v35  ;;  %v2297_v14 = vadd.f32 %v2201_v42, %v5832_v30  ;;  %v2214_v29 = vmul.f32 %v2118_v8, %v5836_v3  ;;  %v2216_v10 = vmul.f32 %v2120_v9, %v5841_v59 }
 0x250   : > { %v2567_v53 = vadd.f32 1.0, %v4067_v37  ;;  %v2119_v48 = vmul.f32 %v2023_v27, %v5854_v6  ;;  %v2391_v56 = vmul.f32 0.7978846, %v2295_v4  ;;  %v2025_v25 = vmul.f32 0.044715, %v5865_v5 }
 0x251   : > { %v4069_v44 = vpop.eup %4068  ;;  %v2664_v39 = vmul.f32 %v2568_v13, %v1896_v22  ;;  %v2393_v60 = vmul.f32 0.7978846, %v2297_v14  ;;  %v2310_v23 = vadd.f32 %v2214_v29, %v5836_v3  ;;  %v2312_v0 = vadd.f32 %v2216_v10, %v5841_v59 }
 0x252   : > { %v2663_v57 = vmul.f32 %v2567_v53, %v1895_v17  ;;  %v2569_v24 = vadd.f32 1.0, %v4069_v44  ;;  %4074 = vtanh.f32 %v2391_v56  ;;  %v2215_v45 = vmul.f32 %v2119_v48, %v5854_v6  ;;  %v6101_v56 = vld [vmem:[#allocation11_spill] sm:$0xff] }
 0x253   : > { %v5879_v43 = vadd.f32 %v5549_v36, %v5016_v52  ;;  %v4071_v51 = vpop.eup %4070  ;;  %4076 = vtanh.f32 %v2393_v60  ;;  %v2406_v33 = vmul.f32 0.7978846, %v2310_v23  ;;  %v2408_v55 = vmul.f32 0.7978846, %v2312_v0 }
 0x254   : > { %v3365_v26 = vpack.c.bf16 %v2663_v57, %v2662_v40  ;;  %v2665_v11 = vmul.f32 %v2569_v24, %v1897_v41  ;;  %v2311_v54 = vadd.f32 %v2215_v45, %v5854_v6  ;;  %v2121_v62 = vmul.f32 %v2025_v25, %v5865_v5 }
 0x255   : > { %v1910_v1 = vmul.f32 0.5, %v5800_v58  ;;  %4078 = vtanh.f32 %v2406_v33  ;;  %v2038_v36 = vmul.f32 0.044715, %v5879_v43  ;;  %v2582_v16 = vadd.f32 1.0, %v4071_v51 }
 0x256   : > { %v4073_v50 = vpop.eup %4072  ;;  %3032 = vst [vmem:[%s5020_s12 + $0x70] sm:$0xff] %v3365_v26  ;;  %v3366_v19 = vpack.c.bf16 %v2665_v11, %v2664_v39  ;;  %v1912_v61 = vmul.f32 0.5, %v5804_v21  ;;  %4080 = vtanh.f32 %v2408_v55  ;;  %v2407_v47 = vmul.f32 0.7978846, %v2311_v54 }
 0x257   : > { %v2217_v32 = vmul.f32 %v2121_v62, %v5865_v5  ;;  %v2134_v7 = vmul.f32 %v2038_v36, %v5879_v43  ;;  %v5892_v22 = vadd.f32 %v5551_v38, %v5016_v52  ;;  %v5896_v58 = vadd.f32 %v5560_v15, %v5016_v52 }
 0x258   : > { %3033 = vst [vmem:[%s5020_s12 + $0x78] sm:$0xff] %v3366_v19  ;;  %v2584_v12 = vadd.f32 1.0, %v4073_v50  ;;  %4082 = vtanh.f32 %v2407_v47  ;;  %v5900_v21 = vadd.f32 %v6099_v34, %v5016_v52  ;;  %v5904_v20 = vadd.f32 %v6100_v49, %v5072_v18  ;;  %v6103_v47 = vld [vmem:[#allocation13_spill] sm:$0xff] }
 0x259   : > { %v1911_v46 = vmul.f32 0.5, %v5828_v31  ;;  %v2313_v63 = vadd.f32 %v2217_v32, %v5865_v5  ;;  %v2230_v38 = vmul.f32 %v2134_v7, %v5879_v43  ;;  %v2040_v28 = vmul.f32 0.044715, %v5892_v22 }
 0x25a   : > { %v1913_v15 = vmul.f32 0.5, %v5832_v30  ;;  %v1926_v2 = vmul.f32 0.5, %v5836_v3  ;;  %v2039_v42 = vmul.f32 0.044715, %v5896_v58  ;;  %v2041_v52 = vmul.f32 0.044715, %v5900_v21 }
 0x25b   : > { %v2678_v8 = vmul.f32 %v2582_v16, %v1910_v1  ;;  %v2409_v35 = vmul.f32 0.7978846, %v2313_v63  ;;  %v2326_v17 = vadd.f32 %v2230_v38, %v5879_v43  ;;  %v2136_v31 = vmul.f32 %v2040_v28, %v5892_v22 }
 0x25c   : > { %v4075_v9 = vpop.eup %4074  ;;  %v2680_v27 = vmul.f32 %v2584_v12, %v1912_v61  ;;  %v2135_v37 = vmul.f32 %v2039_v42, %v5896_v58  ;;  %v2137_v40 = vmul.f32 %v2041_v52, %v5900_v21  ;;  %v2054_v30 = vmul.f32 0.044715, %v5904_v20 }
 0x25d   : > { %v4077_v13 = vpop.eup %4076  ;;  %v2583_v3 = vadd.f32 1.0, %v4075_v9  ;;  %4084 = vtanh.f32 %v2409_v35  ;;  %v2422_v4 = vmul.f32 0.7978846, %v2326_v17  ;;  %v2232_v14 = vmul.f32 %v2136_v31, %v5892_v22 }
 0x25e   : > { %v2585_v53 = vadd.f32 1.0, %v4077_v13  ;;  %v2231_v29 = vmul.f32 %v2135_v37, %v5896_v58  ;;  %v2233_v10 = vmul.f32 %v2137_v40, %v5900_v21  ;;  %v2150_v48 = vmul.f32 %v2054_v30, %v5904_v20 }
 0x25f   : > { %v4079_v44 = vpop.eup %4078  ;;  %v2679_v39 = vmul.f32 %v2583_v3, %v1911_v46  ;;  %4086 = vtanh.f32 %v2422_v4  ;;  %v2328_v41 = vadd.f32 %v2232_v14, %v5892_v22  ;;  %v5926_v60 = vadd.f32 %v6101_v56, %v5072_v18 }
 0x260   : > { %v4081_v57 = vpop.eup %4080  ;;  %v2681_v24 = vmul.f32 %v2585_v53, %v1913_v15  ;;  %v2598_v23 = vadd.f32 1.0, %v4079_v44  ;;  %v2327_v0 = vadd.f32 %v2231_v29, %v5896_v58  ;;  %v2329_v45 = vadd.f32 %v2233_v10, %v5900_v21 }
 0x261   : > { %v3373_v25 = vpack.c.bf16 %v2679_v39, %v2678_v8  ;;  %v1927_v51 = vmul.f32 0.5, %v5854_v6  ;;  %v2424_v26 = vmul.f32 0.7978846, %v2328_v41  ;;  %v2246_v11 = vmul.f32 %v2150_v48, %v5904_v20  ;;  %v6102_v6 = vld [vmem:[#allocation12_spill] sm:$0xff] }
 0x262   : > { %v4083_v33 = vpop.eup %4082  ;;  %v3374_v55 = vpack.c.bf16 %v2681_v24, %v2680_v27  ;;  %v2600_v54 = vadd.f32 1.0, %v4081_v57  ;;  %v2423_v62 = vmul.f32 0.7978846, %v2327_v0  ;;  %v2425_v50 = vmul.f32 0.7978846, %v2329_v45 }
 0x263   : > { %3040 = vst [vmem:[%s5020_s12 + $0xb0] sm:$0xff] %v3373_v25  ;;  %v2694_v19 = vmul.f32 %v2598_v23, %v1926_v2  ;;  %v2599_v1 = vadd.f32 1.0, %v4083_v33  ;;  %4088 = vtanh.f32 %v2424_v26  ;;  %v2342_v36 = vadd.f32 %v2246_v11, %v5904_v20 }
 0x264   : > { %3041 = vst [vmem:[%s5020_s12 + $0xb8] sm:$0xff] %v3374_v55  ;;  %4090 = vtanh.f32 %v2423_v62  ;;  %v2056_v16 = vmul.f32 0.044715, %v5926_v60  ;;  %v1763_v61 = vadd.f32 %v6102_v6, %v5072_v18  ;;  %v5940_v32 = vadd.f32 %v6103_v47, %v5072_v18 }
 0x265   : > { %v2695_v7 = vmul.f32 %v2599_v1, %v1927_v51  ;;  %4092 = vtanh.f32 %v2425_v50  ;;  %v1928_v12 = vmul.f32 0.5, %v5841_v59  ;;  %v2438_v34 = vmul.f32 0.7978846, %v2342_v36 }
 0x266   : > { %v2152_v49 = vmul.f32 %v2056_v16, %v5926_v60  ;;  %v2055_v46 = vmul.f32 0.044715, %v1763_v61  ;;  %v1929_v28 = vmul.f32 0.5, %v5865_v5  ;;  %v2057_v15 = vmul.f32 0.044715, %v5940_v32 }
 0x267   : > { %v4085_v63 = vpop.eup %4084  ;;  %v3381_v38 = vpack.c.bf16 %v2695_v7, %v2694_v19  ;;  %v2696_v2 = vmul.f32 %v2600_v54, %v1928_v12  ;;  %4094 = vtanh.f32 %v2438_v34  ;;  %v1942_v13 = vmul.f32 0.5, %v5879_v43  ;;  %v3096_v7 = vld [vmem:[%s5020_s12 + $0x20] sm:$0xff] (%p4177_p5)  ;;  %v3098_v12 = vld [vmem:[%s5020_s12 + $0x28] sm:$0xff] (%p4177_p5)  ;;  %v3100_v34 = vld [vmem:[%s5020_s12 + $0x30] sm:$0xff] (%p4177_p5) }
 0x268   : > { %v2601_v42 = vadd.f32 1.0, %v4085_v63  ;;  %v2248_v18 = vmul.f32 %v2152_v49, %v5926_v60  ;;  %v2151_v52 = vmul.f32 %v2055_v46, %v1763_v61  ;;  %v2153_v59 = vmul.f32 %v2057_v15, %v5940_v32  ;;  %3097 = vst [vmem:[%s5974_s20 + $0x20] sm:$0xff] (%p4177_p5), %v3096_v7  ;;  %3099 = vst [vmem:[%s5974_s20 + $0x28] sm:$0xff] (%p4177_p5), %v3098_v12  ;;  %v3102_v49 = vld [vmem:[%s5020_s12 + $0x38] sm:$0xff] (%p4177_p5)  ;;  %v3104_v46 = vld [vmem:[%s5020_s12 + $0x40] sm:$0xff] (%p4177_p5) }
 0x269   : > { %v4087_v8 = vpop.eup %4086  ;;  %3048 = vst [vmem:[%s5020_s12 + $0xf0] sm:$0xff] %v3381_v38  ;;  %v1944_v14 = vmul.f32 0.5, %v5892_v22  ;;  %v1943_v44 = vmul.f32 0.5, %v5896_v58  ;;  %v1945_v43 = vmul.f32 0.5, %v5900_v21  ;;  %v1958_v58 = vmul.f32 0.5, %v5904_v20  ;;  %v3088_v20 = vld [vmem:[%s5020_s12] sm:$0xff] (%p4177_p5) }
 0x26a   : > { %v2697_v35 = vmul.f32 %v2601_v42, %v1929_v28  ;;  %v2344_v17 = vadd.f32 %v2248_v18, %v5926_v60  ;;  %v2247_v31 = vmul.f32 %v2151_v52, %v1763_v61  ;;  %v2614_v9 = vadd.f32 1.0, %v4087_v8  ;;  %3089 = vst [vmem:[%s5974_s20] sm:$0xff] (%p4177_p5), %v3088_v20  ;;  %3101 = vst [vmem:[%s5974_s20 + $0x30] sm:$0xff] (%p4177_p5), %v3100_v34  ;;  %v3106_v63 = vld [vmem:[%s5020_s12 + $0x48] sm:$0xff] (%p4177_p5)  ;;  %v3108_v38 = vld [vmem:[%s5020_s12 + $0x50] sm:$0xff] (%p4177_p5) }
 0x26b   : > { %v2249_v5 = vmul.f32 %v2153_v59, %v5940_v32  ;;  %v1960_v21 = vmul.f32 0.5, %v5926_v60  ;;  %v1959_v54 = vmul.f32 0.5, %v1763_v61  ;;  %v1961_v19 = vmul.f32 0.5, %v5940_v32  ;;  %v3090_v60 = vld [vmem:[%s5020_s12 + $0x8] sm:$0xff] (%p4177_p5)  ;;  %3103 = vst [vmem:[%s5974_s20 + $0x38] sm:$0xff] (%p4177_p5), %v3102_v49  ;;  %3105 = vst [vmem:[%s5974_s20 + $0x100] sm:$0xff] (%p4177_p5), %v3104_v46 }
 0x26c   : > { %v3382_v27 = vpack.c.bf16 %v2697_v35, %v2696_v2  ;;  %v2440_v37 = vmul.f32 0.7978846, %v2344_v17  ;;  %v2343_v40 = vadd.f32 %v2247_v31, %v1763_v61  ;;  %v2710_v48 = vmul.f32 %v2614_v9, %v1942_v13  ;;  %v3092_v61 = vld [vmem:[%s5020_s12 + $0x10] sm:$0xff] (%p4177_p5)  ;;  %3091 = vst [vmem:[%s5974_s20 + $0x8] sm:$0xff] (%p4177_p5), %v3090_v60  ;;  %v3110_v28 = vld [vmem:[%s5020_s12 + $0x58] sm:$0xff] (%p4177_p5)  ;;  %3107 = vst [vmem:[%s5974_s20 + $0x108] sm:$0xff] (%p4177_p5), %v3106_v63 }
 0x26d   : > { %v4089_v30 = vpop.eup %4088  ;;  %v2345_v3 = vadd.f32 %v2249_v5, %v5940_v32  ;;  %v3094_v32 = vld [vmem:[%s5020_s12 + $0x18] sm:$0xff] (%p4177_p5)  ;;  %3093 = vst [vmem:[%s5974_s20 + $0x10] sm:$0xff] (%p4177_p5), %v3092_v61  ;;  %3109 = vst [vmem:[%s5974_s20 + $0x110] sm:$0xff] (%p4177_p5), %v3108_v38  ;;  %v3112_v15 = vld [vmem:[%s5020_s12 + $0x60] sm:$0xff] (%p4177_p5) }
 0x26e   : > { %v4091_v4 = vpop.eup %4090  ;;  %3049 = vst [vmem:[%s5020_s12 + $0xf8] sm:$0xff] %v3382_v27  ;;  %v2616_v53 = vadd.f32 1.0, %v4089_v30  ;;  %4096 = vtanh.f32 %v2440_v37  ;;  %v2439_v29 = vmul.f32 0.7978846, %v2343_v40  ;;  %3095 = vst [vmem:[%s5974_s20 + $0x18] sm:$0xff] (%p4177_p5), %v3094_v32  ;;  %v3114_v2 = vld [vmem:[%s5020_s12 + $0x68] sm:$0xff] (%p4177_p5) }
 0x26f   : > { %v4093_v10 = vpop.eup %4092  ;;  %v2615_v39 = vadd.f32 1.0, %v4091_v4  ;;  %v2441_v41 = vmul.f32 0.7978846, %v2345_v3  ;;  %3111 = vst [vmem:[%s5974_s20 + $0x118] sm:$0xff] (%p4177_p5), %v3110_v28  ;;  %v3116_v42 = vld [vmem:[%s5020_s12 + $0x70] sm:$0xff] (%p4177_p5)  ;;  %3113 = vst [vmem:[%s5974_s20 + $0x120] sm:$0xff] (%p4177_p5), %v3112_v15 }
 0x270   : > { %v2712_v56 = vmul.f32 %v2616_v53, %v1944_v14  ;;  %v2617_v57 = vadd.f32 1.0, %v4093_v10  ;;  %4098 = vtanh.f32 %v2439_v29  ;;  %3115 = vst [vmem:[%s5974_s20 + $0x128] sm:$0xff] (%p4177_p5), %v3114_v2  ;;  %3117 = vst [vmem:[%s5974_s20 + $0x130] sm:$0xff] (%p4177_p5), %v3116_v42  ;;  %v3118_v18 = vld [vmem:[%s5020_s12 + $0x78] sm:$0xff] (%p4177_p5)  ;;  %v3120_v52 = vld [vmem:[%s5020_s12 + $0x80] sm:$0xff] (%p4177_p5) }
 0x271   : > { %v2711_v24 = vmul.f32 %v2615_v39, %v1943_v44  ;;  %4100 = vtanh.f32 %v2441_v41  ;;  %v4095_v0 = vpop.eup %4094  ;;  %v3122_v8 = vld [vmem:[%s5020_s12 + $0x88] sm:$0xff] (%p4177_p5)  ;;  %3119 = vst [vmem:[%s5974_s20 + $0x138] sm:$0xff] (%p4177_p5), %v3118_v18  ;;  %3121 = vst [vmem:[%s5974_s20 + $0x200] sm:$0xff] (%p4177_p5), %v3120_v52  ;;  %v3124_v59 = vld [vmem:[%s5020_s12 + $0x90] sm:$0xff] (%p4177_p5) }
 0x272   : > { %v2713_v23 = vmul.f32 %v2617_v57, %v1945_v43  ;;  %v2630_v25 = vadd.f32 1.0, %v4095_v0  ;;  %3123 = vst [vmem:[%s5974_s20 + $0x208] sm:$0xff] (%p4177_p5), %v3122_v8  ;;  %v3126_v35 = vld [vmem:[%s5020_s12 + $0x98] sm:$0xff] (%p4177_p5)  ;;  %v3128_v17 = vld [vmem:[%s5020_s12 + $0xa0] sm:$0xff] (%p4177_p5)  ;;  %3125 = vst [vmem:[%s5974_s20 + $0x210] sm:$0xff] (%p4177_p5), %v3124_v59 }
 0x273   : > { %v3389_v22 = vpack.c.bf16 %v2711_v24, %v2710_v48  ;;  %3127 = vst [vmem:[%s5974_s20 + $0x218] sm:$0xff] (%p4177_p5), %v3126_v35  ;;  %3129 = vst [vmem:[%s5974_s20 + $0x220] sm:$0xff] (%p4177_p5), %v3128_v17  ;;  %v3130_v31 = vld [vmem:[%s5020_s12 + $0xa8] sm:$0xff] (%p4177_p5)  ;;  %v3132_v9 = vld [vmem:[%s5020_s12 + $0xb0] sm:$0xff] (%p4177_p5) }
 0x274   : > { %v3390_v45 = vpack.c.bf16 %v2713_v23, %v2712_v56  ;;  %v2726_v55 = vmul.f32 %v2630_v25, %v1958_v58  ;;  %v3134_v5 = vld [vmem:[%s5020_s12 + $0xb8] sm:$0xff] (%p4177_p5)  ;;  %3131 = vst [vmem:[%s5974_s20 + $0x228] sm:$0xff] (%p4177_p5), %v3130_v31  ;;  %3133 = vst [vmem:[%s5974_s20 + $0x230] sm:$0xff] (%p4177_p5), %v3132_v9  ;;  %v3136_v27 = vld [vmem:[%s5020_s12 + $0xc0] sm:$0xff] (%p4177_p5) }
 0x275   : > { %3056 = vst [vmem:[%s5020_s12 + $0x130] sm:$0xff] %v3389_v22  ;;  %3135 = vst [vmem:[%s5974_s20 + $0x238] sm:$0xff] (%p4177_p5), %v3134_v5  ;;  %v3138_v37 = vld [vmem:[%s5020_s12 + $0xc8] sm:$0xff] (%p4177_p5)  ;;  %v3140_v40 = vld [vmem:[%s5020_s12 + $0xd0] sm:$0xff] (%p4177_p5) }
 0x276   : > { %3057 = vst [vmem:[%s5020_s12 + $0x138] sm:$0xff] %v3390_v45  ;;  %3137 = vst [vmem:[%s5974_s20 + $0x300] sm:$0xff] (%p4177_p5), %v3136_v27  ;;  %v3142_v30 = vld [vmem:[%s5020_s12 + $0xd8] sm:$0xff] (%p4177_p5)  ;;  %v3144_v13 = vld [vmem:[%s5020_s12 + $0xe0] sm:$0xff] (%p4177_p5) }
 0x277   : > { %3139 = vst [vmem:[%s5974_s20 + $0x308] sm:$0xff] (%p4177_p5), %v3138_v37  ;;  %3141 = vst [vmem:[%s5974_s20 + $0x310] sm:$0xff] (%p4177_p5), %v3140_v40  ;;  %v3146_v3 = vld [vmem:[%s5020_s12 + $0xe8] sm:$0xff] (%p4177_p5)  ;;  %v3148_v4 = vld [vmem:[%s5020_s12 + $0xf0] sm:$0xff] (%p4177_p5) }
 0x278   : > { %v4097_v51 = vpop.eup %4096  ;;  %3143 = vst [vmem:[%s5974_s20 + $0x318] sm:$0xff] (%p4177_p5), %v3142_v30  ;;  %3145 = vst [vmem:[%s5974_s20 + $0x320] sm:$0xff] (%p4177_p5), %v3144_v13  ;;  %v3150_v14 = vld [vmem:[%s5020_s12 + $0xf8] sm:$0xff] (%p4177_p5)  ;;  %v3152_v53 = vld [vmem:[%s5020_s12 + $0x100] sm:$0xff] (%p4177_p5) }
 0x279   : > { %v2632_v26 = vadd.f32 1.0, %v4097_v51  ;;  %3147 = vst [vmem:[%s5974_s20 + $0x328] sm:$0xff] (%p4177_p5), %v3146_v3  ;;  %3149 = vst [vmem:[%s5974_s20 + $0x330] sm:$0xff] (%p4177_p5), %v3148_v4  ;;  %v3154_v29 = vld [vmem:[%s5020_s12 + $0x108] sm:$0xff] (%p4177_p5)  ;;  %v3156_v10 = vld [vmem:[%s5020_s12 + $0x110] sm:$0xff] (%p4177_p5) }
 0x27a   : > { %v4099_v11 = vpop.eup %4098  ;;  %3151 = vst [vmem:[%s5974_s20 + $0x338] sm:$0xff] (%p4177_p5), %v3150_v14  ;;  %3153 = vst [vmem:[%s5974_s20 + $0x400] sm:$0xff] (%p4177_p5), %v3152_v53  ;;  %v3158_v48 = vld [vmem:[%s5020_s12 + $0x118] sm:$0xff] (%p4177_p5)  ;;  %v3160_v44 = vld [vmem:[%s5020_s12 + $0x120] sm:$0xff] (%p4177_p5) }
 0x27b   : > { %v4101_v33 = vpop.eup %4100  ;;  %v2631_v62 = vadd.f32 1.0, %v4099_v11  ;;  %v2728_v50 = vmul.f32 %v2632_v26, %v1960_v21  ;;  %3155 = vst [vmem:[%s5974_s20 + $0x408] sm:$0xff] (%p4177_p5), %v3154_v29  ;;  %3157 = vst [vmem:[%s5974_s20 + $0x410] sm:$0xff] (%p4177_p5), %v3156_v10  ;;  %v3162_v39 = vld [vmem:[%s5020_s12 + $0x128] sm:$0xff] (%p4177_p5)  ;;  %v3168_v43 = vld [vmem:[%s5020_s12 + $0x140] sm:$0xff] (%p4177_p5) }
 0x27c   : > { %v2633_v1 = vadd.f32 1.0, %v4101_v33  ;;  %3072 = sbr.rel (!%p4177_p5) target bundleno = 651 (0x28b), region = 59  ;;  %3159 = vst [vmem:[%s5974_s20 + $0x418] sm:$0xff] (%p4177_p5), %v3158_v48  ;;  %v3164_v41 = vld [vmem:[%s5020_s12 + $0x130] sm:$0xff] (%p4177_p5)  ;;  %3161 = vst [vmem:[%s5974_s20 + $0x420] sm:$0xff] (%p4177_p5), %v3160_v44  ;;  %v3170_v57 = vld [vmem:[%s5020_s12 + $0x148] sm:$0xff] (%p4177_p5) }
 0x27d   : > { %v2727_v36 = vmul.f32 %v2631_v62, %v1959_v54  ;;  %3163 = vst [vmem:[%s5974_s20 + $0x428] sm:$0xff] (%p4177_p5), %v3162_v39  ;;  %3165 = vst [vmem:[%s5974_s20 + $0x430] sm:$0xff] (%p4177_p5), %v3164_v41  ;;  %v3166_v56 = vld [vmem:[%s5020_s12 + $0x138] sm:$0xff] (%p4177_p5)  ;;  %v3172_v24 = vld [vmem:[%s5020_s12 + $0x150] sm:$0xff] (%p4177_p5) }
 0x27e   : > { %v2729_v16 = vmul.f32 %v2633_v1, %v1961_v19  ;;  %3167 = vst [vmem:[%s5974_s20 + $0x438] sm:$0xff] (%p4177_p5), %v3166_v56  ;;  %3169 = vst [vmem:[%s5974_s20 + $0x500] sm:$0xff] (%p4177_p5), %v3168_v43  ;;  %v3174_v23 = vld [vmem:[%s5020_s12 + $0x158] sm:$0xff] (%p4177_p5)  ;;  %v3176_v22 = vld [vmem:[%s5020_s12 + $0x160] sm:$0xff] (%p4177_p5) }
 0x27f   : > { %v3397_v6 = vpack.c.bf16 %v2727_v36, %v2726_v55  ;;  %3171 = vst [vmem:[%s5974_s20 + $0x508] sm:$0xff] (%p4177_p5), %v3170_v57  ;;  %3173 = vst [vmem:[%s5974_s20 + $0x510] sm:$0xff] (%p4177_p5), %v3172_v24  ;;  %v3178_v0 = vld [vmem:[%s5020_s12 + $0x168] sm:$0xff] (%p4177_p5) }
 0x280   : > { %v3398_v47 = vpack.c.bf16 %v2729_v16, %v2728_v50  ;;  %3175 = vst [vmem:[%s5974_s20 + $0x518] sm:$0xff] (%p4177_p5), %v3174_v23  ;;  %3177 = vst [vmem:[%s5974_s20 + $0x520] sm:$0xff] (%p4177_p5), %v3176_v22 }
 0x281   : > { %3064 = vst [vmem:[%s5020_s12 + $0x170] sm:$0xff] %v3397_v6  ;;  %3179 = vst [vmem:[%s5974_s20 + $0x528] sm:$0xff] (%p4177_p5), %v3178_v0 }
 0x282   : > { %3065 = vst [vmem:[%s5020_s12 + $0x178] sm:$0xff] %v3398_v47 }
 0x288   : > { %v3180_v45 = vld [vmem:[%s5020_s12 + $0x170] sm:$0xff] }
 0x289   : > { %v3182_v25 = vld [vmem:[%s5020_s12 + $0x178] sm:$0xff]  ;;  %3181 = vst [vmem:[%s5974_s20 + $0x530] sm:$0xff] %v3180_v45 }
 0x28a   : > { %3183 = vst [vmem:[%s5974_s20 + $0x538] sm:$0xff] %v3182_v25 }
 0x28b PF: > { %p10_p10 = scmp.ge.s32.totalorder %s4164_s16, 6   ;;  %s6104_s12 = smov %s4120_s13 }
 0x28c   : > { %s6105_s13 = smov %s4175_s19  ;;  %s6106_s14 = smov %s4164_s16 }
 0x28d   :  { %12 = sbr.rel (!%p10_p10) target bundleno = 2 (0x2), region = 113 }

// kernel: forward_pallas.6
= control target key start
LH: loop header
LB: loop body
LE: loop exit
PB: predicated region body
PF: predicated region fallthrough
CT: control target
= control target key end

     0   :  { %s5355_s12 = smov 0   ;;  %s5357_s13 = smov 0   ;;  %s6765_s0 = inlined_call_operand.vmem [shape: bf16[48,1296], index: 0, kind: input, shape index: {}]   ;;  %s6766_s1 = inlined_call_operand.vmem [shape: bf16[1296,1024], index: 1, kind: input, shape index: {}]   ;;  %s6767_s2 = inlined_call_operand.vmem [shape: f32[48,1], index: 2, kind: input, shape index: {}]   ;;  %s6768_s3 = inlined_call_operand.vmem [shape: bf16[48,1024], index: 3, kind: output, shape index: {}]  }
   0x1   :  { %s5359_s14 = smov 0  }
   0x2 LB: > { %s3579_s15 = sadd.s32 4294967295, %s5331_s14   ;;  %s5372_s16 = sadd.s32 1, %s5331_s14   ;;  %s5331_s14 = sphi %s5359_s14, %s6772_s14   ;;  %s5327_s13 = sphi %s5357_s13, %s6771_s13   ;;  %s5323_s12 = sphi %s5355_s12, %s6770_s12  }
   0x3   : > { %s38_s17 = ssub.s32 %s5331_s14, %s5372_s16  ;;  %s41_s18 = sadd.s32 1, %s5327_s13 }
   0x4   : > { %p39_p0 = scmp.eq.s32.totalorder %s38_s17, 0  ;;  %p48_p1 = scmp.ne.s32.totalorder %s5327_s13, %s5323_s12 }
   0x5   : > { %p49_p2 = scmp.eq.s32.totalorder %s5331_s14, 0  ;;  %p99_p3 = scmp.eq.s32.totalorder %s3579_s15, 1 }
   0x6   : > { %s5383_s19 = scalar_select %p39_p0, %s5327_s13, %s41_s18  }
   0x7   : > { %p50_p4 = por %p49_p2, %p48_p1  ;;  %p5385_p5 = por %p99_p3, %p48_p1 }
   0x8   : > { %p3582_p6 = scmp.ge.s32.totalorder %s5331_s14, 2 }
   0xa   : > { %127 = sbr.rel (%p3582_p6) target bundleno = 183 (0xb7), region = 24 }
  0x11   : > { %130 = sbr.rel (!%p50_p4) target bundleno = 183 (0xb7), region = 28  ;;  %s132_s21 = sand.u32 (%p50_p4), 1, %s5327_s13  }
  0x12   : > { %s3614_s22 = sshll.u32 (%p50_p4), %s5331_s14, 4  ;;  %s4744_s23 = smul.u32 (%p50_p4), 2592, %s132_s21 }
  0x13   : > { %s5395_s26 = scalar_lea.vmem (%p50_p4), %s6766_s1, %s3614_s22 }
  0x14   : > { %v150_v0 = vld [vmem:[%s5395_s26] sm:$0xff] (%p50_p4)  ;;  %v152_v1 = vld [vmem:[%s5395_s26 + $0x8] sm:$0xff] (%p50_p4)  ;;  %s5403_s27 = scalar_lea.vmem (%p50_p4), [#allocation2], %s4744_s23 }
  0x15   : > { %v154_v2 = vld [vmem:[%s5395_s26 + $0x20] sm:$0xff] (%p50_p4)  ;;  %v156_v3 = vld [vmem:[%s5395_s26 + $0x28] sm:$0xff] (%p50_p4)  ;;  %151 = vst [vmem:[%s5403_s27] sm:$0xff] (%p50_p4), %v150_v0  ;;  %153 = vst [vmem:[%s5403_s27 + $0x8] sm:$0xff] (%p50_p4), %v152_v1 }
  0x16   : > { %v158_v4 = vld [vmem:[%s5395_s26 + $0x40] sm:$0xff] (%p50_p4)  ;;  %v160_v5 = vld [vmem:[%s5395_s26 + $0x48] sm:$0xff] (%p50_p4)  ;;  %155 = vst [vmem:[%s5403_s27 + $0x10] sm:$0xff] (%p50_p4), %v154_v2  ;;  %157 = vst [vmem:[%s5403_s27 + $0x18] sm:$0xff] (%p50_p4), %v156_v3 }
  0x17   : > { %159 = vst [vmem:[%s5403_s27 + $0x20] sm:$0xff] (%p50_p4), %v158_v4  ;;  %161 = vst [vmem:[%s5403_s27 + $0x28] sm:$0xff] (%p50_p4), %v160_v5  ;;  %v162_v6 = vld [vmem:[%s5395_s26 + $0x60] sm:$0xff] (%p50_p4)  ;;  %v164_v7 = vld [vmem:[%s5395_s26 + $0x68] sm:$0xff] (%p50_p4) }
  0x18   : > { %v166_v8 = vld [vmem:[%s5395_s26 + $0x80] sm:$0xff]  ;;  %163 = vst [vmem:[%s5403_s27 + $0x30] sm:$0xff] %v162_v6  ;;  %165 = vst [vmem:[%s5403_s27 + $0x38] sm:$0xff] %v164_v7  ;;  %v168_v9 = vld [vmem:[%s5395_s26 + $0x88] sm:$0xff] }
  0x19   : > { %167 = vst [vmem:[%s5403_s27 + $0x40] sm:$0xff] %v166_v8  ;;  %v170_v10 = vld [vmem:[%s5395_s26 + $0xa0] sm:$0xff]  ;;  %v172_v11 = vld [vmem:[%s5395_s26 + $0xa8] sm:$0xff]  ;;  %169 = vst [vmem:[%s5403_s27 + $0x48] sm:$0xff] %v168_v9 }
  0x1a   : > { %171 = vst [vmem:[%s5403_s27 + $0x50] sm:$0xff] %v170_v10  ;;  %173 = vst [vmem:[%s5403_s27 + $0x58] sm:$0xff] %v172_v11  ;;  %v174_v12 = vld [vmem:[%s5395_s26 + $0xc0] sm:$0xff]  ;;  %v176_v13 = vld [vmem:[%s5395_s26 + $0xc8] sm:$0xff] }
  0x1b   : > { %v178_v14 = vld [vmem:[%s5395_s26 + $0xe0] sm:$0xff]  ;;  %175 = vst [vmem:[%s5403_s27 + $0x60] sm:$0xff] %v174_v12  ;;  %177 = vst [vmem:[%s5403_s27 + $0x68] sm:$0xff] %v176_v13  ;;  %v180_v15 = vld [vmem:[%s5395_s26 + $0xe8] sm:$0xff] }
  0x1c   : > { %179 = vst [vmem:[%s5403_s27 + $0x70] sm:$0xff] %v178_v14  ;;  %v182_v16 = vld [vmem:[%s5395_s26 + $0x100] sm:$0xff]  ;;  %v184_v17 = vld [vmem:[%s5395_s26 + $0x108] sm:$0xff]  ;;  %181 = vst [vmem:[%s5403_s27 + $0x78] sm:$0xff] %v180_v15 }
  0x1d   : > { %183 = vst [vmem:[%s5403_s27 + $0x80] sm:$0xff] %v182_v16  ;;  %185 = vst [vmem:[%s5403_s27 + $0x88] sm:$0xff] %v184_v17  ;;  %v186_v18 = vld [vmem:[%s5395_s26 + $0x120] sm:$0xff]  ;;  %v188_v19 = vld [vmem:[%s5395_s26 + $0x128] sm:$0xff] }
  0x1e   : > { %v190_v20 = vld [vmem:[%s5395_s26 + $0x140] sm:$0xff]  ;;  %187 = vst [vmem:[%s5403_s27 + $0x90] sm:$0xff] %v186_v18  ;;  %189 = vst [vmem:[%s5403_s27 + $0x98] sm:$0xff] %v188_v19  ;;  %v192_v21 = vld [vmem:[%s5395_s26 + $0x148] sm:$0xff] }
  0x1f   : > { %191 = vst [vmem:[%s5403_s27 + $0xa0] sm:$0xff] %v190_v20  ;;  %v194_v22 = vld [vmem:[%s5395_s26 + $0x160] sm:$0xff]  ;;  %v196_v23 = vld [vmem:[%s5395_s26 + $0x168] sm:$0xff]  ;;  %193 = vst [vmem:[%s5403_s27 + $0xa8] sm:$0xff] %v192_v21 }
  0x20   : > { %195 = vst [vmem:[%s5403_s27 + $0xb0] sm:$0xff] %v194_v22  ;;  %197 = vst [vmem:[%s5403_s27 + $0xb8] sm:$0xff] %v196_v23  ;;  %v198_v24 = vld [vmem:[%s5395_s26 + $0x180] sm:$0xff]  ;;  %v200_v25 = vld [vmem:[%s5395_s26 + $0x188] sm:$0xff] }
  0x21   : > { %v202_v26 = vld [vmem:[%s5395_s26 + $0x1a0] sm:$0xff]  ;;  %199 = vst [vmem:[%s5403_s27 + $0xc0] sm:$0xff] %v198_v24  ;;  %201 = vst [vmem:[%s5403_s27 + $0xc8] sm:$0xff] %v200_v25  ;;  %v204_v27 = vld [vmem:[%s5395_s26 + $0x1a8] sm:$0xff] }
  0x22   : > { %203 = vst [vmem:[%s5403_s27 + $0xd0] sm:$0xff] %v202_v26  ;;  %v206_v28 = vld [vmem:[%s5395_s26 + $0x1c0] sm:$0xff]  ;;  %v208_v29 = vld [vmem:[%s5395_s26 + $0x1c8] sm:$0xff]  ;;  %205 = vst [vmem:[%s5403_s27 + $0xd8] sm:$0xff] %v204_v27 }
  0x23   : > { %207 = vst [vmem:[%s5403_s27 + $0xe0] sm:$0xff] %v206_v28  ;;  %209 = vst [vmem:[%s5403_s27 + $0xe8] sm:$0xff] %v208_v29  ;;  %v210_v30 = vld [vmem:[%s5395_s26 + $0x1e0] sm:$0xff]  ;;  %v212_v31 = vld [vmem:[%s5395_s26 + $0x1e8] sm:$0xff] }
  0x24   : > { %v214_v32 = vld [vmem:[%s5395_s26 + $0x200] sm:$0xff]  ;;  %211 = vst [vmem:[%s5403_s27 + $0xf0] sm:$0xff] %v210_v30  ;;  %213 = vst [vmem:[%s5403_s27 + $0xf8] sm:$0xff] %v212_v31  ;;  %v216_v33 = vld [vmem:[%s5395_s26 + $0x208] sm:$0xff] }
  0x25   : > { %215 = vst [vmem:[%s5403_s27 + $0x100] sm:$0xff] %v214_v32  ;;  %v218_v34 = vld [vmem:[%s5395_s26 + $0x220] sm:$0xff]  ;;  %v220_v35 = vld [vmem:[%s5395_s26 + $0x228] sm:$0xff]  ;;  %217 = vst [vmem:[%s5403_s27 + $0x108] sm:$0xff] %v216_v33 }
  0x26   : > { %219 = vst [vmem:[%s5403_s27 + $0x110] sm:$0xff] %v218_v34  ;;  %221 = vst [vmem:[%s5403_s27 + $0x118] sm:$0xff] %v220_v35  ;;  %v222_v36 = vld [vmem:[%s5395_s26 + $0x240] sm:$0xff]  ;;  %v224_v37 = vld [vmem:[%s5395_s26 + $0x248] sm:$0xff] }
  0x27   : > { %v226_v38 = vld [vmem:[%s5395_s26 + $0x260] sm:$0xff]  ;;  %223 = vst [vmem:[%s5403_s27 + $0x120] sm:$0xff] %v222_v36  ;;  %225 = vst [vmem:[%s5403_s27 + $0x128] sm:$0xff] %v224_v37  ;;  %v228_v39 = vld [vmem:[%s5395_s26 + $0x268] sm:$0xff] }
  0x28   : > { %227 = vst [vmem:[%s5403_s27 + $0x130] sm:$0xff] %v226_v38  ;;  %v230_v40 = vld [vmem:[%s5395_s26 + $0x280] sm:$0xff]  ;;  %v232_v41 = vld [vmem:[%s5395_s26 + $0x288] sm:$0xff]  ;;  %229 = vst [vmem:[%s5403_s27 + $0x138] sm:$0xff] %v228_v39 }
  0x29   : > { %231 = vst [vmem:[%s5403_s27 + $0x140] sm:$0xff] %v230_v40  ;;  %233 = vst [vmem:[%s5403_s27 + $0x148] sm:$0xff] %v232_v41  ;;  %v234_v42 = vld [vmem:[%s5395_s26 + $0x2a0] sm:$0xff]  ;;  %v236_v43 = vld [vmem:[%s5395_s26 + $0x2a8] sm:$0xff] }
  0x2a   : > { %v238_v44 = vld [vmem:[%s5395_s26 + $0x2c0] sm:$0xff]  ;;  %235 = vst [vmem:[%s5403_s27 + $0x150] sm:$0xff] %v234_v42  ;;  %237 = vst [vmem:[%s5403_s27 + $0x158] sm:$0xff] %v236_v43  ;;  %v240_v45 = vld [vmem:[%s5395_s26 + $0x2c8] sm:$0xff] }
  0x2b   : > { %239 = vst [vmem:[%s5403_s27 + $0x160] sm:$0xff] %v238_v44  ;;  %v242_v46 = vld [vmem:[%s5395_s26 + $0x2e0] sm:$0xff]  ;;  %v244_v47 = vld [vmem:[%s5395_s26 + $0x2e8] sm:$0xff]  ;;  %241 = vst [vmem:[%s5403_s27 + $0x168] sm:$0xff] %v240_v45 }
  0x2c   : > { %243 = vst [vmem:[%s5403_s27 + $0x170] sm:$0xff] %v242_v46  ;;  %245 = vst [vmem:[%s5403_s27 + $0x178] sm:$0xff] %v244_v47  ;;  %v246_v48 = vld [vmem:[%s5395_s26 + $0x300] sm:$0xff]  ;;  %v248_v49 = vld [vmem:[%s5395_s26 + $0x308] sm:$0xff] }
  0x2d   : > { %v250_v50 = vld [vmem:[%s5395_s26 + $0x320] sm:$0xff]  ;;  %247 = vst [vmem:[%s5403_s27 + $0x180] sm:$0xff] %v246_v48  ;;  %249 = vst [vmem:[%s5403_s27 + $0x188] sm:$0xff] %v248_v49  ;;  %v252_v51 = vld [vmem:[%s5395_s26 + $0x328] sm:$0xff] }
  0x2e   : > { %251 = vst [vmem:[%s5403_s27 + $0x190] sm:$0xff] %v250_v50  ;;  %v254_v52 = vld [vmem:[%s5395_s26 + $0x340] sm:$0xff]  ;;  %v256_v53 = vld [vmem:[%s5395_s26 + $0x348] sm:$0xff]  ;;  %253 = vst [vmem:[%s5403_s27 + $0x198] sm:$0xff] %v252_v51 }
  0x2f   : > { %255 = vst [vmem:[%s5403_s27 + $0x1a0] sm:$0xff] %v254_v52  ;;  %257 = vst [vmem:[%s5403_s27 + $0x1a8] sm:$0xff] %v256_v53  ;;  %v258_v54 = vld [vmem:[%s5395_s26 + $0x360] sm:$0xff]  ;;  %v260_v55 = vld [vmem:[%s5395_s26 + $0x368] sm:$0xff] }
  0x30   : > { %v262_v56 = vld [vmem:[%s5395_s26 + $0x380] sm:$0xff]  ;;  %259 = vst [vmem:[%s5403_s27 + $0x1b0] sm:$0xff] %v258_v54  ;;  %261 = vst [vmem:[%s5403_s27 + $0x1b8] sm:$0xff] %v260_v55  ;;  %v264_v57 = vld [vmem:[%s5395_s26 + $0x388] sm:$0xff] }
  0x31   : > { %263 = vst [vmem:[%s5403_s27 + $0x1c0] sm:$0xff] %v262_v56  ;;  %v266_v58 = vld [vmem:[%s5395_s26 + $0x3a0] sm:$0xff]  ;;  %v268_v59 = vld [vmem:[%s5395_s26 + $0x3a8] sm:$0xff]  ;;  %265 = vst [vmem:[%s5403_s27 + $0x1c8] sm:$0xff] %v264_v57 }
  0x32   : > { %267 = vst [vmem:[%s5403_s27 + $0x1d0] sm:$0xff] %v266_v58  ;;  %269 = vst [vmem:[%s5403_s27 + $0x1d8] sm:$0xff] %v268_v59  ;;  %v270_v60 = vld [vmem:[%s5395_s26 + $0x3c0] sm:$0xff]  ;;  %v272_v61 = vld [vmem:[%s5395_s26 + $0x3c8] sm:$0xff] }
  0x33   : > { %v274_v62 = vld [vmem:[%s5395_s26 + $0x3e0] sm:$0xff]  ;;  %271 = vst [vmem:[%s5403_s27 + $0x1e0] sm:$0xff] %v270_v60  ;;  %273 = vst [vmem:[%s5403_s27 + $0x1e8] sm:$0xff] %v272_v61  ;;  %v276_v63 = vld [vmem:[%s5395_s26 + $0x3e8] sm:$0xff] }
  0x34   : > { %275 = vst [vmem:[%s5403_s27 + $0x1f0] sm:$0xff] %v274_v62  ;;  %v278_v0 = vld [vmem:[%s5395_s26 + $0x400] sm:$0xff]  ;;  %v280_v1 = vld [vmem:[%s5395_s26 + $0x408] sm:$0xff]  ;;  %277 = vst [vmem:[%s5403_s27 + $0x1f8] sm:$0xff] %v276_v63 }
  0x35   : > { %279 = vst [vmem:[%s5403_s27 + $0x200] sm:$0xff] %v278_v0  ;;  %281 = vst [vmem:[%s5403_s27 + $0x208] sm:$0xff] %v280_v1  ;;  %v282_v2 = vld [vmem:[%s5395_s26 + $0x420] sm:$0xff]  ;;  %v284_v3 = vld [vmem:[%s5395_s26 + $0x428] sm:$0xff] }
  0x36   : > { %v286_v4 = vld [vmem:[%s5395_s26 + $0x440] sm:$0xff]  ;;  %283 = vst [vmem:[%s5403_s27 + $0x210] sm:$0xff] %v282_v2  ;;  %285 = vst [vmem:[%s5403_s27 + $0x218] sm:$0xff] %v284_v3  ;;  %v288_v5 = vld [vmem:[%s5395_s26 + $0x448] sm:$0xff] }
  0x37   : > { %287 = vst [vmem:[%s5403_s27 + $0x220] sm:$0xff] %v286_v4  ;;  %v290_v6 = vld [vmem:[%s5395_s26 + $0x460] sm:$0xff]  ;;  %v292_v7 = vld [vmem:[%s5395_s26 + $0x468] sm:$0xff]  ;;  %289 = vst [vmem:[%s5403_s27 + $0x228] sm:$0xff] %v288_v5 }
  0x38   : > { %291 = vst [vmem:[%s5403_s27 + $0x230] sm:$0xff] %v290_v6  ;;  %293 = vst [vmem:[%s5403_s27 + $0x238] sm:$0xff] %v292_v7  ;;  %v294_v8 = vld [vmem:[%s5395_s26 + $0x480] sm:$0xff]  ;;  %v296_v9 = vld [vmem:[%s5395_s26 + $0x488] sm:$0xff] }
  0x39   : > { %v298_v10 = vld [vmem:[%s5395_s26 + $0x4a0] sm:$0xff]  ;;  %295 = vst [vmem:[%s5403_s27 + $0x240] sm:$0xff] %v294_v8  ;;  %297 = vst [vmem:[%s5403_s27 + $0x248] sm:$0xff] %v296_v9  ;;  %v300_v11 = vld [vmem:[%s5395_s26 + $0x4a8] sm:$0xff] }
  0x3a   : > { %299 = vst [vmem:[%s5403_s27 + $0x250] sm:$0xff] %v298_v10  ;;  %v302_v12 = vld [vmem:[%s5395_s26 + $0x4c0] sm:$0xff]  ;;  %v304_v13 = vld [vmem:[%s5395_s26 + $0x4c8] sm:$0xff]  ;;  %301 = vst [vmem:[%s5403_s27 + $0x258] sm:$0xff] %v300_v11 }
  0x3b   : > { %303 = vst [vmem:[%s5403_s27 + $0x260] sm:$0xff] %v302_v12  ;;  %305 = vst [vmem:[%s5403_s27 + $0x268] sm:$0xff] %v304_v13  ;;  %v306_v14 = vld [vmem:[%s5395_s26 + $0x4e0] sm:$0xff]  ;;  %v308_v15 = vld [vmem:[%s5395_s26 + $0x4e8] sm:$0xff] }
  0x3c   : > { %v310_v16 = vld [vmem:[%s5395_s26 + $0x500] sm:$0xff]  ;;  %307 = vst [vmem:[%s5403_s27 + $0x270] sm:$0xff] %v306_v14  ;;  %309 = vst [vmem:[%s5403_s27 + $0x278] sm:$0xff] %v308_v15  ;;  %v312_v17 = vld [vmem:[%s5395_s26 + $0x508] sm:$0xff] }
  0x3d   : > { %311 = vst [vmem:[%s5403_s27 + $0x280] sm:$0xff] %v310_v16  ;;  %v314_v18 = vld [vmem:[%s5395_s26 + $0x520] sm:$0xff]  ;;  %v316_v19 = vld [vmem:[%s5395_s26 + $0x528] sm:$0xff]  ;;  %313 = vst [vmem:[%s5403_s27 + $0x288] sm:$0xff] %v312_v17 }
  0x3e   : > { %315 = vst [vmem:[%s5403_s27 + $0x290] sm:$0xff] %v314_v18  ;;  %317 = vst [vmem:[%s5403_s27 + $0x298] sm:$0xff] %v316_v19  ;;  %v318_v20 = vld [vmem:[%s5395_s26 + $0x540] sm:$0xff]  ;;  %v320_v21 = vld [vmem:[%s5395_s26 + $0x548] sm:$0xff] }
  0x3f   : > { %v322_v22 = vld [vmem:[%s5395_s26 + $0x560] sm:$0xff]  ;;  %319 = vst [vmem:[%s5403_s27 + $0x2a0] sm:$0xff] %v318_v20  ;;  %321 = vst [vmem:[%s5403_s27 + $0x2a8] sm:$0xff] %v320_v21  ;;  %v324_v23 = vld [vmem:[%s5395_s26 + $0x568] sm:$0xff] }
  0x40   : > { %323 = vst [vmem:[%s5403_s27 + $0x2b0] sm:$0xff] %v322_v22  ;;  %v326_v24 = vld [vmem:[%s5395_s26 + $0x580] sm:$0xff]  ;;  %v328_v25 = vld [vmem:[%s5395_s26 + $0x588] sm:$0xff]  ;;  %325 = vst [vmem:[%s5403_s27 + $0x2b8] sm:$0xff] %v324_v23 }
  0x41   : > { %327 = vst [vmem:[%s5403_s27 + $0x2c0] sm:$0xff] %v326_v24  ;;  %329 = vst [vmem:[%s5403_s27 + $0x2c8] sm:$0xff] %v328_v25  ;;  %v330_v26 = vld [vmem:[%s5395_s26 + $0x5a0] sm:$0xff]  ;;  %v332_v27 = vld [vmem:[%s5395_s26 + $0x5a8] sm:$0xff] }
  0x42   : > { %v334_v28 = vld [vmem:[%s5395_s26 + $0x5c0] sm:$0xff]  ;;  %331 = vst [vmem:[%s5403_s27 + $0x2d0] sm:$0xff] %v330_v26  ;;  %333 = vst [vmem:[%s5403_s27 + $0x2d8] sm:$0xff] %v332_v27  ;;  %v336_v29 = vld [vmem:[%s5395_s26 + $0x5c8] sm:$0xff] }
  0x43   : > { %335 = vst [vmem:[%s5403_s27 + $0x2e0] sm:$0xff] %v334_v28  ;;  %v338_v30 = vld [vmem:[%s5395_s26 + $0x5e0] sm:$0xff]  ;;  %v340_v31 = vld [vmem:[%s5395_s26 + $0x5e8] sm:$0xff]  ;;  %337 = vst [vmem:[%s5403_s27 + $0x2e8] sm:$0xff] %v336_v29 }
  0x44   : > { %339 = vst [vmem:[%s5403_s27 + $0x2f0] sm:$0xff] %v338_v30  ;;  %341 = vst [vmem:[%s5403_s27 + $0x2f8] sm:$0xff] %v340_v31  ;;  %v342_v32 = vld [vmem:[%s5395_s26 + $0x600] sm:$0xff]  ;;  %v344_v33 = vld [vmem:[%s5395_s26 + $0x608] sm:$0xff] }
  0x45   : > { %v346_v34 = vld [vmem:[%s5395_s26 + $0x620] sm:$0xff]  ;;  %343 = vst [vmem:[%s5403_s27 + $0x300] sm:$0xff] %v342_v32  ;;  %345 = vst [vmem:[%s5403_s27 + $0x308] sm:$0xff] %v344_v33  ;;  %v348_v35 = vld [vmem:[%s5395_s26 + $0x628] sm:$0xff] }
  0x46   : > { %347 = vst [vmem:[%s5403_s27 + $0x310] sm:$0xff] %v346_v34  ;;  %v350_v36 = vld [vmem:[%s5395_s26 + $0x640] sm:$0xff]  ;;  %v352_v37 = vld [vmem:[%s5395_s26 + $0x648] sm:$0xff]  ;;  %349 = vst [vmem:[%s5403_s27 + $0x318] sm:$0xff] %v348_v35 }
  0x47   : > { %351 = vst [vmem:[%s5403_s27 + $0x320] sm:$0xff] %v350_v36  ;;  %353 = vst [vmem:[%s5403_s27 + $0x328] sm:$0xff] %v352_v37  ;;  %v354_v38 = vld [vmem:[%s5395_s26 + $0x660] sm:$0xff]  ;;  %v356_v39 = vld [vmem:[%s5395_s26 + $0x668] sm:$0xff] }
  0x48   : > { %v358_v40 = vld [vmem:[%s5395_s26 + $0x680] sm:$0xff]  ;;  %355 = vst [vmem:[%s5403_s27 + $0x330] sm:$0xff] %v354_v38  ;;  %357 = vst [vmem:[%s5403_s27 + $0x338] sm:$0xff] %v356_v39  ;;  %v360_v41 = vld [vmem:[%s5395_s26 + $0x688] sm:$0xff] }
  0x49   : > { %359 = vst [vmem:[%s5403_s27 + $0x340] sm:$0xff] %v358_v40  ;;  %v362_v42 = vld [vmem:[%s5395_s26 + $0x6a0] sm:$0xff]  ;;  %v364_v43 = vld [vmem:[%s5395_s26 + $0x6a8] sm:$0xff]  ;;  %361 = vst [vmem:[%s5403_s27 + $0x348] sm:$0xff] %v360_v41 }
  0x4a   : > { %363 = vst [vmem:[%s5403_s27 + $0x350] sm:$0xff] %v362_v42  ;;  %365 = vst [vmem:[%s5403_s27 + $0x358] sm:$0xff] %v364_v43  ;;  %v366_v44 = vld [vmem:[%s5395_s26 + $0x6c0] sm:$0xff]  ;;  %v368_v45 = vld [vmem:[%s5395_s26 + $0x6c8] sm:$0xff] }
  0x4b   : > { %v370_v46 = vld [vmem:[%s5395_s26 + $0x6e0] sm:$0xff]  ;;  %367 = vst [vmem:[%s5403_s27 + $0x360] sm:$0xff] %v366_v44  ;;  %369 = vst [vmem:[%s5403_s27 + $0x368] sm:$0xff] %v368_v45  ;;  %v372_v47 = vld [vmem:[%s5395_s26 + $0x6e8] sm:$0xff] }
  0x4c   : > { %371 = vst [vmem:[%s5403_s27 + $0x370] sm:$0xff] %v370_v46  ;;  %v374_v48 = vld [vmem:[%s5395_s26 + $0x700] sm:$0xff]  ;;  %v376_v49 = vld [vmem:[%s5395_s26 + $0x708] sm:$0xff]  ;;  %373 = vst [vmem:[%s5403_s27 + $0x378] sm:$0xff] %v372_v47 }
  0x4d   : > { %375 = vst [vmem:[%s5403_s27 + $0x380] sm:$0xff] %v374_v48  ;;  %377 = vst [vmem:[%s5403_s27 + $0x388] sm:$0xff] %v376_v49  ;;  %v378_v50 = vld [vmem:[%s5395_s26 + $0x720] sm:$0xff]  ;;  %v380_v51 = vld [vmem:[%s5395_s26 + $0x728] sm:$0xff] }
  0x4e   : > { %v382_v52 = vld [vmem:[%s5395_s26 + $0x740] sm:$0xff]  ;;  %379 = vst [vmem:[%s5403_s27 + $0x390] sm:$0xff] %v378_v50  ;;  %381 = vst [vmem:[%s5403_s27 + $0x398] sm:$0xff] %v380_v51  ;;  %v384_v53 = vld [vmem:[%s5395_s26 + $0x748] sm:$0xff] }
  0x4f   : > { %383 = vst [vmem:[%s5403_s27 + $0x3a0] sm:$0xff] %v382_v52  ;;  %v386_v54 = vld [vmem:[%s5395_s26 + $0x760] sm:$0xff]  ;;  %v388_v55 = vld [vmem:[%s5395_s26 + $0x768] sm:$0xff]  ;;  %385 = vst [vmem:[%s5403_s27 + $0x3a8] sm:$0xff] %v384_v53 }
  0x50   : > { %387 = vst [vmem:[%s5403_s27 + $0x3b0] sm:$0xff] %v386_v54  ;;  %389 = vst [vmem:[%s5403_s27 + $0x3b8] sm:$0xff] %v388_v55  ;;  %v390_v56 = vld [vmem:[%s5395_s26 + $0x780] sm:$0xff]  ;;  %v392_v57 = vld [vmem:[%s5395_s26 + $0x788] sm:$0xff] }
  0x51   : > { %v394_v58 = vld [vmem:[%s5395_s26 + $0x7a0] sm:$0xff]  ;;  %391 = vst [vmem:[%s5403_s27 + $0x3c0] sm:$0xff] %v390_v56  ;;  %393 = vst [vmem:[%s5403_s27 + $0x3c8] sm:$0xff] %v392_v57  ;;  %v396_v59 = vld [vmem:[%s5395_s26 + $0x7a8] sm:$0xff] }
  0x52   : > { %395 = vst [vmem:[%s5403_s27 + $0x3d0] sm:$0xff] %v394_v58  ;;  %v398_v60 = vld [vmem:[%s5395_s26 + $0x7c0] sm:$0xff]  ;;  %v400_v61 = vld [vmem:[%s5395_s26 + $0x7c8] sm:$0xff]  ;;  %397 = vst [vmem:[%s5403_s27 + $0x3d8] sm:$0xff] %v396_v59 }
  0x53   : > { %399 = vst [vmem:[%s5403_s27 + $0x3e0] sm:$0xff] %v398_v60  ;;  %401 = vst [vmem:[%s5403_s27 + $0x3e8] sm:$0xff] %v400_v61  ;;  %v402_v62 = vld [vmem:[%s5395_s26 + $0x7e0] sm:$0xff]  ;;  %v404_v63 = vld [vmem:[%s5395_s26 + $0x7e8] sm:$0xff] }
  0x54   : > { %v406_v0 = vld [vmem:[%s5395_s26 + $0x800] sm:$0xff]  ;;  %403 = vst [vmem:[%s5403_s27 + $0x3f0] sm:$0xff] %v402_v62  ;;  %405 = vst [vmem:[%s5403_s27 + $0x3f8] sm:$0xff] %v404_v63  ;;  %v408_v1 = vld [vmem:[%s5395_s26 + $0x808] sm:$0xff] }
  0x55   : > { %407 = vst [vmem:[%s5403_s27 + $0x400] sm:$0xff] %v406_v0  ;;  %v410_v2 = vld [vmem:[%s5395_s26 + $0x820] sm:$0xff]  ;;  %v412_v3 = vld [vmem:[%s5395_s26 + $0x828] sm:$0xff]  ;;  %409 = vst [vmem:[%s5403_s27 + $0x408] sm:$0xff] %v408_v1 }
  0x56   : > { %411 = vst [vmem:[%s5403_s27 + $0x410] sm:$0xff] %v410_v2  ;;  %413 = vst [vmem:[%s5403_s27 + $0x418] sm:$0xff] %v412_v3  ;;  %v414_v4 = vld [vmem:[%s5395_s26 + $0x840] sm:$0xff]  ;;  %v416_v5 = vld [vmem:[%s5395_s26 + $0x848] sm:$0xff] }
  0x57   : > { %v418_v6 = vld [vmem:[%s5395_s26 + $0x860] sm:$0xff]  ;;  %415 = vst [vmem:[%s5403_s27 + $0x420] sm:$0xff] %v414_v4  ;;  %417 = vst [vmem:[%s5403_s27 + $0x428] sm:$0xff] %v416_v5  ;;  %v420_v7 = vld [vmem:[%s5395_s26 + $0x868] sm:$0xff] }
  0x58   : > { %419 = vst [vmem:[%s5403_s27 + $0x430] sm:$0xff] %v418_v6  ;;  %v422_v8 = vld [vmem:[%s5395_s26 + $0x880] sm:$0xff]  ;;  %v424_v9 = vld [vmem:[%s5395_s26 + $0x888] sm:$0xff]  ;;  %421 = vst [vmem:[%s5403_s27 + $0x438] sm:$0xff] %v420_v7 }
  0x59   : > { %423 = vst [vmem:[%s5403_s27 + $0x440] sm:$0xff] %v422_v8  ;;  %425 = vst [vmem:[%s5403_s27 + $0x448] sm:$0xff] %v424_v9  ;;  %v426_v10 = vld [vmem:[%s5395_s26 + $0x8a0] sm:$0xff]  ;;  %v428_v11 = vld [vmem:[%s5395_s26 + $0x8a8] sm:$0xff] }
  0x5a   : > { %v430_v12 = vld [vmem:[%s5395_s26 + $0x8c0] sm:$0xff]  ;;  %427 = vst [vmem:[%s5403_s27 + $0x450] sm:$0xff] %v426_v10  ;;  %429 = vst [vmem:[%s5403_s27 + $0x458] sm:$0xff] %v428_v11  ;;  %v432_v13 = vld [vmem:[%s5395_s26 + $0x8c8] sm:$0xff] }
  0x5b   : > { %431 = vst [vmem:[%s5403_s27 + $0x460] sm:$0xff] %v430_v12  ;;  %v434_v14 = vld [vmem:[%s5395_s26 + $0x8e0] sm:$0xff]  ;;  %v436_v15 = vld [vmem:[%s5395_s26 + $0x8e8] sm:$0xff]  ;;  %433 = vst [vmem:[%s5403_s27 + $0x468] sm:$0xff] %v432_v13 }
  0x5c   : > { %435 = vst [vmem:[%s5403_s27 + $0x470] sm:$0xff] %v434_v14  ;;  %437 = vst [vmem:[%s5403_s27 + $0x478] sm:$0xff] %v436_v15  ;;  %v438_v16 = vld [vmem:[%s5395_s26 + $0x900] sm:$0xff]  ;;  %v440_v17 = vld [vmem:[%s5395_s26 + $0x908] sm:$0xff] }
  0x5d   : > { %v442_v18 = vld [vmem:[%s5395_s26 + $0x920] sm:$0xff]  ;;  %439 = vst [vmem:[%s5403_s27 + $0x480] sm:$0xff] %v438_v16  ;;  %441 = vst [vmem:[%s5403_s27 + $0x488] sm:$0xff] %v440_v17  ;;  %v444_v19 = vld [vmem:[%s5395_s26 + $0x928] sm:$0xff] }
  0x5e   : > { %443 = vst [vmem:[%s5403_s27 + $0x490] sm:$0xff] %v442_v18  ;;  %v446_v20 = vld [vmem:[%s5395_s26 + $0x940] sm:$0xff]  ;;  %v448_v21 = vld [vmem:[%s5395_s26 + $0x948] sm:$0xff]  ;;  %445 = vst [vmem:[%s5403_s27 + $0x498] sm:$0xff] %v444_v19 }
  0x5f   : > { %447 = vst [vmem:[%s5403_s27 + $0x4a0] sm:$0xff] %v446_v20  ;;  %449 = vst [vmem:[%s5403_s27 + $0x4a8] sm:$0xff] %v448_v21  ;;  %v450_v22 = vld [vmem:[%s5395_s26 + $0x960] sm:$0xff]  ;;  %v452_v23 = vld [vmem:[%s5395_s26 + $0x968] sm:$0xff] }
  0x60   : > { %v454_v24 = vld [vmem:[%s5395_s26 + $0x980] sm:$0xff]  ;;  %451 = vst [vmem:[%s5403_s27 + $0x4b0] sm:$0xff] %v450_v22  ;;  %453 = vst [vmem:[%s5403_s27 + $0x4b8] sm:$0xff] %v452_v23  ;;  %v456_v25 = vld [vmem:[%s5395_s26 + $0x988] sm:$0xff] }
  0x61   : > { %455 = vst [vmem:[%s5403_s27 + $0x4c0] sm:$0xff] %v454_v24  ;;  %v458_v26 = vld [vmem:[%s5395_s26 + $0x9a0] sm:$0xff]  ;;  %v460_v27 = vld [vmem:[%s5395_s26 + $0x9a8] sm:$0xff]  ;;  %457 = vst [vmem:[%s5403_s27 + $0x4c8] sm:$0xff] %v456_v25 }
  0x62   : > { %459 = vst [vmem:[%s5403_s27 + $0x4d0] sm:$0xff] %v458_v26  ;;  %461 = vst [vmem:[%s5403_s27 + $0x4d8] sm:$0xff] %v460_v27  ;;  %v462_v28 = vld [vmem:[%s5395_s26 + $0x9c0] sm:$0xff]  ;;  %v464_v29 = vld [vmem:[%s5395_s26 + $0x9c8] sm:$0xff] }
  0x63   : > { %v466_v30 = vld [vmem:[%s5395_s26 + $0x9e0] sm:$0xff]  ;;  %463 = vst [vmem:[%s5403_s27 + $0x4e0] sm:$0xff] %v462_v28  ;;  %465 = vst [vmem:[%s5403_s27 + $0x4e8] sm:$0xff] %v464_v29  ;;  %v468_v31 = vld [vmem:[%s5395_s26 + $0x9e8] sm:$0xff] }
  0x64   : > { %467 = vst [vmem:[%s5403_s27 + $0x4f0] sm:$0xff] %v466_v30  ;;  %v470_v32 = vld [vmem:[%s5395_s26 + $0xa00] sm:$0xff]  ;;  %v472_v33 = vld [vmem:[%s5395_s26 + $0xa08] sm:$0xff]  ;;  %469 = vst [vmem:[%s5403_s27 + $0x4f8] sm:$0xff] %v468_v31 }
  0x65   : > { %471 = vst [vmem:[%s5403_s27 + $0x500] sm:$0xff] %v470_v32  ;;  %473 = vst [vmem:[%s5403_s27 + $0x508] sm:$0xff] %v472_v33  ;;  %v474_v34 = vld [vmem:[%s5395_s26 + $0xa20] sm:$0xff]  ;;  %v476_v35 = vld [vmem:[%s5395_s26 + $0xa28] sm:$0xff] }
  0x66   : > { %v478_v36 = vld [vmem:[%s5395_s26 + $0xa40] sm:$0xff]  ;;  %475 = vst [vmem:[%s5403_s27 + $0x510] sm:$0xff] %v474_v34  ;;  %477 = vst [vmem:[%s5403_s27 + $0x518] sm:$0xff] %v476_v35  ;;  %v480_v37 = vld [vmem:[%s5395_s26 + $0xa48] sm:$0xff] }
  0x67   : > { %479 = vst [vmem:[%s5403_s27 + $0x520] sm:$0xff] %v478_v36  ;;  %v482_v38 = vld [vmem:[%s5395_s26 + $0xa60] sm:$0xff]  ;;  %v484_v39 = vld [vmem:[%s5395_s26 + $0xa68] sm:$0xff]  ;;  %481 = vst [vmem:[%s5403_s27 + $0x528] sm:$0xff] %v480_v37 }
  0x68   : > { %483 = vst [vmem:[%s5403_s27 + $0x530] sm:$0xff] %v482_v38  ;;  %485 = vst [vmem:[%s5403_s27 + $0x538] sm:$0xff] %v484_v39  ;;  %v486_v40 = vld [vmem:[%s5395_s26 + $0xa80] sm:$0xff]  ;;  %v488_v41 = vld [vmem:[%s5395_s26 + $0xa88] sm:$0xff] }
  0x69   : > { %v490_v42 = vld [vmem:[%s5395_s26 + $0xaa0] sm:$0xff]  ;;  %487 = vst [vmem:[%s5403_s27 + $0x540] sm:$0xff] %v486_v40  ;;  %489 = vst [vmem:[%s5403_s27 + $0x548] sm:$0xff] %v488_v41  ;;  %v492_v43 = vld [vmem:[%s5395_s26 + $0xaa8] sm:$0xff] }
  0x6a   : > { %491 = vst [vmem:[%s5403_s27 + $0x550] sm:$0xff] %v490_v42  ;;  %v494_v44 = vld [vmem:[%s5395_s26 + $0xac0] sm:$0xff]  ;;  %v496_v45 = vld [vmem:[%s5395_s26 + $0xac8] sm:$0xff]  ;;  %493 = vst [vmem:[%s5403_s27 + $0x558] sm:$0xff] %v492_v43 }
  0x6b   : > { %495 = vst [vmem:[%s5403_s27 + $0x560] sm:$0xff] %v494_v44  ;;  %497 = vst [vmem:[%s5403_s27 + $0x568] sm:$0xff] %v496_v45  ;;  %v498_v46 = vld [vmem:[%s5395_s26 + $0xae0] sm:$0xff]  ;;  %v500_v47 = vld [vmem:[%s5395_s26 + $0xae8] sm:$0xff] }
  0x6c   : > { %v502_v48 = vld [vmem:[%s5395_s26 + $0xb00] sm:$0xff]  ;;  %499 = vst [vmem:[%s5403_s27 + $0x570] sm:$0xff] %v498_v46  ;;  %501 = vst [vmem:[%s5403_s27 + $0x578] sm:$0xff] %v500_v47  ;;  %v504_v49 = vld [vmem:[%s5395_s26 + $0xb08] sm:$0xff] }
  0x6d   : > { %503 = vst [vmem:[%s5403_s27 + $0x580] sm:$0xff] %v502_v48  ;;  %v506_v50 = vld [vmem:[%s5395_s26 + $0xb20] sm:$0xff]  ;;  %v508_v51 = vld [vmem:[%s5395_s26 + $0xb28] sm:$0xff]  ;;  %505 = vst [vmem:[%s5403_s27 + $0x588] sm:$0xff] %v504_v49 }
  0x6e   : > { %507 = vst [vmem:[%s5403_s27 + $0x590] sm:$0xff] %v506_v50  ;;  %509 = vst [vmem:[%s5403_s27 + $0x598] sm:$0xff] %v508_v51  ;;  %v510_v52 = vld [vmem:[%s5395_s26 + $0xb40] sm:$0xff]  ;;  %v512_v53 = vld [vmem:[%s5395_s26 + $0xb48] sm:$0xff] }
  0x6f   : > { %v514_v54 = vld [vmem:[%s5395_s26 + $0xb60] sm:$0xff]  ;;  %511 = vst [vmem:[%s5403_s27 + $0x5a0] sm:$0xff] %v510_v52  ;;  %513 = vst [vmem:[%s5403_s27 + $0x5a8] sm:$0xff] %v512_v53  ;;  %v516_v55 = vld [vmem:[%s5395_s26 + $0xb68] sm:$0xff] }
  0x70   : > { %515 = vst [vmem:[%s5403_s27 + $0x5b0] sm:$0xff] %v514_v54  ;;  %v518_v56 = vld [vmem:[%s5395_s26 + $0xb80] sm:$0xff]  ;;  %v520_v57 = vld [vmem:[%s5395_s26 + $0xb88] sm:$0xff]  ;;  %517 = vst [vmem:[%s5403_s27 + $0x5b8] sm:$0xff] %v516_v55 }
  0x71   : > { %519 = vst [vmem:[%s5403_s27 + $0x5c0] sm:$0xff] %v518_v56  ;;  %521 = vst [vmem:[%s5403_s27 + $0x5c8] sm:$0xff] %v520_v57  ;;  %v522_v58 = vld [vmem:[%s5395_s26 + $0xba0] sm:$0xff]  ;;  %v524_v59 = vld [vmem:[%s5395_s26 + $0xba8] sm:$0xff] }
  0x72   : > { %v526_v60 = vld [vmem:[%s5395_s26 + $0xbc0] sm:$0xff]  ;;  %523 = vst [vmem:[%s5403_s27 + $0x5d0] sm:$0xff] %v522_v58  ;;  %525 = vst [vmem:[%s5403_s27 + $0x5d8] sm:$0xff] %v524_v59  ;;  %v528_v61 = vld [vmem:[%s5395_s26 + $0xbc8] sm:$0xff] }
  0x73   : > { %527 = vst [vmem:[%s5403_s27 + $0x5e0] sm:$0xff] %v526_v60  ;;  %v530_v62 = vld [vmem:[%s5395_s26 + $0xbe0] sm:$0xff]  ;;  %v532_v63 = vld [vmem:[%s5395_s26 + $0xbe8] sm:$0xff]  ;;  %529 = vst [vmem:[%s5403_s27 + $0x5e8] sm:$0xff] %v528_v61 }
  0x74   : > { %531 = vst [vmem:[%s5403_s27 + $0x5f0] sm:$0xff] %v530_v62  ;;  %533 = vst [vmem:[%s5403_s27 + $0x5f8] sm:$0xff] %v532_v63  ;;  %v534_v0 = vld [vmem:[%s5395_s26 + $0xc00] sm:$0xff]  ;;  %v536_v1 = vld [vmem:[%s5395_s26 + $0xc08] sm:$0xff] }
  0x75   : > { %v538_v2 = vld [vmem:[%s5395_s26 + $0xc20] sm:$0xff]  ;;  %535 = vst [vmem:[%s5403_s27 + $0x600] sm:$0xff] %v534_v0  ;;  %537 = vst [vmem:[%s5403_s27 + $0x608] sm:$0xff] %v536_v1  ;;  %v540_v3 = vld [vmem:[%s5395_s26 + $0xc28] sm:$0xff] }
  0x76   : > { %539 = vst [vmem:[%s5403_s27 + $0x610] sm:$0xff] %v538_v2  ;;  %v542_v4 = vld [vmem:[%s5395_s26 + $0xc40] sm:$0xff]  ;;  %v544_v5 = vld [vmem:[%s5395_s26 + $0xc48] sm:$0xff]  ;;  %541 = vst [vmem:[%s5403_s27 + $0x618] sm:$0xff] %v540_v3 }
  0x77   : > { %543 = vst [vmem:[%s5403_s27 + $0x620] sm:$0xff] %v542_v4  ;;  %545 = vst [vmem:[%s5403_s27 + $0x628] sm:$0xff] %v544_v5  ;;  %v546_v6 = vld [vmem:[%s5395_s26 + $0xc60] sm:$0xff]  ;;  %v548_v7 = vld [vmem:[%s5395_s26 + $0xc68] sm:$0xff] }
  0x78   : > { %v550_v8 = vld [vmem:[%s5395_s26 + $0xc80] sm:$0xff]  ;;  %547 = vst [vmem:[%s5403_s27 + $0x630] sm:$0xff] %v546_v6  ;;  %549 = vst [vmem:[%s5403_s27 + $0x638] sm:$0xff] %v548_v7  ;;  %v552_v9 = vld [vmem:[%s5395_s26 + $0xc88] sm:$0xff] }
  0x79   : > { %551 = vst [vmem:[%s5403_s27 + $0x640] sm:$0xff] %v550_v8  ;;  %v554_v10 = vld [vmem:[%s5395_s26 + $0xca0] sm:$0xff]  ;;  %v556_v11 = vld [vmem:[%s5395_s26 + $0xca8] sm:$0xff]  ;;  %553 = vst [vmem:[%s5403_s27 + $0x648] sm:$0xff] %v552_v9 }
  0x7a   : > { %555 = vst [vmem:[%s5403_s27 + $0x650] sm:$0xff] %v554_v10  ;;  %557 = vst [vmem:[%s5403_s27 + $0x658] sm:$0xff] %v556_v11  ;;  %v558_v12 = vld [vmem:[%s5395_s26 + $0xcc0] sm:$0xff]  ;;  %v560_v13 = vld [vmem:[%s5395_s26 + $0xcc8] sm:$0xff] }
  0x7b   : > { %v562_v14 = vld [vmem:[%s5395_s26 + $0xce0] sm:$0xff]  ;;  %559 = vst [vmem:[%s5403_s27 + $0x660] sm:$0xff] %v558_v12  ;;  %561 = vst [vmem:[%s5403_s27 + $0x668] sm:$0xff] %v560_v13  ;;  %v564_v15 = vld [vmem:[%s5395_s26 + $0xce8] sm:$0xff] }
  0x7c   : > { %563 = vst [vmem:[%s5403_s27 + $0x670] sm:$0xff] %v562_v14  ;;  %v566_v16 = vld [vmem:[%s5395_s26 + $0xd00] sm:$0xff]  ;;  %v568_v17 = vld [vmem:[%s5395_s26 + $0xd08] sm:$0xff]  ;;  %565 = vst [vmem:[%s5403_s27 + $0x678] sm:$0xff] %v564_v15 }
  0x7d   : > { %567 = vst [vmem:[%s5403_s27 + $0x680] sm:$0xff] %v566_v16  ;;  %569 = vst [vmem:[%s5403_s27 + $0x688] sm:$0xff] %v568_v17  ;;  %v570_v18 = vld [vmem:[%s5395_s26 + $0xd20] sm:$0xff]  ;;  %v572_v19 = vld [vmem:[%s5395_s26 + $0xd28] sm:$0xff] }
  0x7e   : > { %v574_v20 = vld [vmem:[%s5395_s26 + $0xd40] sm:$0xff]  ;;  %571 = vst [vmem:[%s5403_s27 + $0x690] sm:$0xff] %v570_v18  ;;  %573 = vst [vmem:[%s5403_s27 + $0x698] sm:$0xff] %v572_v19  ;;  %v576_v21 = vld [vmem:[%s5395_s26 + $0xd48] sm:$0xff] }
  0x7f   : > { %575 = vst [vmem:[%s5403_s27 + $0x6a0] sm:$0xff] %v574_v20  ;;  %v578_v22 = vld [vmem:[%s5395_s26 + $0xd60] sm:$0xff]  ;;  %v580_v23 = vld [vmem:[%s5395_s26 + $0xd68] sm:$0xff]  ;;  %577 = vst [vmem:[%s5403_s27 + $0x6a8] sm:$0xff] %v576_v21 }
  0x80   : > { %579 = vst [vmem:[%s5403_s27 + $0x6b0] sm:$0xff] %v578_v22  ;;  %581 = vst [vmem:[%s5403_s27 + $0x6b8] sm:$0xff] %v580_v23  ;;  %v582_v24 = vld [vmem:[%s5395_s26 + $0xd80] sm:$0xff]  ;;  %v584_v25 = vld [vmem:[%s5395_s26 + $0xd88] sm:$0xff] }
  0x81   : > { %v586_v26 = vld [vmem:[%s5395_s26 + $0xda0] sm:$0xff]  ;;  %583 = vst [vmem:[%s5403_s27 + $0x6c0] sm:$0xff] %v582_v24  ;;  %585 = vst [vmem:[%s5403_s27 + $0x6c8] sm:$0xff] %v584_v25  ;;  %v588_v27 = vld [vmem:[%s5395_s26 + $0xda8] sm:$0xff] }
  0x82   : > { %587 = vst [vmem:[%s5403_s27 + $0x6d0] sm:$0xff] %v586_v26  ;;  %v590_v28 = vld [vmem:[%s5395_s26 + $0xdc0] sm:$0xff]  ;;  %v592_v29 = vld [vmem:[%s5395_s26 + $0xdc8] sm:$0xff]  ;;  %589 = vst [vmem:[%s5403_s27 + $0x6d8] sm:$0xff] %v588_v27 }
  0x83   : > { %591 = vst [vmem:[%s5403_s27 + $0x6e0] sm:$0xff] %v590_v28  ;;  %593 = vst [vmem:[%s5403_s27 + $0x6e8] sm:$0xff] %v592_v29  ;;  %v594_v30 = vld [vmem:[%s5395_s26 + $0xde0] sm:$0xff]  ;;  %v596_v31 = vld [vmem:[%s5395_s26 + $0xde8] sm:$0xff] }
  0x84   : > { %v598_v32 = vld [vmem:[%s5395_s26 + $0xe00] sm:$0xff]  ;;  %595 = vst [vmem:[%s5403_s27 + $0x6f0] sm:$0xff] %v594_v30  ;;  %597 = vst [vmem:[%s5403_s27 + $0x6f8] sm:$0xff] %v596_v31  ;;  %v600_v33 = vld [vmem:[%s5395_s26 + $0xe08] sm:$0xff] }
  0x85   : > { %599 = vst [vmem:[%s5403_s27 + $0x700] sm:$0xff] %v598_v32  ;;  %v602_v34 = vld [vmem:[%s5395_s26 + $0xe20] sm:$0xff]  ;;  %v604_v35 = vld [vmem:[%s5395_s26 + $0xe28] sm:$0xff]  ;;  %601 = vst [vmem:[%s5403_s27 + $0x708] sm:$0xff] %v600_v33 }
  0x86   : > { %603 = vst [vmem:[%s5403_s27 + $0x710] sm:$0xff] %v602_v34  ;;  %605 = vst [vmem:[%s5403_s27 + $0x718] sm:$0xff] %v604_v35  ;;  %v606_v36 = vld [vmem:[%s5395_s26 + $0xe40] sm:$0xff]  ;;  %v608_v37 = vld [vmem:[%s5395_s26 + $0xe48] sm:$0xff] }
  0x87   : > { %v610_v38 = vld [vmem:[%s5395_s26 + $0xe60] sm:$0xff]  ;;  %607 = vst [vmem:[%s5403_s27 + $0x720] sm:$0xff] %v606_v36  ;;  %609 = vst [vmem:[%s5403_s27 + $0x728] sm:$0xff] %v608_v37  ;;  %v612_v39 = vld [vmem:[%s5395_s26 + $0xe68] sm:$0xff] }
  0x88   : > { %611 = vst [vmem:[%s5403_s27 + $0x730] sm:$0xff] %v610_v38  ;;  %v614_v40 = vld [vmem:[%s5395_s26 + $0xe80] sm:$0xff]  ;;  %v616_v41 = vld [vmem:[%s5395_s26 + $0xe88] sm:$0xff]  ;;  %613 = vst [vmem:[%s5403_s27 + $0x738] sm:$0xff] %v612_v39 }
  0x89   : > { %615 = vst [vmem:[%s5403_s27 + $0x740] sm:$0xff] %v614_v40  ;;  %617 = vst [vmem:[%s5403_s27 + $0x748] sm:$0xff] %v616_v41  ;;  %v618_v42 = vld [vmem:[%s5395_s26 + $0xea0] sm:$0xff]  ;;  %v620_v43 = vld [vmem:[%s5395_s26 + $0xea8] sm:$0xff] }
  0x8a   : > { %v622_v44 = vld [vmem:[%s5395_s26 + $0xec0] sm:$0xff]  ;;  %619 = vst [vmem:[%s5403_s27 + $0x750] sm:$0xff] %v618_v42  ;;  %621 = vst [vmem:[%s5403_s27 + $0x758] sm:$0xff] %v620_v43  ;;  %v624_v45 = vld [vmem:[%s5395_s26 + $0xec8] sm:$0xff] }
  0x8b   : > { %623 = vst [vmem:[%s5403_s27 + $0x760] sm:$0xff] %v622_v44  ;;  %v626_v46 = vld [vmem:[%s5395_s26 + $0xee0] sm:$0xff]  ;;  %v628_v47 = vld [vmem:[%s5395_s26 + $0xee8] sm:$0xff]  ;;  %625 = vst [vmem:[%s5403_s27 + $0x768] sm:$0xff] %v624_v45 }
  0x8c   : > { %627 = vst [vmem:[%s5403_s27 + $0x770] sm:$0xff] %v626_v46  ;;  %629 = vst [vmem:[%s5403_s27 + $0x778] sm:$0xff] %v628_v47  ;;  %v630_v48 = vld [vmem:[%s5395_s26 + $0xf00] sm:$0xff]  ;;  %v632_v49 = vld [vmem:[%s5395_s26 + $0xf08] sm:$0xff] }
  0x8d   : > { %v634_v50 = vld [vmem:[%s5395_s26 + $0xf20] sm:$0xff]  ;;  %631 = vst [vmem:[%s5403_s27 + $0x780] sm:$0xff] %v630_v48  ;;  %633 = vst [vmem:[%s5403_s27 + $0x788] sm:$0xff] %v632_v49  ;;  %v636_v51 = vld [vmem:[%s5395_s26 + $0xf28] sm:$0xff] }
  0x8e   : > { %635 = vst [vmem:[%s5403_s27 + $0x790] sm:$0xff] %v634_v50  ;;  %v638_v52 = vld [vmem:[%s5395_s26 + $0xf40] sm:$0xff]  ;;  %v640_v53 = vld [vmem:[%s5395_s26 + $0xf48] sm:$0xff]  ;;  %637 = vst [vmem:[%s5403_s27 + $0x798] sm:$0xff] %v636_v51 }
  0x8f   : > { %639 = vst [vmem:[%s5403_s27 + $0x7a0] sm:$0xff] %v638_v52  ;;  %641 = vst [vmem:[%s5403_s27 + $0x7a8] sm:$0xff] %v640_v53  ;;  %v642_v54 = vld [vmem:[%s5395_s26 + $0xf60] sm:$0xff]  ;;  %v644_v55 = vld [vmem:[%s5395_s26 + $0xf68] sm:$0xff] }
  0x90   : > { %v646_v56 = vld [vmem:[%s5395_s26 + $0xf80] sm:$0xff]  ;;  %643 = vst [vmem:[%s5403_s27 + $0x7b0] sm:$0xff] %v642_v54  ;;  %645 = vst [vmem:[%s5403_s27 + $0x7b8] sm:$0xff] %v644_v55  ;;  %v648_v57 = vld [vmem:[%s5395_s26 + $0xf88] sm:$0xff] }
  0x91   : > { %647 = vst [vmem:[%s5403_s27 + $0x7c0] sm:$0xff] %v646_v56  ;;  %v650_v58 = vld [vmem:[%s5395_s26 + $0xfa0] sm:$0xff]  ;;  %v652_v59 = vld [vmem:[%s5395_s26 + $0xfa8] sm:$0xff]  ;;  %649 = vst [vmem:[%s5403_s27 + $0x7c8] sm:$0xff] %v648_v57 }
  0x92   : > { %651 = vst [vmem:[%s5403_s27 + $0x7d0] sm:$0xff] %v650_v58  ;;  %653 = vst [vmem:[%s5403_s27 + $0x7d8] sm:$0xff] %v652_v59  ;;  %v654_v60 = vld [vmem:[%s5395_s26 + $0xfc0] sm:$0xff]  ;;  %v656_v61 = vld [vmem:[%s5395_s26 + $0xfc8] sm:$0xff] }
  0x93   : > { %v658_v62 = vld [vmem:[%s5395_s26 + $0xfe0] sm:$0xff]  ;;  %655 = vst [vmem:[%s5403_s27 + $0x7e0] sm:$0xff] %v654_v60  ;;  %657 = vst [vmem:[%s5403_s27 + $0x7e8] sm:$0xff] %v656_v61  ;;  %v660_v63 = vld [vmem:[%s5395_s26 + $0xfe8] sm:$0xff] }
  0x94   : > { %659 = vst [vmem:[%s5403_s27 + $0x7f0] sm:$0xff] %v658_v62  ;;  %v662_v0 = vld [vmem:[%s5395_s26 + $0x1000] sm:$0xff]  ;;  %v664_v1 = vld [vmem:[%s5395_s26 + $0x1008] sm:$0xff]  ;;  %661 = vst [vmem:[%s5403_s27 + $0x7f8] sm:$0xff] %v660_v63 }
  0x95   : > { %663 = vst [vmem:[%s5403_s27 + $0x800] sm:$0xff] %v662_v0  ;;  %665 = vst [vmem:[%s5403_s27 + $0x808] sm:$0xff] %v664_v1  ;;  %v666_v2 = vld [vmem:[%s5395_s26 + $0x1020] sm:$0xff]  ;;  %v668_v3 = vld [vmem:[%s5395_s26 + $0x1028] sm:$0xff] }
  0x96   : > { %v670_v4 = vld [vmem:[%s5395_s26 + $0x1040] sm:$0xff]  ;;  %667 = vst [vmem:[%s5403_s27 + $0x810] sm:$0xff] %v666_v2  ;;  %669 = vst [vmem:[%s5403_s27 + $0x818] sm:$0xff] %v668_v3  ;;  %v672_v5 = vld [vmem:[%s5395_s26 + $0x1048] sm:$0xff] }
  0x97   : > { %671 = vst [vmem:[%s5403_s27 + $0x820] sm:$0xff] %v670_v4  ;;  %v674_v6 = vld [vmem:[%s5395_s26 + $0x1060] sm:$0xff]  ;;  %v676_v7 = vld [vmem:[%s5395_s26 + $0x1068] sm:$0xff]  ;;  %673 = vst [vmem:[%s5403_s27 + $0x828] sm:$0xff] %v672_v5 }
  0x98   : > { %675 = vst [vmem:[%s5403_s27 + $0x830] sm:$0xff] %v674_v6  ;;  %677 = vst [vmem:[%s5403_s27 + $0x838] sm:$0xff] %v676_v7  ;;  %v678_v8 = vld [vmem:[%s5395_s26 + $0x1080] sm:$0xff]  ;;  %v680_v9 = vld [vmem:[%s5395_s26 + $0x1088] sm:$0xff] }
  0x99   : > { %v682_v10 = vld [vmem:[%s5395_s26 + $0x10a0] sm:$0xff]  ;;  %679 = vst [vmem:[%s5403_s27 + $0x840] sm:$0xff] %v678_v8  ;;  %681 = vst [vmem:[%s5403_s27 + $0x848] sm:$0xff] %v680_v9  ;;  %v684_v11 = vld [vmem:[%s5395_s26 + $0x10a8] sm:$0xff] }
  0x9a   : > { %683 = vst [vmem:[%s5403_s27 + $0x850] sm:$0xff] %v682_v10  ;;  %v686_v12 = vld [vmem:[%s5395_s26 + $0x10c0] sm:$0xff]  ;;  %v688_v13 = vld [vmem:[%s5395_s26 + $0x10c8] sm:$0xff]  ;;  %685 = vst [vmem:[%s5403_s27 + $0x858] sm:$0xff] %v684_v11 }
  0x9b   : > { %687 = vst [vmem:[%s5403_s27 + $0x860] sm:$0xff] %v686_v12  ;;  %689 = vst [vmem:[%s5403_s27 + $0x868] sm:$0xff] %v688_v13  ;;  %v690_v14 = vld [vmem:[%s5395_s26 + $0x10e0] sm:$0xff]  ;;  %v692_v15 = vld [vmem:[%s5395_s26 + $0x10e8] sm:$0xff] }
  0x9c   : > { %v694_v16 = vld [vmem:[%s5395_s26 + $0x1100] sm:$0xff]  ;;  %691 = vst [vmem:[%s5403_s27 + $0x870] sm:$0xff] %v690_v14  ;;  %693 = vst [vmem:[%s5403_s27 + $0x878] sm:$0xff] %v692_v15  ;;  %v696_v17 = vld [vmem:[%s5395_s26 + $0x1108] sm:$0xff] }
  0x9d   : > { %695 = vst [vmem:[%s5403_s27 + $0x880] sm:$0xff] %v694_v16  ;;  %v698_v18 = vld [vmem:[%s5395_s26 + $0x1120] sm:$0xff]  ;;  %v700_v19 = vld [vmem:[%s5395_s26 + $0x1128] sm:$0xff]  ;;  %697 = vst [vmem:[%s5403_s27 + $0x888] sm:$0xff] %v696_v17 }
  0x9e   : > { %699 = vst [vmem:[%s5403_s27 + $0x890] sm:$0xff] %v698_v18  ;;  %701 = vst [vmem:[%s5403_s27 + $0x898] sm:$0xff] %v700_v19  ;;  %v702_v20 = vld [vmem:[%s5395_s26 + $0x1140] sm:$0xff]  ;;  %v704_v21 = vld [vmem:[%s5395_s26 + $0x1148] sm:$0xff] }
  0x9f   : > { %v706_v22 = vld [vmem:[%s5395_s26 + $0x1160] sm:$0xff]  ;;  %703 = vst [vmem:[%s5403_s27 + $0x8a0] sm:$0xff] %v702_v20  ;;  %705 = vst [vmem:[%s5403_s27 + $0x8a8] sm:$0xff] %v704_v21  ;;  %v708_v23 = vld [vmem:[%s5395_s26 + $0x1168] sm:$0xff] }
  0xa0   : > { %707 = vst [vmem:[%s5403_s27 + $0x8b0] sm:$0xff] %v706_v22  ;;  %v710_v24 = vld [vmem:[%s5395_s26 + $0x1180] sm:$0xff]  ;;  %v712_v25 = vld [vmem:[%s5395_s26 + $0x1188] sm:$0xff]  ;;  %709 = vst [vmem:[%s5403_s27 + $0x8b8] sm:$0xff] %v708_v23 }
  0xa1   : > { %711 = vst [vmem:[%s5403_s27 + $0x8c0] sm:$0xff] %v710_v24  ;;  %713 = vst [vmem:[%s5403_s27 + $0x8c8] sm:$0xff] %v712_v25  ;;  %v714_v26 = vld [vmem:[%s5395_s26 + $0x11a0] sm:$0xff]  ;;  %v716_v27 = vld [vmem:[%s5395_s26 + $0x11a8] sm:$0xff] }
  0xa2   : > { %v718_v28 = vld [vmem:[%s5395_s26 + $0x11c0] sm:$0xff]  ;;  %715 = vst [vmem:[%s5403_s27 + $0x8d0] sm:$0xff] %v714_v26  ;;  %717 = vst [vmem:[%s5403_s27 + $0x8d8] sm:$0xff] %v716_v27  ;;  %v720_v29 = vld [vmem:[%s5395_s26 + $0x11c8] sm:$0xff] }
  0xa3   : > { %719 = vst [vmem:[%s5403_s27 + $0x8e0] sm:$0xff] %v718_v28  ;;  %v722_v30 = vld [vmem:[%s5395_s26 + $0x11e0] sm:$0xff]  ;;  %v724_v31 = vld [vmem:[%s5395_s26 + $0x11e8] sm:$0xff]  ;;  %721 = vst [vmem:[%s5403_s27 + $0x8e8] sm:$0xff] %v720_v29 }
  0xa4   : > { %723 = vst [vmem:[%s5403_s27 + $0x8f0] sm:$0xff] %v722_v30  ;;  %725 = vst [vmem:[%s5403_s27 + $0x8f8] sm:$0xff] %v724_v31  ;;  %v726_v32 = vld [vmem:[%s5395_s26 + $0x1200] sm:$0xff]  ;;  %v728_v33 = vld [vmem:[%s5395_s26 + $0x1208] sm:$0xff] }
  0xa5   : > { %v730_v34 = vld [vmem:[%s5395_s26 + $0x1220] sm:$0xff]  ;;  %727 = vst [vmem:[%s5403_s27 + $0x900] sm:$0xff] %v726_v32  ;;  %729 = vst [vmem:[%s5403_s27 + $0x908] sm:$0xff] %v728_v33  ;;  %v732_v35 = vld [vmem:[%s5395_s26 + $0x1228] sm:$0xff] }
  0xa6   : > { %731 = vst [vmem:[%s5403_s27 + $0x910] sm:$0xff] %v730_v34  ;;  %v734_v36 = vld [vmem:[%s5395_s26 + $0x1240] sm:$0xff]  ;;  %v736_v37 = vld [vmem:[%s5395_s26 + $0x1248] sm:$0xff]  ;;  %733 = vst [vmem:[%s5403_s27 + $0x918] sm:$0xff] %v732_v35 }
  0xa7   : > { %735 = vst [vmem:[%s5403_s27 + $0x920] sm:$0xff] %v734_v36  ;;  %737 = vst [vmem:[%s5403_s27 + $0x928] sm:$0xff] %v736_v37  ;;  %v738_v38 = vld [vmem:[%s5395_s26 + $0x1260] sm:$0xff]  ;;  %v740_v39 = vld [vmem:[%s5395_s26 + $0x1268] sm:$0xff] }
  0xa8   : > { %v742_v40 = vld [vmem:[%s5395_s26 + $0x1280] sm:$0xff]  ;;  %739 = vst [vmem:[%s5403_s27 + $0x930] sm:$0xff] %v738_v38  ;;  %741 = vst [vmem:[%s5403_s27 + $0x938] sm:$0xff] %v740_v39  ;;  %v744_v41 = vld [vmem:[%s5395_s26 + $0x1288] sm:$0xff] }
  0xa9   : > { %743 = vst [vmem:[%s5403_s27 + $0x940] sm:$0xff] %v742_v40  ;;  %v746_v42 = vld [vmem:[%s5395_s26 + $0x12a0] sm:$0xff]  ;;  %v748_v43 = vld [vmem:[%s5395_s26 + $0x12a8] sm:$0xff]  ;;  %745 = vst [vmem:[%s5403_s27 + $0x948] sm:$0xff] %v744_v41 }
  0xaa   : > { %747 = vst [vmem:[%s5403_s27 + $0x950] sm:$0xff] %v746_v42  ;;  %749 = vst [vmem:[%s5403_s27 + $0x958] sm:$0xff] %v748_v43  ;;  %v750_v44 = vld [vmem:[%s5395_s26 + $0x12c0] sm:$0xff]  ;;  %v752_v45 = vld [vmem:[%s5395_s26 + $0x12c8] sm:$0xff] }
  0xab   : > { %v754_v46 = vld [vmem:[%s5395_s26 + $0x12e0] sm:$0xff]  ;;  %751 = vst [vmem:[%s5403_s27 + $0x960] sm:$0xff] %v750_v44  ;;  %753 = vst [vmem:[%s5403_s27 + $0x968] sm:$0xff] %v752_v45  ;;  %v756_v47 = vld [vmem:[%s5395_s26 + $0x12e8] sm:$0xff] }
  0xac   : > { %755 = vst [vmem:[%s5403_s27 + $0x970] sm:$0xff] %v754_v46  ;;  %v758_v48 = vld [vmem:[%s5395_s26 + $0x1300] sm:$0xff]  ;;  %v760_v49 = vld [vmem:[%s5395_s26 + $0x1308] sm:$0xff]  ;;  %757 = vst [vmem:[%s5403_s27 + $0x978] sm:$0xff] %v756_v47 }
  0xad   : > { %759 = vst [vmem:[%s5403_s27 + $0x980] sm:$0xff] %v758_v48  ;;  %761 = vst [vmem:[%s5403_s27 + $0x988] sm:$0xff] %v760_v49  ;;  %v762_v50 = vld [vmem:[%s5395_s26 + $0x1320] sm:$0xff]  ;;  %v764_v51 = vld [vmem:[%s5395_s26 + $0x1328] sm:$0xff] }
  0xae   : > { %v766_v52 = vld [vmem:[%s5395_s26 + $0x1340] sm:$0xff]  ;;  %763 = vst [vmem:[%s5403_s27 + $0x990] sm:$0xff] %v762_v50  ;;  %765 = vst [vmem:[%s5403_s27 + $0x998] sm:$0xff] %v764_v51  ;;  %v768_v53 = vld [vmem:[%s5395_s26 + $0x1348] sm:$0xff] }
  0xaf   : > { %767 = vst [vmem:[%s5403_s27 + $0x9a0] sm:$0xff] %v766_v52  ;;  %v770_v54 = vld [vmem:[%s5395_s26 + $0x1360] sm:$0xff]  ;;  %v772_v55 = vld [vmem:[%s5395_s26 + $0x1368] sm:$0xff]  ;;  %769 = vst [vmem:[%s5403_s27 + $0x9a8] sm:$0xff] %v768_v53 }
  0xb0   : > { %771 = vst [vmem:[%s5403_s27 + $0x9b0] sm:$0xff] %v770_v54  ;;  %773 = vst [vmem:[%s5403_s27 + $0x9b8] sm:$0xff] %v772_v55  ;;  %v774_v56 = vld [vmem:[%s5395_s26 + $0x1380] sm:$0xff]  ;;  %v776_v57 = vld [vmem:[%s5395_s26 + $0x1388] sm:$0xff] }
  0xb1   : > { %v778_v58 = vld [vmem:[%s5395_s26 + $0x13a0] sm:$0xff]  ;;  %775 = vst [vmem:[%s5403_s27 + $0x9c0] sm:$0xff] %v774_v56  ;;  %777 = vst [vmem:[%s5403_s27 + $0x9c8] sm:$0xff] %v776_v57  ;;  %v780_v59 = vld [vmem:[%s5395_s26 + $0x13a8] sm:$0xff] }
  0xb2   : > { %779 = vst [vmem:[%s5403_s27 + $0x9d0] sm:$0xff] %v778_v58  ;;  %v782_v60 = vld [vmem:[%s5395_s26 + $0x13c0] sm:$0xff]  ;;  %v784_v61 = vld [vmem:[%s5395_s26 + $0x13c8] sm:$0xff]  ;;  %781 = vst [vmem:[%s5403_s27 + $0x9d8] sm:$0xff] %v780_v59 }
  0xb3   : > { %783 = vst [vmem:[%s5403_s27 + $0x9e0] sm:$0xff] %v782_v60  ;;  %785 = vst [vmem:[%s5403_s27 + $0x9e8] sm:$0xff] %v784_v61  ;;  %v786_v62 = vld [vmem:[%s5395_s26 + $0x13e0] sm:$0xff]  ;;  %v788_v63 = vld [vmem:[%s5395_s26 + $0x13e8] sm:$0xff] }
  0xb4   : > { %v790_v0 = vld [vmem:[%s5395_s26 + $0x1400] sm:$0xff]  ;;  %787 = vst [vmem:[%s5403_s27 + $0x9f0] sm:$0xff] %v786_v62  ;;  %789 = vst [vmem:[%s5403_s27 + $0x9f8] sm:$0xff] %v788_v63  ;;  %v792_v1 = vld [vmem:[%s5395_s26 + $0x1408] sm:$0xff] }
  0xb5   : > { %791 = vst [vmem:[%s5403_s27 + $0xa00] sm:$0xff] %v790_v0  ;;  %v794_v2 = vld [vmem:[%s5395_s26 + $0x1420] sm:$0xff]  ;;  %v796_v3 = vld [vmem:[%s5395_s26 + $0x1428] sm:$0xff]  ;;  %793 = vst [vmem:[%s5403_s27 + $0xa08] sm:$0xff] %v792_v1 }
  0xb6   : > { %795 = vst [vmem:[%s5403_s27 + $0xa10] sm:$0xff] %v794_v2  ;;  %797 = vst [vmem:[%s5403_s27 + $0xa18] sm:$0xff] %v796_v3 }
  0xb7 PF: > { %p3585_p7 = scmp.ge.s32.totalorder %s5331_s14, 1  ;;  %p802_p8 = scmp.lt.s32.totalorder %s5331_s14, 3 }
  0xb9   : > { %p803_p9 = pnand %p3585_p7, %p802_p8 }
  0xba   : > { %s809_s28 = sand.u32 (!%p803_p9), 1, %s5323_s12   ;;  %v6053_v4 = vld [vmem:[%s6765_s0] sm:$0xff] (!%p803_p9)  ;;  %vm1943_vm0 = vcmask (!%p803_p9), 130048  }
  0xbb   : > { %806 = sbr.rel (%p803_p9) target bundleno = 835 (0x343), region = 51  ;;  %v870_v5 = vunpack.c.h.bf16 (!%p803_p9), %v6053_v4 }
  0xbc   : > { %s4745_s4 = smul.u32 (!%p803_p9), 2592, %s809_s28 }
  0xbd   : > { %2026 = vmatprep.mubr.f32.mxu0 (!%p803_p9), %v870_v5  ;;  %2632 = vmatprep.mubr.f32.mxu1 (!%p803_p9), %v870_v5  ;;  %s6617_s9 = smul.u32 (!%p803_p9), 96, %s809_s28 }
  0xbe   : > { %s6058_s5 = scalar_lea.vmem (!%p803_p9), [#allocation2], %s4745_s4 }
  0xbf   : > { %v4775_v6 = vld [vmem:[%s6058_s5 + $0x4] ss:$16 sps:$4 sm:$0xff] (!%p803_p9)   ;;  %v4777_v7 = vld [vmem:[%s6058_s5 + $0xc] ss:$16 sps:$4 sm:$0xff] (!%p803_p9)   ;;  %v4779_v8 = vld [vmem:[%s6058_s5] ss:$16 sps:$4 sm:$0xff] (!%p803_p9)  }
  0xc0   : > { %3629 = vmatprep.subr.bf16.mxu0 (!%p803_p9), %v4775_v6  ;;  %v4780_v9 = vld [vmem:[%s6058_s5 + $0x8] ss:$16 sps:$4 sm:$0xff] (!%p803_p9)   ;;  %3953 = vmatprep.subr.bf16.mxu1 (!%p803_p9), %v4777_v7  ;;  %v4781_v10 = vld [vmem:[%s6058_s5 + $0x24] ss:$16 sps:$4 sm:$0xff] (!%p803_p9)   ;;  %v4783_v11 = vld [vmem:[%s6058_s5 + $0x2c] ss:$16 sps:$4 sm:$0xff] (!%p803_p9)  }
  0xc1   : > { %3631 = vmatpush1.bf16.msra.mxu0 (!%p803_p9), %v4779_v8  ;;  %3955 = vmatpush1.bf16.msra.mxu1 (!%p803_p9), %v4780_v9  ;;  %v4785_v12 = vld [vmem:[%s6058_s5 + $0x20] ss:$16 sps:$4 sm:$0xff] (!%p803_p9)   ;;  %v4786_v13 = vld [vmem:[%s6058_s5 + $0x28] ss:$16 sps:$4 sm:$0xff] (!%p803_p9)   ;;  %v4787_v14 = vld [vmem:[%s6058_s5 + $0x44] ss:$16 sps:$4 sm:$0xff] (!%p803_p9)  }
  0xc2   : > { %3633 = vmatprep.subr.bf16.mxu0 %v4781_v10  ;;  %3957 = vmatprep.subr.bf16.mxu1 %v4783_v11  ;;  %v4789_v15 = vld [vmem:[%s6058_s5 + $0x4c] ss:$16 sps:$4 sm:$0xff]   ;;  %v4791_v16 = vld [vmem:[%s6058_s5 + $0x40] ss:$16 sps:$4 sm:$0xff]   ;;  %v4792_v17 = vld [vmem:[%s6058_s5 + $0x48] ss:$16 sps:$4 sm:$0xff]   ;;  %v869_v10 = vunpack.c.l.bf16 %v6053_v4 }
  0xc3   : > { %v4793_v18 = vld [vmem:[%s6058_s5 + $0x64] ss:$16 sps:$4 sm:$0xff]   ;;  %v4795_v19 = vld [vmem:[%s6058_s5 + $0x6c] ss:$16 sps:$4 sm:$0xff]   ;;  %v4797_v20 = vld [vmem:[%s6058_s5 + $0x60] ss:$16 sps:$4 sm:$0xff]  }
  0xc4   : > { %v4798_v21 = vld [vmem:[%s6058_s5 + $0x68] ss:$16 sps:$4 sm:$0xff]   ;;  %v4799_v22 = vld [vmem:[%s6058_s5 + $0x84] ss:$16 sps:$4 sm:$0xff]   ;;  %v4801_v23 = vld [vmem:[%s6058_s5 + $0x8c] ss:$16 sps:$4 sm:$0xff]  }
  0xc5   : > { %3635 = vmatpush1.bf16.msra.mxu0 %v4785_v12  ;;  %3959 = vmatpush1.bf16.msra.mxu1 %v4786_v13  ;;  %v4803_v24 = vld [vmem:[%s6058_s5 + $0x80] ss:$16 sps:$4 sm:$0xff]   ;;  %v4804_v25 = vld [vmem:[%s6058_s5 + $0x88] ss:$16 sps:$4 sm:$0xff]   ;;  %v4805_v26 = vld [vmem:[%s6058_s5 + $0xa4] ss:$16 sps:$4 sm:$0xff]  }
  0xc6   : > { %3637 = vmatprep.subr.bf16.mxu0 %v4787_v14  ;;  %3961 = vmatprep.subr.bf16.mxu1 %v4789_v15  ;;  %v4807_v27 = vld [vmem:[%s6058_s5 + $0xac] ss:$16 sps:$4 sm:$0xff]   ;;  %v4809_v28 = vld [vmem:[%s6058_s5 + $0xa0] ss:$16 sps:$4 sm:$0xff]   ;;  %v4810_v29 = vld [vmem:[%s6058_s5 + $0xa8] ss:$16 sps:$4 sm:$0xff]  }
  0xc7   : > { %v4811_v30 = vld [vmem:[%s6058_s5 + $0xc4] ss:$16 sps:$4 sm:$0xff]   ;;  %v4813_v31 = vld [vmem:[%s6058_s5 + $0xcc] ss:$16 sps:$4 sm:$0xff]   ;;  %v4815_v32 = vld [vmem:[%s6058_s5 + $0xc0] ss:$16 sps:$4 sm:$0xff]  }
  0xc8   : > { %v4816_v33 = vld [vmem:[%s6058_s5 + $0xc8] ss:$16 sps:$4 sm:$0xff]   ;;  %v4817_v34 = vld [vmem:[%s6058_s5 + $0xe4] ss:$16 sps:$4 sm:$0xff]   ;;  %v4819_v35 = vld [vmem:[%s6058_s5 + $0xec] ss:$16 sps:$4 sm:$0xff]  }
  0xc9   : > { %3639 = vmatpush1.bf16.msra.mxu0 %v4791_v16  ;;  %3963 = vmatpush1.bf16.msra.mxu1 %v4792_v17  ;;  %v4821_v36 = vld [vmem:[%s6058_s5 + $0xe0] ss:$16 sps:$4 sm:$0xff]   ;;  %v4822_v37 = vld [vmem:[%s6058_s5 + $0xe8] ss:$16 sps:$4 sm:$0xff]   ;;  %v4823_v38 = vld [vmem:[%s6058_s5 + $0x104] ss:$16 sps:$4 sm:$0xff]  }
  0xca   : > { %3641 = vmatprep.subr.bf16.mxu0 %v4793_v18  ;;  %3965 = vmatprep.subr.bf16.mxu1 %v4795_v19  ;;  %v4825_v39 = vld [vmem:[%s6058_s5 + $0x10c] ss:$16 sps:$4 sm:$0xff]   ;;  %v4827_v40 = vld [vmem:[%s6058_s5 + $0x100] ss:$16 sps:$4 sm:$0xff]   ;;  %v4828_v41 = vld [vmem:[%s6058_s5 + $0x108] ss:$16 sps:$4 sm:$0xff]  }
  0xcb   : > { %v4829_v42 = vld [vmem:[%s6058_s5 + $0x124] ss:$16 sps:$4 sm:$0xff]   ;;  %v4831_v43 = vld [vmem:[%s6058_s5 + $0x12c] ss:$16 sps:$4 sm:$0xff]   ;;  %v4833_v44 = vld [vmem:[%s6058_s5 + $0x120] ss:$16 sps:$4 sm:$0xff]  }
  0xcc   : > { %v4834_v45 = vld [vmem:[%s6058_s5 + $0x128] ss:$16 sps:$4 sm:$0xff]   ;;  %v4835_v46 = vld [vmem:[%s6058_s5 + $0x144] ss:$16 sps:$4 sm:$0xff]   ;;  %v4837_v47 = vld [vmem:[%s6058_s5 + $0x14c] ss:$16 sps:$4 sm:$0xff]  }
  0xcd   : > { %3643 = vmatpush1.bf16.msra.mxu0 %v4797_v20  ;;  %3967 = vmatpush1.bf16.msra.mxu1 %v4798_v21  ;;  %v4839_v48 = vld [vmem:[%s6058_s5 + $0x140] ss:$16 sps:$4 sm:$0xff]   ;;  %v4840_v49 = vld [vmem:[%s6058_s5 + $0x148] ss:$16 sps:$4 sm:$0xff]   ;;  %v4841_v50 = vld [vmem:[%s6058_s5 + $0x164] ss:$16 sps:$4 sm:$0xff]  }
  0xce   : > { %3645 = vmatprep.subr.bf16.mxu0 %v4799_v22  ;;  %3969 = vmatprep.subr.bf16.mxu1 %v4801_v23  ;;  %v4843_v51 = vld [vmem:[%s6058_s5 + $0x16c] ss:$16 sps:$4 sm:$0xff]   ;;  %v4845_v52 = vld [vmem:[%s6058_s5 + $0x160] ss:$16 sps:$4 sm:$0xff]   ;;  %v4846_v53 = vld [vmem:[%s6058_s5 + $0x168] ss:$16 sps:$4 sm:$0xff]  }
  0xcf   : > { %v4847_v54 = vld [vmem:[%s6058_s5 + $0x184] ss:$16 sps:$4 sm:$0xff]   ;;  %v4849_v55 = vld [vmem:[%s6058_s5 + $0x18c] ss:$16 sps:$4 sm:$0xff]   ;;  %v4851_v56 = vld [vmem:[%s6058_s5 + $0x180] ss:$16 sps:$4 sm:$0xff]  }
  0xd0   : > { %v4852_v57 = vld [vmem:[%s6058_s5 + $0x188] ss:$16 sps:$4 sm:$0xff]   ;;  %v4853_v58 = vld [vmem:[%s6058_s5 + $0x1a4] ss:$16 sps:$4 sm:$0xff]   ;;  %v4855_v59 = vld [vmem:[%s6058_s5 + $0x1ac] ss:$16 sps:$4 sm:$0xff]  }
  0xd1   : > { %3647 = vmatpush1.bf16.msra.mxu0 %v4803_v24  ;;  %3971 = vmatpush1.bf16.msra.mxu1 %v4804_v25  ;;  %v4857_v60 = vld [vmem:[%s6058_s5 + $0x1a0] ss:$16 sps:$4 sm:$0xff]   ;;  %v4858_v61 = vld [vmem:[%s6058_s5 + $0x1a8] ss:$16 sps:$4 sm:$0xff]   ;;  %v4859_v62 = vld [vmem:[%s6058_s5 + $0x1c4] ss:$16 sps:$4 sm:$0xff]  }
  0xd2   : > { %3649 = vmatprep.subr.bf16.mxu0 %v4805_v26  ;;  %3973 = vmatprep.subr.bf16.mxu1 %v4807_v27  ;;  %v4861_v63 = vld [vmem:[%s6058_s5 + $0x1cc] ss:$16 sps:$4 sm:$0xff]   ;;  %v4863_v0 = vld [vmem:[%s6058_s5 + $0x1c0] ss:$16 sps:$4 sm:$0xff]   ;;  %v4864_v1 = vld [vmem:[%s6058_s5 + $0x1c8] ss:$16 sps:$4 sm:$0xff]  }
  0xd3   : > { %v4865_v2 = vld [vmem:[%s6058_s5 + $0x1e4] ss:$16 sps:$4 sm:$0xff]   ;;  %v4867_v3 = vld [vmem:[%s6058_s5 + $0x1ec] ss:$16 sps:$4 sm:$0xff]   ;;  %v4869_v5 = vld [vmem:[%s6058_s5 + $0x1e0] ss:$16 sps:$4 sm:$0xff]  }
  0xd4   : > { %v4870_v6 = vld [vmem:[%s6058_s5 + $0x1e8] ss:$16 sps:$4 sm:$0xff]   ;;  %v4871_v7 = vld [vmem:[%s6058_s5 + $0x204] ss:$16 sps:$4 sm:$0xff]   ;;  %v4874_v8 = vld [vmem:[%s6058_s5 + $0x20c] ss:$16 sps:$4 sm:$0xff]  }
  0xd5   : > { %3651 = vmatpush1.bf16.msra.mxu0 %v4809_v28  ;;  %3975 = vmatpush1.bf16.msra.mxu1 %v4810_v29  ;;  %v839_v9 = vld [vmem:[%s6765_s0 + $0x2c] sm:$0xff]  ;;  %v4876_v12 = vld [vmem:[%s6058_s5 + $0x208] ss:$16 sps:$4 sm:$0xff]   ;;  %v4877_v13 = vld [vmem:[%s6058_s5 + $0x224] ss:$16 sps:$4 sm:$0xff]   ;;  %s6635_s12 = scalar_lea.vmem [#allocation3], %s6617_s9 }
  0xd6   : > { %3653 = vmatprep.subr.bf16.mxu0 %v4811_v30  ;;  %3977 = vmatprep.subr.bf16.mxu1 %v4813_v31  ;;  %v4873_v11 = vld [vmem:[%s6058_s5 + $0x200] ss:$16 sps:$4 sm:$0xff]   ;;  %v4880_v14 = vld [vmem:[%s6058_s5 + $0x22c] ss:$16 sps:$4 sm:$0xff]   ;;  %v881_v15 = vunpack.c.h.bf16 %v839_v9  ;;  %v4882_v17 = vld [vmem:[%s6058_s5 + $0x228] ss:$16 sps:$4 sm:$0xff]   ;;  %v880_v18 = vunpack.c.l.bf16 %v839_v9 }
  0xd7   : > { %v845_v16 = vld [vmem:[%s6765_s0 + $0x58] sm:$0xff]  ;;  %v4879_v4 = vld [vmem:[%s6058_s5 + $0x220] ss:$16 sps:$4 sm:$0xff]   ;;  %v4883_v19 = vld [vmem:[%s6058_s5 + $0x244] ss:$16 sps:$4 sm:$0xff]   ;;  %s3627_s28 = sshll.u32 (%p5385_p5), %s3579_s15, 4 }
  0xd8   : > { %v4886_v20 = vld [vmem:[%s6058_s5 + $0x24c] ss:$16 sps:$4 sm:$0xff]   ;;  %v892_v21 = vunpack.c.h.bf16 %v845_v16  ;;  %v851_v22 = vld [vmem:[%s6765_s0 + $0x84] sm:$0xff]  ;;  %v4885_v23 = vld [vmem:[%s6058_s5 + $0x240] ss:$16 sps:$4 sm:$0xff]   ;;  %v891_v25 = vunpack.c.l.bf16 %v845_v16  ;;  %s3483_s20 = scalar_lea.vmem (%p5385_p5), %s6768_s3, %s3627_s28 }
  0xd9   : > { %3655 = vmatpush1.bf16.msra.mxu0 %v4815_v32  ;;  %3979 = vmatpush1.bf16.msra.mxu1 %v4816_v33  ;;  %v4888_v24 = vld [vmem:[%s6058_s5 + $0x248] ss:$16 sps:$4 sm:$0xff]   ;;  %v4889_v26 = vld [vmem:[%s6058_s5 + $0x264] ss:$16 sps:$4 sm:$0xff]   ;;  %v4892_v27 = vld [vmem:[%s6058_s5 + $0x26c] ss:$16 sps:$4 sm:$0xff]   ;;  %v903_v28 = vunpack.c.h.bf16 %v851_v22  ;;  %v902_v32 = vunpack.c.l.bf16 %v851_v22 }
  0xda   : > { %3657 = vmatprep.subr.bf16.mxu0 %v4817_v34  ;;  %3981 = vmatprep.subr.bf16.mxu1 %v4819_v35  ;;  %v857_v29 = vld [vmem:[%s6765_s0 + $0xb0] sm:$0xff]  ;;  %v4894_v31 = vld [vmem:[%s6058_s5 + $0x268] ss:$16 sps:$4 sm:$0xff]   ;;  %v4898_v34 = vld [vmem:[%s6058_s5 + $0x28c] ss:$16 sps:$4 sm:$0xff]  }
  0xdb   : > { %v4891_v30 = vld [vmem:[%s6058_s5 + $0x260] ss:$16 sps:$4 sm:$0xff]   ;;  %v4895_v33 = vld [vmem:[%s6058_s5 + $0x284] ss:$16 sps:$4 sm:$0xff]   ;;  %v914_v35 = vunpack.c.h.bf16 %v857_v29  ;;  %v4954_v16 = vld [vmem:[%s6058_s5 + $0x3a8] ss:$16 sps:$4 sm:$0xff]  }
  0xdc   : > { %v4943_v9 = vld [vmem:[%s6058_s5 + $0x384] ss:$16 sps:$4 sm:$0xff]   ;;  %v4963_v22 = vld [vmem:[%s6058_s5 + $0x3e0] ss:$16 sps:$4 sm:$0xff]  }
  0xdd   : > { %3659 = vmatpush1.bf16.msra.mxu0 %v4821_v36  ;;  %3983 = vmatpush1.bf16.msra.mxu1 %v4822_v37  ;;  %v863_v36 = vld [vmem:[%s6765_s0 + $0xdc] sm:$0xff] }
  0xde   : > { %3661 = vmatprep.subr.bf16.mxu0 %v4823_v38  ;;  %3985 = vmatprep.subr.bf16.mxu1 %v4825_v39  ;;  %v4897_v37 = vld [vmem:[%s6058_s5 + $0x280] ss:$16 sps:$4 sm:$0xff]   ;;  %v4900_v38 = vld [vmem:[%s6058_s5 + $0x288] ss:$16 sps:$4 sm:$0xff]   ;;  %v913_v39 = vunpack.c.l.bf16 %v857_v29 }
  0xdf   : > { %v4972_v29 = vld [vmem:[%s6058_s5 + $0x408] ss:$16 sps:$4 sm:$0xff]  }
  0xe1   : > { %3663 = vmatpush1.bf16.msra.mxu0 %v4827_v40  ;;  %3987 = vmatpush1.bf16.msra.mxu1 %v4828_v41  ;;  %v4901_v40 = vld [vmem:[%s6058_s5 + $0x2a4] ss:$16 sps:$4 sm:$0xff]   ;;  %v4904_v41 = vld [vmem:[%s6058_s5 + $0x2ac] ss:$16 sps:$4 sm:$0xff]  }
  0xe2   : > { %3665 = vmatprep.subr.bf16.mxu0 %v4829_v42  ;;  %3989 = vmatprep.subr.bf16.mxu1 %v4831_v43  ;;  %v925_v42 = vunpack.c.h.bf16 %v863_v36  ;;  %v4903_v43 = vld [vmem:[%s6058_s5 + $0x2a0] ss:$16 sps:$4 sm:$0xff]  }
  0xe5   : > { %3667 = vmatpush1.bf16.msra.mxu0 %v4833_v44  ;;  %3991 = vmatpush1.bf16.msra.mxu1 %v4834_v45  ;;  %v4906_v44 = vld [vmem:[%s6058_s5 + $0x2a8] ss:$16 sps:$4 sm:$0xff]   ;;  %v924_v45 = vunpack.c.l.bf16 %v863_v36 }
  0xe6   : > { %3669 = vmatprep.subr.bf16.mxu0 %v4835_v46  ;;  %3993 = vmatprep.subr.bf16.mxu1 %v4837_v47  ;;  %v4907_v46 = vld [vmem:[%s6058_s5 + $0x2c4] ss:$16 sps:$4 sm:$0xff]   ;;  %v4910_v47 = vld [vmem:[%s6058_s5 + $0x2cc] ss:$16 sps:$4 sm:$0xff]   ;;  %v4978_v36 = vld [vmem:[%s6058_s5 + $0x428] ss:$16 sps:$4 sm:$0xff]  }
  0xe9   : > { %3671 = vmatpush1.bf16.msra.mxu0 %v4839_v48  ;;  %3995 = vmatpush1.bf16.msra.mxu1 %v4840_v49  ;;  %v6169_v48 = vld [vmem:[%s6765_s0 + $0x8] sm:$0xff] }
  0xea   : > { %3673 = vmatprep.subr.bf16.mxu0 %v4841_v50  ;;  %3997 = vmatprep.subr.bf16.mxu1 %v4843_v51  ;;  %v872_v49 = vunpack.c.h.bf16 %v6169_v48  ;;  %v4909_v50 = vld [vmem:[%s6058_s5 + $0x2c0] ss:$16 sps:$4 sm:$0xff]   ;;  %v4912_v51 = vld [vmem:[%s6058_s5 + $0x2c8] ss:$16 sps:$4 sm:$0xff]  }
  0xed   : > { %3675 = vmatpush1.bf16.msra.mxu0 %v4845_v52  ;;  %3999 = vmatpush1.bf16.msra.mxu1 %v4846_v53  ;;  %v4913_v52 = vld [vmem:[%s6058_s5 + $0x2e4] ss:$16 sps:$4 sm:$0xff]   ;;  %v4916_v53 = vld [vmem:[%s6058_s5 + $0x2ec] ss:$16 sps:$4 sm:$0xff]  }
  0xee   : > { %3677 = vmatprep.subr.bf16.mxu0 %v4847_v54  ;;  %4001 = vmatprep.subr.bf16.mxu1 %v4849_v55  ;;  %v4915_v54 = vld [vmem:[%s6058_s5 + $0x2e0] ss:$16 sps:$4 sm:$0xff]   ;;  %v4918_v55 = vld [vmem:[%s6058_s5 + $0x2e8] ss:$16 sps:$4 sm:$0xff]  }
  0xf1   : > { %3679 = vmatpush1.bf16.msra.mxu0 %v4851_v56  ;;  %4003 = vmatpush1.bf16.msra.mxu1 %v4852_v57  ;;  %v4919_v56 = vld [vmem:[%s6058_s5 + $0x304] ss:$16 sps:$4 sm:$0xff]   ;;  %v4922_v57 = vld [vmem:[%s6058_s5 + $0x30c] ss:$16 sps:$4 sm:$0xff]  }
  0xf2   : > { %3681 = vmatprep.subr.bf16.mxu0 %v4853_v58  ;;  %4005 = vmatprep.subr.bf16.mxu1 %v4855_v59  ;;  %v4921_v58 = vld [vmem:[%s6058_s5 + $0x300] ss:$16 sps:$4 sm:$0xff]   ;;  %v4924_v59 = vld [vmem:[%s6058_s5 + $0x308] ss:$16 sps:$4 sm:$0xff]  }
  0xf5   : > { %3683 = vmatpush1.bf16.msra.mxu0 %v4857_v60  ;;  %4007 = vmatpush1.bf16.msra.mxu1 %v4858_v61  ;;  %v4925_v60 = vld [vmem:[%s6058_s5 + $0x324] ss:$16 sps:$4 sm:$0xff]   ;;  %v4928_v61 = vld [vmem:[%s6058_s5 + $0x32c] ss:$16 sps:$4 sm:$0xff]  }
  0xf6   : > { %3685 = vmatprep.subr.bf16.mxu0 %v4859_v62  ;;  %4009 = vmatprep.subr.bf16.mxu1 %v4861_v63  ;;  %v4927_v62 = vld [vmem:[%s6058_s5 + $0x320] ss:$16 sps:$4 sm:$0xff]   ;;  %v4930_v63 = vld [vmem:[%s6058_s5 + $0x328] ss:$16 sps:$4 sm:$0xff]  }
  0xf9   : > { %3687 = vmatpush1.bf16.msra.mxu0 %v4863_v0  ;;  %4011 = vmatpush1.bf16.msra.mxu1 %v4864_v1  ;;  %v4931_v0 = vld [vmem:[%s6058_s5 + $0x344] ss:$16 sps:$4 sm:$0xff]   ;;  %v4934_v1 = vld [vmem:[%s6058_s5 + $0x34c] ss:$16 sps:$4 sm:$0xff]  }
  0xfa   : > { %3689 = vmatprep.subr.bf16.mxu0 %v4865_v2  ;;  %4013 = vmatprep.subr.bf16.mxu1 %v4867_v3  ;;  %v4933_v2 = vld [vmem:[%s6058_s5 + $0x340] ss:$16 sps:$4 sm:$0xff]   ;;  %v4936_v3 = vld [vmem:[%s6058_s5 + $0x348] ss:$16 sps:$4 sm:$0xff]  }
  0xfd   : > { %3691 = vmatpush1.bf16.msra.mxu0 %v4869_v5  ;;  %4015 = vmatpush1.bf16.msra.mxu1 %v4870_v6  ;;  %v4937_v5 = vld [vmem:[%s6058_s5 + $0x364] ss:$16 sps:$4 sm:$0xff]   ;;  %v4940_v6 = vld [vmem:[%s6058_s5 + $0x36c] ss:$16 sps:$4 sm:$0xff]  }
  0xfe   : > { %3693 = vmatprep.subr.bf16.mxu0 %v4871_v7  ;;  %4017 = vmatprep.subr.bf16.mxu1 %v4874_v8  ;;  %v4939_v7 = vld [vmem:[%s6058_s5 + $0x360] ss:$16 sps:$4 sm:$0xff]   ;;  %v4942_v8 = vld [vmem:[%s6058_s5 + $0x368] ss:$16 sps:$4 sm:$0xff]  }
 0x100   : > { %2027 = vmatmul.mubr.f32.vlgmr.msra.gmra.mrb[0].mxu0 %v869_v10  ;;  %2633 = vmatmul.mubr.f32.vlgmr.msra.gmra.mrb[0].mxu1 %v869_v10  ;;  %v4946_v10 = vld [vmem:[%s6058_s5 + $0x38c] ss:$16 sps:$4 sm:$0xff]  }
 0x101   : > { %3695 = vmatpush1.bf16.msra.mxu0 %v4873_v11  ;;  %4019 = vmatpush1.bf16.msra.mxu1 %v4876_v12  ;;  %v4945_v11 = vld [vmem:[%s6058_s5 + $0x380] ss:$16 sps:$4 sm:$0xff]   ;;  %v4948_v12 = vld [vmem:[%s6058_s5 + $0x388] ss:$16 sps:$4 sm:$0xff]  }
 0x102   : > { %3697 = vmatprep.subr.bf16.mxu0 %v4877_v13  ;;  %4021 = vmatprep.subr.bf16.mxu1 %v4880_v14  ;;  %v4949_v13 = vld [vmem:[%s6058_s5 + $0x3a4] ss:$16 sps:$4 sm:$0xff]   ;;  %v4952_v14 = vld [vmem:[%s6058_s5 + $0x3ac] ss:$16 sps:$4 sm:$0xff]  }
 0x103   : > { %2032 = vmatprep.mubr.f32.mxu0 %v881_v15  ;;  %2638 = vmatprep.mubr.f32.mxu1 %v881_v15  ;;  %v4951_v15 = vld [vmem:[%s6058_s5 + $0x3a0] ss:$16 sps:$4 sm:$0xff]  }
 0x104   : > { %2033 = vmatmul.mubr.f32.gmra.mrb[2].mxu0 %v880_v18  ;;  %2639 = vmatmul.mubr.f32.gmra.mrb[2].mxu1 %v880_v18  ;;  %v4957_v18 = vld [vmem:[%s6058_s5 + $0x3c0] ss:$16 sps:$4 sm:$0xff]  }
 0x105   : > { %3699 = vmatpush1.bf16.msra.mxu0 %v4879_v4  ;;  %4023 = vmatpush1.bf16.msra.mxu1 %v4882_v17  ;;  %v4955_v4 = vld [vmem:[%s6058_s5 + $0x3c4] ss:$16 sps:$4 sm:$0xff]   ;;  %v4958_v17 = vld [vmem:[%s6058_s5 + $0x3cc] ss:$16 sps:$4 sm:$0xff]  }
 0x106   : > { %3701 = vmatprep.subr.bf16.mxu0 %v4883_v19  ;;  %4025 = vmatprep.subr.bf16.mxu1 %v4886_v20  ;;  %v4960_v19 = vld [vmem:[%s6058_s5 + $0x3c8] ss:$16 sps:$4 sm:$0xff]   ;;  %v4961_v20 = vld [vmem:[%s6058_s5 + $0x3e4] ss:$16 sps:$4 sm:$0xff]  }
 0x107   : > { %2038 = vmatprep.mubr.f32.mxu0 %v892_v21  ;;  %2644 = vmatprep.mubr.f32.mxu1 %v892_v21  ;;  %v4964_v21 = vld [vmem:[%s6058_s5 + $0x3ec] ss:$16 sps:$4 sm:$0xff]  }
 0x108   : > { %2039 = vmatmul.mubr.f32.gmra.mrb[4].mxu0 %v891_v25  ;;  %2645 = vmatmul.mubr.f32.gmra.mrb[4].mxu1 %v891_v25  ;;  %v4970_v25 = vld [vmem:[%s6058_s5 + $0x40c] ss:$16 sps:$4 sm:$0xff]  }
 0x109   : > { %3703 = vmatpush1.bf16.msra.mxu0 %v4885_v23  ;;  %4027 = vmatpush1.bf16.msra.mxu1 %v4888_v24  ;;  %v4966_v23 = vld [vmem:[%s6058_s5 + $0x3e8] ss:$16 sps:$4 sm:$0xff]   ;;  %v4967_v24 = vld [vmem:[%s6058_s5 + $0x404] ss:$16 sps:$4 sm:$0xff]  }
 0x10a   : > { %3705 = vmatprep.subr.bf16.mxu0 %v4889_v26  ;;  %4029 = vmatprep.subr.bf16.mxu1 %v4892_v27  ;;  %v871_v26 = vunpack.c.l.bf16 %v6169_v48  ;;  %v840_v27 = vld [vmem:[%s6765_s0 + $0x34] sm:$0xff] }
 0x10b   : > { %2044 = vmatprep.mubr.f32.mxu0 %v903_v28  ;;  %2650 = vmatprep.mubr.f32.mxu1 %v903_v28  ;;  %v4969_v28 = vld [vmem:[%s6058_s5 + $0x400] ss:$16 sps:$4 sm:$0xff]  }
 0x10c   : > { %2045 = vmatmul.mubr.f32.gmra.mrb[6].mxu0 %v902_v32  ;;  %2651 = vmatmul.mubr.f32.gmra.mrb[6].mxu1 %v902_v32  ;;  %v883_v32 = vunpack.c.h.bf16 %v840_v27 }
 0x10d   : > { %3707 = vmatpush1.bf16.msra.mxu0 %v4891_v30  ;;  %4031 = vmatpush1.bf16.msra.mxu1 %v4894_v31  ;;  %v4973_v30 = vld [vmem:[%s6058_s5 + $0x424] ss:$16 sps:$4 sm:$0xff]   ;;  %v4976_v31 = vld [vmem:[%s6058_s5 + $0x42c] ss:$16 sps:$4 sm:$0xff]  }
 0x10e   : > { %3709 = vmatprep.subr.bf16.mxu0 %v4895_v33  ;;  %4033 = vmatprep.subr.bf16.mxu1 %v4898_v34  ;;  %v4975_v33 = vld [vmem:[%s6058_s5 + $0x420] ss:$16 sps:$4 sm:$0xff]   ;;  %v882_v34 = vunpack.c.l.bf16 %v840_v27  ;;  %v5042_v27 = vld [vmem:[%s6058_s5 + $0x58c] ss:$16 sps:$4 sm:$0xff]  }
 0x10f   : > { %2050 = vmatprep.mubr.f32.mxu0 %v914_v35  ;;  %2656 = vmatprep.mubr.f32.mxu1 %v914_v35  ;;  %v846_v35 = vld [vmem:[%s6765_s0 + $0x60] sm:$0xff] }
 0x110   : > { %2051 = vmatmul.mubr.f32.gmra.mrb[8].mxu0 %v913_v39  ;;  %2657 = vmatmul.mubr.f32.gmra.mrb[8].mxu1 %v913_v39  ;;  %v894_v39 = vunpack.c.h.bf16 %v846_v35 }
 0x111   : > { %3711 = vmatpush1.bf16.msra.mxu0 %v4897_v37  ;;  %4035 = vmatpush1.bf16.msra.mxu1 %v4900_v38  ;;  %v4979_v37 = vld [vmem:[%s6058_s5 + $0x444] ss:$16 sps:$4 sm:$0xff]   ;;  %v4982_v38 = vld [vmem:[%s6058_s5 + $0x44c] ss:$16 sps:$4 sm:$0xff]  }
 0x112   : > { %3713 = vmatprep.subr.bf16.mxu0 %v4901_v40  ;;  %4037 = vmatprep.subr.bf16.mxu1 %v4904_v41  ;;  %v4981_v40 = vld [vmem:[%s6058_s5 + $0x440] ss:$16 sps:$4 sm:$0xff]   ;;  %v893_v41 = vunpack.c.l.bf16 %v846_v35  ;;  %v5054_v35 = vld [vmem:[%s6058_s5 + $0x5cc] ss:$16 sps:$4 sm:$0xff]  }
 0x113   : > { %2056 = vmatprep.mubr.f32.mxu0 %v925_v42  ;;  %2662 = vmatprep.mubr.f32.mxu1 %v925_v42  ;;  %v852_v42 = vld [vmem:[%s6765_s0 + $0x8c] sm:$0xff] }
 0x114   : > { %2057 = vmatmul.mubr.f32.gmra.mrb[10].mxu0 %v924_v45  ;;  %2663 = vmatmul.mubr.f32.gmra.mrb[10].mxu1 %v924_v45  ;;  %v4988_v45 = vld [vmem:[%s6058_s5 + $0x46c] ss:$16 sps:$4 sm:$0xff]   ;;  %v904_v48 = vunpack.c.l.bf16 %v852_v42 }
 0x115   : > { %3715 = vmatpush1.bf16.msra.mxu0 %v4903_v43  ;;  %4039 = vmatpush1.bf16.msra.mxu1 %v4906_v44  ;;  %v4984_v43 = vld [vmem:[%s6058_s5 + $0x448] ss:$16 sps:$4 sm:$0xff]   ;;  %v4985_v44 = vld [vmem:[%s6058_s5 + $0x464] ss:$16 sps:$4 sm:$0xff]  }
 0x116   : > { %3717 = vmatprep.subr.bf16.mxu0 %v4907_v46  ;;  %4041 = vmatprep.subr.bf16.mxu1 %v4910_v47  ;;  %v905_v46 = vunpack.c.h.bf16 %v852_v42  ;;  %v4987_v47 = vld [vmem:[%s6058_s5 + $0x460] ss:$16 sps:$4 sm:$0xff]   ;;  %v5063_v42 = vld [vmem:[%s6058_s5 + $0x604] ss:$16 sps:$4 sm:$0xff]  }
 0x117   : > { %2127 = vmatprep.mubr.f32.mxu0 %v872_v49  ;;  %2733 = vmatprep.mubr.f32.mxu1 %v872_v49  ;;  %v858_v49 = vld [vmem:[%s6765_s0 + $0xb8] sm:$0xff] }
 0x119   : > { %3719 = vmatpush1.bf16.msra.mxu0 %v4909_v50  ;;  %4043 = vmatpush1.bf16.msra.mxu1 %v4912_v51  ;;  %v4990_v50 = vld [vmem:[%s6058_s5 + $0x468] ss:$16 sps:$4 sm:$0xff]   ;;  %v4991_v51 = vld [vmem:[%s6058_s5 + $0x484] ss:$16 sps:$4 sm:$0xff]  }
 0x11a   : > { %3721 = vmatprep.subr.bf16.mxu0 %v4913_v52  ;;  %4045 = vmatprep.subr.bf16.mxu1 %v4916_v53  ;;  %v4994_v52 = vld [vmem:[%s6058_s5 + $0x48c] ss:$16 sps:$4 sm:$0xff]   ;;  %v916_v53 = vunpack.c.h.bf16 %v858_v49 }
 0x11d   : > { %3723 = vmatpush1.bf16.msra.mxu0 %v4915_v54  ;;  %4047 = vmatpush1.bf16.msra.mxu1 %v4918_v55  ;;  %v4993_v54 = vld [vmem:[%s6058_s5 + $0x480] ss:$16 sps:$4 sm:$0xff]   ;;  %v915_v55 = vunpack.c.l.bf16 %v858_v49  ;;  %v5072_v49 = vld [vmem:[%s6058_s5 + $0x62c] ss:$16 sps:$4 sm:$0xff]  }
 0x11e   : > { %3725 = vmatprep.subr.bf16.mxu0 %v4919_v56  ;;  %4049 = vmatprep.subr.bf16.mxu1 %v4922_v57  ;;  %v864_v56 = vld [vmem:[%s6765_s0 + $0xe4] sm:$0xff] }
 0x11f   : > { %v4996_v57 = vld [vmem:[%s6058_s5 + $0x488] ss:$16 sps:$4 sm:$0xff]  }
 0x121   : > { %3727 = vmatpush1.bf16.msra.mxu0 %v4921_v58  ;;  %4051 = vmatpush1.bf16.msra.mxu1 %v4924_v59  ;;  %v4997_v58 = vld [vmem:[%s6058_s5 + $0x4a4] ss:$16 sps:$4 sm:$0xff]   ;;  %v5000_v59 = vld [vmem:[%s6058_s5 + $0x4ac] ss:$16 sps:$4 sm:$0xff]  }
 0x122   : > { %3729 = vmatprep.subr.bf16.mxu0 %v4925_v60  ;;  %4053 = vmatprep.subr.bf16.mxu1 %v4928_v61  ;;  %v927_v60 = vunpack.c.h.bf16 %v864_v56  ;;  %v4999_v61 = vld [vmem:[%s6058_s5 + $0x4a0] ss:$16 sps:$4 sm:$0xff]  }
 0x125   : > { %3731 = vmatpush1.bf16.msra.mxu0 %v4927_v62  ;;  %4055 = vmatpush1.bf16.msra.mxu1 %v4930_v63  ;;  %v926_v62 = vunpack.c.l.bf16 %v864_v56  ;;  %v6252_v63 = vld [vmem:[%s6765_s0 + $0x10] sm:$0xff]  ;;  %v5078_v56 = vld [vmem:[%s6058_s5 + $0x64c] ss:$16 sps:$4 sm:$0xff]  }
 0x126   : > { %3733 = vmatprep.subr.bf16.mxu0 %v4931_v0  ;;  %4057 = vmatprep.subr.bf16.mxu1 %v4934_v1  ;;  %v5002_v0 = vld [vmem:[%s6058_s5 + $0x4a8] ss:$16 sps:$4 sm:$0xff]   ;;  %v5003_v1 = vld [vmem:[%s6058_s5 + $0x4c4] ss:$16 sps:$4 sm:$0xff]  }
 0x129   : > { %3735 = vmatpush1.bf16.msra.mxu0 %v4933_v2  ;;  %4059 = vmatpush1.bf16.msra.mxu1 %v4936_v3  ;;  %v5006_v2 = vld [vmem:[%s6058_s5 + $0x4cc] ss:$16 sps:$4 sm:$0xff]   ;;  %v874_v3 = vunpack.c.h.bf16 %v6252_v63 }
 0x12a   : > { %3737 = vmatprep.subr.bf16.mxu0 %v4937_v5  ;;  %4061 = vmatprep.subr.bf16.mxu1 %v4940_v6  ;;  %v5005_v5 = vld [vmem:[%s6058_s5 + $0x4c0] ss:$16 sps:$4 sm:$0xff]   ;;  %v5008_v6 = vld [vmem:[%s6058_s5 + $0x4c8] ss:$16 sps:$4 sm:$0xff]  }
 0x12d   : > { %3739 = vmatpush1.bf16.msra.mxu0 %v4939_v7  ;;  %4063 = vmatpush1.bf16.msra.mxu1 %v4942_v8  ;;  %v5009_v7 = vld [vmem:[%s6058_s5 + $0x4e4] ss:$16 sps:$4 sm:$0xff]   ;;  %v5012_v8 = vld [vmem:[%s6058_s5 + $0x4ec] ss:$16 sps:$4 sm:$0xff]  }
 0x12e   : > { %3741 = vmatprep.subr.bf16.mxu0 %v4943_v9  ;;  %4065 = vmatprep.subr.bf16.mxu1 %v4946_v10  ;;  %v5011_v9 = vld [vmem:[%s6058_s5 + $0x4e0] ss:$16 sps:$4 sm:$0xff]   ;;  %v5014_v10 = vld [vmem:[%s6058_s5 + $0x4e8] ss:$16 sps:$4 sm:$0xff]  }
 0x131   : > { %3743 = vmatpush1.bf16.msra.mxu0 %v4945_v11  ;;  %4067 = vmatpush1.bf16.msra.mxu1 %v4948_v12  ;;  %v5015_v11 = vld [vmem:[%s6058_s5 + $0x504] ss:$16 sps:$4 sm:$0xff]   ;;  %v5018_v12 = vld [vmem:[%s6058_s5 + $0x50c] ss:$16 sps:$4 sm:$0xff]  }
 0x132   : > { %3745 = vmatprep.subr.bf16.mxu0 %v4949_v13  ;;  %4069 = vmatprep.subr.bf16.mxu1 %v4952_v14  ;;  %v5017_v13 = vld [vmem:[%s6058_s5 + $0x500] ss:$16 sps:$4 sm:$0xff]   ;;  %v5020_v14 = vld [vmem:[%s6058_s5 + $0x508] ss:$16 sps:$4 sm:$0xff]  }
 0x135   : > { %3747 = vmatpush1.bf16.msra.mxu0 %v4951_v15  ;;  %4071 = vmatpush1.bf16.msra.mxu1 %v4954_v16  ;;  %v5021_v15 = vld [vmem:[%s6058_s5 + $0x524] ss:$16 sps:$4 sm:$0xff]   ;;  %v5024_v16 = vld [vmem:[%s6058_s5 + $0x52c] ss:$16 sps:$4 sm:$0xff]  }
 0x136   : > { %3749 = vmatprep.subr.bf16.mxu0 %v4955_v4  ;;  %4073 = vmatprep.subr.bf16.mxu1 %v4958_v17  ;;  %v5023_v4 = vld [vmem:[%s6058_s5 + $0x520] ss:$16 sps:$4 sm:$0xff]   ;;  %v5026_v17 = vld [vmem:[%s6058_s5 + $0x528] ss:$16 sps:$4 sm:$0xff]  }
 0x139   : > { %3751 = vmatpush1.bf16.msra.mxu0 %v4957_v18  ;;  %4075 = vmatpush1.bf16.msra.mxu1 %v4960_v19  ;;  %v5027_v18 = vld [vmem:[%s6058_s5 + $0x544] ss:$16 sps:$4 sm:$0xff]   ;;  %v5030_v19 = vld [vmem:[%s6058_s5 + $0x54c] ss:$16 sps:$4 sm:$0xff]  }
 0x13a   : > { %3753 = vmatprep.subr.bf16.mxu0 %v4961_v20  ;;  %4077 = vmatprep.subr.bf16.mxu1 %v4964_v21  ;;  %v5029_v20 = vld [vmem:[%s6058_s5 + $0x540] ss:$16 sps:$4 sm:$0xff]   ;;  %v5032_v21 = vld [vmem:[%s6058_s5 + $0x548] ss:$16 sps:$4 sm:$0xff]  }
 0x13d   : > { %3755 = vmatpush1.bf16.msra.mxu0 %v4963_v22  ;;  %4079 = vmatpush1.bf16.msra.mxu1 %v4966_v23  ;;  %v5033_v22 = vld [vmem:[%s6058_s5 + $0x564] ss:$16 sps:$4 sm:$0xff]   ;;  %v5036_v23 = vld [vmem:[%s6058_s5 + $0x56c] ss:$16 sps:$4 sm:$0xff]  }
 0x13e   : > { %3757 = vmatprep.subr.bf16.mxu0 %v4967_v24  ;;  %4081 = vmatprep.subr.bf16.mxu1 %v4970_v25  ;;  %v5035_v24 = vld [vmem:[%s6058_s5 + $0x560] ss:$16 sps:$4 sm:$0xff]   ;;  %v5038_v25 = vld [vmem:[%s6058_s5 + $0x568] ss:$16 sps:$4 sm:$0xff]  }
 0x140   : > { %2128 = vmatmul.mubr.f32.vlgmr.msra.gmra.mrb[0].mxu0 %v871_v26  ;;  %2734 = vmatmul.mubr.f32.vlgmr.msra.gmra.mrb[0].mxu1 %v871_v26  ;;  %v5039_v26 = vld [vmem:[%s6058_s5 + $0x584] ss:$16 sps:$4 sm:$0xff]  }
 0x141   : > { %3759 = vmatpush1.bf16.msra.mxu0 %v4969_v28  ;;  %4083 = vmatpush1.bf16.msra.mxu1 %v4972_v29  ;;  %v5041_v28 = vld [vmem:[%s6058_s5 + $0x580] ss:$16 sps:$4 sm:$0xff]   ;;  %v5044_v29 = vld [vmem:[%s6058_s5 + $0x588] ss:$16 sps:$4 sm:$0xff]  }
 0x142   : > { %3761 = vmatprep.subr.bf16.mxu0 %v4973_v30  ;;  %4085 = vmatprep.subr.bf16.mxu1 %v4976_v31  ;;  %v5045_v30 = vld [vmem:[%s6058_s5 + $0x5a4] ss:$16 sps:$4 sm:$0xff]   ;;  %v5048_v31 = vld [vmem:[%s6058_s5 + $0x5ac] ss:$16 sps:$4 sm:$0xff]  }
 0x143   : > { %2133 = vmatprep.mubr.f32.mxu0 %v883_v32  ;;  %2739 = vmatprep.mubr.f32.mxu1 %v883_v32  ;;  %v5047_v32 = vld [vmem:[%s6058_s5 + $0x5a0] ss:$16 sps:$4 sm:$0xff]  }
 0x144   : > { %2134 = vmatmul.mubr.f32.gmra.mrb[2].mxu0 %v882_v34  ;;  %2740 = vmatmul.mubr.f32.gmra.mrb[2].mxu1 %v882_v34  ;;  %v5051_v34 = vld [vmem:[%s6058_s5 + $0x5c4] ss:$16 sps:$4 sm:$0xff]  }
 0x145   : > { %3763 = vmatpush1.bf16.msra.mxu0 %v4975_v33  ;;  %4087 = vmatpush1.bf16.msra.mxu1 %v4978_v36  ;;  %v5050_v33 = vld [vmem:[%s6058_s5 + $0x5a8] ss:$16 sps:$4 sm:$0xff]   ;;  %v5053_v36 = vld [vmem:[%s6058_s5 + $0x5c0] ss:$16 sps:$4 sm:$0xff]  }
 0x146   : > { %3765 = vmatprep.subr.bf16.mxu0 %v4979_v37  ;;  %4089 = vmatprep.subr.bf16.mxu1 %v4982_v38  ;;  %v5056_v37 = vld [vmem:[%s6058_s5 + $0x5c8] ss:$16 sps:$4 sm:$0xff]   ;;  %v5057_v38 = vld [vmem:[%s6058_s5 + $0x5e4] ss:$16 sps:$4 sm:$0xff]  }
 0x147   : > { %2139 = vmatprep.mubr.f32.mxu0 %v894_v39  ;;  %2745 = vmatprep.mubr.f32.mxu1 %v894_v39  ;;  %v5060_v39 = vld [vmem:[%s6058_s5 + $0x5ec] ss:$16 sps:$4 sm:$0xff]  }
 0x148   : > { %2140 = vmatmul.mubr.f32.gmra.mrb[4].mxu0 %v893_v41  ;;  %2746 = vmatmul.mubr.f32.gmra.mrb[4].mxu1 %v893_v41  ;;  %v5062_v41 = vld [vmem:[%s6058_s5 + $0x5e8] ss:$16 sps:$4 sm:$0xff]  }
 0x149   : > { %3767 = vmatpush1.bf16.msra.mxu0 %v4981_v40  ;;  %4091 = vmatpush1.bf16.msra.mxu1 %v4984_v43  ;;  %v5059_v40 = vld [vmem:[%s6058_s5 + $0x5e0] ss:$16 sps:$4 sm:$0xff]   ;;  %v5066_v43 = vld [vmem:[%s6058_s5 + $0x60c] ss:$16 sps:$4 sm:$0xff]  }
 0x14a   : > { %3769 = vmatprep.subr.bf16.mxu0 %v4985_v44  ;;  %4093 = vmatprep.subr.bf16.mxu1 %v4988_v45  ;;  %v5065_v44 = vld [vmem:[%s6058_s5 + $0x600] ss:$16 sps:$4 sm:$0xff]   ;;  %v873_v45 = vunpack.c.l.bf16 %v6252_v63  ;;  %v5084_v63 = vld [vmem:[%s6058_s5 + $0x66c] ss:$16 sps:$4 sm:$0xff]  }
 0x14b   : > { %2145 = vmatprep.mubr.f32.mxu0 %v905_v46  ;;  %2751 = vmatprep.mubr.f32.mxu1 %v905_v46  ;;  %v841_v46 = vld [vmem:[%s6765_s0 + $0x3c] sm:$0xff] }
 0x14c   : > { %2146 = vmatmul.mubr.f32.gmra.mrb[6].mxu0 %v904_v48  ;;  %2752 = vmatmul.mubr.f32.gmra.mrb[6].mxu1 %v904_v48  ;;  %v5069_v48 = vld [vmem:[%s6058_s5 + $0x624] ss:$16 sps:$4 sm:$0xff]  }
 0x14d   : > { %3771 = vmatpush1.bf16.msra.mxu0 %v4987_v47  ;;  %4095 = vmatpush1.bf16.msra.mxu1 %v4990_v50  ;;  %v5068_v47 = vld [vmem:[%s6058_s5 + $0x608] ss:$16 sps:$4 sm:$0xff]   ;;  %v5071_v50 = vld [vmem:[%s6058_s5 + $0x620] ss:$16 sps:$4 sm:$0xff]  }
 0x14e   : > { %3773 = vmatprep.subr.bf16.mxu0 %v4991_v51  ;;  %4097 = vmatprep.subr.bf16.mxu1 %v4994_v52  ;;  %v885_v51 = vunpack.c.h.bf16 %v841_v46  ;;  %v884_v52 = vunpack.c.l.bf16 %v841_v46  ;;  %v5137_v46 = vld [vmem:[%s6058_s5 + $0x780] ss:$16 sps:$4 sm:$0xff]  }
 0x14f   : > { %2151 = vmatprep.mubr.f32.mxu0 %v916_v53  ;;  %2757 = vmatprep.mubr.f32.mxu1 %v916_v53  ;;  %v847_v53 = vld [vmem:[%s6765_s0 + $0x68] sm:$0xff] }
 0x150   : > { %2152 = vmatmul.mubr.f32.gmra.mrb[8].mxu0 %v915_v55  ;;  %2758 = vmatmul.mubr.f32.gmra.mrb[8].mxu1 %v915_v55  ;;  %v5075_v55 = vld [vmem:[%s6058_s5 + $0x644] ss:$16 sps:$4 sm:$0xff]  }
 0x151   : > { %3775 = vmatpush1.bf16.msra.mxu0 %v4993_v54  ;;  %4099 = vmatpush1.bf16.msra.mxu1 %v4996_v57  ;;  %v5074_v54 = vld [vmem:[%s6058_s5 + $0x628] ss:$16 sps:$4 sm:$0xff]   ;;  %v5077_v57 = vld [vmem:[%s6058_s5 + $0x640] ss:$16 sps:$4 sm:$0xff]  }
 0x152   : > { %3777 = vmatprep.subr.bf16.mxu0 %v4997_v58  ;;  %4101 = vmatprep.subr.bf16.mxu1 %v5000_v59  ;;  %v896_v58 = vunpack.c.h.bf16 %v847_v53  ;;  %v895_v59 = vunpack.c.l.bf16 %v847_v53  ;;  %v5143_v53 = vld [vmem:[%s6058_s5 + $0x7a0] ss:$16 sps:$4 sm:$0xff]  }
 0x153   : > { %2157 = vmatprep.mubr.f32.mxu0 %v927_v60  ;;  %2763 = vmatprep.mubr.f32.mxu1 %v927_v60  ;;  %v853_v60 = vld [vmem:[%s6765_s0 + $0x94] sm:$0xff] }
 0x154   : > { %2158 = vmatmul.mubr.f32.gmra.mrb[10].mxu0 %v926_v62  ;;  %2764 = vmatmul.mubr.f32.gmra.mrb[10].mxu1 %v926_v62  ;;  %v5081_v62 = vld [vmem:[%s6058_s5 + $0x664] ss:$16 sps:$4 sm:$0xff]  }
 0x155   : > { %3779 = vmatpush1.bf16.msra.mxu0 %v4999_v61  ;;  %4103 = vmatpush1.bf16.msra.mxu1 %v5002_v0  ;;  %v5080_v61 = vld [vmem:[%s6058_s5 + $0x648] ss:$16 sps:$4 sm:$0xff]   ;;  %v907_v0 = vunpack.c.h.bf16 %v853_v60 }
 0x156   : > { %3781 = vmatprep.subr.bf16.mxu0 %v5003_v1  ;;  %4105 = vmatprep.subr.bf16.mxu1 %v5006_v2  ;;  %v906_v1 = vunpack.c.l.bf16 %v853_v60  ;;  %v859_v2 = vld [vmem:[%s6765_s0 + $0xc0] sm:$0xff]  ;;  %v5152_v60 = vld [vmem:[%s6058_s5 + $0x7c8] ss:$16 sps:$4 sm:$0xff]  }
 0x157   : > { %2228 = vmatprep.mubr.f32.mxu0 %v874_v3  ;;  %2834 = vmatprep.mubr.f32.mxu1 %v874_v3  ;;  %v5083_v3 = vld [vmem:[%s6058_s5 + $0x660] ss:$16 sps:$4 sm:$0xff]  }
 0x159   : > { %3783 = vmatpush1.bf16.msra.mxu0 %v5005_v5  ;;  %4107 = vmatpush1.bf16.msra.mxu1 %v5008_v6  ;;  %v5086_v5 = vld [vmem:[%s6058_s5 + $0x668] ss:$16 sps:$4 sm:$0xff]   ;;  %v5087_v6 = vld [vmem:[%s6058_s5 + $0x684] ss:$16 sps:$4 sm:$0xff]  }
 0x15a   : > { %3785 = vmatprep.subr.bf16.mxu0 %v5009_v7  ;;  %4109 = vmatprep.subr.bf16.mxu1 %v5012_v8  ;;  %v5090_v7 = vld [vmem:[%s6058_s5 + $0x68c] ss:$16 sps:$4 sm:$0xff]   ;;  %v918_v8 = vunpack.c.h.bf16 %v859_v2 }
 0x15d   : > { %3787 = vmatpush1.bf16.msra.mxu0 %v5011_v9  ;;  %4111 = vmatpush1.bf16.msra.mxu1 %v5014_v10  ;;  %v5089_v9 = vld [vmem:[%s6058_s5 + $0x680] ss:$16 sps:$4 sm:$0xff]   ;;  %v917_v10 = vunpack.c.l.bf16 %v859_v2  ;;  %v5158_v2 = vld [vmem:[%s6058_s5 + $0x7e8] ss:$16 sps:$4 sm:$0xff]  }
 0x15e   : > { %3789 = vmatprep.subr.bf16.mxu0 %v5015_v11  ;;  %4113 = vmatprep.subr.bf16.mxu1 %v5018_v12  ;;  %v865_v11 = vld [vmem:[%s6765_s0 + $0xec] sm:$0xff]  ;;  %v5092_v12 = vld [vmem:[%s6058_s5 + $0x688] ss:$16 sps:$4 sm:$0xff]  }
 0x161   : > { %3791 = vmatpush1.bf16.msra.mxu0 %v5017_v13  ;;  %4115 = vmatpush1.bf16.msra.mxu1 %v5020_v14  ;;  %v5093_v13 = vld [vmem:[%s6058_s5 + $0x6a4] ss:$16 sps:$4 sm:$0xff]   ;;  %v5096_v14 = vld [vmem:[%s6058_s5 + $0x6ac] ss:$16 sps:$4 sm:$0xff]  }
 0x162   : > { %3793 = vmatprep.subr.bf16.mxu0 %v5021_v15  ;;  %4117 = vmatprep.subr.bf16.mxu1 %v5024_v16  ;;  %v929_v15 = vunpack.c.h.bf16 %v865_v11  ;;  %v5095_v16 = vld [vmem:[%s6058_s5 + $0x6a0] ss:$16 sps:$4 sm:$0xff]  }
 0x165   : > { %3795 = vmatpush1.bf16.msra.mxu0 %v5023_v4  ;;  %4119 = vmatpush1.bf16.msra.mxu1 %v5026_v17  ;;  %v928_v4 = vunpack.c.l.bf16 %v865_v11  ;;  %v6338_v17 = vld [vmem:[%s6765_s0 + $0x18] sm:$0xff] }
 0x166   : > { %3797 = vmatprep.subr.bf16.mxu0 %v5027_v18  ;;  %4121 = vmatprep.subr.bf16.mxu1 %v5030_v19  ;;  %v5098_v18 = vld [vmem:[%s6058_s5 + $0x6a8] ss:$16 sps:$4 sm:$0xff]   ;;  %v5099_v19 = vld [vmem:[%s6058_s5 + $0x6c4] ss:$16 sps:$4 sm:$0xff]   ;;  %v5168_v11 = vld [vmem:[%s6058_s5 + $0x82c] ss:$16 sps:$4 sm:$0xff]  }
 0x169   : > { %3799 = vmatpush1.bf16.msra.mxu0 %v5029_v20  ;;  %4123 = vmatpush1.bf16.msra.mxu1 %v5032_v21  ;;  %v5102_v20 = vld [vmem:[%s6058_s5 + $0x6cc] ss:$16 sps:$4 sm:$0xff]   ;;  %v876_v21 = vunpack.c.h.bf16 %v6338_v17 }
 0x16a   : > { %3801 = vmatprep.subr.bf16.mxu0 %v5033_v22  ;;  %4125 = vmatprep.subr.bf16.mxu1 %v5036_v23  ;;  %v5101_v22 = vld [vmem:[%s6058_s5 + $0x6c0] ss:$16 sps:$4 sm:$0xff]   ;;  %v5104_v23 = vld [vmem:[%s6058_s5 + $0x6c8] ss:$16 sps:$4 sm:$0xff]  }
 0x16d   : > { %3803 = vmatpush1.bf16.msra.mxu0 %v5035_v24  ;;  %4127 = vmatpush1.bf16.msra.mxu1 %v5038_v25  ;;  %v5105_v24 = vld [vmem:[%s6058_s5 + $0x6e4] ss:$16 sps:$4 sm:$0xff]   ;;  %v5108_v25 = vld [vmem:[%s6058_s5 + $0x6ec] ss:$16 sps:$4 sm:$0xff]  }
 0x16e   : > { %3805 = vmatprep.subr.bf16.mxu0 %v5039_v26  ;;  %4129 = vmatprep.subr.bf16.mxu1 %v5042_v27  ;;  %v5107_v26 = vld [vmem:[%s6058_s5 + $0x6e0] ss:$16 sps:$4 sm:$0xff]   ;;  %v5110_v27 = vld [vmem:[%s6058_s5 + $0x6e8] ss:$16 sps:$4 sm:$0xff]  }
 0x171   : > { %3807 = vmatpush1.bf16.msra.mxu0 %v5041_v28  ;;  %4131 = vmatpush1.bf16.msra.mxu1 %v5044_v29  ;;  %v5111_v28 = vld [vmem:[%s6058_s5 + $0x704] ss:$16 sps:$4 sm:$0xff]   ;;  %v5114_v29 = vld [vmem:[%s6058_s5 + $0x70c] ss:$16 sps:$4 sm:$0xff]  }
 0x172   : > { %3809 = vmatprep.subr.bf16.mxu0 %v5045_v30  ;;  %4133 = vmatprep.subr.bf16.mxu1 %v5048_v31  ;;  %v5113_v30 = vld [vmem:[%s6058_s5 + $0x700] ss:$16 sps:$4 sm:$0xff]   ;;  %v5116_v31 = vld [vmem:[%s6058_s5 + $0x708] ss:$16 sps:$4 sm:$0xff]  }
 0x175   : > { %3811 = vmatpush1.bf16.msra.mxu0 %v5047_v32  ;;  %4135 = vmatpush1.bf16.msra.mxu1 %v5050_v33  ;;  %v5117_v32 = vld [vmem:[%s6058_s5 + $0x724] ss:$16 sps:$4 sm:$0xff]   ;;  %v5120_v33 = vld [vmem:[%s6058_s5 + $0x72c] ss:$16 sps:$4 sm:$0xff]  }
 0x176   : > { %3813 = vmatprep.subr.bf16.mxu0 %v5051_v34  ;;  %4137 = vmatprep.subr.bf16.mxu1 %v5054_v35  ;;  %v5119_v34 = vld [vmem:[%s6058_s5 + $0x720] ss:$16 sps:$4 sm:$0xff]   ;;  %v5122_v35 = vld [vmem:[%s6058_s5 + $0x728] ss:$16 sps:$4 sm:$0xff]  }
 0x179   : > { %3815 = vmatpush1.bf16.msra.mxu0 %v5053_v36  ;;  %4139 = vmatpush1.bf16.msra.mxu1 %v5056_v37  ;;  %v5123_v36 = vld [vmem:[%s6058_s5 + $0x744] ss:$16 sps:$4 sm:$0xff]   ;;  %v5126_v37 = vld [vmem:[%s6058_s5 + $0x74c] ss:$16 sps:$4 sm:$0xff]  }
 0x17a   : > { %3817 = vmatprep.subr.bf16.mxu0 %v5057_v38  ;;  %4141 = vmatprep.subr.bf16.mxu1 %v5060_v39  ;;  %v5125_v38 = vld [vmem:[%s6058_s5 + $0x740] ss:$16 sps:$4 sm:$0xff]   ;;  %v5128_v39 = vld [vmem:[%s6058_s5 + $0x748] ss:$16 sps:$4 sm:$0xff]  }
 0x17d   : > { %3819 = vmatpush1.bf16.msra.mxu0 %v5059_v40  ;;  %4143 = vmatpush1.bf16.msra.mxu1 %v5062_v41  ;;  %v5129_v40 = vld [vmem:[%s6058_s5 + $0x764] ss:$16 sps:$4 sm:$0xff]   ;;  %v5132_v41 = vld [vmem:[%s6058_s5 + $0x76c] ss:$16 sps:$4 sm:$0xff]  }
 0x17e   : > { %3821 = vmatprep.subr.bf16.mxu0 %v5063_v42  ;;  %4145 = vmatprep.subr.bf16.mxu1 %v5066_v43  ;;  %v5131_v42 = vld [vmem:[%s6058_s5 + $0x760] ss:$16 sps:$4 sm:$0xff]   ;;  %v5134_v43 = vld [vmem:[%s6058_s5 + $0x768] ss:$16 sps:$4 sm:$0xff]  }
 0x180   : > { %2229 = vmatmul.mubr.f32.vlgmr.msra.gmra.mrb[0].mxu0 %v873_v45  ;;  %2835 = vmatmul.mubr.f32.vlgmr.msra.gmra.mrb[0].mxu1 %v873_v45  ;;  %v5138_v45 = vld [vmem:[%s6058_s5 + $0x78c] ss:$16 sps:$4 sm:$0xff]  }
 0x181   : > { %3823 = vmatpush1.bf16.msra.mxu0 %v5065_v44  ;;  %4147 = vmatpush1.bf16.msra.mxu1 %v5068_v47  ;;  %v5135_v44 = vld [vmem:[%s6058_s5 + $0x784] ss:$16 sps:$4 sm:$0xff]   ;;  %v5140_v47 = vld [vmem:[%s6058_s5 + $0x788] ss:$16 sps:$4 sm:$0xff]  }
 0x182   : > { %3825 = vmatprep.subr.bf16.mxu0 %v5069_v48  ;;  %4149 = vmatprep.subr.bf16.mxu1 %v5072_v49  ;;  %v1907_v48 = vld [vmem:[%s6767_s2] sm:$0xff]  ;;  %v1909_v49 = vld [vmem:[%s6767_s2 + $0x10] sm:$0xff] }
 0x183   : > { %2234 = vmatprep.mubr.f32.mxu0 %v885_v51  ;;  %2840 = vmatprep.mubr.f32.mxu1 %v885_v51  ;;  %v5144_v51 = vld [vmem:[%s6058_s5 + $0x7ac] ss:$16 sps:$4 sm:$0xff]  }
 0x184   : > { %2235 = vmatmul.mubr.f32.gmra.mrb[2].mxu0 %v884_v52  ;;  %2841 = vmatmul.mubr.f32.gmra.mrb[2].mxu1 %v884_v52  ;;  %v5333_v52 = vmov 0  }
 0x185   : > { %3827 = vmatpush1.bf16.msra.mxu0 %v5071_v50  ;;  %4151 = vmatpush1.bf16.msra.mxu1 %v5074_v54  ;;  %v5141_v50 = vld [vmem:[%s6058_s5 + $0x7a4] ss:$16 sps:$4 sm:$0xff]   ;;  %v5146_v54 = vld [vmem:[%s6058_s5 + $0x7a8] ss:$16 sps:$4 sm:$0xff]  }
 0x186   : > { %3829 = vmatprep.subr.bf16.mxu0 %v5075_v55  ;;  %4153 = vmatprep.subr.bf16.mxu1 %v5078_v56  ;;  %v1908_v55 = vld [vmem:[%s6767_s2 + $0x8] sm:$0xff]  ;;  %v1910_v56 = vld [vmem:[%s6767_s2 + $0x18] sm:$0xff] }
 0x187   : > { %2240 = vmatprep.mubr.f32.mxu0 %v896_v58  ;;  %2846 = vmatprep.mubr.f32.mxu1 %v896_v58  ;;  %v5150_v58 = vld [vmem:[%s6058_s5 + $0x7cc] ss:$16 sps:$4 sm:$0xff]  }
 0x188   : > { %2241 = vmatmul.mubr.f32.gmra.mrb[4].mxu0 %v895_v59  ;;  %2847 = vmatmul.mubr.f32.gmra.mrb[4].mxu1 %v895_v59  ;;  %v5149_v59 = vld [vmem:[%s6058_s5 + $0x7c0] ss:$16 sps:$4 sm:$0xff]  }
 0x189   : > { %3831 = vmatpush1.bf16.msra.mxu0 %v5077_v57  ;;  %4155 = vmatpush1.bf16.msra.mxu1 %v5080_v61  ;;  %v5147_v57 = vld [vmem:[%s6058_s5 + $0x7c4] ss:$16 sps:$4 sm:$0xff]   ;;  %v1912_v61 = vld [vmem:[%s6767_s2 + $0x28] sm:$0xff] }
 0x18a   : > { %3833 = vmatprep.subr.bf16.mxu0 %v5081_v62  ;;  %4157 = vmatprep.subr.bf16.mxu1 %v5084_v63  ;;  %v1911_v62 = vld [vmem:[%s6767_s2 + $0x20] sm:$0xff] }
 0x18b   : > { %2246 = vmatprep.mubr.f32.mxu0 %v907_v0  ;;  %2852 = vmatprep.mubr.f32.mxu1 %v907_v0  ;;  %v5153_v63 = vld [vmem:[%s6058_s5 + $0x7e4] ss:$16 sps:$4 sm:$0xff]   ;;  %v5156_v0 = vld [vmem:[%s6058_s5 + $0x7ec] ss:$16 sps:$4 sm:$0xff]  }
 0x18c   : > { %2247 = vmatmul.mubr.f32.gmra.mrb[6].mxu0 %v906_v1  ;;  %2853 = vmatmul.mubr.f32.gmra.mrb[6].mxu1 %v906_v1  ;;  %v5155_v1 = vld [vmem:[%s6058_s5 + $0x7e0] ss:$16 sps:$4 sm:$0xff]  }
 0x18d   : > { %3835 = vmatpush1.bf16.msra.mxu0 %v5083_v3  ;;  %4159 = vmatpush1.bf16.msra.mxu1 %v5086_v5  ;;  %v5159_v3 = vld [vmem:[%s6058_s5 + $0x804] ss:$16 sps:$4 sm:$0xff]   ;;  %v5162_v5 = vld [vmem:[%s6058_s5 + $0x80c] ss:$16 sps:$4 sm:$0xff]  }
 0x18e   : > { %3837 = vmatprep.subr.bf16.mxu0 %v5087_v6  ;;  %4161 = vmatprep.subr.bf16.mxu1 %v5090_v7  ;;  %v875_v6 = vunpack.c.l.bf16 %v6338_v17  ;;  %v842_v7 = vld [vmem:[%s6765_s0 + $0x44] sm:$0xff]  ;;  %v5174_v17 = vld [vmem:[%s6058_s5 + $0x84c] ss:$16 sps:$4 sm:$0xff]  }
 0x18f   : > { %2252 = vmatprep.mubr.f32.mxu0 %v918_v8  ;;  %2858 = vmatprep.mubr.f32.mxu1 %v918_v8  ;;  %v5161_v8 = vld [vmem:[%s6058_s5 + $0x800] ss:$16 sps:$4 sm:$0xff]  }
 0x190   : > { %2253 = vmatmul.mubr.f32.gmra.mrb[8].mxu0 %v917_v10  ;;  %2859 = vmatmul.mubr.f32.gmra.mrb[8].mxu1 %v917_v10  ;;  %v5165_v10 = vld [vmem:[%s6058_s5 + $0x824] ss:$16 sps:$4 sm:$0xff]  }
 0x191   : > { %3839 = vmatpush1.bf16.msra.mxu0 %v5089_v9  ;;  %4163 = vmatpush1.bf16.msra.mxu1 %v5092_v12  ;;  %v5164_v9 = vld [vmem:[%s6058_s5 + $0x808] ss:$16 sps:$4 sm:$0xff]   ;;  %v887_v12 = vunpack.c.h.bf16 %v842_v7 }
 0x192   : > { %3841 = vmatprep.subr.bf16.mxu0 %v5093_v13  ;;  %4165 = vmatprep.subr.bf16.mxu1 %v5096_v14  ;;  %v886_v13 = vunpack.c.l.bf16 %v842_v7  ;;  %v848_v14 = vld [vmem:[%s6765_s0 + $0x70] sm:$0xff]  ;;  %v5234_v7 = vld [vmem:[%s6058_s5 + $0x98c] ss:$16 sps:$4 sm:$0xff]  }
 0x193   : > { %2258 = vmatprep.mubr.f32.mxu0 %v929_v15  ;;  %2864 = vmatprep.mubr.f32.mxu1 %v929_v15  ;;  %v5167_v15 = vld [vmem:[%s6058_s5 + $0x820] ss:$16 sps:$4 sm:$0xff]  }
 0x194   : > { %2259 = vmatmul.mubr.f32.gmra.mrb[10].mxu0 %v928_v4  ;;  %2865 = vmatmul.mubr.f32.gmra.mrb[10].mxu1 %v928_v4  ;;  %v5171_v4 = vld [vmem:[%s6058_s5 + $0x844] ss:$16 sps:$4 sm:$0xff]  }
 0x195   : > { %3843 = vmatpush1.bf16.msra.mxu0 %v5095_v16  ;;  %4167 = vmatpush1.bf16.msra.mxu1 %v5098_v18  ;;  %v5170_v16 = vld [vmem:[%s6058_s5 + $0x828] ss:$16 sps:$4 sm:$0xff]   ;;  %v898_v18 = vunpack.c.h.bf16 %v848_v14 }
 0x196   : > { %3845 = vmatprep.subr.bf16.mxu0 %v5099_v19  ;;  %4169 = vmatprep.subr.bf16.mxu1 %v5102_v20  ;;  %v897_v19 = vunpack.c.l.bf16 %v848_v14  ;;  %v854_v20 = vld [vmem:[%s6765_s0 + $0x9c] sm:$0xff]  ;;  %v5243_v14 = vld [vmem:[%s6058_s5 + $0x9c4] ss:$16 sps:$4 sm:$0xff]  }
 0x197   : > { %2329 = vmatprep.mubr.f32.mxu0 %v876_v21  ;;  %2935 = vmatprep.mubr.f32.mxu1 %v876_v21  ;;  %v5173_v21 = vld [vmem:[%s6058_s5 + $0x840] ss:$16 sps:$4 sm:$0xff]  }
 0x198   : > { %4773 = vset.pattern.permute.xlu0 %v5333_v52  ;;  %4774 = vset.pattern.permute.xlu1 %v5333_v52  ;;  %v5206_v52 = vld [vmem:[%s6058_s5 + $0x8e8] ss:$16 sps:$4 sm:$0xff]  }
 0x199   : > { %3847 = vmatpush1.bf16.msra.mxu0 %v5101_v22  ;;  %4171 = vmatpush1.bf16.msra.mxu1 %v5104_v23  ;;  %v5176_v22 = vld [vmem:[%s6058_s5 + $0x848] ss:$16 sps:$4 sm:$0xff]   ;;  %v5177_v23 = vld [vmem:[%s6058_s5 + $0x864] ss:$16 sps:$4 sm:$0xff]  }
 0x19a   : > { %3849 = vmatprep.subr.bf16.mxu0 %v5105_v24  ;;  %4173 = vmatprep.subr.bf16.mxu1 %v5108_v25  ;;  %v5180_v24 = vld [vmem:[%s6058_s5 + $0x86c] ss:$16 sps:$4 sm:$0xff]   ;;  %v909_v25 = vunpack.c.h.bf16 %v854_v20 }
 0x19b   : > { %1915 = vperm.xlu0 %4773, %v1907_v48   ;;  %1925 = vperm.xlu1 %4774, %v1909_v49   ;;  %v5200_v48 = vld [vmem:[%s6058_s5 + $0x8c8] ss:$16 sps:$4 sm:$0xff]   ;;  %v5201_v49 = vld [vmem:[%s6058_s5 + $0x8e4] ss:$16 sps:$4 sm:$0xff]  }
 0x19d   : > { %3851 = vmatpush1.bf16.msra.mxu0 %v5107_v26  ;;  %4175 = vmatpush1.bf16.msra.mxu1 %v5110_v27  ;;  %v908_v26 = vunpack.c.l.bf16 %v854_v20  ;;  %v860_v27 = vld [vmem:[%s6765_s0 + $0xc8] sm:$0xff] }
 0x19e   : > { %3853 = vmatprep.subr.bf16.mxu0 %v5111_v28  ;;  %4177 = vmatprep.subr.bf16.mxu1 %v5114_v29  ;;  %v5179_v28 = vld [vmem:[%s6058_s5 + $0x860] ss:$16 sps:$4 sm:$0xff]   ;;  %v5182_v29 = vld [vmem:[%s6058_s5 + $0x868] ss:$16 sps:$4 sm:$0xff]  }
 0x19f   : > { %1920 = vperm.xlu0 %4773, %v1908_v55   ;;  %1930 = vperm.xlu1 %4774, %v1910_v56   ;;  %v5209_v55 = vld [vmem:[%s6058_s5 + $0x900] ss:$16 sps:$4 sm:$0xff]   ;;  %v5212_v56 = vld [vmem:[%s6058_s5 + $0x908] ss:$16 sps:$4 sm:$0xff]  }
 0x1a0   : > { %v5254_v20 = vld [vmem:[%s6058_s5 + $0x9e8] ss:$16 sps:$4 sm:$0xff]  }
 0x1a1   : > { %3855 = vmatpush1.bf16.msra.mxu0 %v5113_v30  ;;  %4179 = vmatpush1.bf16.msra.mxu1 %v5116_v31  ;;  %v5183_v30 = vld [vmem:[%s6058_s5 + $0x884] ss:$16 sps:$4 sm:$0xff]   ;;  %v5186_v31 = vld [vmem:[%s6058_s5 + $0x88c] ss:$16 sps:$4 sm:$0xff]  }
 0x1a2   : > { %3857 = vmatprep.subr.bf16.mxu0 %v5117_v32  ;;  %4181 = vmatprep.subr.bf16.mxu1 %v5120_v33  ;;  %v920_v32 = vunpack.c.h.bf16 %v860_v27  ;;  %v919_v33 = vunpack.c.l.bf16 %v860_v27 }
 0x1a3   : > { %1940 = vperm.xlu1 %4774, %v1912_v61   ;;  %1935 = vperm.xlu0 %4773, %v1911_v62   ;;  %v5219_v61 = vld [vmem:[%s6058_s5 + $0x944] ss:$16 sps:$4 sm:$0xff]   ;;  %v5222_v62 = vld [vmem:[%s6058_s5 + $0x94c] ss:$16 sps:$4 sm:$0xff]  }
 0x1a5   : > { %3859 = vmatpush1.bf16.msra.mxu0 %v5119_v34  ;;  %4183 = vmatpush1.bf16.msra.mxu1 %v5122_v35  ;;  %v866_v34 = vld [vmem:[%s6765_s0 + $0xf4] sm:$0xff]  ;;  %v5185_v35 = vld [vmem:[%s6058_s5 + $0x880] ss:$16 sps:$4 sm:$0xff]  }
 0x1a6   : > { %3861 = vmatprep.subr.bf16.mxu0 %v5123_v36  ;;  %4185 = vmatprep.subr.bf16.mxu1 %v5126_v37  ;;  %v5188_v36 = vld [vmem:[%s6058_s5 + $0x888] ss:$16 sps:$4 sm:$0xff]   ;;  %v5189_v37 = vld [vmem:[%s6058_s5 + $0x8a4] ss:$16 sps:$4 sm:$0xff]  }
 0x1a9   : > { %3863 = vmatpush1.bf16.msra.mxu0 %v5125_v38  ;;  %4187 = vmatpush1.bf16.msra.mxu1 %v5128_v39  ;;  %v5192_v38 = vld [vmem:[%s6058_s5 + $0x8ac] ss:$16 sps:$4 sm:$0xff]   ;;  %v931_v39 = vunpack.c.h.bf16 %v866_v34 }
 0x1aa   : > { %3865 = vmatprep.subr.bf16.mxu0 %v5129_v40  ;;  %4189 = vmatprep.subr.bf16.mxu1 %v5132_v41  ;;  %v930_v40 = vunpack.c.l.bf16 %v866_v34  ;;  %v6441_v41 = vld [vmem:[%s6765_s0 + $0x20] sm:$0xff]  ;;  %v861_v34 = vld [vmem:[%s6765_s0 + $0xd0] sm:$0xff] }
 0x1ad   : > { %3867 = vmatpush1.bf16.msra.mxu0 %v5131_v42  ;;  %4191 = vmatpush1.bf16.msra.mxu1 %v5134_v43  ;;  %v5191_v42 = vld [vmem:[%s6058_s5 + $0x8a0] ss:$16 sps:$4 sm:$0xff]   ;;  %v5194_v43 = vld [vmem:[%s6058_s5 + $0x8a8] ss:$16 sps:$4 sm:$0xff]  }
 0x1ae   : > { %3869 = vmatprep.subr.bf16.mxu0 %v5135_v44  ;;  %4193 = vmatprep.subr.bf16.mxu1 %v5138_v45  ;;  %v5195_v44 = vld [vmem:[%s6058_s5 + $0x8c4] ss:$16 sps:$4 sm:$0xff]   ;;  %v5198_v45 = vld [vmem:[%s6058_s5 + $0x8cc] ss:$16 sps:$4 sm:$0xff]  }
 0x1b1   : > { %3871 = vmatpush1.bf16.msra.mxu0 %v5137_v46  ;;  %4195 = vmatpush1.bf16.msra.mxu1 %v5140_v47  ;;  %v878_v46 = vunpack.c.h.bf16 %v6441_v41  ;;  %v5197_v47 = vld [vmem:[%s6058_s5 + $0x8c0] ss:$16 sps:$4 sm:$0xff]  }
 0x1b2   : > { %3873 = vmatprep.subr.bf16.mxu0 %v5141_v50  ;;  %4197 = vmatprep.subr.bf16.mxu1 %v5144_v51  ;;  %v5204_v50 = vld [vmem:[%s6058_s5 + $0x8ec] ss:$16 sps:$4 sm:$0xff]   ;;  %v5203_v51 = vld [vmem:[%s6058_s5 + $0x8e0] ss:$16 sps:$4 sm:$0xff]  }
 0x1b5   : > { %3875 = vmatpush1.bf16.msra.mxu0 %v5143_v53  ;;  %4199 = vmatpush1.bf16.msra.mxu1 %v5146_v54  ;;  %v5207_v53 = vld [vmem:[%s6058_s5 + $0x904] ss:$16 sps:$4 sm:$0xff]   ;;  %v5210_v54 = vld [vmem:[%s6058_s5 + $0x90c] ss:$16 sps:$4 sm:$0xff]  }
 0x1b6   : > { %3877 = vmatprep.subr.bf16.mxu0 %v5147_v57  ;;  %4201 = vmatprep.subr.bf16.mxu1 %v5150_v58  ;;  %v5213_v57 = vld [vmem:[%s6058_s5 + $0x924] ss:$16 sps:$4 sm:$0xff]   ;;  %v5216_v58 = vld [vmem:[%s6058_s5 + $0x92c] ss:$16 sps:$4 sm:$0xff]  }
 0x1b9   : > { %3879 = vmatpush1.bf16.msra.mxu0 %v5149_v59  ;;  %4203 = vmatpush1.bf16.msra.mxu1 %v5152_v60  ;;  %v5215_v59 = vld [vmem:[%s6058_s5 + $0x920] ss:$16 sps:$4 sm:$0xff]   ;;  %v5218_v60 = vld [vmem:[%s6058_s5 + $0x928] ss:$16 sps:$4 sm:$0xff]  }
 0x1ba   : > { %3881 = vmatprep.subr.bf16.mxu0 %v5153_v63  ;;  %4205 = vmatprep.subr.bf16.mxu1 %v5156_v0  ;;  %v5221_v63 = vld [vmem:[%s6058_s5 + $0x940] ss:$16 sps:$4 sm:$0xff]   ;;  %v5224_v0 = vld [vmem:[%s6058_s5 + $0x948] ss:$16 sps:$4 sm:$0xff]  }
 0x1bd   : > { %3883 = vmatpush1.bf16.msra.mxu0 %v5155_v1  ;;  %4207 = vmatpush1.bf16.msra.mxu1 %v5158_v2  ;;  %v5225_v1 = vld [vmem:[%s6058_s5 + $0x964] ss:$16 sps:$4 sm:$0xff]   ;;  %v5228_v2 = vld [vmem:[%s6058_s5 + $0x96c] ss:$16 sps:$4 sm:$0xff]  }
 0x1be   : > { %3885 = vmatprep.subr.bf16.mxu0 %v5159_v3  ;;  %4209 = vmatprep.subr.bf16.mxu1 %v5162_v5  ;;  %v5227_v3 = vld [vmem:[%s6058_s5 + $0x960] ss:$16 sps:$4 sm:$0xff]   ;;  %v5230_v5 = vld [vmem:[%s6058_s5 + $0x968] ss:$16 sps:$4 sm:$0xff]  }
 0x1c0   : > { %2330 = vmatmul.mubr.f32.vlgmr.msra.gmra.mrb[0].mxu0 %v875_v6  ;;  %2936 = vmatmul.mubr.f32.vlgmr.msra.gmra.mrb[0].mxu1 %v875_v6  ;;  %v5231_v6 = vld [vmem:[%s6058_s5 + $0x984] ss:$16 sps:$4 sm:$0xff]  }
 0x1c1   : > { %3887 = vmatpush1.bf16.msra.mxu0 %v5161_v8  ;;  %4211 = vmatpush1.bf16.msra.mxu1 %v5164_v9  ;;  %v5233_v8 = vld [vmem:[%s6058_s5 + $0x980] ss:$16 sps:$4 sm:$0xff]   ;;  %v5236_v9 = vld [vmem:[%s6058_s5 + $0x988] ss:$16 sps:$4 sm:$0xff]  }
 0x1c2   : > { %3889 = vmatprep.subr.bf16.mxu0 %v5165_v10  ;;  %4213 = vmatprep.subr.bf16.mxu1 %v5168_v11  ;;  %v5237_v10 = vld [vmem:[%s6058_s5 + $0x9a4] ss:$16 sps:$4 sm:$0xff]   ;;  %v5240_v11 = vld [vmem:[%s6058_s5 + $0x9ac] ss:$16 sps:$4 sm:$0xff]  }
 0x1c3   : > { %2335 = vmatprep.mubr.f32.mxu0 %v887_v12  ;;  %2941 = vmatprep.mubr.f32.mxu1 %v887_v12  ;;  %v5239_v12 = vld [vmem:[%s6058_s5 + $0x9a0] ss:$16 sps:$4 sm:$0xff]  }
 0x1c4   : > { %2336 = vmatmul.mubr.f32.gmra.mrb[2].mxu0 %v886_v13  ;;  %2942 = vmatmul.mubr.f32.gmra.mrb[2].mxu1 %v886_v13  ;;  %v5242_v13 = vld [vmem:[%s6058_s5 + $0x9a8] ss:$16 sps:$4 sm:$0xff]  }
 0x1c5   : > { %3891 = vmatpush1.bf16.msra.mxu0 %v5167_v15  ;;  %4215 = vmatpush1.bf16.msra.mxu1 %v5170_v16  ;;  %v5246_v15 = vld [vmem:[%s6058_s5 + $0x9cc] ss:$16 sps:$4 sm:$0xff]   ;;  %v5245_v16 = vld [vmem:[%s6058_s5 + $0x9c0] ss:$16 sps:$4 sm:$0xff]  }
 0x1c6   : > { %3893 = vmatprep.subr.bf16.mxu0 %v5171_v4  ;;  %4217 = vmatprep.subr.bf16.mxu1 %v5174_v17  ;;  %v5248_v4 = vld [vmem:[%s6058_s5 + $0x9c8] ss:$16 sps:$4 sm:$0xff]   ;;  %v5249_v17 = vld [vmem:[%s6058_s5 + $0x9e4] ss:$16 sps:$4 sm:$0xff]  }
 0x1c7   : > { %2341 = vmatprep.mubr.f32.mxu0 %v898_v18  ;;  %2947 = vmatprep.mubr.f32.mxu1 %v898_v18  ;;  %v5252_v18 = vld [vmem:[%s6058_s5 + $0x9ec] ss:$16 sps:$4 sm:$0xff]  }
 0x1c8   : > { %2342 = vmatmul.mubr.f32.gmra.mrb[4].mxu0 %v897_v19  ;;  %2948 = vmatmul.mubr.f32.gmra.mrb[4].mxu1 %v897_v19  ;;  %v5251_v19 = vld [vmem:[%s6058_s5 + $0x9e0] ss:$16 sps:$4 sm:$0xff]  }
 0x1c9   : > { %3895 = vmatpush1.bf16.msra.mxu0 %v5173_v21  ;;  %4219 = vmatpush1.bf16.msra.mxu1 %v5176_v22  ;;  %v5255_v21 = vld [vmem:[%s6058_s5 + $0xa04] ss:$16 sps:$4 sm:$0xff]   ;;  %v5258_v22 = vld [vmem:[%s6058_s5 + $0xa0c] ss:$16 sps:$4 sm:$0xff]  }
 0x1ca   : > { %3897 = vmatprep.subr.bf16.mxu0 %v5177_v23  ;;  %4221 = vmatprep.subr.bf16.mxu1 %v5180_v24  ;;  %v843_v23 = vld [vmem:[%s6765_s0 + $0x4c] sm:$0xff]  ;;  %v877_v24 = vunpack.c.l.bf16 %v6441_v41  ;;  %v838_v41 = vld [vmem:[%s6765_s0 + $0x28] ss:$44 sps:$4 sm:$0xff]  }
 0x1cb   : > { %2347 = vmatprep.mubr.f32.mxu0 %v909_v25  ;;  %2953 = vmatprep.mubr.f32.mxu1 %v909_v25  ;;  %v5257_v25 = vld [vmem:[%s6058_s5 + $0xa00] ss:$16 sps:$4 sm:$0xff]   ;;  %v889_v27 = vunpack.c.h.bf16 %v843_v23 }
 0x1cc   : > { %2348 = vmatmul.mubr.f32.gmra.mrb[6].mxu0 %v908_v26  ;;  %2954 = vmatmul.mubr.f32.gmra.mrb[6].mxu1 %v908_v26  ;;  %v5260_v26 = vld [vmem:[%s6058_s5 + $0xa08] ss:$16 sps:$4 sm:$0xff]  }
 0x1cd   : > { %3899 = vmatpush1.bf16.msra.mxu0 %v5179_v28  ;;  %4223 = vmatpush1.bf16.msra.mxu1 %v5182_v29  ;;  %v849_v28 = vld [vmem:[%s6765_s0 + $0x78] sm:$0xff]  ;;  %v888_v29 = vunpack.c.l.bf16 %v843_v23 }
 0x1ce   : > { %3901 = vmatprep.subr.bf16.mxu0 %v5183_v30  ;;  %4225 = vmatprep.subr.bf16.mxu1 %v5186_v31  ;;  %v900_v30 = vunpack.c.h.bf16 %v849_v28  ;;  %v855_v31 = vld [vmem:[%s6765_s0 + $0xa4] sm:$0xff] }
 0x1cf   : > { %2353 = vmatprep.mubr.f32.mxu0 %v920_v32  ;;  %2959 = vmatprep.mubr.f32.mxu1 %v920_v32  ;;  %v899_v32 = vunpack.c.l.bf16 %v849_v28 }
 0x1d0   : > { %2354 = vmatmul.mubr.f32.gmra.mrb[8].mxu0 %v919_v33  ;;  %2960 = vmatmul.mubr.f32.gmra.mrb[8].mxu1 %v919_v33  ;;  %v911_v33 = vunpack.c.h.bf16 %v855_v31 }
 0x1d1   : > { %3903 = vmatpush1.bf16.msra.mxu0 %v5185_v35  ;;  %4227 = vmatpush1.bf16.msra.mxu1 %v5188_v36  ;;  %v910_v35 = vunpack.c.l.bf16 %v855_v31  ;;  %v922_v36 = vunpack.c.h.bf16 %v861_v34 }
 0x1d2   : > { %3905 = vmatprep.subr.bf16.mxu0 %v5189_v37  ;;  %4229 = vmatprep.subr.bf16.mxu1 %v5192_v38  ;;  %v867_v37 = vld [vmem:[%s6765_s0 + $0xfc] sm:$0xff]  ;;  %v921_v38 = vunpack.c.l.bf16 %v861_v34 }
 0x1d3   : > { %2359 = vmatprep.mubr.f32.mxu0 %v931_v39  ;;  %2965 = vmatprep.mubr.f32.mxu1 %v931_v39  ;;  %v933_v39 = vunpack.c.h.bf16 %v867_v37 }
 0x1d4   : > { %2360 = vmatmul.mubr.f32.gmra.mrb[10].mxu0 %v930_v40  ;;  %2966 = vmatmul.mubr.f32.gmra.mrb[10].mxu1 %v930_v40  ;;  %v932_v40 = vunpack.c.l.bf16 %v867_v37 }
 0x1d5   : > { %3907 = vmatpush1.bf16.msra.mxu0 %v5191_v42  ;;  %4231 = vmatpush1.bf16.msra.mxu1 %v5194_v43  ;;  %v879_v42 = vunpack.c.l.bf16 %v838_v41  ;;  %v5334_v43 = vmov 0.0  }
 0x1d6   : > { %3909 = vmatprep.subr.bf16.mxu0 %v5195_v44  ;;  %4233 = vmatprep.subr.bf16.mxu1 %v5198_v45  ;;  %v890_v44 = vunpack.c.h.bf16 %v838_v41  ;;  %v850_v45 = vld [vmem:[%s6765_s0 + $0x80] ss:$44 sps:$4 sm:$0xff]  }
 0x1d7   : > { %2430 = vmatprep.mubr.f32.mxu0 %v878_v46  ;;  %3036 = vmatprep.mubr.f32.mxu1 %v878_v46  ;;  %v901_v46 = vunpack.c.l.bf16 %v850_v45 }
 0x1d9   : > { %3911 = vmatpush1.bf16.msra.mxu0 %v5197_v47  ;;  %4235 = vmatpush1.bf16.msra.mxu1 %v5200_v48  ;;  %v912_v47 = vunpack.c.h.bf16 %v850_v45  ;;  %v862_v48 = vld [vmem:[%s6765_s0 + $0xd8] ss:$44 sps:$4 sm:$0xff]  }
 0x1da   : > { %3913 = vmatprep.subr.bf16.mxu0 %v5201_v49  ;;  %4237 = vmatprep.subr.bf16.mxu1 %v5204_v50  ;;  %v923_v49 = vunpack.c.l.bf16 %v862_v48  ;;  %v934_v50 = vunpack.c.h.bf16 %v862_v48 }
 0x1dd   : > { %3915 = vmatpush1.bf16.msra.mxu0 %v5203_v51  ;;  %4239 = vmatpush1.bf16.msra.mxu1 %v5206_v52 }
 0x1de   : > { %3917 = vmatprep.subr.bf16.mxu0 %v5207_v53  ;;  %4241 = vmatprep.subr.bf16.mxu1 %v5210_v54 }
 0x1e1   : > { %3919 = vmatpush1.bf16.msra.mxu0 %v5209_v55  ;;  %4243 = vmatpush1.bf16.msra.mxu1 %v5212_v56 }
 0x1e2   : > { %3921 = vmatprep.subr.bf16.mxu0 %v5213_v57  ;;  %4245 = vmatprep.subr.bf16.mxu1 %v5216_v58 }
 0x1e5   : > { %3923 = vmatpush1.bf16.msra.mxu0 %v5215_v59  ;;  %4247 = vmatpush1.bf16.msra.mxu1 %v5218_v60 }
 0x1e6   : > { %3925 = vmatprep.subr.bf16.mxu0 %v5219_v61  ;;  %4249 = vmatprep.subr.bf16.mxu1 %v5222_v62 }
 0x1e9   : > { %3927 = vmatpush1.bf16.msra.mxu0 %v5221_v63  ;;  %4251 = vmatpush1.bf16.msra.mxu1 %v5224_v0 }
 0x1ea   : > { %3929 = vmatprep.subr.bf16.mxu0 %v5225_v1  ;;  %4253 = vmatprep.subr.bf16.mxu1 %v5228_v2 }
 0x1ed   : > { %3931 = vmatpush1.bf16.msra.mxu0 %v5227_v3  ;;  %4255 = vmatpush1.bf16.msra.mxu1 %v5230_v5 }
 0x1ee   : > { %3933 = vmatprep.subr.bf16.mxu0 %v5231_v6  ;;  %4257 = vmatprep.subr.bf16.mxu1 %v5234_v7 }
 0x1f1   : > { %3935 = vmatpush1.bf16.msra.mxu0 %v5233_v8  ;;  %4259 = vmatpush1.bf16.msra.mxu1 %v5236_v9 }
 0x1f2   : > { %3937 = vmatprep.subr.bf16.mxu0 %v5237_v10  ;;  %4261 = vmatprep.subr.bf16.mxu1 %v5240_v11 }
 0x1f5   : > { %3939 = vmatpush1.bf16.msra.mxu0 %v5239_v12  ;;  %4263 = vmatpush1.bf16.msra.mxu1 %v5242_v13 }
 0x1f6   : > { %3941 = vmatprep.subr.bf16.mxu0 %v5243_v14  ;;  %4265 = vmatprep.subr.bf16.mxu1 %v5246_v15 }
 0x1f9   : > { %3943 = vmatpush1.bf16.msra.mxu0 %v5245_v16  ;;  %4267 = vmatpush1.bf16.msra.mxu1 %v5248_v4 }
 0x1fa   : > { %3945 = vmatprep.subr.bf16.mxu0 %v5249_v17  ;;  %4269 = vmatprep.subr.bf16.mxu1 %v5252_v18 }
 0x1fd   : > { %3947 = vmatpush1.bf16.msra.mxu0 %v5251_v19  ;;  %4271 = vmatpush1.bf16.msra.mxu1 %v5254_v20 }
 0x1fe   : > { %3949 = vmatprep.subr.bf16.mxu0 %v5255_v21  ;;  %4273 = vmatprep.subr.bf16.mxu1 %v5258_v22 }
 0x200   : > { %2431 = vmatmul.mubr.f32.vlgmr.msra.gmra.mrb[0].mxu0 %v877_v24  ;;  %3037 = vmatmul.mubr.f32.vlgmr.msra.gmra.mrb[0].mxu1 %v877_v24 }
 0x201   : > { %3951 = vmatpush1.bf16.msra.mxu0 %v5257_v25  ;;  %4275 = vmatpush1.bf16.msra.mxu1 %v5260_v26 }
 0x202   : > { %2436 = vmatprep.mubr.f32.mxu0 %v889_v27  ;;  %3042 = vmatprep.mubr.f32.mxu1 %v889_v27 }
 0x204   : > { %2437 = vmatmul.mubr.f32.gmra.mrb[2].mxu0 %v888_v29  ;;  %3043 = vmatmul.mubr.f32.gmra.mrb[2].mxu1 %v888_v29 }
 0x205   : > { %2442 = vmatprep.mubr.f32.mxu0 %v900_v30  ;;  %3048 = vmatprep.mubr.f32.mxu1 %v900_v30 }
 0x208   : > { %2443 = vmatmul.mubr.f32.gmra.mrb[4].mxu0 %v899_v32  ;;  %3049 = vmatmul.mubr.f32.gmra.mrb[4].mxu1 %v899_v32 }
 0x209   : > { %2448 = vmatprep.mubr.f32.mxu0 %v911_v33  ;;  %3054 = vmatprep.mubr.f32.mxu1 %v911_v33 }
 0x20c   : > { %2449 = vmatmul.mubr.f32.gmra.mrb[6].mxu0 %v910_v35  ;;  %3055 = vmatmul.mubr.f32.gmra.mrb[6].mxu1 %v910_v35 }
 0x20d   : > { %2454 = vmatprep.mubr.f32.mxu0 %v922_v36  ;;  %3060 = vmatprep.mubr.f32.mxu1 %v922_v36 }
 0x210   : > { %2455 = vmatmul.mubr.f32.gmra.mrb[8].mxu0 %v921_v38  ;;  %3061 = vmatmul.mubr.f32.gmra.mrb[8].mxu1 %v921_v38 }
 0x211   : > { %2460 = vmatprep.mubr.f32.mxu0 %v933_v39  ;;  %3066 = vmatprep.mubr.f32.mxu1 %v933_v39 }
 0x214   : > { %2461 = vmatmul.mubr.f32.gmra.mrb[10].mxu0 %v932_v40  ;;  %3067 = vmatmul.mubr.f32.gmra.mrb[10].mxu1 %v932_v40 }
 0x215   : > { %2531 = vmatprep.mubr.f32.mxu0 %v5334_v43  ;;  %3137 = vmatprep.mubr.f32.mxu1 %v5334_v43 }
 0x218   : > { %3586 = vmatmul.mubr.msk.f32.vlgmr.msra.gmra.mrb[0].mxu0 %vm1943_vm0, %v879_v42  ;;  %3592 = vmatmul.mubr.msk.f32.vlgmr.msra.gmra.mrb[0].mxu1 %vm1943_vm0, %v879_v42 }
 0x219   : > { %2537 = vmatprep.mubr.f32.mxu0 %v5334_v43  ;;  %3143 = vmatprep.mubr.f32.mxu1 %v5334_v43 }
 0x21a   : > { %v1916_v51 = vpop.permute.xlu0 %1915  ;;  %v1926_v36 = vpop.permute.xlu1 %1925 }
 0x21c   : > { %3587 = vmatmul.mubr.msk.f32.gmra.mrb[2].mxu0 %vm1943_vm0, %v890_v44  ;;  %3593 = vmatmul.mubr.msk.f32.gmra.mrb[2].mxu1 %vm1943_vm0, %v890_v44 }
 0x21d   : > { %2543 = vmatprep.mubr.f32.mxu0 %v5334_v43  ;;  %3149 = vmatprep.mubr.f32.mxu1 %v5334_v43 }
 0x21e   : > { %v1921_v62 = vpop.permute.xlu0 %1920 }
 0x220   : > { %3588 = vmatmul.mubr.msk.f32.gmra.mrb[4].mxu0 %vm1943_vm0, %v901_v46  ;;  %3594 = vmatmul.mubr.msk.f32.gmra.mrb[4].mxu1 %vm1943_vm0, %v901_v46 }
 0x221   : > { %2549 = vmatprep.mubr.f32.mxu0 %v5334_v43  ;;  %3155 = vmatprep.mubr.f32.mxu1 %v5334_v43 }
 0x224   : > { %3589 = vmatmul.mubr.msk.f32.gmra.mrb[6].mxu0 %vm1943_vm0, %v912_v47  ;;  %3595 = vmatmul.mubr.msk.f32.gmra.mrb[6].mxu1 %vm1943_vm0, %v912_v47 }
 0x225   : > { %2555 = vmatprep.mubr.f32.mxu0 %v5334_v43  ;;  %3161 = vmatprep.mubr.f32.mxu1 %v5334_v43 }
 0x228   : > { %3590 = vmatmul.mubr.msk.f32.gmra.mrb[8].mxu0 %vm1943_vm0, %v923_v49  ;;  %3596 = vmatmul.mubr.msk.f32.gmra.mrb[8].mxu1 %vm1943_vm0, %v923_v49 }
 0x229   : > { %2561 = vmatprep.mubr.f32.mxu0 %v5334_v43  ;;  %3167 = vmatprep.mubr.f32.mxu1 %v5334_v43 }
 0x22c   : > { %3591 = vmatmul.mubr.msk.f32.gmra.mrb[10].mxu0 %vm1943_vm0, %v934_v50  ;;  %3597 = vmatmul.mubr.msk.f32.gmra.mrb[10].mxu1 %vm1943_vm0, %v934_v50 }
 0x2eb   : > { %v2533_v52 = vpop.f32.mrb[0].mxu0  ;;  %v3139_v53 = vpop.f32.mrb[0].mxu1 }
 0x2ec   : > { %v4276_v54 = vadd.f32 %v2533_v52, %v1916_v51  ;;  %v4288_v55 = vadd.f32 %v3139_v53, %v1916_v51  ;;  %v2535_v56 = vpop.f32.mrb[1].mxu0  ;;  %v3141_v57 = vpop.f32.mrb[1].mxu1 }
 0x2ed   : > { %v6527_v58 = vadd.f32 %v2535_v56, %v1916_v51  ;;  %v6529_v59 = vadd.f32 %v3141_v57, %v1916_v51 }
 0x2ee   : > { %v3198_v60 = vmul.f32 0.044715, %v4276_v54  ;;  %v3200_v61 = vmul.f32 0.044715, %v4288_v55  ;;  %v6552_v32 = vmul.f32 0.5, %v4276_v54  ;;  %v3176_v50 = vmul.f32 0.5, %v4288_v55 }
 0x2ef   : > { %v3199_v63 = vmul.f32 0.044715, %v6527_v58  ;;  %v3201_v0 = vmul.f32 0.044715, %v6529_v59  ;;  %v2539_v3 = vpop.f32.mrb[2].mxu0  ;;  %v3145_v5 = vpop.f32.mrb[2].mxu1 }
 0x2f0   : > { %v3222_v1 = vmul.f32 %v4276_v54, %v3198_v60  ;;  %v3224_v2 = vmul.f32 %v4288_v55, %v3200_v61  ;;  %v6535_v8 = vadd.f32 %v2539_v3, %v1921_v62  ;;  %v6537_v9 = vadd.f32 %v3145_v5, %v1921_v62  ;;  %v2541_v10 = vpop.f32.mrb[3].mxu0  ;;  %v3147_v11 = vpop.f32.mrb[3].mxu1 }
 0x2f1   : > { %v3223_v6 = vmul.f32 %v6527_v58, %v3199_v63  ;;  %v3225_v7 = vmul.f32 %v6529_v59, %v3201_v0  ;;  %v6539_v14 = vadd.f32 %v2541_v10, %v1921_v62  ;;  %v6545_v22 = vadd.f32 %v3147_v11, %v1921_v62 }
 0x2f2   : > { %v3246_v12 = vmul.f32 %v4276_v54, %v3222_v1  ;;  %v3248_v13 = vmul.f32 %v4288_v55, %v3224_v2  ;;  %v3202_v4 = vmul.f32 0.044715, %v6535_v8  ;;  %v3204_v21 = vmul.f32 0.044715, %v6537_v9 }
 0x2f3   : > { %v3247_v15 = vmul.f32 %v6527_v58, %v3223_v6  ;;  %v3249_v16 = vmul.f32 %v6529_v59, %v3225_v7  ;;  %v2545_v17 = vpop.f32.mrb[4].mxu0  ;;  %v3151_v18 = vpop.f32.mrb[4].mxu1  ;;  %v3203_v31 = vmul.f32 0.044715, %v6539_v14  ;;  %v3205_v40 = vmul.f32 0.044715, %v6545_v22 }
 0x2f4   : > { %v3270_v19 = vadd.f32 %v4276_v54, %v3246_v12  ;;  %v3272_v20 = vadd.f32 %v4288_v55, %v3248_v13  ;;  %v2547_v23 = vpop.f32.mrb[5].mxu0  ;;  %v3153_v24 = vpop.f32.mrb[5].mxu1  ;;  %v3226_v27 = vmul.f32 %v6535_v8, %v3202_v4  ;;  %v3228_v30 = vmul.f32 %v6537_v9, %v3204_v21 }
 0x2f5   : > { %v3271_v25 = vadd.f32 %v6527_v58, %v3247_v15  ;;  %v3273_v26 = vadd.f32 %v6529_v59, %v3249_v16  ;;  %v3227_v39 = vmul.f32 %v6539_v14, %v3203_v31  ;;  %v6563_v44 = vadd.f32 %v2545_v17, %v1926_v36  ;;  %v1931_v4 = vpop.permute.xlu1 %1930 }
 0x2f6   : > { %v3294_v28 = vmul.f32 0.7978846, %v3270_v19  ;;  %v3296_v29 = vmul.f32 0.7978846, %v3272_v20  ;;  %v3250_v35 = vmul.f32 %v6535_v8, %v3226_v27  ;;  %v3252_v38 = vmul.f32 %v6537_v9, %v3228_v30 }
 0x2f7   : > { %v3295_v33 = vmul.f32 0.7978846, %v3271_v25  ;;  %v3297_v34 = vmul.f32 0.7978846, %v3273_v26  ;;  %v2551_v37 = vpop.f32.mrb[6].mxu0  ;;  %v6558_v41 = vpop.f32.mrb[6].mxu1  ;;  %v6565_v45 = vadd.f32 %v3151_v18, %v1926_v36  ;;  %v3251_v48 = vmul.f32 %v6539_v14, %v3227_v39 }
 0x2f8   : > { %5261 = vtanh.f32 %v3294_v28  ;;  %v6560_v42 = vpop.f32.mrb[7].mxu0  ;;  %v3274_v43 = vadd.f32 %v6535_v8, %v3250_v35  ;;  %v6567_v46 = vpop.f32.mrb[7].mxu1  ;;  %v3276_v47 = vadd.f32 %v6537_v9, %v3252_v38  ;;  %v3229_v49 = vmul.f32 %v6545_v22, %v3205_v40 }
 0x2f9   : > { %5263 = vtanh.f32 %v3296_v29  ;;  %v3206_v52 = vmul.f32 0.044715, %v6563_v44  ;;  %v3175_v54 = vmul.f32 0.5, %v6527_v58  ;;  %v3275_v57 = vadd.f32 %v6539_v14, %v3251_v48 }
 0x2fa   : > { %5265 = vtanh.f32 %v3295_v33  ;;  %v3298_v51 = vmul.f32 0.7978846, %v3274_v43  ;;  %v3300_v56 = vmul.f32 0.7978846, %v3276_v47  ;;  %v3253_v60 = vmul.f32 %v6545_v22, %v3229_v49 }
 0x2fb   : > { %5267 = vtanh.f32 %v3297_v34  ;;  %v6573_v53 = vpop.f32.mrb[8].mxu0  ;;  %v6578_v61 = vpop.f32.mrb[8].mxu1  ;;  %v3230_v55 = vmul.f32 %v6563_v44, %v3206_v52  ;;  %v3208_v63 = vmul.f32 0.044715, %v6565_v45  ;;  %v6584_v0 = vadd.f32 %v2547_v23, %v1926_v36 }
 0x2fc   : > { %v6580_v62 = vpop.f32.mrb[9].mxu0  ;;  %5269 = vtanh.f32 %v3298_v51  ;;  %v6586_v1 = vpop.f32.mrb[9].mxu1  ;;  %v3299_v58 = vmul.f32 0.7978846, %v3275_v57  ;;  %v3277_v2 = vadd.f32 %v6545_v22, %v3253_v60  ;;  %v6589_v3 = vadd.f32 %v3153_v24, %v1926_v36 }
 0x2fd   : > { %5271 = vtanh.f32 %v3300_v56  ;;  %v3177_v5 = vmul.f32 0.5, %v6529_v59  ;;  %v3254_v6 = vmul.f32 %v6563_v44, %v3230_v55  ;;  %v3232_v7 = vmul.f32 %v6565_v45, %v3208_v63 }
 0x2fe   : > { %v3207_v10 = vmul.f32 0.044715, %v6584_v0  ;;  %v3178_v13 = vmul.f32 0.5, %v6535_v8  ;;  %5273 = vtanh.f32 %v3299_v58  ;;  %v3301_v15 = vmul.f32 0.7978846, %v3277_v2 }
 0x2ff   : > { %v6595_v11 = vpop.f32.mrb[10].mxu0  ;;  %v6597_v12 = vpop.f32.mrb[10].mxu1  ;;  %v3209_v16 = vmul.f32 0.044715, %v6589_v3  ;;  %v3278_v59 = vadd.f32 %v6563_v44, %v3254_v6  ;;  %v3256_v18 = vmul.f32 %v6565_v45, %v3232_v7  ;;  %v6606_v20 = vadd.f32 %v2551_v37, %v1931_v4 }
 0x300   : > { %v6601_v17 = vpop.f32.mrb[11].mxu0  ;;  %v3231_v19 = vmul.f32 %v6584_v0, %v3207_v10  ;;  %v6608_v21 = vpop.f32.mrb[11].mxu1  ;;  %v3180_v8 = vmul.f32 0.5, %v6537_v9  ;;  %v3179_v24 = vmul.f32 0.5, %v6539_v14  ;;  %5275 = vtanh.f32 %v3301_v15 }
 0x301   : > { %v3233_v25 = vmul.f32 %v6589_v3, %v3209_v16  ;;  %v3302_v28 = vmul.f32 0.7978846, %v3278_v59  ;;  %v3280_v29 = vadd.f32 %v6565_v45, %v3256_v18  ;;  %v3210_v9 = vmul.f32 0.044715, %v6606_v20  ;;  %v1936_v15 = vpop.permute.xlu0 %1935 }
 0x302   : > { %v5262_v23 = vpop.eup %5261  ;;  %v3255_v30 = vmul.f32 %v6584_v0, %v3231_v19  ;;  %v6622_v14 = vadd.f32 %v6558_v41, %v1931_v4  ;;  %v6629_v41 = vadd.f32 %v6560_v42, %v1931_v4  ;;  %v3181_v7 = vmul.f32 0.5, %v6545_v22 }
 0x303   : > { %v5264_v26 = vpop.eup %5263  ;;  %v3342_v27 = vadd.f32 1.0, %v5262_v23  ;;  %v3257_v34 = vmul.f32 %v6589_v3, %v3233_v25  ;;  %5277 = vtanh.f32 %v3302_v28  ;;  %v3304_v38 = vmul.f32 0.7978846, %v3280_v29 }
 0x304   : > { %v5266_v31 = vpop.eup %5265  ;;  %v3344_v33 = vadd.f32 1.0, %v5264_v26  ;;  %v3279_v43 = vadd.f32 %v6584_v0, %v3255_v30  ;;  %v3234_v51 = vmul.f32 %v6606_v20, %v3210_v9  ;;  %v3212_v58 = vmul.f32 0.044715, %v6622_v14 }
 0x305   : > { %v5268_v35 = vpop.eup %5267  ;;  %v3366_v36 = vmul.f32 %v3342_v27, %v6552_v32  ;;  %v3343_v37 = vadd.f32 1.0, %v5266_v31  ;;  %v3281_v47 = vadd.f32 %v6589_v3, %v3257_v34  ;;  %5279 = vtanh.f32 %v3304_v38 }
 0x306   : > { %v3368_v39 = vmul.f32 %v3344_v33, %v3176_v50  ;;  %v3345_v40 = vadd.f32 1.0, %v5268_v35  ;;  %v5270_v48 = vpop.eup %5269  ;;  %v3303_v57 = vmul.f32 0.7978846, %v3279_v43  ;;  %v3258_v63 = vmul.f32 %v6606_v20, %v3234_v51 }
 0x307   : > { %v3367_v49 = vmul.f32 %v3343_v37, %v3175_v54  ;;  %v5272_v52 = vpop.eup %5271  ;;  %v3346_v56 = vadd.f32 1.0, %v5270_v48  ;;  %v3305_v60 = vmul.f32 0.7978846, %v3281_v47  ;;  %v3236_v59 = vmul.f32 %v6622_v14, %v3212_v58 }
 0x308   : > { %v3369_v32 = vmul.f32 %v3345_v40, %v3177_v5  ;;  %v3348_v55 = vadd.f32 1.0, %v5272_v52  ;;  %v5274_v2 = vpop.eup %5273  ;;  %5281 = vtanh.f32 %v3303_v57  ;;  %v3282_v10 = vadd.f32 %v6606_v20, %v3258_v63 }
 0x309   : > { %v3615_v50 = vpack.c.bf16 %v3367_v49, %v3366_v36  ;;  %v3370_v6 = vmul.f32 %v3346_v56, %v3178_v13  ;;  %v3347_v5 = vadd.f32 1.0, %v5274_v2  ;;  %5283 = vtanh.f32 %v3305_v60 }
 0x30a   : > { %v3616_v54 = vpack.c.bf16 %v3369_v32, %v3368_v39  ;;  %v3372_v42 = vmul.f32 %v3348_v55, %v3180_v8  ;;  %v5276_v16 = vpop.eup %5275  ;;  %v3211_v13 = vmul.f32 0.044715, %v6629_v41  ;;  %v6643_v22 = vadd.f32 %v6567_v46, %v1931_v4 }
 0x30b   : > { %3462 = vst [vmem:[%s6635_s12] sm:$0xff] %v3615_v50  ;;  %v6646_v18 = vadd.f32 %v6573_v53, %v1936_v15  ;;  %v3371_v19 = vmul.f32 %v3347_v5, %v3179_v24  ;;  %v3349_v23 = vadd.f32 1.0, %v5276_v16  ;;  %v3306_v8 = vmul.f32 0.7978846, %v3282_v10 }
 0x30c   : > { %3463 = vst [vmem:[%s6635_s12 + $0x8] sm:$0xff] %v3616_v54  ;;  %v6649_v25 = vadd.f32 %v6578_v61, %v1936_v15  ;;  %v3182_v26 = vmul.f32 0.5, %v6563_v44  ;;  %v3260_v27 = vmul.f32 %v6622_v14, %v3236_v59  ;;  %v3235_v28 = vmul.f32 %v6629_v41, %v3211_v13  ;;  %v1941_v59 = vpop.permute.xlu1 %1940 }
 0x30d   : > { %v3213_v29 = vmul.f32 0.044715, %v6643_v22  ;;  %v5278_v46 = vpop.eup %5277  ;;  %v3617_v4 = vpack.c.bf16 %v3371_v19, %v3370_v6  ;;  %v3373_v30 = vmul.f32 %v3349_v23, %v3181_v7  ;;  %v3184_v53 = vmul.f32 0.5, %v6565_v45 }
 0x30e   : > { %5285 = vtanh.f32 %v3306_v8  ;;  %v3350_v24 = vadd.f32 1.0, %v5278_v46  ;;  %v3284_v31 = vadd.f32 %v6622_v14, %v3260_v27  ;;  %v3259_v61 = vmul.f32 %v6629_v41, %v3235_v28 }
 0x30f   : > { %v3237_v44 = vmul.f32 %v6643_v22, %v3213_v29  ;;  %v5280_v33 = vpop.eup %5279  ;;  %3464 = vst [vmem:[%s6635_s12 + $0x10] sm:$0xff] %v3617_v4  ;;  %v3618_v34 = vpack.c.bf16 %v3373_v30, %v3372_v42  ;;  %v3183_v9 = vmul.f32 0.5, %v6584_v0  ;;  %v3214_v35 = vmul.f32 0.044715, %v6646_v18 }
 0x310   : > { %v3216_v36 = vmul.f32 0.044715, %v6649_v25  ;;  %v3352_v37 = vadd.f32 1.0, %v5280_v33  ;;  %v3185_v45 = vmul.f32 0.5, %v6589_v3  ;;  %v3308_v38 = vmul.f32 0.7978846, %v3284_v31 }
 0x311   : > { %v3283_v39 = vadd.f32 %v6629_v41, %v3259_v61  ;;  %3465 = vst [vmem:[%s6635_s12 + $0x18] sm:$0xff] %v3618_v34  ;;  %v3261_v40 = vmul.f32 %v6643_v22, %v3237_v44  ;;  %v3238_v43 = vmul.f32 %v6646_v18, %v3214_v35  ;;  %v6670_v48 = vadd.f32 %v6580_v62, %v1936_v15 }
 0x312   : > { %v3240_v47 = vmul.f32 %v6649_v25, %v3216_v36  ;;  %v5282_v0 = vpop.eup %5281  ;;  %v3374_v49 = vmul.f32 %v3350_v24, %v3182_v26  ;;  %5287 = vtanh.f32 %v3308_v38  ;;  %v6673_v52 = vadd.f32 %v6586_v1, %v1936_v15 }
 0x313   : > { %v3307_v51 = vmul.f32 0.7978846, %v3283_v39  ;;  %v5284_v3 = vpop.eup %5283  ;;  %v3351_v32 = vadd.f32 1.0, %v5282_v0  ;;  %v3285_v56 = vadd.f32 %v6643_v22, %v3261_v40  ;;  %v3262_v57 = vmul.f32 %v6646_v18, %v3238_v43 }
 0x314   : > { %v3264_v60 = vmul.f32 %v6649_v25, %v3240_v47  ;;  %v3376_v50 = vmul.f32 %v3352_v37, %v3184_v53  ;;  %v3353_v55 = vadd.f32 1.0, %v5284_v3  ;;  %v3215_v62 = vmul.f32 0.044715, %v6670_v48 }
 0x315   : > { %5289 = vtanh.f32 %v3307_v51  ;;  %v3375_v63 = vmul.f32 %v3351_v32, %v3183_v9  ;;  %v3309_v58 = vmul.f32 0.7978846, %v3285_v56  ;;  %v3286_v2 = vadd.f32 %v6646_v18, %v3262_v57 }
 0x316   : > { %v3288_v1 = vadd.f32 %v6649_v25, %v3264_v60  ;;  %v3377_v54 = vmul.f32 %v3353_v55, %v3185_v45  ;;  %v3239_v6 = vmul.f32 %v6670_v48, %v3215_v62  ;;  %v3217_v7 = vmul.f32 0.044715, %v6673_v52 }
 0x317   : > { %v3619_v5 = vpack.c.bf16 %v3375_v63, %v3374_v49  ;;  %5291 = vtanh.f32 %v3309_v58  ;;  %v3310_v10 = vmul.f32 0.7978846, %v3286_v2  ;;  %v6687_v23 = vadd.f32 %v6595_v11, %v1941_v59 }
 0x318   : > { %v5286_v42 = vpop.eup %5285  ;;  %v3312_v15 = vmul.f32 0.7978846, %v3288_v1  ;;  %v3620_v16 = vpack.c.bf16 %v3377_v54, %v3376_v50  ;;  %v3263_v13 = vmul.f32 %v6670_v48, %v3239_v6  ;;  %v3241_v19 = vmul.f32 %v6673_v52, %v3217_v7 }
 0x319   : > { %3466 = vst [vmem:[%s6635_s12 + $0x20] sm:$0xff] %v3619_v5  ;;  %5293 = vtanh.f32 %v3310_v10  ;;  %v6690_v8 = vadd.f32 %v6597_v12, %v1941_v59  ;;  %v6693_v26 = vadd.f32 %v6601_v17, %v1941_v59  ;;  %v3354_v29 = vadd.f32 1.0, %v5286_v42 }
 0x31a   : > { %3467 = vst [vmem:[%s6635_s12 + $0x28] sm:$0xff] %v3620_v16  ;;  %5295 = vtanh.f32 %v3312_v15  ;;  %v3287_v27 = vadd.f32 %v6670_v48, %v3263_v13  ;;  %v3265_v28 = vmul.f32 %v6673_v52, %v3241_v19  ;;  %v3218_v46 = vmul.f32 0.044715, %v6687_v23 }
 0x31b   : > { %v3220_v4 = vmul.f32 0.044715, %v6690_v8  ;;  %v3186_v11 = vmul.f32 0.5, %v6606_v20  ;;  %v3219_v17 = vmul.f32 0.044715, %v6693_v26  ;;  %v3187_v24 = vmul.f32 0.5, %v6629_v41 }
 0x31c   : > { %v5288_v30 = vpop.eup %5287  ;;  %v3311_v53 = vmul.f32 0.7978846, %v3287_v27  ;;  %v3289_v12 = vadd.f32 %v6673_v52, %v3265_v28  ;;  %v3242_v31 = vmul.f32 %v6687_v23, %v3218_v46  ;;  %v6707_v44 = vadd.f32 %v6608_v21, %v1941_v59 }
 0x31d   : > { %v3244_v61 = vmul.f32 %v6690_v8, %v3220_v4  ;;  %v3356_v34 = vadd.f32 1.0, %v5288_v30  ;;  %v3243_v20 = vmul.f32 %v6693_v26, %v3219_v17  ;;  %v3378_v35 = vmul.f32 %v3354_v29, %v3186_v11 }
 0x31e   : > { %5297 = vtanh.f32 %v3311_v53  ;;  %v3313_v9 = vmul.f32 0.7978846, %v3289_v12  ;;  %v3266_v37 = vmul.f32 %v6687_v23, %v3242_v31  ;;  %v3188_v41 = vmul.f32 0.5, %v6622_v14 }
 0x31f   : > { %v5290_v33 = vpop.eup %5289  ;;  %v3268_v45 = vmul.f32 %v6690_v8, %v3244_v61  ;;  %v3267_v38 = vmul.f32 %v6693_v26, %v3243_v20  ;;  %v3221_v21 = vmul.f32 0.044715, %v6707_v44  ;;  %v3189_v43 = vmul.f32 0.5, %v6643_v22 }
 0x320   : > { %v3355_v36 = vadd.f32 1.0, %v5290_v33  ;;  %5299 = vtanh.f32 %v3313_v9  ;;  %v3290_v47 = vadd.f32 %v6687_v23, %v3266_v37  ;;  %v3380_v49 = vmul.f32 %v3356_v34, %v3188_v41 }
 0x321   : > { %v5292_v39 = vpop.eup %5291  ;;  %v3292_v0 = vadd.f32 %v6690_v8, %v3268_v45  ;;  %v3291_v3 = vadd.f32 %v6693_v26, %v3267_v38  ;;  %v3245_v14 = vmul.f32 %v6707_v44, %v3221_v21  ;;  %v3190_v1 = vmul.f32 0.5, %v6646_v18  ;;  %v3506_v37 = vld [vmem:[%s6635_s12 + $0x28] sm:$0xff] (%p5385_p5) }
 0x322   : > { %v3379_v40 = vmul.f32 %v3355_v36, %v3187_v24  ;;  %v3357_v51 = vadd.f32 1.0, %v5292_v39  ;;  %v3314_v57 = vmul.f32 0.7978846, %v3290_v47  ;;  %v3192_v5 = vmul.f32 0.5, %v6649_v25  ;;  %v3504_v36 = vld [vmem:[%s6635_s12 + $0x20] sm:$0xff] (%p5385_p5)  ;;  %3507 = vst [vmem:[%s3483_s20 + $0x48] sm:$0xff] (%p5385_p5), %v3506_v37 }
 0x323   : > { %v5294_v32 = vpop.eup %5293  ;;  %v3316_v60 = vmul.f32 0.7978846, %v3292_v0  ;;  %v3315_v62 = vmul.f32 0.7978846, %v3291_v3  ;;  %v3269_v22 = vmul.f32 %v6707_v44, %v3245_v14  ;;  %v3191_v10 = vmul.f32 0.5, %v6670_v48  ;;  %3505 = vst [vmem:[%s3483_s20 + $0x40] sm:$0xff] (%p5385_p5), %v3504_v36 }
 0x324   : > { %v3621_v56 = vpack.c.bf16 %v3379_v40, %v3378_v35  ;;  %v5296_v50 = vpop.eup %5295  ;;  %v3381_v55 = vmul.f32 %v3357_v51, %v3189_v43  ;;  %v3358_v63 = vadd.f32 1.0, %v5294_v32  ;;  %5301 = vtanh.f32 %v3314_v57  ;;  %v3502_v35 = vld [vmem:[%s6635_s12 + $0x18] sm:$0xff] (%p5385_p5) }
 0x325   : > { %5303 = vtanh.f32 %v3316_v60  ;;  %v3293_v2 = vadd.f32 %v6707_v44, %v3269_v22  ;;  %v3360_v54 = vadd.f32 1.0, %v5296_v50  ;;  %v3193_v19 = vmul.f32 0.5, %v6673_v52  ;;  %3503 = vst [vmem:[%s3483_s20 + $0x28] sm:$0xff] (%p5385_p5), %v3502_v35 }
 0x326   : > { %3468 = vst [vmem:[%s6635_s12 + $0x30] sm:$0xff] %v3621_v56  ;;  %v3622_v58 = vpack.c.bf16 %v3381_v55, %v3380_v49  ;;  %5305 = vtanh.f32 %v3315_v62  ;;  %v3382_v42 = vmul.f32 %v3358_v63, %v3190_v1  ;;  %v3194_v30 = vmul.f32 0.5, %v6687_v23 }
 0x327   : > { %v3317_v7 = vmul.f32 0.7978846, %v3293_v2  ;;  %v3384_v59 = vmul.f32 %v3360_v54, %v3192_v5  ;;  %v3195_v12 = vmul.f32 0.5, %v6693_v26  ;;  %v3196_v52 = vmul.f32 0.5, %v6690_v8  ;;  %v3496_v8 = vld [vmem:[%s6635_s12] sm:$0xff] (%p5385_p5)  ;;  %v3498_v26 = vld [vmem:[%s6635_s12 + $0x8] sm:$0xff] (%p5385_p5) }
 0x328   : > { %v5298_v6 = vpop.eup %5297  ;;  %3469 = vst [vmem:[%s6635_s12 + $0x38] sm:$0xff] %v3622_v58  ;;  %v3197_v33 = vmul.f32 0.5, %v6707_v44  ;;  %v3500_v44 = vld [vmem:[%s6635_s12 + $0x10] sm:$0xff] (%p5385_p5)  ;;  %3497 = vst [vmem:[%s3483_s20] sm:$0xff] (%p5385_p5), %v3496_v8 }
 0x329   : > { %v3359_v15 = vadd.f32 1.0, %v5298_v6  ;;  %5307 = vtanh.f32 %v3317_v7  ;;  %3499 = vst [vmem:[%s3483_s20 + $0x8] sm:$0xff] (%p5385_p5), %v3498_v26  ;;  %3501 = vst [vmem:[%s3483_s20 + $0x20] sm:$0xff] (%p5385_p5), %v3500_v44 }
 0x32a   : > { %v5300_v16 = vpop.eup %5299 }
 0x32b   : > { %v3383_v13 = vmul.f32 %v3359_v15, %v3191_v10  ;;  %v3361_v18 = vadd.f32 1.0, %v5300_v16 }
 0x32d   : > { %v3623_v27 = vpack.c.bf16 %v3383_v13, %v3382_v42  ;;  %v3385_v28 = vmul.f32 %v3361_v18, %v3193_v19  ;;  %v3508_v45 = vld [vmem:[%s6635_s12 + $0x30] sm:$0xff] (%p5385_p5) }
 0x32e   : > { %v5302_v29 = vpop.eup %5301  ;;  %3509 = vst [vmem:[%s3483_s20 + $0x60] sm:$0xff] (%p5385_p5), %v3508_v45 }
 0x32f   : > { %3470 = vst [vmem:[%s6635_s12 + $0x40] sm:$0xff] %v3623_v27  ;;  %v3624_v46 = vpack.c.bf16 %v3385_v28, %v3384_v59  ;;  %v5304_v4 = vpop.eup %5303  ;;  %v3362_v25 = vadd.f32 1.0, %v5302_v29  ;;  %v3510_v41 = vld [vmem:[%s6635_s12 + $0x38] sm:$0xff] (%p5385_p5) }
 0x330   : > { %v5306_v48 = vpop.eup %5305  ;;  %v3364_v11 = vadd.f32 1.0, %v5304_v4  ;;  %3511 = vst [vmem:[%s3483_s20 + $0x68] sm:$0xff] (%p5385_p5), %v3510_v41 }
 0x331   : > { %3471 = vst [vmem:[%s6635_s12 + $0x48] sm:$0xff] %v3624_v46  ;;  %v3386_v53 = vmul.f32 %v3362_v25, %v3194_v30  ;;  %v3363_v17 = vadd.f32 1.0, %v5306_v48 }
 0x332   : > { %v3388_v61 = vmul.f32 %v3364_v11, %v3196_v52 }
 0x333   : > { %v5308_v24 = vpop.eup %5307  ;;  %v3387_v31 = vmul.f32 %v3363_v17, %v3195_v12 }
 0x334   : > { %v3365_v34 = vadd.f32 1.0, %v5308_v24  ;;  %3480 = sbr.rel (!%p5385_p5) target bundleno = 835 (0x343), region = 59 }
 0x335   : > { %v3625_v9 = vpack.c.bf16 %v3387_v31, %v3386_v53 }
 0x336   : > { %v3389_v23 = vmul.f32 %v3365_v34, %v3197_v33  ;;  %v3512_v38 = vld [vmem:[%s6635_s12 + $0x40] sm:$0xff] (%p5385_p5) }
 0x337   : > { %3472 = vst [vmem:[%s6635_s12 + $0x50] sm:$0xff] %v3625_v9  ;;  %3513 = vst [vmem:[%s3483_s20 + $0x80] sm:$0xff] (%p5385_p5), %v3512_v38 }
 0x338   : > { %v3626_v20 = vpack.c.bf16 %v3389_v23, %v3388_v61  ;;  %v3514_v21 = vld [vmem:[%s6635_s12 + $0x48] sm:$0xff] (%p5385_p5) }
 0x339   : > { %3515 = vst [vmem:[%s3483_s20 + $0x88] sm:$0xff] (%p5385_p5), %v3514_v21 }
 0x33a   : > { %3473 = vst [vmem:[%s6635_s12 + $0x58] sm:$0xff] %v3626_v20 }
 0x33e   : > { %v3516_v39 = vld [vmem:[%s6635_s12 + $0x50] sm:$0xff] }
 0x33f   : > { %3517 = vst [vmem:[%s3483_s20 + $0xa0] sm:$0xff] %v3516_v39 }
 0x341   : > { %v3518_v40 = vld [vmem:[%s6635_s12 + $0x58] sm:$0xff] }
 0x342   : > { %3519 = vst [vmem:[%s3483_s20 + $0xa8] sm:$0xff] %v3518_v40 }
 0x343 PF: > { %p10_p10 = scmp.ge.s32.totalorder %s5372_s16, 4   ;;  %s6770_s12 = smov %s5327_s13 }
 0x344   : > { %s6771_s13 = smov %s5383_s19  ;;  %s6772_s14 = smov %s5372_s16 }
 0x345   :  { %12 = sbr.rel (!%p10_p10) target bundleno = 2 (0x2), region = 113 }

// kernel: forward_pallas.7
= control target key start
LH: loop header
LB: loop body
LE: loop exit
PB: predicated region body
PF: predicated region fallthrough
CT: control target
= control target key end

     0   :  { %v2249_v3 = vmov 0   ;;  %vm522_vm0 = vcmask 130048   ;;  %s2752_s1 = inlined_call_operand.vmem [shape: bf16[1296,128], index: 1, kind: input, shape index: {}]   ;;  %s2753_s0 = inlined_call_operand.vmem [shape: bf16[64,1296], index: 0, kind: input, shape index: {}]   ;;  %s2754_s2 = inlined_call_operand.vmem [shape: f32[64,1], index: 2, kind: input, shape index: {}]   ;;  %s2755_s3 = inlined_call_operand.vmem [shape: bf16[64,128], index: 3, kind: output, shape index: {}]  }
   0x1   :  { %v1668_v0 = vld [vmem:[%s2752_s1 + $0x40] sm:$0xff]   ;;  %2231 = vset.pattern.permute.xlu0 %v2249_v3  ;;  %2232 = vset.pattern.permute.xlu1 %v2249_v3  ;;  %v1669_v5 = vld [vmem:[%s2752_s1 + $0x48] sm:$0xff]   ;;  %v1670_v9 = vld [vmem:[%s2752_s1 + $0x50] sm:$0xff]  }
   0x2   :  { %v1684_v1 = vld [vmem:[%s2752_s1 + $0xc0] sm:$0xff]   ;;  %2051 = vmatprep.subr.bf16.mxu0 %v1668_v0  ;;  %v1685_v6 = vld [vmem:[%s2752_s1 + $0xc8] sm:$0xff]   ;;  %v1686_v10 = vld [vmem:[%s2752_s1 + $0xd0] sm:$0xff]  }
   0x3   :  { %v1318_v2 = vld [vmem:[%s2752_s1] sm:$0xff]   ;;  %2083 = vmatprep.subr.bf16.mxu1 %v1684_v1  ;;  %v1661_v7 = vld [vmem:[%s2752_s1 + $0x8] sm:$0xff]   ;;  %v1662_v11 = vld [vmem:[%s2752_s1 + $0x10] sm:$0xff]  }
   0x4   :  { %v1676_v4 = vld [vmem:[%s2752_s1 + $0x80] sm:$0xff]   ;;  %2053 = vmatpush3.bf16.msra.mxu0 %v1318_v2  ;;  %v1677_v8 = vld [vmem:[%s2752_s1 + $0x88] sm:$0xff]   ;;  %v1678_v12 = vld [vmem:[%s2752_s1 + $0x90] sm:$0xff]  }
   0x5   :  { %2085 = vmatpush3.bf16.msra.mxu1 %v1676_v4  ;;  %2055 = vmatprep.subr.bf16.mxu0 %v1669_v5  ;;  %v1671_v13 = vld [vmem:[%s2752_s1 + $0x58] sm:$0xff]   ;;  %v14_v15 = vld [vmem:[%s2753_s0] sm:$0xff]  ;;  %v15_v19 = vld [vmem:[%s2753_s0 + $0x8] sm:$0xff] }
   0x6   :  { %2087 = vmatprep.subr.bf16.mxu1 %v1685_v6  ;;  %v1687_v14 = vld [vmem:[%s2752_s1 + $0xd8] sm:$0xff]   ;;  %v63_v18 = vunpack.c.h.bf16 %v14_v15  ;;  %v1672_v20 = vld [vmem:[%s2752_s1 + $0x60] sm:$0xff]   ;;  %v65_v22 = vunpack.c.h.bf16 %v15_v19  ;;  %v1673_v25 = vld [vmem:[%s2752_s1 + $0x68] sm:$0xff]   ;;  %v62_v41 = vunpack.c.l.bf16 %v14_v15  ;;  %v64_v42 = vunpack.c.l.bf16 %v15_v19 }
   0x7   :  { %v1663_v16 = vld [vmem:[%s2752_s1 + $0x18] sm:$0xff]   ;;  %v1688_v21 = vld [vmem:[%s2752_s1 + $0xe0] sm:$0xff]   ;;  %v1689_v26 = vld [vmem:[%s2752_s1 + $0xe8] sm:$0xff]  }
   0x8   :  { %2057 = vmatpush3.bf16.msra.mxu0 %v1661_v7  ;;  %v1679_v17 = vld [vmem:[%s2752_s1 + $0x98] sm:$0xff]   ;;  %611 = vmatprep.mubr.f32.mxu0 %v63_v18  ;;  %v1664_v23 = vld [vmem:[%s2752_s1 + $0x20] sm:$0xff]   ;;  %v1665_v27 = vld [vmem:[%s2752_s1 + $0x28] sm:$0xff]  }
   0x9   :  { %2089 = vmatpush3.bf16.msra.mxu1 %v1677_v8  ;;  %2059 = vmatprep.subr.bf16.mxu0 %v1670_v9  ;;  %v1680_v24 = vld [vmem:[%s2752_s1 + $0xa0] sm:$0xff]   ;;  %v1681_v28 = vld [vmem:[%s2752_s1 + $0xa8] sm:$0xff]   ;;  %v1674_v29 = vld [vmem:[%s2752_s1 + $0x70] sm:$0xff]  }
   0xa   :  { %2091 = vmatprep.subr.bf16.mxu1 %v1686_v10  ;;  %716 = vmatprep.mubr.f32.mxu1 %v65_v22  ;;  %v1690_v30 = vld [vmem:[%s2752_s1 + $0xf0] sm:$0xff]   ;;  %v1675_v33 = vld [vmem:[%s2752_s1 + $0x78] sm:$0xff]   ;;  %v1700_v37 = vld [vmem:[%s2752_s1 + $0x140] sm:$0xff]  }
   0xb   :  { %v1666_v31 = vld [vmem:[%s2752_s1 + $0x30] sm:$0xff]   ;;  %v1691_v34 = vld [vmem:[%s2752_s1 + $0xf8] sm:$0xff]   ;;  %v1716_v38 = vld [vmem:[%s2752_s1 + $0x1c0] sm:$0xff]  }
   0xc   :  { %2061 = vmatpush3.bf16.msra.mxu0 %v1662_v11  ;;  %v1682_v32 = vld [vmem:[%s2752_s1 + $0xb0] sm:$0xff]   ;;  %v1667_v35 = vld [vmem:[%s2752_s1 + $0x38] sm:$0xff]   ;;  %v1692_v43 = vld [vmem:[%s2752_s1 + $0x100] sm:$0xff]  }
   0xd   :  { %2093 = vmatpush3.bf16.msra.mxu1 %v1678_v12  ;;  %2063 = vmatprep.subr.bf16.mxu0 %v1671_v13  ;;  %v1683_v36 = vld [vmem:[%s2752_s1 + $0xb8] sm:$0xff]   ;;  %v20_v39 = vld [vmem:[%s2753_s0 + $0x2c] sm:$0xff]  ;;  %v1708_v44 = vld [vmem:[%s2752_s1 + $0x180] sm:$0xff]  }
   0xe   :  { %2095 = vmatprep.subr.bf16.mxu1 %v1687_v14  ;;  %v21_v40 = vld [vmem:[%s2753_s0 + $0x34] sm:$0xff]  ;;  %v74_v45 = vunpack.c.h.bf16 %v20_v39  ;;  %v27_v48 = vld [vmem:[%s2753_s0 + $0x60] sm:$0xff]  ;;  %v73_v49 = vunpack.c.l.bf16 %v20_v39  ;;  %v1701_v51 = vld [vmem:[%s2752_s1 + $0x148] sm:$0xff]  }
   0xf   :  { %v76_v46 = vunpack.c.h.bf16 %v21_v40  ;;  %v26_v47 = vld [vmem:[%s2753_s0 + $0x58] sm:$0xff]  ;;  %v75_v50 = vunpack.c.l.bf16 %v21_v40  ;;  %v1717_v52 = vld [vmem:[%s2752_s1 + $0x1c8] sm:$0xff]   ;;  %v87_v56 = vunpack.c.h.bf16 %v27_v48  ;;  %v86_v60 = vunpack.c.l.bf16 %v27_v48  ;;  %v1702_v61 = vld [vmem:[%s2752_s1 + $0x150] sm:$0xff]  }
  0x10   :  { %2065 = vmatpush3.bf16.msra.mxu0 %v1663_v16  ;;  %v1693_v53 = vld [vmem:[%s2752_s1 + $0x108] sm:$0xff]   ;;  %v85_v55 = vunpack.c.h.bf16 %v26_v47  ;;  %v84_v59 = vunpack.c.l.bf16 %v26_v47  ;;  %v1718_v62 = vld [vmem:[%s2752_s1 + $0x1d0] sm:$0xff]   ;;  %v39_v4 = vld [vmem:[%s2753_s0 + $0xb8] sm:$0xff] }
  0x11   :  { %2097 = vmatpush3.bf16.msra.mxu1 %v1679_v17  ;;  %2067 = vmatprep.subr.bf16.mxu0 %v1672_v20  ;;  %v1709_v54 = vld [vmem:[%s2752_s1 + $0x188] sm:$0xff]   ;;  %v1694_v63 = vld [vmem:[%s2752_s1 + $0x110] sm:$0xff]   ;;  %v1703_v7 = vld [vmem:[%s2752_s1 + $0x158] sm:$0xff]   ;;  %v109_v12 = vunpack.c.h.bf16 %v39_v4  ;;  %v108_v16 = vunpack.c.l.bf16 %v39_v4 }
  0x12   :  { %2099 = vmatprep.subr.bf16.mxu1 %v1688_v21  ;;  %v32_v57 = vld [vmem:[%s2753_s0 + $0x84] sm:$0xff]  ;;  %v33_v58 = vld [vmem:[%s2753_s0 + $0x8c] sm:$0xff]  ;;  %v1719_v8 = vld [vmem:[%s2752_s1 + $0x1d8] sm:$0xff]  }
  0x13   :  { %v1710_v0 = vld [vmem:[%s2752_s1 + $0x190] sm:$0xff]   ;;  %v96_v1 = vunpack.c.h.bf16 %v32_v57  ;;  %v98_v2 = vunpack.c.h.bf16 %v33_v58  ;;  %v95_v5 = vunpack.c.l.bf16 %v32_v57  ;;  %v97_v6 = vunpack.c.l.bf16 %v33_v58  ;;  %v1695_v9 = vld [vmem:[%s2752_s1 + $0x118] sm:$0xff]   ;;  %v45_v14 = vld [vmem:[%s2753_s0 + $0xe4] sm:$0xff] }
  0x14   :  { %2069 = vmatpush3.bf16.msra.mxu0 %v1664_v23  ;;  %v38_v3 = vld [vmem:[%s2753_s0 + $0xb0] sm:$0xff]  ;;  %v1711_v10 = vld [vmem:[%s2752_s1 + $0x198] sm:$0xff]   ;;  %v1704_v17 = vld [vmem:[%s2752_s1 + $0x160] sm:$0xff]   ;;  %v120_v22 = vunpack.c.h.bf16 %v45_v14 }
  0x15   :  { %2101 = vmatpush3.bf16.msra.mxu1 %v1680_v24  ;;  %2071 = vmatprep.subr.bf16.mxu0 %v1673_v25  ;;  %v107_v11 = vunpack.c.h.bf16 %v38_v3  ;;  %v44_v13 = vld [vmem:[%s2753_s0 + $0xdc] sm:$0xff]  ;;  %v106_v15 = vunpack.c.l.bf16 %v38_v3  ;;  %v50_v23 = vld [vmem:[%s2753_s0 + $0x108] sm:$0xff]  ;;  %v51_v24 = vld [vmem:[%s2753_s0 + $0x110] sm:$0xff] }
  0x16   :  { %2103 = vmatprep.subr.bf16.mxu1 %v1689_v26  ;;  %v1720_v18 = vld [vmem:[%s2752_s1 + $0x1e0] sm:$0xff]   ;;  %v118_v21 = vunpack.c.h.bf16 %v44_v13  ;;  %v117_v25 = vunpack.c.l.bf16 %v44_v13  ;;  %v119_v26 = vunpack.c.l.bf16 %v45_v14  ;;  %v1698_v39 = vld [vmem:[%s2752_s1 + $0x130] sm:$0xff]   ;;  %v1707_v47 = vld [vmem:[%s2752_s1 + $0x178] sm:$0xff]  }
  0x17   :  { %v1696_v19 = vld [vmem:[%s2752_s1 + $0x120] sm:$0xff]   ;;  %v1714_v40 = vld [vmem:[%s2752_s1 + $0x1b0] sm:$0xff]   ;;  %v1723_v48 = vld [vmem:[%s2752_s1 + $0x1f8] sm:$0xff]  }
  0x18   :  { %2073 = vmatpush3.bf16.msra.mxu0 %v1665_v27  ;;  %v1712_v20 = vld [vmem:[%s2752_s1 + $0x1a0] sm:$0xff]   ;;  %v1705_v27 = vld [vmem:[%s2752_s1 + $0x168] sm:$0xff]  }
  0x19   :  { %2105 = vmatpush3.bf16.msra.mxu1 %v1681_v28  ;;  %2075 = vmatprep.subr.bf16.mxu0 %v1674_v29  ;;  %v1721_v28 = vld [vmem:[%s2752_s1 + $0x1e8] sm:$0xff]   ;;  %v1732_v57 = vld [vmem:[%s2752_s1 + $0x240] sm:$0xff]  }
  0x1a   :  { %2107 = vmatprep.subr.bf16.mxu1 %v1690_v30  ;;  %v1697_v29 = vld [vmem:[%s2752_s1 + $0x128] sm:$0xff]   ;;  %v1724_v58 = vld [vmem:[%s2752_s1 + $0x200] sm:$0xff]  }
  0x1b   :  { %v1713_v30 = vld [vmem:[%s2752_s1 + $0x1a8] sm:$0xff]   ;;  %v40_v13 = vld [vmem:[%s2753_s0 + $0xc0] sm:$0xff] }
  0x1c   :  { %2077 = vmatpush3.bf16.msra.mxu0 %v1666_v31  ;;  %v129_v31 = vunpack.c.h.bf16 %v50_v23  ;;  %v41_v14 = vld [vmem:[%s2753_s0 + $0xc8] sm:$0xff] }
  0x1d   :  { %2109 = vmatpush3.bf16.msra.mxu1 %v1682_v32  ;;  %2079 = vmatprep.subr.bf16.mxu0 %v1675_v33  ;;  %v131_v32 = vunpack.c.h.bf16 %v51_v24  ;;  %v56_v33 = vld [vmem:[%s2753_s0 + $0x134] sm:$0xff] }
  0x1e   :  { %2111 = vmatprep.subr.bf16.mxu1 %v1691_v34  ;;  %v57_v34 = vld [vmem:[%s2753_s0 + $0x13c] sm:$0xff] }
  0x20   :  { %2081 = vmatpush3.bf16.msra.mxu0 %v1667_v35  ;;  %v128_v35 = vunpack.c.l.bf16 %v50_v23  ;;  %v110_v23 = vunpack.c.l.bf16 %v40_v13 }
  0x21   :  { %2113 = vmatpush3.bf16.msra.mxu1 %v1683_v36  ;;  %2115 = vmatprep.subr.bf16.mxu0 %v1700_v37  ;;  %v130_v36 = vunpack.c.l.bf16 %v51_v24  ;;  %v1706_v37 = vld [vmem:[%s2752_s1 + $0x170] sm:$0xff]   ;;  %v112_v24 = vunpack.c.l.bf16 %v41_v14 }
  0x22   :  { %2147 = vmatprep.subr.bf16.mxu1 %v1716_v38  ;;  %v1722_v38 = vld [vmem:[%s2752_s1 + $0x1f0] sm:$0xff]  }
  0x23   :  { %612 = vmatmul.mubr.f32.vlgmr.msra.gmra.mrb[0].mxu0 %v62_v41  ;;  %v140_v41 = vunpack.c.h.bf16 %v56_v33 }
  0x24   :  { %717 = vmatmul.mubr.f32.vlgmr.msra.gmra.mrb[0].mxu1 %v64_v42  ;;  %2117 = vmatpush3.bf16.msra.mxu0 %v1692_v43  ;;  %v142_v42 = vunpack.c.h.bf16 %v57_v34  ;;  %v16_v43 = vld [vmem:[%s2753_s0 + $0x10] sm:$0xff] }
  0x25   :  { %2149 = vmatpush3.bf16.msra.mxu1 %v1708_v44  ;;  %616 = vmatprep.mubr.f32.mxu0 %v74_v45  ;;  %v17_v44 = vld [vmem:[%s2753_s0 + $0x18] sm:$0xff]  ;;  %v139_v45 = vunpack.c.l.bf16 %v56_v33  ;;  %v1737_v33 = vld [vmem:[%s2752_s1 + $0x268] sm:$0xff]  }
  0x26   :  { %721 = vmatprep.mubr.f32.mxu1 %v76_v46  ;;  %2119 = vmatprep.subr.bf16.mxu0 %v1701_v51  ;;  %v141_v46 = vunpack.c.l.bf16 %v57_v34  ;;  %v67_v51 = vunpack.c.h.bf16 %v16_v43  ;;  %v1729_v34 = vld [vmem:[%s2752_s1 + $0x228] sm:$0xff]  }
  0x27   :  { %2151 = vmatprep.subr.bf16.mxu1 %v1717_v52  ;;  %617 = vmatmul.mubr.f32.gmra.mrb[2].mxu0 %v73_v49  ;;  %v1699_v49 = vld [vmem:[%s2752_s1 + $0x138] sm:$0xff]   ;;  %v69_v52 = vunpack.c.h.bf16 %v17_v44 }
  0x28   :  { %722 = vmatmul.mubr.f32.gmra.mrb[2].mxu1 %v75_v50  ;;  %2121 = vmatpush3.bf16.msra.mxu0 %v1693_v53  ;;  %v1715_v50 = vld [vmem:[%s2752_s1 + $0x1b8] sm:$0xff]  }
  0x29   :  { %2153 = vmatpush3.bf16.msra.mxu1 %v1709_v54  ;;  %621 = vmatprep.mubr.f32.mxu0 %v85_v55  ;;  %v22_v53 = vld [vmem:[%s2753_s0 + $0x3c] sm:$0xff]  ;;  %v23_v54 = vld [vmem:[%s2753_s0 + $0x44] sm:$0xff]  ;;  %v66_v55 = vunpack.c.l.bf16 %v16_v43 }
  0x2a   :  { %726 = vmatprep.mubr.f32.mxu1 %v87_v56  ;;  %2123 = vmatprep.subr.bf16.mxu0 %v1702_v61  ;;  %v68_v56 = vunpack.c.l.bf16 %v17_v44  ;;  %v28_v61 = vld [vmem:[%s2753_s0 + $0x68] sm:$0xff] }
  0x2b   :  { %2155 = vmatprep.subr.bf16.mxu1 %v1718_v62  ;;  %622 = vmatmul.mubr.f32.gmra.mrb[4].mxu0 %v84_v59  ;;  %v78_v59 = vunpack.c.h.bf16 %v22_v53  ;;  %v29_v62 = vld [vmem:[%s2753_s0 + $0x70] sm:$0xff]  ;;  %v89_v3 = vunpack.c.h.bf16 %v28_v61 }
  0x2c   :  { %727 = vmatmul.mubr.f32.gmra.mrb[4].mxu1 %v86_v60  ;;  %2125 = vmatpush3.bf16.msra.mxu0 %v1694_v63  ;;  %v80_v60 = vunpack.c.h.bf16 %v23_v54  ;;  %v77_v63 = vunpack.c.l.bf16 %v22_v53  ;;  %v91_v4 = vunpack.c.h.bf16 %v29_v62  ;;  %v24_v53 = vld [vmem:[%s2753_s0 + $0x4c] sm:$0xff] }
  0x2d   :  { %2157 = vmatpush3.bf16.msra.mxu1 %v1710_v0  ;;  %626 = vmatprep.mubr.f32.mxu0 %v96_v1  ;;  %v79_v0 = vunpack.c.l.bf16 %v23_v54  ;;  %v1733_v1 = vld [vmem:[%s2752_s1 + $0x248] sm:$0xff]   ;;  %v60_v54 = vld [vmem:[%s2753_s0 + $0x154] sm:$0xff] }
  0x2e   :  { %731 = vmatprep.mubr.f32.mxu1 %v98_v2  ;;  %2127 = vmatprep.subr.bf16.mxu0 %v1703_v7  ;;  %v1725_v2 = vld [vmem:[%s2752_s1 + $0x208] sm:$0xff]   ;;  %v88_v7 = vunpack.c.l.bf16 %v28_v61  ;;  %v30_v61 = vld [vmem:[%s2753_s0 + $0x78] sm:$0xff] }
  0x2f   :  { %2159 = vmatprep.subr.bf16.mxu1 %v1719_v8  ;;  %627 = vmatmul.mubr.f32.gmra.mrb[6].mxu0 %v95_v5  ;;  %v34_v5 = vld [vmem:[%s2753_s0 + $0x94] sm:$0xff]  ;;  %v90_v8 = vunpack.c.l.bf16 %v29_v62 }
  0x30   :  { %732 = vmatmul.mubr.f32.gmra.mrb[6].mxu1 %v97_v6  ;;  %2129 = vmatpush3.bf16.msra.mxu0 %v1695_v9  ;;  %v35_v6 = vld [vmem:[%s2753_s0 + $0x9c] sm:$0xff]  ;;  %v1734_v9 = vld [vmem:[%s2752_s1 + $0x250] sm:$0xff]  }
  0x31   :  { %2161 = vmatpush3.bf16.msra.mxu1 %v1711_v10  ;;  %631 = vmatprep.mubr.f32.mxu0 %v107_v11  ;;  %v1726_v10 = vld [vmem:[%s2752_s1 + $0x210] sm:$0xff]   ;;  %v100_v11 = vunpack.c.h.bf16 %v34_v5 }
  0x32   :  { %736 = vmatprep.mubr.f32.mxu1 %v109_v12  ;;  %2131 = vmatprep.subr.bf16.mxu0 %v1704_v17  ;;  %v102_v12 = vunpack.c.h.bf16 %v35_v6  ;;  %v1735_v17 = vld [vmem:[%s2752_s1 + $0x258] sm:$0xff]   ;;  %v19_v62 = vld [vmem:[%s2753_s0 + $0x28] ss:$44 sps:$4 sm:$0xff]  }
  0x33   :  { %2163 = vmatprep.subr.bf16.mxu1 %v1720_v18  ;;  %632 = vmatmul.mubr.f32.gmra.mrb[8].mxu0 %v106_v15  ;;  %v99_v15 = vunpack.c.l.bf16 %v34_v5  ;;  %v1727_v18 = vld [vmem:[%s2752_s1 + $0x218] sm:$0xff]   ;;  %v36_v5 = vld [vmem:[%s2753_s0 + $0xa4] sm:$0xff] }
  0x34   :  { %737 = vmatmul.mubr.f32.gmra.mrb[8].mxu1 %v108_v16  ;;  %2133 = vmatpush3.bf16.msra.mxu0 %v1696_v19  ;;  %v101_v16 = vunpack.c.l.bf16 %v35_v6  ;;  %v111_v19 = vunpack.c.h.bf16 %v40_v13  ;;  %v31_v6 = vld [vmem:[%s2753_s0 + $0x80] ss:$44 sps:$4 sm:$0xff]   ;;  %v42_v13 = vld [vmem:[%s2753_s0 + $0xd0] sm:$0xff] }
  0x35   :  { %2165 = vmatpush3.bf16.msra.mxu1 %v1712_v20  ;;  %636 = vmatprep.mubr.f32.mxu0 %v118_v21  ;;  %v113_v20 = vunpack.c.h.bf16 %v41_v14  ;;  %v46_v21 = vld [vmem:[%s2753_s0 + $0xec] sm:$0xff]  ;;  %v43_v14 = vld [vmem:[%s2753_s0 + $0xd8] ss:$44 sps:$4 sm:$0xff]  }
  0x36   :  { %741 = vmatprep.mubr.f32.mxu1 %v120_v22  ;;  %2135 = vmatprep.subr.bf16.mxu0 %v1705_v27  ;;  %v47_v22 = vld [vmem:[%s2753_s0 + $0xf4] sm:$0xff]  ;;  %v122_v27 = vunpack.c.h.bf16 %v46_v21 }
  0x37   :  { %2167 = vmatprep.subr.bf16.mxu1 %v1721_v28  ;;  %637 = vmatmul.mubr.f32.gmra.mrb[10].mxu0 %v117_v25  ;;  %v1736_v25 = vld [vmem:[%s2752_s1 + $0x260] sm:$0xff]   ;;  %v124_v28 = vunpack.c.h.bf16 %v47_v22 }
  0x38   :  { %742 = vmatmul.mubr.f32.gmra.mrb[10].mxu1 %v119_v26  ;;  %2137 = vmatpush3.bf16.msra.mxu0 %v1697_v29  ;;  %v1728_v26 = vld [vmem:[%s2752_s1 + $0x220] sm:$0xff]   ;;  %v52_v29 = vld [vmem:[%s2753_s0 + $0x118] sm:$0xff] }
  0x39   :  { %2169 = vmatpush3.bf16.msra.mxu1 %v1713_v30  ;;  %641 = vmatprep.mubr.f32.mxu0 %v129_v31  ;;  %v53_v30 = vld [vmem:[%s2753_s0 + $0x120] sm:$0xff]  ;;  %v121_v31 = vunpack.c.l.bf16 %v46_v21 }
  0x3a   :  { %746 = vmatprep.mubr.f32.mxu1 %v131_v32  ;;  %2139 = vmatprep.subr.bf16.mxu0 %v1706_v37  ;;  %v123_v32 = vunpack.c.l.bf16 %v47_v22  ;;  %v58_v37 = vld [vmem:[%s2753_s0 + $0x144] sm:$0xff]  ;;  %v48_v21 = vld [vmem:[%s2753_s0 + $0xfc] sm:$0xff] }
  0x3b   :  { %2171 = vmatprep.subr.bf16.mxu1 %v1722_v38  ;;  %642 = vmatmul.mubr.f32.gmra.mrb[12].mxu0 %v128_v35  ;;  %v133_v35 = vunpack.c.h.bf16 %v52_v29  ;;  %v59_v38 = vld [vmem:[%s2753_s0 + $0x14c] sm:$0xff]  ;;  %v144_v43 = vunpack.c.h.bf16 %v58_v37 }
  0x3c   :  { %747 = vmatmul.mubr.f32.gmra.mrb[12].mxu1 %v130_v36  ;;  %2141 = vmatpush3.bf16.msra.mxu0 %v1698_v39  ;;  %v135_v36 = vunpack.c.h.bf16 %v53_v30  ;;  %v132_v39 = vunpack.c.l.bf16 %v52_v29  ;;  %v146_v44 = vunpack.c.h.bf16 %v59_v38  ;;  %v55_v22 = vld [vmem:[%s2753_s0 + $0x130] ss:$44 sps:$4 sm:$0xff]  }
  0x3d   :  { %2173 = vmatpush3.bf16.msra.mxu1 %v1714_v40  ;;  %646 = vmatprep.mubr.f32.mxu0 %v140_v41  ;;  %v134_v40 = vunpack.c.l.bf16 %v53_v30  ;;  %v1738_v41 = vld [vmem:[%s2752_s1 + $0x270] sm:$0xff]   ;;  %v149_v29 = vunpack.c.h.bf16 %v55_v22 }
  0x3e   :  { %751 = vmatprep.mubr.f32.mxu1 %v142_v42  ;;  %2143 = vmatprep.subr.bf16.mxu0 %v1707_v47  ;;  %v1730_v42 = vld [vmem:[%s2752_s1 + $0x230] sm:$0xff]   ;;  %v143_v47 = vunpack.c.l.bf16 %v58_v37 }
  0x3f   :  { %2175 = vmatprep.subr.bf16.mxu1 %v1723_v48  ;;  %647 = vmatmul.mubr.f32.gmra.mrb[14].mxu0 %v139_v45  ;;  %v18_v45 = vld [vmem:[%s2753_s0 + $0x20] sm:$0xff]  ;;  %v145_v48 = vunpack.c.l.bf16 %v59_v38 }
  0x40   :  { %752 = vmatmul.mubr.f32.gmra.mrb[14].mxu1 %v141_v46  ;;  %2145 = vmatpush3.bf16.msra.mxu0 %v1699_v49  ;;  %v54_v46 = vld [vmem:[%s2753_s0 + $0x128] sm:$0xff]  ;;  %v1739_v49 = vld [vmem:[%s2752_s1 + $0x278] sm:$0xff]  }
  0x41   :  { %2177 = vmatpush3.bf16.msra.mxu1 %v1715_v50  ;;  %821 = vmatprep.mubr.f32.mxu0 %v67_v51  ;;  %v1731_v50 = vld [vmem:[%s2752_s1 + $0x238] sm:$0xff]   ;;  %v71_v51 = vunpack.c.h.bf16 %v18_v45 }
  0x42   :  { %926 = vmatprep.mubr.f32.mxu1 %v69_v52  ;;  %2179 = vmatprep.subr.bf16.mxu0 %v1732_v57  ;;  %v137_v52 = vunpack.c.h.bf16 %v54_v46 }
  0x43   :  { %2214 = vmatprep.subr.bf16.mxu1 %v1732_v57  ;;  %822 = vmatmul.mubr.f32.vlgmr.msra.gmra.mrb[16].mxu0 %v66_v55  ;;  %v70_v55 = vunpack.c.l.bf16 %v18_v45  ;;  %v1740_v57 = vld [vmem:[%s2752_s1 + $0x280] sm:$0xff]  }
  0x44   :  { %927 = vmatmul.mubr.f32.vlgmr.msra.gmra.mrb[16].mxu1 %v68_v56  ;;  %2181 = vmatpush3.bf16.msra.mxu0 %v1724_v58  ;;  %v136_v56 = vunpack.c.l.bf16 %v54_v46 }
  0x45   :  { %2222 = vmatpush3.bf16.msra.mxu1 %v1724_v58  ;;  %826 = vmatprep.mubr.f32.mxu0 %v78_v59  ;;  %v474_v58 = vld [vmem:[%s2754_s2] sm:$0xff]  ;;  %v82_v59 = vunpack.c.h.bf16 %v24_v53 }
  0x46   :  { %931 = vmatprep.mubr.f32.mxu1 %v80_v60  ;;  %2183 = vmatprep.subr.bf16.mxu0 %v1733_v1  ;;  %v148_v60 = vunpack.c.h.bf16 %v60_v54 }
  0x47   :  { %2215 = vmatprep.subr.bf16.mxu1 %v1733_v1  ;;  %827 = vmatmul.mubr.f32.gmra.mrb[18].mxu0 %v77_v63  ;;  %v476_v63 = vld [vmem:[%s2754_s2 + $0x10] sm:$0xff]  ;;  %v147_v1 = vunpack.c.l.bf16 %v60_v54 }
  0x48   :  { %932 = vmatmul.mubr.f32.gmra.mrb[18].mxu1 %v79_v0  ;;  %2185 = vmatpush3.bf16.msra.mxu0 %v1725_v2  ;;  %v81_v0 = vunpack.c.l.bf16 %v24_v53 }
  0x49   :  { %2223 = vmatpush3.bf16.msra.mxu1 %v1725_v2  ;;  %831 = vmatprep.mubr.f32.mxu0 %v89_v3  ;;  %v475_v2 = vld [vmem:[%s2754_s2 + $0x8] sm:$0xff]  ;;  %v93_v3 = vunpack.c.h.bf16 %v30_v61 }
  0x4a   :  { %936 = vmatprep.mubr.f32.mxu1 %v91_v4  ;;  %2187 = vmatprep.subr.bf16.mxu0 %v1734_v9  ;;  %v72_v4 = vunpack.c.l.bf16 %v19_v62 }
  0x4b   :  { %2216 = vmatprep.subr.bf16.mxu1 %v1734_v9  ;;  %832 = vmatmul.mubr.f32.gmra.mrb[20].mxu0 %v88_v7  ;;  %v477_v7 = vld [vmem:[%s2754_s2 + $0x18] sm:$0xff]  ;;  %v83_v9 = vunpack.c.h.bf16 %v19_v62 }
  0x4c   :  { %937 = vmatmul.mubr.f32.gmra.mrb[20].mxu1 %v90_v8  ;;  %2189 = vmatpush3.bf16.msra.mxu0 %v1726_v10  ;;  %v92_v8 = vunpack.c.l.bf16 %v30_v61 }
  0x4d   :  { %2224 = vmatpush3.bf16.msra.mxu1 %v1726_v10  ;;  %836 = vmatprep.mubr.f32.mxu0 %v100_v11  ;;  %v478_v10 = vld [vmem:[%s2754_s2 + $0x20] sm:$0xff]  ;;  %v104_v11 = vunpack.c.h.bf16 %v36_v5 }
  0x4e   :  { %941 = vmatprep.mubr.f32.mxu1 %v102_v12  ;;  %2191 = vmatprep.subr.bf16.mxu0 %v1735_v17  ;;  %v94_v12 = vunpack.c.l.bf16 %v31_v6 }
  0x4f   :  { %2217 = vmatprep.subr.bf16.mxu1 %v1735_v17  ;;  %837 = vmatmul.mubr.f32.gmra.mrb[22].mxu0 %v99_v15  ;;  %v479_v15 = vld [vmem:[%s2754_s2 + $0x28] sm:$0xff]  ;;  %v105_v17 = vunpack.c.h.bf16 %v31_v6 }
  0x50   :  { %942 = vmatmul.mubr.f32.gmra.mrb[22].mxu1 %v101_v16  ;;  %2193 = vmatpush3.bf16.msra.mxu0 %v1727_v18  ;;  %v103_v16 = vunpack.c.l.bf16 %v36_v5 }
  0x51   :  { %2225 = vmatpush3.bf16.msra.mxu1 %v1727_v18  ;;  %841 = vmatprep.mubr.f32.mxu0 %v111_v19  ;;  %v480_v18 = vld [vmem:[%s2754_s2 + $0x30] sm:$0xff]  ;;  %v115_v19 = vunpack.c.h.bf16 %v42_v13 }
  0x52   :  { %946 = vmatprep.mubr.f32.mxu1 %v113_v20  ;;  %2195 = vmatprep.subr.bf16.mxu0 %v1736_v25  ;;  %v116_v20 = vunpack.c.l.bf16 %v43_v14 }
  0x53   :  { %2218 = vmatprep.subr.bf16.mxu1 %v1736_v25  ;;  %842 = vmatmul.mubr.f32.gmra.mrb[24].mxu0 %v110_v23  ;;  %v481_v23 = vld [vmem:[%s2754_s2 + $0x38] sm:$0xff]  ;;  %v127_v25 = vunpack.c.h.bf16 %v43_v14 }
  0x54   :  { %947 = vmatmul.mubr.f32.gmra.mrb[24].mxu1 %v112_v24  ;;  %2197 = vmatpush3.bf16.msra.mxu0 %v1728_v26  ;;  %v114_v24 = vunpack.c.l.bf16 %v42_v13 }
  0x55   :  { %2226 = vmatpush3.bf16.msra.mxu1 %v1728_v26  ;;  %846 = vmatprep.mubr.f32.mxu0 %v122_v27  ;;  %v126_v26 = vunpack.c.h.bf16 %v48_v21  ;;  %v138_v27 = vunpack.c.l.bf16 %v55_v22 }
  0x56   :  { %951 = vmatprep.mubr.f32.mxu1 %v124_v28  ;;  %2199 = vmatprep.subr.bf16.mxu0 %v1737_v33  ;;  %v125_v28 = vunpack.c.l.bf16 %v48_v21 }
  0x57   :  { %2219 = vmatprep.subr.bf16.mxu1 %v1737_v33  ;;  %847 = vmatmul.mubr.f32.gmra.mrb[26].mxu0 %v121_v31 }
  0x58   :  { %952 = vmatmul.mubr.f32.gmra.mrb[26].mxu1 %v123_v32  ;;  %2201 = vmatpush3.bf16.msra.mxu0 %v1729_v34 }
  0x59   :  { %2227 = vmatpush3.bf16.msra.mxu1 %v1729_v34  ;;  %851 = vmatprep.mubr.f32.mxu0 %v133_v35 }
  0x5a   :  { %956 = vmatprep.mubr.f32.mxu1 %v135_v36  ;;  %2203 = vmatprep.subr.bf16.mxu0 %v1738_v41 }
  0x5b   :  { %2220 = vmatprep.subr.bf16.mxu1 %v1738_v41  ;;  %852 = vmatmul.mubr.f32.gmra.mrb[28].mxu0 %v132_v39 }
  0x5c   :  { %957 = vmatmul.mubr.f32.gmra.mrb[28].mxu1 %v134_v40  ;;  %2205 = vmatpush3.bf16.msra.mxu0 %v1730_v42 }
  0x5d   :  { %2228 = vmatpush3.bf16.msra.mxu1 %v1730_v42  ;;  %856 = vmatprep.mubr.f32.mxu0 %v144_v43 }
  0x5e   :  { %961 = vmatprep.mubr.f32.mxu1 %v146_v44  ;;  %2207 = vmatprep.subr.bf16.mxu0 %v1739_v49 }
  0x5f   :  { %2221 = vmatprep.subr.bf16.mxu1 %v1739_v49  ;;  %857 = vmatmul.mubr.f32.gmra.mrb[30].mxu0 %v143_v47 }
  0x60   :  { %962 = vmatmul.mubr.f32.gmra.mrb[30].mxu1 %v145_v48  ;;  %2209 = vmatpush3.bf16.msra.mxu0 %v1731_v50 }
  0x61   :  { %2229 = vmatpush3.bf16.msra.mxu1 %v1731_v50  ;;  %1031 = vmatprep.mubr.f32.mxu0 %v71_v51 }
  0x62   :  { %1061 = vmatprep.mubr.f32.mxu1 %v137_v52  ;;  %2211 = vmatprep.subr.bf16.mxu1 %v1740_v57 }
  0x63   :  { %484 = vperm.xlu0 %2231, %v474_v58   ;;  %1032 = vmatmul.mubr.f32.vlgmr.msra.gmra.mrb[32].mxu0 %v70_v55 }
  0x64   :  { %1062 = vmatmul.mubr.f32.vlgmr.msra.gmra.mrb[32].mxu1 %v136_v56  ;;  %1036 = vmatprep.mubr.f32.mxu0 %v82_v59 }
  0x65   :  { %1066 = vmatprep.mubr.f32.mxu1 %v148_v60  ;;  %2213 = vmatpush3.bf16.msra.mxu1 %v1740_v57 }
  0x66   :  { %494 = vperm.xlu1 %2232, %v476_v63  }
  0x67   :  { %489 = vperm.xlu0 %2231, %v475_v2   ;;  %1037 = vmatmul.mubr.f32.gmra.mrb[34].mxu0 %v81_v0 }
  0x68   :  { %1067 = vmatmul.mubr.f32.gmra.mrb[34].mxu1 %v147_v1  ;;  %1041 = vmatprep.mubr.f32.mxu0 %v93_v3 }
  0x69   :  { %2038 = vmatprep.mubr.msk.f32.mxu1 %vm522_vm0, %v72_v4 }
  0x6a   :  { %499 = vperm.xlu1 %2232, %v477_v7  }
  0x6b   :  { %504 = vperm.xlu0 %2231, %v478_v10   ;;  %1042 = vmatmul.mubr.f32.gmra.mrb[36].mxu0 %v92_v8 }
  0x6c   :  { %2039 = vmatmul.mubr.msk.f32.vlgmr.msra.gmra.mrb[36].mxu1 %vm522_vm0, %v83_v9  ;;  %1046 = vmatprep.mubr.f32.mxu0 %v104_v11 }
  0x6d   :  { %2041 = vmatprep.mubr.msk.f32.mxu1 %vm522_vm0, %v94_v12 }
  0x6e   :  { %509 = vperm.xlu1 %2232, %v479_v15  }
  0x6f   :  { %514 = vperm.xlu0 %2231, %v480_v18   ;;  %1047 = vmatmul.mubr.f32.gmra.mrb[38].mxu0 %v103_v16 }
  0x70   :  { %2042 = vmatmul.mubr.msk.f32.gmra.mrb[38].mxu1 %vm522_vm0, %v105_v17  ;;  %1051 = vmatprep.mubr.f32.mxu0 %v115_v19 }
  0x71   :  { %2044 = vmatprep.mubr.msk.f32.mxu1 %vm522_vm0, %v116_v20 }
  0x72   :  { %519 = vperm.xlu1 %2232, %v481_v23  }
  0x73   :  { %1052 = vmatmul.mubr.f32.gmra.mrb[40].mxu0 %v114_v24 }
  0x74   :  { %2045 = vmatmul.mubr.msk.f32.gmra.mrb[40].mxu1 %vm522_vm0, %v127_v25  ;;  %1056 = vmatprep.mubr.f32.mxu0 %v126_v26 }
  0x75   :  { %2047 = vmatprep.mubr.msk.f32.mxu1 %vm522_vm0, %v138_v27 }
  0x77   :  { %1057 = vmatmul.mubr.f32.gmra.mrb[42].mxu0 %v125_v28 }
  0x78   :  { %2048 = vmatmul.mubr.msk.f32.gmra.mrb[42].mxu1 %vm522_vm0, %v149_v29 }
  0xe2   :  { %v485_v30 = vpop.permute.xlu0 %484 }
  0xe5   :  { %v495_v38 = vpop.permute.xlu1 %494 }
  0xe6   :  { %v490_v37 = vpop.permute.xlu0 %489 }
  0xe9   :  { %v500_v55 = vpop.permute.xlu1 %499 }
  0xea   :  { %v505_v0 = vpop.permute.xlu0 %504 }
  0xed   :  { %v510_v9 = vpop.permute.xlu1 %509 }
  0xee   :  { %v515_v18 = vpop.permute.xlu0 %514 }
  0xf1   :  { %v520_v27 = vpop.permute.xlu1 %519 }
  0xf6   :  { %v1776_v31 = vpop.f32.mrb[0].mxu0 }
  0xf7   :  { %v1832_v32 = vpop.f32.mrb[0].mxu1  ;;  %v1777_v33 = vpop.f32.mrb[1].mxu0 }
  0xf8   :  { %v1833_v34 = vpop.f32.mrb[1].mxu1  ;;  %v1778_v35 = vadd.f32 %v1777_v33, %v1776_v31 }
  0xf9   :  { %v1834_v36 = vadd.f32 %v1833_v34, %v1832_v32 }
  0xfa   :  { %v614_v39 = vadd.f32 %v1778_v35, %v485_v30  ;;  %v1779_v40 = vpop.f32.mrb[2].mxu0 }
  0xfb   :  { %v1835_v41 = vpop.f32.mrb[2].mxu1  ;;  %v1780_v42 = vpop.f32.mrb[3].mxu0 }
  0xfc   :  { %v1836_v43 = vpop.f32.mrb[3].mxu1  ;;  %v2677_v44 = vadd.f32 %v1834_v36, %v614_v39  ;;  %v1781_v45 = vadd.f32 %v1780_v42, %v1779_v40 }
  0xfd   :  { %v1837_v46 = vadd.f32 %v1836_v43, %v1835_v41 }
  0xfe   :  { %v619_v47 = vadd.f32 %v1781_v45, %v490_v37  ;;  %v1782_v48 = vpop.f32.mrb[4].mxu0 }
  0xff   :  { %v1838_v49 = vpop.f32.mrb[4].mxu1  ;;  %v1783_v50 = vpop.f32.mrb[5].mxu0 }
 0x100   :  { %v1839_v51 = vpop.f32.mrb[5].mxu1  ;;  %v2679_v52 = vadd.f32 %v1837_v46, %v619_v47  ;;  %v1784_v53 = vadd.f32 %v1783_v50, %v1782_v48 }
 0x101   :  { %v1840_v54 = vadd.f32 %v1839_v51, %v1838_v49 }
 0x102   :  { %v624_v56 = vadd.f32 %v1784_v53, %v495_v38  ;;  %v1785_v57 = vpop.f32.mrb[6].mxu0 }
 0x103   :  { %v1841_v58 = vpop.f32.mrb[6].mxu1  ;;  %v1786_v59 = vpop.f32.mrb[7].mxu0 }
 0x104   :  { %v1842_v60 = vpop.f32.mrb[7].mxu1  ;;  %v2681_v61 = vadd.f32 %v1840_v54, %v624_v56  ;;  %v1787_v62 = vadd.f32 %v1786_v59, %v1785_v57 }
 0x105   :  { %v1843_v63 = vadd.f32 %v1842_v60, %v1841_v58 }
 0x106   :  { %v629_v1 = vadd.f32 %v1787_v62, %v500_v55  ;;  %v1788_v2 = vpop.f32.mrb[8].mxu0 }
 0x107   :  { %v1844_v3 = vpop.f32.mrb[8].mxu1  ;;  %v1789_v4 = vpop.f32.mrb[9].mxu0 }
 0x108   :  { %v1845_v5 = vpop.f32.mrb[9].mxu1  ;;  %v734_v6 = vadd.f32 %v1843_v63, %v629_v1  ;;  %v1790_v7 = vadd.f32 %v1789_v4, %v1788_v2 }
 0x109   :  { %v1846_v8 = vadd.f32 %v1845_v5, %v1844_v3 }
 0x10a   :  { %v634_v10 = vadd.f32 %v1790_v7, %v505_v0  ;;  %v1791_v11 = vpop.f32.mrb[10].mxu0 }
 0x10b   :  { %v1847_v12 = vpop.f32.mrb[10].mxu1  ;;  %v1792_v13 = vpop.f32.mrb[11].mxu0 }
 0x10c   :  { %v1848_v14 = vpop.f32.mrb[11].mxu1  ;;  %v739_v15 = vadd.f32 %v1846_v8, %v634_v10  ;;  %v1793_v16 = vadd.f32 %v1792_v13, %v1791_v11 }
 0x10d   :  { %v1849_v17 = vadd.f32 %v1848_v14, %v1847_v12 }
 0x10e   :  { %v639_v19 = vadd.f32 %v1793_v16, %v510_v9  ;;  %v1794_v20 = vpop.f32.mrb[12].mxu0 }
 0x10f   :  { %v1850_v21 = vpop.f32.mrb[12].mxu1  ;;  %v1795_v22 = vpop.f32.mrb[13].mxu0 }
 0x110   :  { %v1851_v23 = vpop.f32.mrb[13].mxu1  ;;  %v744_v24 = vadd.f32 %v1849_v17, %v639_v19  ;;  %v1796_v25 = vadd.f32 %v1795_v22, %v1794_v20 }
 0x111   :  { %v1852_v26 = vadd.f32 %v1851_v23, %v1850_v21 }
 0x112   :  { %v644_v28 = vadd.f32 %v1796_v25, %v515_v18  ;;  %v1797_v29 = vpop.f32.mrb[14].mxu0 }
 0x113   :  { %v1853_v30 = vpop.f32.mrb[14].mxu1  ;;  %v1798_v31 = vpop.f32.mrb[15].mxu0 }
 0x114   :  { %v1854_v32 = vpop.f32.mrb[15].mxu1  ;;  %v749_v33 = vadd.f32 %v1852_v26, %v644_v28  ;;  %v1799_v34 = vadd.f32 %v1798_v31, %v1797_v29 }
 0x115   :  { %v1855_v35 = vadd.f32 %v1854_v32, %v1853_v30 }
 0x116   :  { %v649_v36 = vadd.f32 %v1799_v34, %v520_v27  ;;  %v1888_v37 = vpop.f32.mrb[16].mxu0 }
 0x117   :  { %v1944_v38 = vpop.f32.mrb[16].mxu1  ;;  %v1889_v39 = vpop.f32.mrb[17].mxu0 }
 0x118   :  { %v1945_v40 = vpop.f32.mrb[17].mxu1  ;;  %v754_v41 = vadd.f32 %v1855_v35, %v649_v36  ;;  %v1890_v42 = vadd.f32 %v1889_v39, %v1888_v37 }
 0x119   :  { %v1946_v43 = vadd.f32 %v1945_v40, %v1944_v38 }
 0x11a   :  { %v824_v45 = vadd.f32 %v1890_v42, %v2677_v44  ;;  %v1891_v46 = vpop.f32.mrb[18].mxu0 }
 0x11b   :  { %v1947_v47 = vpop.f32.mrb[18].mxu1  ;;  %v1892_v48 = vpop.f32.mrb[19].mxu0 }
 0x11c   :  { %v1948_v49 = vpop.f32.mrb[19].mxu1  ;;  %v929_v50 = vadd.f32 %v1946_v43, %v824_v45  ;;  %v1893_v51 = vadd.f32 %v1892_v48, %v1891_v46 }
 0x11d   :  { %v1949_v53 = vadd.f32 %v1948_v49, %v1947_v47 }
 0x11e   :  { %v829_v54 = vadd.f32 %v1893_v51, %v2679_v52  ;;  %v1894_v55 = vpop.f32.mrb[20].mxu0 }
 0x11f   :  { %v1950_v56 = vpop.f32.mrb[20].mxu1  ;;  %v1895_v57 = vpop.f32.mrb[21].mxu0 }
 0x120   :  { %v1951_v58 = vpop.f32.mrb[21].mxu1  ;;  %v934_v59 = vadd.f32 %v1949_v53, %v829_v54  ;;  %v1896_v60 = vadd.f32 %v1895_v57, %v1894_v55 }
 0x121   :  { %v1952_v62 = vadd.f32 %v1951_v58, %v1950_v56 }
 0x122   :  { %v834_v63 = vadd.f32 %v1896_v60, %v2681_v61  ;;  %v1897_v0 = vpop.f32.mrb[22].mxu0 }
 0x123   :  { %v1953_v44 = vpop.f32.mrb[22].mxu1  ;;  %v1898_v1 = vpop.f32.mrb[23].mxu0 }
 0x124   :  { %v1954_v2 = vpop.f32.mrb[23].mxu1  ;;  %v2686_v3 = vadd.f32 %v1952_v62, %v834_v63  ;;  %v1899_v4 = vadd.f32 %v1898_v1, %v1897_v0 }
 0x125   :  { %v1955_v5 = vadd.f32 %v1954_v2, %v1953_v44 }
 0x126   :  { %v839_v7 = vadd.f32 %v1899_v4, %v734_v6  ;;  %v1900_v8 = vpop.f32.mrb[24].mxu0 }
 0x127   :  { %v1956_v52 = vpop.f32.mrb[24].mxu1  ;;  %v1901_v9 = vpop.f32.mrb[25].mxu0 }
 0x128   :  { %v1957_v10 = vpop.f32.mrb[25].mxu1  ;;  %v2688_v11 = vadd.f32 %v1955_v5, %v839_v7  ;;  %v1902_v12 = vadd.f32 %v1901_v9, %v1900_v8 }
 0x129   :  { %v1958_v13 = vadd.f32 %v1957_v10, %v1956_v52 }
 0x12a   :  { %v844_v14 = vadd.f32 %v1902_v12, %v739_v15  ;;  %v1903_v16 = vpop.f32.mrb[26].mxu0 }
 0x12b   :  { %v1959_v61 = vpop.f32.mrb[26].mxu1  ;;  %v1904_v17 = vpop.f32.mrb[27].mxu0 }
 0x12c   :  { %v1960_v18 = vpop.f32.mrb[27].mxu1  ;;  %v2690_v19 = vadd.f32 %v1958_v13, %v844_v14  ;;  %v1905_v20 = vadd.f32 %v1904_v17, %v1903_v16 }
 0x12d   :  { %v1961_v21 = vadd.f32 %v1960_v18, %v1959_v61 }
 0x12e   :  { %v849_v22 = vadd.f32 %v1905_v20, %v744_v24  ;;  %v1906_v23 = vpop.f32.mrb[28].mxu0 }
 0x12f   :  { %v1962_v6 = vpop.f32.mrb[28].mxu1  ;;  %v1907_v25 = vpop.f32.mrb[29].mxu0 }
 0x130   :  { %v1963_v26 = vpop.f32.mrb[29].mxu1  ;;  %v2692_v27 = vadd.f32 %v1961_v21, %v849_v22  ;;  %v1908_v28 = vadd.f32 %v1907_v25, %v1906_v23 }
 0x131   :  { %v1964_v29 = vadd.f32 %v1963_v26, %v1962_v6 }
 0x132   :  { %v854_v30 = vadd.f32 %v1908_v28, %v749_v33  ;;  %v1909_v31 = vpop.f32.mrb[30].mxu0 }
 0x133   :  { %v1965_v15 = vpop.f32.mrb[30].mxu1  ;;  %v1910_v32 = vpop.f32.mrb[31].mxu0 }
 0x134   :  { %v1966_v34 = vpop.f32.mrb[31].mxu1  ;;  %v959_v35 = vadd.f32 %v1964_v29, %v854_v30  ;;  %v1911_v36 = vadd.f32 %v1910_v32, %v1909_v31 }
 0x135   :  { %v1967_v37 = vadd.f32 %v1966_v34, %v1965_v15 }
 0x136   :  { %v859_v38 = vadd.f32 %v1911_v36, %v754_v41  ;;  %v2000_v39 = vpop.f32.mrb[32].mxu0 }
 0x137   :  { %v2018_v40 = vpop.f32.mrb[32].mxu1  ;;  %v2001_v24 = vpop.f32.mrb[33].mxu0 }
 0x138   :  { %v2019_v42 = vpop.f32.mrb[33].mxu1  ;;  %v964_v43 = vadd.f32 %v1967_v37, %v859_v38  ;;  %v2002_v45 = vadd.f32 %v2001_v24, %v2000_v39 }
 0x139   :  { %v2020_v46 = vadd.f32 %v2019_v42, %v2018_v40 }
 0x13a   :  { %v2003_v47 = vpop.f32.mrb[34].mxu0  ;;  %v1034_v49 = vadd.f32 %v2002_v45, %v929_v50 }
 0x13b   :  { %v2021_v48 = vpop.f32.mrb[34].mxu1  ;;  %v1064_v51 = vadd.f32 %v2020_v46, %v959_v35  ;;  %v2004_v33 = vpop.f32.mrb[35].mxu0 }
 0x13c   :  { %v2022_v53 = vpop.f32.mrb[35].mxu1  ;;  %v2005_v54 = vadd.f32 %v2004_v33, %v2003_v47 }
 0x13d   :  { %v2023_v55 = vadd.f32 %v2022_v53, %v2021_v48 }
 0x13e   :  { %v2006_v56 = vpop.f32.mrb[36].mxu0  ;;  %v1039_v57 = vadd.f32 %v2005_v54, %v934_v59 }
 0x13f   :  { %v2040_v58 = vpop.f32.mrb[36].mxu1  ;;  %v1069_v60 = vadd.f32 %v2023_v55, %v964_v43  ;;  %v2007_v41 = vpop.f32.mrb[37].mxu0 }
 0x140   :  { %v1138_v62 = vpop.f32.mrb[37].mxu1  ;;  %v2694_v63 = vadd.f32 %v2040_v58, %v1039_v57  ;;  %v2008_v0 = vadd.f32 %v2007_v41, %v2006_v56 }
 0x141   :  { %v2696_v44 = vadd.f32 %v1138_v62, %v1034_v49 }
 0x142   :  { %v1186_v1 = vmul.f32 0.044715, %v2694_v63  ;;  %v2009_v2 = vpop.f32.mrb[38].mxu0  ;;  %v1044_v5 = vadd.f32 %v2008_v0, %v2686_v3 }
 0x143   :  { %v1185_v50 = vmul.f32 0.044715, %v2696_v44  ;;  %v2043_v4 = vpop.f32.mrb[38].mxu1  ;;  %v2010_v8 = vpop.f32.mrb[39].mxu0 }
 0x144   :  { %v1194_v7 = vmul.f32 %v1186_v1, %v2694_v63  ;;  %v1148_v52 = vpop.f32.mrb[39].mxu1  ;;  %v2011_v9 = vadd.f32 %v2010_v8, %v2009_v2  ;;  %v1178_v2 = vmul.f32 0.5, %v2694_v63 }
 0x145   :  { %v1193_v59 = vmul.f32 %v1185_v50, %v2696_v44  ;;  %v2703_v10 = vadd.f32 %v1148_v52, %v1044_v5 }
 0x146   :  { %v1202_v12 = vmul.f32 %v1194_v7, %v2694_v63  ;;  %v2012_v14 = vpop.f32.mrb[40].mxu0  ;;  %v1049_v61 = vadd.f32 %v2011_v9, %v2688_v11  ;;  %v1177_v7 = vmul.f32 0.5, %v2696_v44 }
 0x147   :  { %v1201_v13 = vmul.f32 %v1193_v59, %v2696_v44  ;;  %v2046_v16 = vpop.f32.mrb[40].mxu1  ;;  %v1187_v17 = vmul.f32 0.044715, %v2703_v10  ;;  %v2013_v3 = vpop.f32.mrb[41].mxu0 }
 0x148   :  { %v1158_v18 = vpop.f32.mrb[41].mxu1  ;;  %v1210_v20 = vadd.f32 %v1202_v12, %v2694_v63  ;;  %v2014_v22 = vadd.f32 %v2013_v3, %v2012_v14  ;;  %v2711_v23 = vadd.f32 %v2043_v4, %v1049_v61 }
 0x149   :  { %v1209_v21 = vadd.f32 %v1201_v13, %v2696_v44  ;;  %v1195_v6 = vmul.f32 %v1187_v17, %v2703_v10  ;;  %v1179_v17 = vmul.f32 0.5, %v2703_v10 }
 0x14a   :  { %v1218_v25 = vmul.f32 0.7978846, %v1210_v20  ;;  %v1054_v28 = vadd.f32 %v2014_v22, %v2690_v19  ;;  %v2015_v29 = vpop.f32.mrb[42].mxu0  ;;  %v1188_v11 = vmul.f32 0.044715, %v2711_v23  ;;  %v1180_v61 = vmul.f32 0.5, %v2711_v23 }
 0x14b   :  { %v1217_v26 = vmul.f32 0.7978846, %v1209_v21  ;;  %v2049_v30 = vpop.f32.mrb[42].mxu1  ;;  %v1203_v31 = vmul.f32 %v1195_v6, %v2703_v10  ;;  %v2016_v32 = vpop.f32.mrb[43].mxu0 }
 0x14c   :  { %v2717_v15 = vadd.f32 %v2049_v30, %v1069_v60  ;;  %v1168_v34 = vpop.f32.mrb[43].mxu1  ;;  %2233 = vtanh.f32 %v1218_v25  ;;  %v2719_v35 = vadd.f32 %v1158_v18, %v1054_v28  ;;  %v2017_v36 = vadd.f32 %v2016_v32, %v2015_v29 }
 0x14d   :  { %v1169_v37 = vadd.f32 %v1168_v34, %v1064_v51  ;;  %2235 = vtanh.f32 %v1217_v26  ;;  %v1196_v38 = vmul.f32 %v1188_v11, %v2711_v23  ;;  %v1211_v19 = vadd.f32 %v1203_v31, %v2703_v10 }
 0x14e   :  { %v1189_v39 = vmul.f32 0.044715, %v2719_v35  ;;  %v1192_v40 = vmul.f32 0.044715, %v2717_v15  ;;  %v1059_v24 = vadd.f32 %v2017_v36, %v2692_v27  ;;  %v1184_v25 = vmul.f32 0.5, %v2717_v15 }
 0x14f   :  { %v1204_v42 = vmul.f32 %v1196_v38, %v2711_v23  ;;  %v1219_v43 = vmul.f32 0.7978846, %v1211_v19  ;;  %v1191_v45 = vmul.f32 0.044715, %v1169_v37  ;;  %v1183_v29 = vmul.f32 0.5, %v1169_v37 }
 0x150   :  { %v1197_v46 = vmul.f32 %v1189_v39, %v2719_v35  ;;  %v1200_v47 = vmul.f32 %v1192_v40, %v2717_v15  ;;  %v1164_v48 = vadd.f32 %v2046_v16, %v1059_v24  ;;  %v1181_v10 = vmul.f32 0.5, %v2719_v35 }
 0x151   :  { %v1212_v49 = vadd.f32 %v1204_v42, %v2711_v23  ;;  %2237 = vtanh.f32 %v1219_v43  ;;  %v1199_v51 = vmul.f32 %v1191_v45, %v1169_v37 }
 0x152   :  { %v1205_v33 = vmul.f32 %v1197_v46, %v2719_v35  ;;  %v1208_v53 = vmul.f32 %v1200_v47, %v2717_v15  ;;  %v1190_v54 = vmul.f32 0.044715, %v1164_v48  ;;  %v1182_v31 = vmul.f32 0.5, %v1164_v48 }
 0x153   :  { %v1220_v55 = vmul.f32 0.7978846, %v1212_v49  ;;  %v1207_v27 = vmul.f32 %v1199_v51, %v1169_v37 }
 0x154   :  { %v1213_v56 = vadd.f32 %v1205_v33, %v2719_v35  ;;  %v1216_v57 = vadd.f32 %v1208_v53, %v2717_v15  ;;  %v1198_v58 = vmul.f32 %v1190_v54, %v1164_v48 }
 0x155   :  { %2239 = vtanh.f32 %v1220_v55  ;;  %v1215_v60 = vadd.f32 %v1207_v27, %v1169_v37 }
 0x156   :  { %v2234_v41 = vpop.eup %2233  ;;  %v1221_v62 = vmul.f32 0.7978846, %v1213_v56  ;;  %v1224_v0 = vmul.f32 0.7978846, %v1216_v57  ;;  %v1206_v1 = vmul.f32 %v1198_v58, %v1164_v48 }
 0x157   :  { %v2236_v50 = vpop.eup %2235  ;;  %v1234_v4 = vadd.f32 1.0, %v2234_v41  ;;  %v1223_v5 = vmul.f32 0.7978846, %v1215_v60 }
 0x158   :  { %v1233_v59 = vadd.f32 1.0, %v2236_v50  ;;  %2241 = vtanh.f32 %v1221_v62  ;;  %v1214_v8 = vadd.f32 %v1206_v1, %v1164_v48 }
 0x159   :  { %v1242_v52 = vmul.f32 %v1234_v4, %v1178_v2  ;;  %2243 = vtanh.f32 %v1224_v0 }
 0x15a   :  { %v1241_v9 = vmul.f32 %v1233_v59, %v1177_v7  ;;  %v1222_v12 = vmul.f32 0.7978846, %v1214_v8  ;;  %2245 = vtanh.f32 %v1223_v5 }
 0x15b   :  { %v2238_v13 = vpop.eup %2237 }
 0x15c   :  { %v1644_v14 = vpack.c.bf16 %v1242_v52, %v1241_v9  ;;  %2247 = vtanh.f32 %v1222_v12  ;;  %v1235_v63 = vadd.f32 1.0, %v2238_v13 }
 0x15e   :  { %1645 = vst [vmem:[%s2755_s3] sm:$0xff] %v1644_v14   ;;  %v1243_v18 = vmul.f32 %v1235_v63, %v1179_v17 }
 0x15f   :  { %v2240_v16 = vpop.eup %2239 }
 0x160   :  { %v1236_v44 = vadd.f32 1.0, %v2240_v16 }
 0x162   :  { %v2242_v3 = vpop.eup %2241  ;;  %v1244_v20 = vmul.f32 %v1236_v44, %v1180_v61 }
 0x163   :  { %v2244_v21 = vpop.eup %2243  ;;  %v1237_v28 = vadd.f32 1.0, %v2242_v3 }
 0x164   :  { %v2246_v22 = vpop.eup %2245  ;;  %v1649_v6 = vpack.c.bf16 %v1244_v20, %v1243_v18  ;;  %v1240_v26 = vadd.f32 1.0, %v2244_v21 }
 0x165   :  { %v1239_v30 = vadd.f32 1.0, %v2246_v22  ;;  %v1245_v36 = vmul.f32 %v1237_v28, %v1181_v10 }
 0x166   :  { %v2248_v11 = vpop.eup %2247  ;;  %1741 = vst [vmem:[%s2755_s3 + $0x8] sm:$0xff] %v1649_v6   ;;  %v1248_v23 = vmul.f32 %v1240_v26, %v1184_v25 }
 0x167   :  { %v1238_v32 = vadd.f32 1.0, %v2248_v11  ;;  %v1247_v34 = vmul.f32 %v1239_v30, %v1183_v29 }
 0x169   :  { %v1246_v38 = vmul.f32 %v1238_v32, %v1182_v31  ;;  %v1659_v19 = vpack.c.bf16 %v1248_v23, %v1247_v34 }
 0x16b   :  { %v1654_v39 = vpack.c.bf16 %v1246_v38, %v1245_v36  ;;  %1743 = vst [vmem:[%s2755_s3 + $0x18] sm:$0xff] %v1659_v19  }
 0x16d   :  { %1742 = vst [vmem:[%s2755_s3 + $0x10] sm:$0xff] %v1654_v39  }

// kernel: forward_pallas.8
= control target key start
LH: loop header
LB: loop body
LE: loop exit
PB: predicated region body
PF: predicated region fallthrough
CT: control target
= control target key end

     0   :  { %v3152_v3 = vmov 0   ;;  %vm770_vm0 = vcmask 523264   ;;  %s4020_s1 = inlined_call_operand.vmem [shape: bf16[1728,128], index: 1, kind: input, shape index: {}]   ;;  %s4021_s0 = inlined_call_operand.vmem [shape: bf16[96,1728], index: 0, kind: input, shape index: {}]   ;;  %s4022_s2 = inlined_call_operand.vmem [shape: f32[96,1], index: 2, kind: input, shape index: {}]   ;;  %s4023_s3 = inlined_call_operand.vmem [shape: bf16[96,128], index: 3, kind: output, shape index: {}]  }
   0x1   :  { %v2359_v0 = vld [vmem:[%s4020_s1 + $0x40] sm:$0xff]   ;;  %3126 = vset.pattern.permute.xlu0 %v3152_v3  ;;  %3127 = vset.pattern.permute.xlu1 %v3152_v3  ;;  %v2360_v5 = vld [vmem:[%s4020_s1 + $0x48] sm:$0xff]   ;;  %v2361_v9 = vld [vmem:[%s4020_s1 + $0x50] sm:$0xff]  }
   0x2   :  { %v2375_v1 = vld [vmem:[%s4020_s1 + $0xc0] sm:$0xff]   ;;  %2873 = vmatprep.subr.bf16.mxu0 %v2359_v0  ;;  %v2376_v6 = vld [vmem:[%s4020_s1 + $0xc8] sm:$0xff]   ;;  %v2377_v10 = vld [vmem:[%s4020_s1 + $0xd0] sm:$0xff]  }
   0x3   :  { %v1891_v2 = vld [vmem:[%s4020_s1] sm:$0xff]   ;;  %2905 = vmatprep.subr.bf16.mxu1 %v2375_v1  ;;  %v2352_v7 = vld [vmem:[%s4020_s1 + $0x8] sm:$0xff]   ;;  %v2353_v11 = vld [vmem:[%s4020_s1 + $0x10] sm:$0xff]  }
   0x4   :  { %v2367_v4 = vld [vmem:[%s4020_s1 + $0x80] sm:$0xff]   ;;  %2875 = vmatpush3.bf16.msra.mxu0 %v1891_v2  ;;  %v2368_v8 = vld [vmem:[%s4020_s1 + $0x88] sm:$0xff]   ;;  %v2369_v12 = vld [vmem:[%s4020_s1 + $0x90] sm:$0xff]  }
   0x5   :  { %2907 = vmatpush3.bf16.msra.mxu1 %v2367_v4  ;;  %2877 = vmatprep.subr.bf16.mxu0 %v2360_v5  ;;  %v2362_v13 = vld [vmem:[%s4020_s1 + $0x58] sm:$0xff]   ;;  %v14_v15 = vld [vmem:[%s4021_s0] sm:$0xff]  ;;  %v15_v19 = vld [vmem:[%s4021_s0 + $0x8] sm:$0xff] }
   0x6   :  { %2909 = vmatprep.subr.bf16.mxu1 %v2376_v6  ;;  %v2378_v14 = vld [vmem:[%s4020_s1 + $0xd8] sm:$0xff]   ;;  %v99_v18 = vunpack.c.h.bf16 %v14_v15  ;;  %v2363_v20 = vld [vmem:[%s4020_s1 + $0x60] sm:$0xff]   ;;  %v101_v22 = vunpack.c.h.bf16 %v15_v19  ;;  %v2364_v25 = vld [vmem:[%s4020_s1 + $0x68] sm:$0xff]   ;;  %v98_v41 = vunpack.c.l.bf16 %v14_v15  ;;  %v100_v42 = vunpack.c.l.bf16 %v15_v19 }
   0x7   :  { %v2354_v16 = vld [vmem:[%s4020_s1 + $0x18] sm:$0xff]   ;;  %v2379_v21 = vld [vmem:[%s4020_s1 + $0xe0] sm:$0xff]   ;;  %v2380_v26 = vld [vmem:[%s4020_s1 + $0xe8] sm:$0xff]  }
   0x8   :  { %2879 = vmatpush3.bf16.msra.mxu0 %v2352_v7  ;;  %v2370_v17 = vld [vmem:[%s4020_s1 + $0x98] sm:$0xff]   ;;  %871 = vmatprep.mubr.f32.mxu0 %v99_v18  ;;  %v2355_v23 = vld [vmem:[%s4020_s1 + $0x20] sm:$0xff]   ;;  %v2356_v27 = vld [vmem:[%s4020_s1 + $0x28] sm:$0xff]  }
   0x9   :  { %2911 = vmatpush3.bf16.msra.mxu1 %v2368_v8  ;;  %2881 = vmatprep.subr.bf16.mxu0 %v2361_v9  ;;  %v2371_v24 = vld [vmem:[%s4020_s1 + $0xa0] sm:$0xff]   ;;  %v2372_v28 = vld [vmem:[%s4020_s1 + $0xa8] sm:$0xff]   ;;  %v2365_v29 = vld [vmem:[%s4020_s1 + $0x70] sm:$0xff]  }
   0xa   :  { %2913 = vmatprep.subr.bf16.mxu1 %v2377_v10  ;;  %996 = vmatprep.mubr.f32.mxu1 %v101_v22  ;;  %v2381_v30 = vld [vmem:[%s4020_s1 + $0xf0] sm:$0xff]   ;;  %v2366_v33 = vld [vmem:[%s4020_s1 + $0x78] sm:$0xff]   ;;  %v2391_v37 = vld [vmem:[%s4020_s1 + $0x140] sm:$0xff]  }
   0xb   :  { %v2357_v31 = vld [vmem:[%s4020_s1 + $0x30] sm:$0xff]   ;;  %v2382_v34 = vld [vmem:[%s4020_s1 + $0xf8] sm:$0xff]   ;;  %v2407_v38 = vld [vmem:[%s4020_s1 + $0x1c0] sm:$0xff]  }
   0xc   :  { %2883 = vmatpush3.bf16.msra.mxu0 %v2353_v11  ;;  %v2373_v32 = vld [vmem:[%s4020_s1 + $0xb0] sm:$0xff]   ;;  %v2358_v35 = vld [vmem:[%s4020_s1 + $0x38] sm:$0xff]   ;;  %v22_v40 = vld [vmem:[%s4021_s0 + $0x40] sm:$0xff] }
   0xd   :  { %2915 = vmatpush3.bf16.msra.mxu1 %v2369_v12  ;;  %2885 = vmatprep.subr.bf16.mxu0 %v2362_v13  ;;  %v2374_v36 = vld [vmem:[%s4020_s1 + $0xb8] sm:$0xff]   ;;  %v2383_v43 = vld [vmem:[%s4020_s1 + $0x100] sm:$0xff]   ;;  %v115_v46 = vunpack.c.h.bf16 %v22_v40  ;;  %v28_v47 = vld [vmem:[%s4021_s0 + $0x70] sm:$0xff]  ;;  %v114_v50 = vunpack.c.l.bf16 %v22_v40 }
   0xe   :  { %2917 = vmatprep.subr.bf16.mxu1 %v2378_v14  ;;  %v21_v39 = vld [vmem:[%s4021_s0 + $0x38] sm:$0xff]  ;;  %v2399_v44 = vld [vmem:[%s4020_s1 + $0x180] sm:$0xff]   ;;  %v2392_v51 = vld [vmem:[%s4020_s1 + $0x148] sm:$0xff]   ;;  %v127_v53 = vunpack.c.h.bf16 %v28_v47  ;;  %v126_v59 = vunpack.c.l.bf16 %v28_v47 }
   0xf   :  { %v113_v45 = vunpack.c.h.bf16 %v21_v39  ;;  %v29_v48 = vld [vmem:[%s4021_s0 + $0x78] sm:$0xff]  ;;  %v112_v49 = vunpack.c.l.bf16 %v21_v39  ;;  %v2408_v52 = vld [vmem:[%s4020_s1 + $0x1c8] sm:$0xff]   ;;  %v36_v56 = vld [vmem:[%s4021_s0 + $0xb0] sm:$0xff] }
  0x10   :  { %2887 = vmatpush3.bf16.msra.mxu0 %v2354_v16  ;;  %v129_v54 = vunpack.c.h.bf16 %v29_v48  ;;  %v35_v55 = vld [vmem:[%s4021_s0 + $0xa8] sm:$0xff]  ;;  %v128_v60 = vunpack.c.l.bf16 %v29_v48  ;;  %v2393_v61 = vld [vmem:[%s4020_s1 + $0x150] sm:$0xff]   ;;  %v143_v0 = vunpack.c.h.bf16 %v36_v56  ;;  %v42_v1 = vld [vmem:[%s4021_s0 + $0xe0] sm:$0xff]  ;;  %v142_v6 = vunpack.c.l.bf16 %v36_v56 }
  0x11   :  { %2919 = vmatpush3.bf16.msra.mxu1 %v2370_v17  ;;  %2889 = vmatprep.subr.bf16.mxu0 %v2363_v20  ;;  %v2384_v57 = vld [vmem:[%s4020_s1 + $0x108] sm:$0xff]   ;;  %v2409_v62 = vld [vmem:[%s4020_s1 + $0x1d0] sm:$0xff]   ;;  %v141_v63 = vunpack.c.h.bf16 %v35_v55  ;;  %v140_v5 = vunpack.c.l.bf16 %v35_v55  ;;  %v2394_v7 = vld [vmem:[%s4020_s1 + $0x158] sm:$0xff]   ;;  %v155_v9 = vunpack.c.h.bf16 %v42_v1  ;;  %v154_v15 = vunpack.c.l.bf16 %v42_v1 }
  0x12   :  { %2921 = vmatprep.subr.bf16.mxu1 %v2379_v21  ;;  %v2400_v58 = vld [vmem:[%s4020_s1 + $0x188] sm:$0xff]   ;;  %v2385_v3 = vld [vmem:[%s4020_s1 + $0x110] sm:$0xff]   ;;  %v2410_v8 = vld [vmem:[%s4020_s1 + $0x1d8] sm:$0xff]  }
  0x13   :  { %v43_v2 = vld [vmem:[%s4021_s0 + $0xe8] sm:$0xff]  ;;  %v2401_v4 = vld [vmem:[%s4020_s1 + $0x190] sm:$0xff]   ;;  %v49_v11 = vld [vmem:[%s4021_s0 + $0x118] sm:$0xff] }
  0x14   :  { %2891 = vmatpush3.bf16.msra.mxu0 %v2355_v23  ;;  %v157_v10 = vunpack.c.h.bf16 %v43_v2  ;;  %v50_v12 = vld [vmem:[%s4021_s0 + $0x120] sm:$0xff]  ;;  %v2386_v13 = vld [vmem:[%s4020_s1 + $0x118] sm:$0xff]   ;;  %v156_v16 = vunpack.c.l.bf16 %v43_v2  ;;  %v169_v19 = vunpack.c.h.bf16 %v49_v11  ;;  %v56_v21 = vld [vmem:[%s4021_s0 + $0x150] sm:$0xff] }
  0x15   :  { %2923 = vmatpush3.bf16.msra.mxu1 %v2371_v24  ;;  %2893 = vmatprep.subr.bf16.mxu0 %v2364_v25  ;;  %v2402_v14 = vld [vmem:[%s4020_s1 + $0x198] sm:$0xff]   ;;  %v2395_v17 = vld [vmem:[%s4020_s1 + $0x160] sm:$0xff]   ;;  %v171_v20 = vunpack.c.h.bf16 %v50_v12  ;;  %v168_v25 = vunpack.c.l.bf16 %v49_v11 }
  0x16   :  { %2925 = vmatprep.subr.bf16.mxu1 %v2380_v26  ;;  %v2411_v18 = vld [vmem:[%s4020_s1 + $0x1e0] sm:$0xff]   ;;  %v57_v22 = vld [vmem:[%s4021_s0 + $0x158] sm:$0xff]  ;;  %v170_v26 = vunpack.c.l.bf16 %v50_v12 }
  0x17   :  { %v2387_v23 = vld [vmem:[%s4020_s1 + $0x120] sm:$0xff]   ;;  %v2398_v47 = vld [vmem:[%s4020_s1 + $0x178] sm:$0xff]  }
  0x18   :  { %2895 = vmatpush3.bf16.msra.mxu0 %v2356_v27  ;;  %v2403_v24 = vld [vmem:[%s4020_s1 + $0x1a0] sm:$0xff]   ;;  %v2396_v27 = vld [vmem:[%s4020_s1 + $0x168] sm:$0xff]   ;;  %v2414_v48 = vld [vmem:[%s4020_s1 + $0x1f8] sm:$0xff]  }
  0x19   :  { %2927 = vmatpush3.bf16.msra.mxu1 %v2372_v28  ;;  %2897 = vmatprep.subr.bf16.mxu0 %v2365_v29  ;;  %v2412_v28 = vld [vmem:[%s4020_s1 + $0x1e8] sm:$0xff]   ;;  %v183_v29 = vunpack.c.h.bf16 %v56_v21 }
  0x1a   :  { %2929 = vmatprep.subr.bf16.mxu1 %v2381_v30  ;;  %v185_v30 = vunpack.c.h.bf16 %v57_v22 }
  0x1c   :  { %2899 = vmatpush3.bf16.msra.mxu0 %v2357_v31  ;;  %v63_v31 = vld [vmem:[%s4021_s0 + $0x188] sm:$0xff] }
  0x1d   :  { %2931 = vmatpush3.bf16.msra.mxu1 %v2373_v32  ;;  %2901 = vmatprep.subr.bf16.mxu0 %v2366_v33  ;;  %v64_v32 = vld [vmem:[%s4021_s0 + $0x190] sm:$0xff]  ;;  %v2388_v33 = vld [vmem:[%s4020_s1 + $0x128] sm:$0xff]   ;;  %v197_v39 = vunpack.c.h.bf16 %v63_v31 }
  0x1e   :  { %2933 = vmatprep.subr.bf16.mxu1 %v2382_v34  ;;  %v2404_v34 = vld [vmem:[%s4020_s1 + $0x1a8] sm:$0xff]   ;;  %v199_v40 = vunpack.c.h.bf16 %v64_v32 }
  0x20   :  { %2903 = vmatpush3.bf16.msra.mxu0 %v2358_v35  ;;  %v182_v35 = vunpack.c.l.bf16 %v56_v21  ;;  %v23_v21 = vld [vmem:[%s4021_s0 + $0x48] sm:$0xff] }
  0x21   :  { %2935 = vmatpush3.bf16.msra.mxu1 %v2374_v36  ;;  %2937 = vmatprep.subr.bf16.mxu0 %v2391_v37  ;;  %v184_v36 = vunpack.c.l.bf16 %v57_v22  ;;  %v2397_v37 = vld [vmem:[%s4020_s1 + $0x170] sm:$0xff]  }
  0x22   :  { %2969 = vmatprep.subr.bf16.mxu1 %v2407_v38  ;;  %v2413_v38 = vld [vmem:[%s4020_s1 + $0x1f0] sm:$0xff]  }
  0x23   :  { %872 = vmatmul.mubr.f32.vlgmr.msra.gmra.mrb[0].mxu0 %v98_v41  ;;  %v70_v41 = vld [vmem:[%s4021_s0 + $0x1c0] sm:$0xff]  ;;  %v24_v22 = vld [vmem:[%s4021_s0 + $0x50] sm:$0xff] }
  0x24   :  { %997 = vmatmul.mubr.f32.vlgmr.msra.gmra.mrb[0].mxu1 %v100_v42  ;;  %2939 = vmatpush3.bf16.msra.mxu0 %v2383_v43  ;;  %v71_v42 = vld [vmem:[%s4021_s0 + $0x1c8] sm:$0xff]  ;;  %v2389_v43 = vld [vmem:[%s4020_s1 + $0x130] sm:$0xff]   ;;  %v210_v55 = vunpack.c.l.bf16 %v70_v41 }
  0x25   :  { %2971 = vmatpush3.bf16.msra.mxu1 %v2399_v44  ;;  %876 = vmatprep.mubr.f32.mxu0 %v113_v45  ;;  %v2405_v44 = vld [vmem:[%s4020_s1 + $0x1b0] sm:$0xff]   ;;  %v196_v45 = vunpack.c.l.bf16 %v63_v31  ;;  %v212_v56 = vunpack.c.l.bf16 %v71_v42  ;;  %v30_v31 = vld [vmem:[%s4021_s0 + $0x80] sm:$0xff] }
  0x26   :  { %1001 = vmatprep.mubr.f32.mxu1 %v115_v46  ;;  %2941 = vmatprep.subr.bf16.mxu0 %v2392_v51  ;;  %v198_v46 = vunpack.c.l.bf16 %v64_v32  ;;  %v77_v51 = vld [vmem:[%s4021_s0 + $0x1f8] sm:$0xff]  ;;  %v31_v32 = vld [vmem:[%s4021_s0 + $0x88] sm:$0xff] }
  0x27   :  { %2973 = vmatprep.subr.bf16.mxu1 %v2408_v52  ;;  %877 = vmatmul.mubr.f32.gmra.mrb[2].mxu0 %v112_v49  ;;  %v211_v49 = vunpack.c.h.bf16 %v70_v41  ;;  %v78_v52 = vld [vmem:[%s4021_s0 + $0x200] sm:$0xff]  ;;  %v224_v1 = vunpack.c.l.bf16 %v77_v51  ;;  %v2416_v41 = vld [vmem:[%s4020_s1 + $0x208] sm:$0xff]  }
  0x28   :  { %1002 = vmatmul.mubr.f32.gmra.mrb[2].mxu1 %v114_v50  ;;  %881 = vmatprep.mubr.f32.mxu0 %v127_v53  ;;  %v213_v50 = vunpack.c.h.bf16 %v71_v42  ;;  %v2390_v53 = vld [vmem:[%s4020_s1 + $0x138] sm:$0xff]   ;;  %v226_v2 = vunpack.c.l.bf16 %v78_v52  ;;  %v2432_v42 = vld [vmem:[%s4020_s1 + $0x288] sm:$0xff]  }
  0x29   :  { %1006 = vmatprep.mubr.f32.mxu1 %v129_v54  ;;  %2943 = vmatpush3.bf16.msra.mxu0 %v2384_v57  ;;  %v2406_v54 = vld [vmem:[%s4020_s1 + $0x1b8] sm:$0xff]   ;;  %v2423_v57 = vld [vmem:[%s4020_s1 + $0x240] sm:$0xff]  }
  0x2a   :  { %2975 = vmatpush3.bf16.msra.mxu1 %v2400_v58  ;;  %2945 = vmatprep.subr.bf16.mxu0 %v2393_v61  ;;  %v2439_v58 = vld [vmem:[%s4020_s1 + $0x2c0] sm:$0xff]   ;;  %v84_v61 = vld [vmem:[%s4021_s0 + $0x230] sm:$0xff] }
  0x2b   :  { %2977 = vmatprep.subr.bf16.mxu1 %v2409_v62  ;;  %882 = vmatmul.mubr.f32.gmra.mrb[4].mxu0 %v126_v59  ;;  %v225_v59 = vunpack.c.h.bf16 %v77_v51  ;;  %v85_v62 = vld [vmem:[%s4021_s0 + $0x238] sm:$0xff]  ;;  %v2417_v51 = vld [vmem:[%s4020_s1 + $0x210] sm:$0xff]  }
  0x2c   :  { %1007 = vmatmul.mubr.f32.gmra.mrb[4].mxu1 %v128_v60  ;;  %886 = vmatprep.mubr.f32.mxu0 %v141_v63  ;;  %v227_v60 = vunpack.c.h.bf16 %v78_v52  ;;  %v698_v63 = vld [vmem:[%s4022_s2] sm:$0xff]  ;;  %v2433_v52 = vld [vmem:[%s4020_s1 + $0x290] sm:$0xff]  }
  0x2d   :  { %1011 = vmatprep.mubr.f32.mxu1 %v143_v0  ;;  %2947 = vmatpush3.bf16.msra.mxu0 %v2385_v3  ;;  %v700_v0 = vld [vmem:[%s4022_s2 + $0x10] sm:$0xff]  ;;  %v239_v3 = vunpack.c.h.bf16 %v84_v61 }
  0x2e   :  { %2979 = vmatpush3.bf16.msra.mxu1 %v2401_v4  ;;  %2949 = vmatprep.subr.bf16.mxu0 %v2394_v7  ;;  %v241_v4 = vunpack.c.h.bf16 %v85_v62  ;;  %v699_v7 = vld [vmem:[%s4022_s2 + $0x8] sm:$0xff] }
  0x2f   :  { %2981 = vmatprep.subr.bf16.mxu1 %v2410_v8  ;;  %887 = vmatmul.mubr.f32.gmra.mrb[6].mxu0 %v140_v5  ;;  %v91_v5 = vld [vmem:[%s4021_s0 + $0x268] sm:$0xff]  ;;  %v701_v8 = vld [vmem:[%s4022_s2 + $0x18] sm:$0xff] }
  0x30   :  { %1012 = vmatmul.mubr.f32.gmra.mrb[6].mxu1 %v142_v6  ;;  %891 = vmatprep.mubr.f32.mxu0 %v155_v9  ;;  %v92_v6 = vld [vmem:[%s4021_s0 + $0x270] sm:$0xff]  ;;  %v238_v9 = vunpack.c.l.bf16 %v84_v61  ;;  %v253_v11 = vunpack.c.h.bf16 %v91_v5  ;;  %v2418_v61 = vld [vmem:[%s4020_s1 + $0x218] sm:$0xff]  }
  0x31   :  { %1016 = vmatprep.mubr.f32.mxu1 %v157_v10  ;;  %2951 = vmatpush3.bf16.msra.mxu0 %v2386_v13  ;;  %v240_v10 = vunpack.c.l.bf16 %v85_v62  ;;  %v255_v12 = vunpack.c.h.bf16 %v92_v6  ;;  %v16_v13 = vld [vmem:[%s4021_s0 + $0x10] sm:$0xff]  ;;  %v2434_v62 = vld [vmem:[%s4020_s1 + $0x298] sm:$0xff]  }
  0x32   :  { %2983 = vmatpush3.bf16.msra.mxu1 %v2402_v14  ;;  %2953 = vmatprep.subr.bf16.mxu0 %v2395_v17  ;;  %v17_v14 = vld [vmem:[%s4021_s0 + $0x18] sm:$0xff]  ;;  %v252_v17 = vunpack.c.l.bf16 %v91_v5  ;;  %v58_v5 = vld [vmem:[%s4021_s0 + $0x160] sm:$0xff] }
  0x33   :  { %2985 = vmatprep.subr.bf16.mxu1 %v2411_v18  ;;  %892 = vmatmul.mubr.f32.gmra.mrb[8].mxu0 %v154_v15  ;;  %v702_v15 = vld [vmem:[%s4022_s2 + $0x20] sm:$0xff]  ;;  %v254_v18 = vunpack.c.l.bf16 %v92_v6  ;;  %v59_v6 = vld [vmem:[%s4021_s0 + $0x168] sm:$0xff] }
  0x34   :  { %1017 = vmatmul.mubr.f32.gmra.mrb[8].mxu1 %v156_v16  ;;  %896 = vmatprep.mubr.f32.mxu0 %v169_v19  ;;  %v703_v16 = vld [vmem:[%s4022_s2 + $0x28] sm:$0xff]  ;;  %v103_v19 = vunpack.c.h.bf16 %v16_v13 }
  0x35   :  { %1021 = vmatprep.mubr.f32.mxu1 %v171_v20  ;;  %2955 = vmatpush3.bf16.msra.mxu0 %v2387_v23  ;;  %v105_v20 = vunpack.c.h.bf16 %v17_v14  ;;  %v704_v23 = vld [vmem:[%s4022_s2 + $0x30] sm:$0xff] }
  0x36   :  { %2987 = vmatpush3.bf16.msra.mxu1 %v2403_v24  ;;  %2957 = vmatprep.subr.bf16.mxu0 %v2396_v27  ;;  %v705_v24 = vld [vmem:[%s4022_s2 + $0x38] sm:$0xff]  ;;  %v2415_v27 = vld [vmem:[%s4020_s1 + $0x200] sm:$0xff]  }
  0x37   :  { %2989 = vmatprep.subr.bf16.mxu1 %v2412_v28  ;;  %897 = vmatmul.mubr.f32.gmra.mrb[10].mxu0 %v168_v25  ;;  %v102_v25 = vunpack.c.l.bf16 %v16_v13  ;;  %v2431_v28 = vld [vmem:[%s4020_s1 + $0x280] sm:$0xff]   ;;  %v187_v13 = vunpack.c.h.bf16 %v58_v5 }
  0x38   :  { %1022 = vmatmul.mubr.f32.gmra.mrb[10].mxu1 %v170_v26  ;;  %901 = vmatprep.mubr.f32.mxu0 %v183_v29  ;;  %v104_v26 = vunpack.c.l.bf16 %v17_v14  ;;  %v117_v29 = vunpack.c.h.bf16 %v23_v21  ;;  %v189_v14 = vunpack.c.h.bf16 %v59_v6 }
  0x39   :  { %1026 = vmatprep.mubr.f32.mxu1 %v185_v30  ;;  %2959 = vmatpush3.bf16.msra.mxu0 %v2388_v33  ;;  %v119_v30 = vunpack.c.h.bf16 %v24_v22  ;;  %v116_v33 = vunpack.c.l.bf16 %v23_v21  ;;  %v2429_v21 = vld [vmem:[%s4020_s1 + $0x270] sm:$0xff]  }
  0x3a   :  { %2991 = vmatpush3.bf16.msra.mxu1 %v2404_v34  ;;  %2961 = vmatprep.subr.bf16.mxu0 %v2397_v37  ;;  %v118_v34 = vunpack.c.l.bf16 %v24_v22  ;;  %v131_v37 = vunpack.c.h.bf16 %v30_v31  ;;  %v2445_v22 = vld [vmem:[%s4020_s1 + $0x2f0] sm:$0xff]  }
  0x3b   :  { %2993 = vmatprep.subr.bf16.mxu1 %v2413_v38  ;;  %902 = vmatmul.mubr.f32.gmra.mrb[12].mxu0 %v182_v35  ;;  %v2424_v35 = vld [vmem:[%s4020_s1 + $0x248] sm:$0xff]   ;;  %v133_v38 = vunpack.c.h.bf16 %v31_v32 }
  0x3c   :  { %1027 = vmatmul.mubr.f32.gmra.mrb[12].mxu1 %v184_v36  ;;  %906 = vmatprep.mubr.f32.mxu0 %v197_v39  ;;  %v2440_v36 = vld [vmem:[%s4020_s1 + $0x2c8] sm:$0xff]   ;;  %v37_v39 = vld [vmem:[%s4021_s0 + $0xb8] sm:$0xff] }
  0x3d   :  { %1031 = vmatprep.mubr.f32.mxu1 %v199_v40  ;;  %2963 = vmatpush3.bf16.msra.mxu0 %v2389_v43  ;;  %v38_v40 = vld [vmem:[%s4021_s0 + $0xc0] sm:$0xff]  ;;  %v130_v43 = vunpack.c.l.bf16 %v30_v31  ;;  %v2430_v31 = vld [vmem:[%s4020_s1 + $0x278] sm:$0xff]  }
  0x3e   :  { %2995 = vmatpush3.bf16.msra.mxu1 %v2405_v44  ;;  %2965 = vmatprep.subr.bf16.mxu0 %v2398_v47  ;;  %v132_v44 = vunpack.c.l.bf16 %v31_v32  ;;  %v145_v47 = vunpack.c.h.bf16 %v37_v39  ;;  %v2446_v32 = vld [vmem:[%s4020_s1 + $0x2f8] sm:$0xff]  }
  0x3f   :  { %2997 = vmatprep.subr.bf16.mxu1 %v2414_v48  ;;  %907 = vmatmul.mubr.f32.gmra.mrb[14].mxu0 %v196_v45  ;;  %v2425_v45 = vld [vmem:[%s4020_s1 + $0x250] sm:$0xff]   ;;  %v147_v48 = vunpack.c.h.bf16 %v38_v40 }
  0x40   :  { %1032 = vmatmul.mubr.f32.gmra.mrb[14].mxu1 %v198_v46  ;;  %911 = vmatprep.mubr.f32.mxu0 %v211_v49  ;;  %v2441_v46 = vld [vmem:[%s4020_s1 + $0x2d0] sm:$0xff]  }
  0x41   :  { %1036 = vmatprep.mubr.f32.mxu1 %v213_v50  ;;  %2967 = vmatpush3.bf16.msra.mxu0 %v2390_v53  ;;  %v44_v49 = vld [vmem:[%s4021_s0 + $0xf0] sm:$0xff]  ;;  %v45_v50 = vld [vmem:[%s4021_s0 + $0xf8] sm:$0xff]  ;;  %v144_v53 = vunpack.c.l.bf16 %v37_v39 }
  0x42   :  { %2999 = vmatpush3.bf16.msra.mxu1 %v2406_v54  ;;  %3001 = vmatprep.subr.bf16.mxu0 %v2423_v57  ;;  %v146_v54 = vunpack.c.l.bf16 %v38_v40  ;;  %v159_v57 = vunpack.c.h.bf16 %v44_v49 }
  0x43   :  { %3033 = vmatprep.subr.bf16.mxu1 %v2439_v58  ;;  %912 = vmatmul.mubr.f32.gmra.mrb[16].mxu0 %v210_v55  ;;  %v2426_v55 = vld [vmem:[%s4020_s1 + $0x258] sm:$0xff]   ;;  %v161_v58 = vunpack.c.h.bf16 %v45_v50 }
  0x44   :  { %1037 = vmatmul.mubr.f32.gmra.mrb[16].mxu1 %v212_v56  ;;  %916 = vmatprep.mubr.f32.mxu0 %v225_v59  ;;  %v2442_v56 = vld [vmem:[%s4020_s1 + $0x2d8] sm:$0xff]   ;;  %v51_v59 = vld [vmem:[%s4021_s0 + $0x128] sm:$0xff] }
  0x45   :  { %1041 = vmatprep.mubr.f32.mxu1 %v227_v60  ;;  %712 = vperm.xlu0 %3126, %v698_v63   ;;  %v52_v60 = vld [vmem:[%s4021_s0 + $0x130] sm:$0xff]  ;;  %v158_v63 = vunpack.c.l.bf16 %v44_v49 }
  0x46   :  { %722 = vperm.xlu1 %3127, %v700_v0   ;;  %v160_v0 = vunpack.c.l.bf16 %v45_v50 }
  0x47   :  { %917 = vmatmul.mubr.f32.gmra.mrb[18].mxu0 %v224_v1  ;;  %v2427_v1 = vld [vmem:[%s4020_s1 + $0x260] sm:$0xff]  }
  0x48   :  { %1042 = vmatmul.mubr.f32.gmra.mrb[18].mxu1 %v226_v2  ;;  %921 = vmatprep.mubr.f32.mxu0 %v239_v3  ;;  %v2443_v2 = vld [vmem:[%s4020_s1 + $0x2e0] sm:$0xff]   ;;  %v173_v3 = vunpack.c.h.bf16 %v51_v59 }
  0x49   :  { %1046 = vmatprep.mubr.f32.mxu1 %v241_v4  ;;  %717 = vperm.xlu0 %3126, %v699_v7   ;;  %v175_v4 = vunpack.c.h.bf16 %v52_v60  ;;  %v2419_v7 = vld [vmem:[%s4020_s1 + $0x220] sm:$0xff]  }
  0x4a   :  { %727 = vperm.xlu1 %3127, %v701_v8   ;;  %v2435_v8 = vld [vmem:[%s4020_s1 + $0x2a0] sm:$0xff]  }
  0x4b   :  { %922 = vmatmul.mubr.f32.gmra.mrb[20].mxu0 %v238_v9  ;;  %v172_v9 = vunpack.c.l.bf16 %v51_v59 }
  0x4c   :  { %1047 = vmatmul.mubr.f32.gmra.mrb[20].mxu1 %v240_v10  ;;  %926 = vmatprep.mubr.f32.mxu0 %v253_v11  ;;  %v174_v10 = vunpack.c.l.bf16 %v52_v60  ;;  %v2428_v11 = vld [vmem:[%s4020_s1 + $0x268] sm:$0xff]   ;;  %v18_v60 = vld [vmem:[%s4021_s0 + $0x20] sm:$0xff] }
  0x4d   :  { %1051 = vmatprep.mubr.f32.mxu1 %v255_v12  ;;  %732 = vperm.xlu0 %3126, %v702_v15   ;;  %v2444_v12 = vld [vmem:[%s4020_s1 + $0x2e8] sm:$0xff]   ;;  %v65_v15 = vld [vmem:[%s4021_s0 + $0x198] sm:$0xff] }
  0x4e   :  { %737 = vperm.xlu1 %3127, %v703_v16   ;;  %v66_v16 = vld [vmem:[%s4021_s0 + $0x1a0] sm:$0xff] }
  0x4f   :  { %927 = vmatmul.mubr.f32.gmra.mrb[22].mxu0 %v252_v17  ;;  %v2420_v17 = vld [vmem:[%s4020_s1 + $0x228] sm:$0xff]  }
  0x50   :  { %1052 = vmatmul.mubr.f32.gmra.mrb[22].mxu1 %v254_v18  ;;  %1121 = vmatprep.mubr.f32.mxu0 %v103_v19  ;;  %v2436_v18 = vld [vmem:[%s4020_s1 + $0x2a8] sm:$0xff]   ;;  %v186_v19 = vunpack.c.l.bf16 %v58_v5 }
  0x51   :  { %1246 = vmatprep.mubr.f32.mxu1 %v105_v20  ;;  %742 = vperm.xlu0 %3126, %v704_v23   ;;  %v188_v20 = vunpack.c.l.bf16 %v59_v6  ;;  %v201_v23 = vunpack.c.h.bf16 %v65_v15  ;;  %v2447_v6 = vld [vmem:[%s4020_s1 + $0x300] sm:$0xff]  }
  0x52   :  { %747 = vperm.xlu1 %3127, %v705_v24   ;;  %v203_v24 = vunpack.c.h.bf16 %v66_v16 }
  0x53   :  { %1122 = vmatmul.mubr.f32.vlgmr.msra.gmra.mrb[24].mxu0 %v102_v25  ;;  %v72_v25 = vld [vmem:[%s4021_s0 + $0x1d0] sm:$0xff] }
  0x54   :  { %1247 = vmatmul.mubr.f32.vlgmr.msra.gmra.mrb[24].mxu1 %v104_v26  ;;  %3003 = vmatpush3.bf16.msra.mxu0 %v2415_v27  ;;  %v73_v26 = vld [vmem:[%s4021_s0 + $0x1d8] sm:$0xff]  ;;  %v2421_v27 = vld [vmem:[%s4020_s1 + $0x230] sm:$0xff]   ;;  %v214_v39 = vunpack.c.l.bf16 %v72_v25 }
  0x55   :  { %3035 = vmatpush3.bf16.msra.mxu1 %v2431_v28  ;;  %1126 = vmatprep.mubr.f32.mxu0 %v117_v29  ;;  %v2437_v28 = vld [vmem:[%s4020_s1 + $0x2b0] sm:$0xff]   ;;  %v200_v29 = vunpack.c.l.bf16 %v65_v15  ;;  %v216_v40 = vunpack.c.l.bf16 %v73_v26 }
  0x56   :  { %1251 = vmatprep.mubr.f32.mxu1 %v119_v30  ;;  %3005 = vmatprep.subr.bf16.mxu0 %v2424_v35  ;;  %v202_v30 = vunpack.c.l.bf16 %v66_v16  ;;  %v79_v35 = vld [vmem:[%s4021_s0 + $0x208] sm:$0xff] }
  0x57   :  { %3037 = vmatprep.subr.bf16.mxu1 %v2440_v36  ;;  %1127 = vmatmul.mubr.f32.gmra.mrb[26].mxu0 %v116_v33  ;;  %v215_v33 = vunpack.c.h.bf16 %v72_v25  ;;  %v80_v36 = vld [vmem:[%s4021_s0 + $0x210] sm:$0xff]  ;;  %v39_v16 = vld [vmem:[%s4021_s0 + $0xc8] sm:$0xff] }
  0x58   :  { %1252 = vmatmul.mubr.f32.gmra.mrb[26].mxu1 %v118_v34  ;;  %1131 = vmatprep.mubr.f32.mxu0 %v131_v37  ;;  %v217_v34 = vunpack.c.h.bf16 %v73_v26  ;;  %v2422_v37 = vld [vmem:[%s4020_s1 + $0x238] sm:$0xff]   ;;  %v230_v49 = vunpack.c.l.bf16 %v80_v36  ;;  %v148_v25 = vunpack.c.l.bf16 %v39_v16 }
  0x59   :  { %1256 = vmatprep.mubr.f32.mxu1 %v133_v38  ;;  %3007 = vmatpush3.bf16.msra.mxu0 %v2416_v41  ;;  %v2438_v38 = vld [vmem:[%s4020_s1 + $0x2b8] sm:$0xff]   ;;  %v229_v41 = vunpack.c.h.bf16 %v79_v35 }
  0x5a   :  { %3039 = vmatpush3.bf16.msra.mxu1 %v2432_v42  ;;  %3009 = vmatprep.subr.bf16.mxu0 %v2425_v45  ;;  %v231_v42 = vunpack.c.h.bf16 %v80_v36  ;;  %v3153_v45 = vmov 0.0|0.0  }
  0x5b   :  { %3041 = vmatprep.subr.bf16.mxu1 %v2441_v46  ;;  %1132 = vmatmul.mubr.f32.gmra.mrb[28].mxu0 %v130_v43  ;;  %v86_v43 = vld [vmem:[%s4021_s0 + $0x240] sm:$0xff] }
  0x5c   :  { %1257 = vmatmul.mubr.f32.gmra.mrb[28].mxu1 %v132_v44  ;;  %1136 = vmatprep.mubr.f32.mxu0 %v145_v47  ;;  %v87_v44 = vld [vmem:[%s4021_s0 + $0x248] sm:$0xff]  ;;  %v706_v46 = vld [vmem:[%s4022_s2 + $0x40] sm:$0xff]  ;;  %v243_v50 = vunpack.c.h.bf16 %v86_v43 }
  0x5d   :  { %1261 = vmatprep.mubr.f32.mxu1 %v147_v48  ;;  %3011 = vmatpush3.bf16.msra.mxu0 %v2417_v51  ;;  %v707_v47 = vld [vmem:[%s4022_s2 + $0x48] sm:$0xff]  ;;  %v228_v48 = vunpack.c.l.bf16 %v79_v35  ;;  %v245_v51 = vunpack.c.h.bf16 %v87_v44 }
  0x5e   :  { %3043 = vmatpush3.bf16.msra.mxu1 %v2433_v52  ;;  %3013 = vmatprep.subr.bf16.mxu0 %v2426_v55  ;;  %v93_v52 = vld [vmem:[%s4021_s0 + $0x278] sm:$0xff] }
  0x5f   :  { %3045 = vmatprep.subr.bf16.mxu1 %v2442_v56  ;;  %1137 = vmatmul.mubr.f32.gmra.mrb[30].mxu0 %v144_v53  ;;  %v94_v53 = vld [vmem:[%s4021_s0 + $0x280] sm:$0xff]  ;;  %v709_v55 = vld [vmem:[%s4022_s2 + $0x58] sm:$0xff]  ;;  %v242_v56 = vunpack.c.l.bf16 %v86_v43 }
  0x60   :  { %1262 = vmatmul.mubr.f32.gmra.mrb[30].mxu1 %v146_v54  ;;  %1141 = vmatprep.mubr.f32.mxu0 %v159_v57  ;;  %v708_v54 = vld [vmem:[%s4022_s2 + $0x50] sm:$0xff]  ;;  %v244_v57 = vunpack.c.l.bf16 %v87_v44  ;;  %v259_v59 = vunpack.c.h.bf16 %v94_v53  ;;  %v67_v44 = vld [vmem:[%s4021_s0 + $0x1a8] sm:$0xff] }
  0x61   :  { %1266 = vmatprep.mubr.f32.mxu1 %v161_v58  ;;  %3015 = vmatpush3.bf16.msra.mxu0 %v2418_v61  ;;  %v257_v58 = vunpack.c.h.bf16 %v93_v52  ;;  %v19_v61 = vld [vmem:[%s4021_s0 + $0x28] sm:$0xff] }
  0x62   :  { %3047 = vmatpush3.bf16.msra.mxu1 %v2434_v62  ;;  %3017 = vmatprep.subr.bf16.mxu0 %v2427_v1  ;;  %v256_v62 = vunpack.c.l.bf16 %v93_v52  ;;  %v109_v1 = vunpack.c.h.bf16 %v19_v61  ;;  %v108_v5 = vunpack.c.l.bf16 %v19_v61  ;;  %v74_v52 = vld [vmem:[%s4021_s0 + $0x1e0] sm:$0xff] }
  0x63   :  { %3049 = vmatprep.subr.bf16.mxu1 %v2443_v2  ;;  %1142 = vmatmul.mubr.f32.gmra.mrb[32].mxu0 %v158_v63  ;;  %v258_v63 = vunpack.c.l.bf16 %v94_v53  ;;  %v25_v2 = vld [vmem:[%s4021_s0 + $0x58] sm:$0xff]  ;;  %v75_v53 = vld [vmem:[%s4021_s0 + $0x1e8] sm:$0xff]  ;;  %v218_v61 = vunpack.c.l.bf16 %v74_v52 }
  0x64   :  { %1267 = vmatmul.mubr.f32.gmra.mrb[32].mxu1 %v160_v0  ;;  %1146 = vmatprep.mubr.f32.mxu0 %v173_v3  ;;  %v107_v0 = vunpack.c.h.bf16 %v18_v60  ;;  %v26_v3 = vld [vmem:[%s4021_s0 + $0x60] sm:$0xff] }
  0x65   :  { %1271 = vmatprep.mubr.f32.mxu1 %v175_v4  ;;  %3019 = vmatpush3.bf16.msra.mxu0 %v2419_v7  ;;  %v106_v4 = vunpack.c.l.bf16 %v18_v60  ;;  %v121_v7 = vunpack.c.h.bf16 %v25_v2  ;;  %v82_v60 = vld [vmem:[%s4021_s0 + $0x220] sm:$0xff] }
  0x66   :  { %3051 = vmatpush3.bf16.msra.mxu1 %v2435_v8  ;;  %3021 = vmatprep.subr.bf16.mxu0 %v2428_v11  ;;  %v123_v8 = vunpack.c.h.bf16 %v26_v3  ;;  %v120_v11 = vunpack.c.l.bf16 %v25_v2  ;;  %v88_v2 = vld [vmem:[%s4021_s0 + $0x250] sm:$0xff] }
  0x67   :  { %3053 = vmatprep.subr.bf16.mxu1 %v2444_v12  ;;  %1147 = vmatmul.mubr.f32.gmra.mrb[34].mxu0 %v172_v9  ;;  %v32_v9 = vld [vmem:[%s4021_s0 + $0x90] sm:$0xff]  ;;  %v122_v12 = vunpack.c.l.bf16 %v26_v3  ;;  %v89_v3 = vld [vmem:[%s4021_s0 + $0x258] sm:$0xff] }
  0x68   :  { %1272 = vmatmul.mubr.f32.gmra.mrb[34].mxu1 %v174_v10  ;;  %1151 = vmatprep.mubr.f32.mxu0 %v187_v13  ;;  %v33_v10 = vld [vmem:[%s4021_s0 + $0x98] sm:$0xff]  ;;  %v2448_v13 = vld [vmem:[%s4020_s1 + $0x308] sm:$0xff]  }
  0x69   :  { %1276 = vmatprep.mubr.f32.mxu1 %v189_v14  ;;  %3023 = vmatpush3.bf16.msra.mxu0 %v2420_v17  ;;  %v135_v14 = vunpack.c.h.bf16 %v32_v9  ;;  %v137_v15 = vunpack.c.h.bf16 %v33_v10  ;;  %v40_v17 = vld [vmem:[%s4021_s0 + $0xd0] sm:$0xff] }
  0x6a   :  { %3055 = vmatpush3.bf16.msra.mxu1 %v2436_v18  ;;  %3025 = vmatprep.subr.bf16.mxu0 %v2429_v21  ;;  %v134_v18 = vunpack.c.l.bf16 %v32_v9  ;;  %v149_v21 = vunpack.c.h.bf16 %v39_v16  ;;  %v150_v26 = vunpack.c.l.bf16 %v40_v17  ;;  %v95_v9 = vld [vmem:[%s4021_s0 + $0x288] sm:$0xff]  ;;  %v20_v16 = vld [vmem:[%s4021_s0 + $0x30] sm:$0xff] }
  0x6b   :  { %3057 = vmatprep.subr.bf16.mxu1 %v2445_v22  ;;  %1152 = vmatmul.mubr.f32.gmra.mrb[36].mxu0 %v186_v19  ;;  %v136_v19 = vunpack.c.l.bf16 %v33_v10  ;;  %v151_v22 = vunpack.c.h.bf16 %v40_v17  ;;  %v96_v10 = vld [vmem:[%s4021_s0 + $0x290] sm:$0xff]  ;;  %v62_v17 = vld [vmem:[%s4021_s0 + $0x180] sm:$0xff] }
  0x6c   :  { %1277 = vmatmul.mubr.f32.gmra.mrb[36].mxu1 %v188_v20  ;;  %1156 = vmatprep.mubr.f32.mxu0 %v201_v23  ;;  %v2449_v20 = vld [vmem:[%s4020_s1 + $0x310] sm:$0xff]   ;;  %v46_v23 = vld [vmem:[%s4021_s0 + $0x100] sm:$0xff] }
  0x6d   :  { %1281 = vmatprep.mubr.f32.mxu1 %v203_v24  ;;  %3027 = vmatpush3.bf16.msra.mxu0 %v2421_v27  ;;  %v47_v24 = vld [vmem:[%s4021_s0 + $0x108] sm:$0xff]  ;;  %v2450_v27 = vld [vmem:[%s4020_s1 + $0x318] sm:$0xff]  }
  0x6e   :  { %3059 = vmatpush3.bf16.msra.mxu1 %v2437_v28  ;;  %3029 = vmatprep.subr.bf16.mxu0 %v2430_v31  ;;  %v163_v28 = vunpack.c.h.bf16 %v46_v23  ;;  %v54_v31 = vld [vmem:[%s4021_s0 + $0x140] sm:$0xff] }
  0x6f   :  { %3061 = vmatprep.subr.bf16.mxu1 %v2446_v32  ;;  %1157 = vmatmul.mubr.f32.gmra.mrb[38].mxu0 %v200_v29  ;;  %v165_v29 = vunpack.c.h.bf16 %v47_v24  ;;  %v162_v32 = vunpack.c.l.bf16 %v46_v23  ;;  %v179_v36 = vunpack.c.h.bf16 %v54_v31  ;;  %v27_v23 = vld [vmem:[%s4021_s0 + $0x68] sm:$0xff] }
  0x70   :  { %1282 = vmatmul.mubr.f32.gmra.mrb[38].mxu1 %v202_v30  ;;  %1161 = vmatprep.mubr.f32.mxu0 %v215_v33  ;;  %v53_v30 = vld [vmem:[%s4021_s0 + $0x138] sm:$0xff]  ;;  %v164_v33 = vunpack.c.l.bf16 %v47_v24 }
  0x71   :  { %1286 = vmatprep.mubr.f32.mxu1 %v217_v34  ;;  %3031 = vmatpush3.bf16.msra.mxu0 %v2422_v37  ;;  %v2451_v34 = vld [vmem:[%s4020_s1 + $0x320] sm:$0xff]   ;;  %v177_v35 = vunpack.c.h.bf16 %v53_v30  ;;  %v60_v37 = vld [vmem:[%s4021_s0 + $0x170] sm:$0xff]  ;;  %v69_v24 = vld [vmem:[%s4021_s0 + $0x1b8] sm:$0xff] }
  0x72   :  { %3063 = vmatpush3.bf16.msra.mxu1 %v2438_v38  ;;  %3064 = vmatprep.subr.bf16.mxu0 %v3153_v45  ;;  %v61_v38 = vld [vmem:[%s4021_s0 + $0x178] sm:$0xff] }
  0x73   :  { %3100 = vmatprep.subr.bf16.mxu1 %v3153_v45  ;;  %1162 = vmatmul.mubr.f32.gmra.mrb[40].mxu0 %v214_v39  ;;  %v176_v39 = vunpack.c.l.bf16 %v53_v30  ;;  %v193_v43 = vunpack.c.h.bf16 %v61_v38  ;;  %v124_v30 = vunpack.c.l.bf16 %v27_v23 }
  0x74   :  { %1287 = vmatmul.mubr.f32.gmra.mrb[40].mxu1 %v216_v40  ;;  %1166 = vmatprep.mubr.f32.mxu0 %v229_v41  ;;  %v178_v40 = vunpack.c.l.bf16 %v54_v31  ;;  %v2452_v41 = vld [vmem:[%s4020_s1 + $0x328] sm:$0xff]   ;;  %v208_v31 = vunpack.c.l.bf16 %v69_v24 }
  0x75   :  { %1291 = vmatprep.mubr.f32.mxu1 %v231_v42  ;;  %752 = vperm.xlu0 %3126, %v706_v46   ;;  %v191_v42 = vunpack.c.h.bf16 %v60_v37  ;;  %v68_v46 = vld [vmem:[%s4021_s0 + $0x1b0] sm:$0xff] }
  0x76   :  { %757 = vperm.xlu1 %3127, %v707_v47   ;;  %v190_v47 = vunpack.c.l.bf16 %v60_v37 }
  0x77   :  { %1167 = vmatmul.mubr.f32.gmra.mrb[42].mxu0 %v228_v48  ;;  %v192_v48 = vunpack.c.l.bf16 %v61_v38 }
  0x78   :  { %1292 = vmatmul.mubr.f32.gmra.mrb[42].mxu1 %v230_v49  ;;  %1171 = vmatprep.mubr.f32.mxu0 %v243_v50  ;;  %v2453_v49 = vld [vmem:[%s4020_s1 + $0x330] sm:$0xff]   ;;  %v205_v50 = vunpack.c.h.bf16 %v67_v44 }
  0x79   :  { %1296 = vmatprep.mubr.f32.mxu1 %v245_v51  ;;  %762 = vperm.xlu0 %3126, %v708_v54   ;;  %v207_v51 = vunpack.c.h.bf16 %v68_v46  ;;  %v204_v54 = vunpack.c.l.bf16 %v67_v44 }
  0x7a   :  { %767 = vperm.xlu1 %3127, %v709_v55   ;;  %v206_v55 = vunpack.c.l.bf16 %v68_v46 }
  0x7b   :  { %1172 = vmatmul.mubr.f32.gmra.mrb[44].mxu0 %v242_v56  ;;  %v2454_v56 = vld [vmem:[%s4020_s1 + $0x338] sm:$0xff]  }
  0x7c   :  { %1297 = vmatmul.mubr.f32.gmra.mrb[44].mxu1 %v244_v57  ;;  %1176 = vmatprep.mubr.f32.mxu0 %v257_v58  ;;  %v219_v57 = vunpack.c.h.bf16 %v74_v52  ;;  %v221_v58 = vunpack.c.h.bf16 %v75_v53 }
  0x7d   :  { %1301 = vmatprep.mubr.f32.mxu1 %v259_v59  ;;  %v81_v59 = vld [vmem:[%s4021_s0 + $0x218] sm:$0xff] }
  0x7f   :  { %1177 = vmatmul.mubr.f32.gmra.mrb[46].mxu0 %v256_v62  ;;  %v220_v62 = vunpack.c.l.bf16 %v75_v53 }
  0x80   :  { %1302 = vmatmul.mubr.f32.gmra.mrb[46].mxu1 %v258_v63  ;;  %1371 = vmatprep.mubr.f32.mxu0 %v107_v0  ;;  %v2455_v63 = vld [vmem:[%s4020_s1 + $0x340] sm:$0xff]   ;;  %v233_v0 = vunpack.c.h.bf16 %v81_v59 }
  0x81   :  { %1496 = vmatprep.mubr.f32.mxu1 %v109_v1  ;;  %v235_v1 = vunpack.c.h.bf16 %v82_v60 }
  0x83   :  { %1372 = vmatmul.mubr.f32.vlgmr.msra.gmra.mrb[48].mxu0 %v106_v4  ;;  %v232_v4 = vunpack.c.l.bf16 %v81_v59 }
  0x84   :  { %1497 = vmatmul.mubr.f32.vlgmr.msra.gmra.mrb[48].mxu1 %v108_v5  ;;  %3066 = vmatpush1.bf16.msra.mxu0 %v2447_v6  ;;  %v234_v5 = vunpack.c.l.bf16 %v82_v60 }
  0x85   :  { %3112 = vmatpush1.bf16.msra.mxu1 %v2447_v6  ;;  %1376 = vmatprep.mubr.f32.mxu0 %v121_v7  ;;  %v2456_v6 = vld [vmem:[%s4020_s1 + $0x348] sm:$0xff]   ;;  %v247_v7 = vunpack.c.h.bf16 %v88_v2 }
  0x86   :  { %1501 = vmatprep.mubr.f32.mxu1 %v123_v8  ;;  %3067 = vmatprep.subr.bf16.mxu0 %v3153_v45  ;;  %v249_v8 = vunpack.c.h.bf16 %v89_v3 }
  0x87   :  { %3101 = vmatprep.subr.bf16.mxu1 %v3153_v45  ;;  %1377 = vmatmul.mubr.f32.gmra.mrb[50].mxu0 %v120_v11  ;;  %v246_v11 = vunpack.c.l.bf16 %v88_v2 }
  0x88   :  { %1502 = vmatmul.mubr.f32.gmra.mrb[50].mxu1 %v122_v12  ;;  %3069 = vmatpush1.bf16.msra.mxu0 %v2448_v13  ;;  %v248_v12 = vunpack.c.l.bf16 %v89_v3 }
  0x89   :  { %3113 = vmatpush1.bf16.msra.mxu1 %v2448_v13  ;;  %1381 = vmatprep.mubr.f32.mxu0 %v135_v14  ;;  %v2457_v13 = vld [vmem:[%s4020_s1 + $0x350] sm:$0xff]   ;;  %v261_v14 = vunpack.c.h.bf16 %v95_v9 }
  0x8a   :  { %1506 = vmatprep.mubr.f32.mxu1 %v137_v15  ;;  %3070 = vmatprep.subr.bf16.mxu0 %v3153_v45  ;;  %v263_v15 = vunpack.c.h.bf16 %v96_v10 }
  0x8b   :  { %3102 = vmatprep.subr.bf16.mxu1 %v3153_v45  ;;  %1382 = vmatmul.mubr.f32.gmra.mrb[52].mxu0 %v134_v18  ;;  %v260_v18 = vunpack.c.l.bf16 %v95_v9 }
  0x8c   :  { %1507 = vmatmul.mubr.f32.gmra.mrb[52].mxu1 %v136_v19  ;;  %3072 = vmatpush1.bf16.msra.mxu0 %v2449_v20  ;;  %v262_v19 = vunpack.c.l.bf16 %v96_v10 }
  0x8d   :  { %3114 = vmatpush1.bf16.msra.mxu1 %v2449_v20  ;;  %1386 = vmatprep.mubr.f32.mxu0 %v149_v21  ;;  %v2458_v20 = vld [vmem:[%s4020_s1 + $0x358] sm:$0xff]   ;;  %v111_v21 = vunpack.c.h.bf16 %v20_v16 }
  0x8e   :  { %1511 = vmatprep.mubr.f32.mxu1 %v151_v22  ;;  %3073 = vmatprep.subr.bf16.mxu0 %v3153_v45  ;;  %v195_v22 = vunpack.c.h.bf16 %v62_v17 }
  0x8f   :  { %3103 = vmatprep.subr.bf16.mxu1 %v3153_v45  ;;  %1387 = vmatmul.mubr.f32.gmra.mrb[54].mxu0 %v148_v25  ;;  %v110_v25 = vunpack.c.l.bf16 %v20_v16 }
  0x90   :  { %1512 = vmatmul.mubr.f32.gmra.mrb[54].mxu1 %v150_v26  ;;  %3075 = vmatpush1.bf16.msra.mxu0 %v2450_v27  ;;  %v194_v26 = vunpack.c.l.bf16 %v62_v17 }
  0x91   :  { %3115 = vmatpush1.bf16.msra.mxu1 %v2450_v27  ;;  %1391 = vmatprep.mubr.f32.mxu0 %v163_v28  ;;  %v125_v27 = vunpack.c.h.bf16 %v27_v23  ;;  %v209_v28 = vunpack.c.h.bf16 %v69_v24 }
  0x92   :  { %1516 = vmatprep.mubr.f32.mxu1 %v165_v29  ;;  %3076 = vmatprep.subr.bf16.mxu0 %v3153_v45  ;;  %v34_v29 = vld [vmem:[%s4021_s0 + $0xa0] sm:$0xff] }
  0x93   :  { %3104 = vmatprep.subr.bf16.mxu1 %v3153_v45  ;;  %1392 = vmatmul.mubr.f32.gmra.mrb[56].mxu0 %v162_v32  ;;  %v139_v32 = vunpack.c.h.bf16 %v34_v29 }
  0x94   :  { %1517 = vmatmul.mubr.f32.gmra.mrb[56].mxu1 %v164_v33  ;;  %3078 = vmatpush1.bf16.msra.mxu0 %v2451_v34 }
  0x95   :  { %3116 = vmatpush1.bf16.msra.mxu1 %v2451_v34  ;;  %1396 = vmatprep.mubr.f32.mxu0 %v177_v35  ;;  %v41_v34 = vld [vmem:[%s4021_s0 + $0xd8] sm:$0xff]  ;;  %v83_v35 = vld [vmem:[%s4021_s0 + $0x228] sm:$0xff] }
  0x96   :  { %1521 = vmatprep.mubr.f32.mxu1 %v179_v36  ;;  %3079 = vmatprep.subr.bf16.mxu0 %v3153_v45  ;;  %v138_v36 = vunpack.c.l.bf16 %v34_v29  ;;  %v153_v38 = vunpack.c.h.bf16 %v41_v34 }
  0x97   :  { %3105 = vmatprep.subr.bf16.mxu1 %v3153_v45  ;;  %1397 = vmatmul.mubr.f32.gmra.mrb[58].mxu0 %v176_v39  ;;  %v237_v39 = vunpack.c.h.bf16 %v83_v35 }
  0x98   :  { %1522 = vmatmul.mubr.f32.gmra.mrb[58].mxu1 %v178_v40  ;;  %3081 = vmatpush1.bf16.msra.mxu0 %v2452_v41  ;;  %v48_v40 = vld [vmem:[%s4021_s0 + $0x110] sm:$0xff] }
  0x99   :  { %3117 = vmatpush1.bf16.msra.mxu1 %v2452_v41  ;;  %1401 = vmatprep.mubr.f32.mxu0 %v191_v42  ;;  %v90_v41 = vld [vmem:[%s4021_s0 + $0x260] sm:$0xff]  ;;  %v152_v42 = vunpack.c.l.bf16 %v41_v34  ;;  %v167_v44 = vunpack.c.h.bf16 %v48_v40 }
  0x9a   :  { %1526 = vmatprep.mubr.f32.mxu1 %v193_v43  ;;  %3082 = vmatprep.subr.bf16.mxu0 %v3153_v45  ;;  %v236_v43 = vunpack.c.l.bf16 %v83_v35  ;;  %v251_v46 = vunpack.c.h.bf16 %v90_v41 }
  0x9b   :  { %3106 = vmatprep.subr.bf16.mxu1 %v3153_v45  ;;  %1402 = vmatmul.mubr.f32.gmra.mrb[60].mxu0 %v190_v47  ;;  %v55_v47 = vld [vmem:[%s4021_s0 + $0x148] sm:$0xff] }
  0x9c   :  { %1527 = vmatmul.mubr.f32.gmra.mrb[60].mxu1 %v192_v48  ;;  %3084 = vmatpush1.bf16.msra.mxu0 %v2453_v49  ;;  %v97_v48 = vld [vmem:[%s4021_s0 + $0x298] sm:$0xff]  ;;  %v180_v53 = vunpack.c.l.bf16 %v55_v47 }
  0x9d   :  { %3118 = vmatpush1.bf16.msra.mxu1 %v2453_v49  ;;  %1406 = vmatprep.mubr.f32.mxu0 %v205_v50  ;;  %v166_v49 = vunpack.c.l.bf16 %v48_v40  ;;  %v250_v50 = vunpack.c.l.bf16 %v90_v41  ;;  %v265_v52 = vunpack.c.h.bf16 %v97_v48 }
  0x9e   :  { %1531 = vmatprep.mubr.f32.mxu1 %v207_v51  ;;  %3085 = vmatprep.subr.bf16.mxu0 %v3153_v45  ;;  %v181_v51 = vunpack.c.h.bf16 %v55_v47 }
  0x9f   :  { %3107 = vmatprep.subr.bf16.mxu1 %v3153_v45  ;;  %1407 = vmatmul.mubr.f32.gmra.mrb[62].mxu0 %v204_v54  ;;  %v264_v54 = vunpack.c.l.bf16 %v97_v48 }
  0xa0   :  { %1532 = vmatmul.mubr.f32.gmra.mrb[62].mxu1 %v206_v55  ;;  %3087 = vmatpush1.bf16.msra.mxu0 %v2454_v56 }
  0xa1   :  { %3119 = vmatpush1.bf16.msra.mxu1 %v2454_v56  ;;  %1411 = vmatprep.mubr.f32.mxu0 %v219_v57 }
  0xa2   :  { %1536 = vmatprep.mubr.f32.mxu1 %v221_v58  ;;  %3088 = vmatprep.subr.bf16.mxu0 %v3153_v45 }
  0xa3   :  { %3108 = vmatprep.subr.bf16.mxu1 %v3153_v45  ;;  %1412 = vmatmul.mubr.f32.gmra.mrb[64].mxu0 %v218_v61 }
  0xa4   :  { %1537 = vmatmul.mubr.f32.gmra.mrb[64].mxu1 %v220_v62  ;;  %3090 = vmatpush1.bf16.msra.mxu0 %v2455_v63 }
  0xa5   :  { %3120 = vmatpush1.bf16.msra.mxu1 %v2455_v63  ;;  %1416 = vmatprep.mubr.f32.mxu0 %v233_v0 }
  0xa6   :  { %1541 = vmatprep.mubr.f32.mxu1 %v235_v1  ;;  %3091 = vmatprep.subr.bf16.mxu0 %v3153_v45 }
  0xa7   :  { %3109 = vmatprep.subr.bf16.mxu1 %v3153_v45  ;;  %1417 = vmatmul.mubr.f32.gmra.mrb[66].mxu0 %v232_v4 }
  0xa8   :  { %1542 = vmatmul.mubr.f32.gmra.mrb[66].mxu1 %v234_v5  ;;  %3093 = vmatpush1.bf16.msra.mxu0 %v2456_v6 }
  0xa9   :  { %3121 = vmatpush1.bf16.msra.mxu1 %v2456_v6  ;;  %1421 = vmatprep.mubr.f32.mxu0 %v247_v7 }
  0xaa   :  { %1546 = vmatprep.mubr.f32.mxu1 %v249_v8  ;;  %3094 = vmatprep.subr.bf16.mxu0 %v3153_v45 }
  0xab   :  { %3110 = vmatprep.subr.bf16.mxu1 %v3153_v45  ;;  %1422 = vmatmul.mubr.f32.gmra.mrb[68].mxu0 %v246_v11 }
  0xac   :  { %1547 = vmatmul.mubr.f32.gmra.mrb[68].mxu1 %v248_v12  ;;  %3096 = vmatpush1.bf16.msra.mxu0 %v2457_v13 }
  0xad   :  { %3122 = vmatpush1.bf16.msra.mxu1 %v2457_v13  ;;  %1426 = vmatprep.mubr.f32.mxu0 %v261_v14 }
  0xae   :  { %1551 = vmatprep.mubr.f32.mxu1 %v263_v15  ;;  %3097 = vmatprep.subr.bf16.mxu0 %v3153_v45 }
  0xaf   :  { %3111 = vmatprep.subr.bf16.mxu1 %v3153_v45  ;;  %1427 = vmatmul.mubr.f32.gmra.mrb[70].mxu0 %v260_v18  ;;  %v76_v45 = vld [vmem:[%s4021_s0 + $0x1f0] sm:$0xff] }
  0xb0   :  { %1552 = vmatmul.mubr.f32.gmra.mrb[70].mxu1 %v262_v19  ;;  %3099 = vmatpush1.bf16.msra.mxu0 %v2458_v20  ;;  %v223_v33 = vunpack.c.h.bf16 %v76_v45  ;;  %v222_v37 = vunpack.c.l.bf16 %v76_v45 }
  0xb1   :  { %3123 = vmatpush1.bf16.msra.mxu1 %v2458_v20  ;;  %1854 = vmatprep.mubr.msk.f32.mxu0 %vm770_vm0, %v111_v21 }
  0xb2   :  { %1860 = vmatprep.mubr.msk.f32.mxu1 %vm770_vm0, %v195_v22 }
  0xb3   :  { %1622 = vmatmul.mubr.f32.vlgmr.msra.gmra.mrb[72].mxu0 %v110_v25 }
  0xb4   :  { %1652 = vmatmul.mubr.f32.vlgmr.msra.gmra.mrb[72].mxu1 %v194_v26  ;;  %1855 = vmatprep.mubr.msk.f32.mxu0 %vm770_vm0, %v125_v27 }
  0xb5   :  { %1861 = vmatprep.mubr.msk.f32.mxu1 %vm770_vm0, %v209_v28 }
  0xb7   :  { %1627 = vmatmul.mubr.f32.gmra.mrb[74].mxu0 %v124_v30 }
  0xb8   :  { %1657 = vmatmul.mubr.f32.gmra.mrb[74].mxu1 %v208_v31  ;;  %1856 = vmatprep.mubr.msk.f32.mxu0 %vm770_vm0, %v139_v32 }
  0xb9   :  { %1862 = vmatprep.mubr.msk.f32.mxu1 %vm770_vm0, %v223_v33 }
  0xbb   :  { %1632 = vmatmul.mubr.f32.gmra.mrb[76].mxu0 %v138_v36 }
  0xbc   :  { %1662 = vmatmul.mubr.f32.gmra.mrb[76].mxu1 %v222_v37  ;;  %1857 = vmatprep.mubr.msk.f32.mxu0 %vm770_vm0, %v153_v38 }
  0xbd   :  { %1863 = vmatprep.mubr.msk.f32.mxu1 %vm770_vm0, %v237_v39 }
  0xbf   :  { %1637 = vmatmul.mubr.f32.gmra.mrb[78].mxu0 %v152_v42 }
  0xc0   :  { %1667 = vmatmul.mubr.f32.gmra.mrb[78].mxu1 %v236_v43  ;;  %1858 = vmatprep.mubr.msk.f32.mxu0 %vm770_vm0, %v167_v44 }
  0xc1   :  { %1864 = vmatprep.mubr.msk.f32.mxu1 %vm770_vm0, %v251_v46 }
  0xc3   :  { %1642 = vmatmul.mubr.f32.gmra.mrb[80].mxu0 %v166_v49 }
  0xc4   :  { %1672 = vmatmul.mubr.f32.gmra.mrb[80].mxu1 %v250_v50  ;;  %1859 = vmatprep.mubr.msk.f32.mxu0 %vm770_vm0, %v181_v51  ;;  %v713_v55 = vpop.permute.xlu0 %712 }
  0xc5   :  { %1865 = vmatprep.mubr.msk.f32.mxu1 %vm770_vm0, %v265_v52  ;;  %v723_v63 = vpop.permute.xlu1 %722 }
  0xc7   :  { %1647 = vmatmul.mubr.f32.gmra.mrb[82].mxu0 %v180_v53 }
  0xc8   :  { %1677 = vmatmul.mubr.f32.gmra.mrb[82].mxu1 %v264_v54  ;;  %v718_v62 = vpop.permute.xlu0 %717 }
  0xc9   :  { %v728_v16 = vpop.permute.xlu1 %727 }
  0xcc   :  { %v733_v25 = vpop.permute.xlu0 %732 }
  0xcd   :  { %v738_v33 = vpop.permute.xlu1 %737 }
  0xd0   :  { %v743_v42 = vpop.permute.xlu0 %742 }
  0xd1   :  { %v748_v52 = vpop.permute.xlu1 %747 }
  0xf6   :  { %v2496_v56 = vpop.f32.mrb[0].mxu0 }
  0xf7   :  { %v2564_v57 = vpop.f32.mrb[0].mxu1  ;;  %v2497_v58 = vpop.f32.mrb[1].mxu0 }
  0xf8   :  { %v2565_v59 = vpop.f32.mrb[1].mxu1  ;;  %v2498_v60 = vadd.f32 %v2497_v58, %v2496_v56 }
  0xf9   :  { %v2566_v61 = vadd.f32 %v2565_v59, %v2564_v57 }
  0xfa   :  { %v874_v0 = vadd.f32 %v2498_v60, %v713_v55  ;;  %v2499_v1 = vpop.f32.mrb[2].mxu0 }
  0xfb   :  { %v2567_v2 = vpop.f32.mrb[2].mxu1  ;;  %v2500_v3 = vpop.f32.mrb[3].mxu0 }
  0xfc   :  { %v2568_v4 = vpop.f32.mrb[3].mxu1  ;;  %v3822_v5 = vadd.f32 %v2566_v61, %v874_v0  ;;  %v2501_v6 = vadd.f32 %v2500_v3, %v2499_v1  ;;  %v753_v61 = vpop.permute.xlu0 %752 }
  0xfd   :  { %v2569_v7 = vadd.f32 %v2568_v4, %v2567_v2 }
  0xfe   :  { %v879_v8 = vadd.f32 %v2501_v6, %v718_v62  ;;  %v2502_v9 = vpop.f32.mrb[4].mxu0 }
  0xff   :  { %v2570_v10 = vpop.f32.mrb[4].mxu1  ;;  %v2503_v11 = vpop.f32.mrb[5].mxu0 }
 0x100   :  { %v2571_v12 = vpop.f32.mrb[5].mxu1  ;;  %v3824_v13 = vadd.f32 %v2569_v7, %v879_v8  ;;  %v2504_v14 = vadd.f32 %v2503_v11, %v2502_v9  ;;  %v758_v7 = vpop.permute.xlu1 %757 }
 0x101   :  { %v2572_v15 = vadd.f32 %v2571_v12, %v2570_v10 }
 0x102   :  { %v884_v17 = vadd.f32 %v2504_v14, %v723_v63  ;;  %v2505_v18 = vpop.f32.mrb[6].mxu0 }
 0x103   :  { %v2573_v19 = vpop.f32.mrb[6].mxu1  ;;  %v2506_v20 = vpop.f32.mrb[7].mxu0 }
 0x104   :  { %v2574_v21 = vpop.f32.mrb[7].mxu1  ;;  %v3826_v22 = vadd.f32 %v2572_v15, %v884_v17  ;;  %v2507_v23 = vadd.f32 %v2506_v20, %v2505_v18  ;;  %v763_v17 = vpop.permute.xlu0 %762 }
 0x105   :  { %v2575_v24 = vadd.f32 %v2574_v21, %v2573_v19 }
 0x106   :  { %v889_v26 = vadd.f32 %v2507_v23, %v728_v16  ;;  %v2508_v27 = vpop.f32.mrb[8].mxu0 }
 0x107   :  { %v2576_v28 = vpop.f32.mrb[8].mxu1  ;;  %v2509_v29 = vpop.f32.mrb[9].mxu0 }
 0x108   :  { %v2577_v45 = vpop.f32.mrb[9].mxu1  ;;  %v3828_v30 = vadd.f32 %v2575_v24, %v889_v26  ;;  %v2510_v31 = vadd.f32 %v2509_v29, %v2508_v27  ;;  %v768_v27 = vpop.permute.xlu1 %767 }
 0x109   :  { %v2578_v32 = vadd.f32 %v2577_v45, %v2576_v28 }
 0x10a   :  { %v894_v34 = vadd.f32 %v2510_v31, %v733_v25  ;;  %v2511_v35 = vpop.f32.mrb[10].mxu0 }
 0x10b   :  { %v2579_v36 = vpop.f32.mrb[10].mxu1  ;;  %v2512_v37 = vpop.f32.mrb[11].mxu0 }
 0x10c   :  { %v2580_v38 = vpop.f32.mrb[11].mxu1  ;;  %v3830_v39 = vadd.f32 %v2578_v32, %v894_v34  ;;  %v2513_v40 = vadd.f32 %v2512_v37, %v2511_v35 }
 0x10d   :  { %v2581_v41 = vadd.f32 %v2580_v38, %v2579_v36 }
 0x10e   :  { %v899_v43 = vadd.f32 %v2513_v40, %v738_v33  ;;  %v2514_v44 = vpop.f32.mrb[12].mxu0 }
 0x10f   :  { %v2582_v46 = vpop.f32.mrb[12].mxu1  ;;  %v2515_v47 = vpop.f32.mrb[13].mxu0 }
 0x110   :  { %v2583_v48 = vpop.f32.mrb[13].mxu1  ;;  %v3832_v49 = vadd.f32 %v2581_v41, %v899_v43  ;;  %v2516_v50 = vadd.f32 %v2515_v47, %v2514_v44 }
 0x111   :  { %v2584_v51 = vadd.f32 %v2583_v48, %v2582_v46 }
 0x112   :  { %v904_v53 = vadd.f32 %v2516_v50, %v743_v42  ;;  %v2517_v54 = vpop.f32.mrb[14].mxu0 }
 0x113   :  { %v2585_v55 = vpop.f32.mrb[14].mxu1  ;;  %v2518_v56 = vpop.f32.mrb[15].mxu0 }
 0x114   :  { %v2586_v57 = vpop.f32.mrb[15].mxu1  ;;  %v3834_v58 = vadd.f32 %v2584_v51, %v904_v53  ;;  %v2519_v59 = vadd.f32 %v2518_v56, %v2517_v54 }
 0x115   :  { %v2587_v60 = vadd.f32 %v2586_v57, %v2585_v55 }
 0x116   :  { %v909_v62 = vadd.f32 %v2519_v59, %v748_v52  ;;  %v2520_v63 = vpop.f32.mrb[16].mxu0 }
 0x117   :  { %v2588_v0 = vpop.f32.mrb[16].mxu1  ;;  %v2521_v1 = vpop.f32.mrb[17].mxu0 }
 0x118   :  { %v2589_v2 = vpop.f32.mrb[17].mxu1  ;;  %v3836_v3 = vadd.f32 %v2587_v60, %v909_v62  ;;  %v2522_v4 = vadd.f32 %v2521_v1, %v2520_v63 }
 0x119   :  { %v2590_v6 = vadd.f32 %v2589_v2, %v2588_v0 }
 0x11a   :  { %v914_v8 = vadd.f32 %v2522_v4, %v753_v61  ;;  %v2523_v9 = vpop.f32.mrb[18].mxu0 }
 0x11b   :  { %v2591_v10 = vpop.f32.mrb[18].mxu1  ;;  %v2524_v11 = vpop.f32.mrb[19].mxu0 }
 0x11c   :  { %v2592_v12 = vpop.f32.mrb[19].mxu1  ;;  %v3838_v14 = vadd.f32 %v2590_v6, %v914_v8  ;;  %v2525_v15 = vadd.f32 %v2524_v11, %v2523_v9 }
 0x11d   :  { %v2593_v16 = vadd.f32 %v2592_v12, %v2591_v10 }
 0x11e   :  { %v919_v18 = vadd.f32 %v2525_v15, %v758_v7  ;;  %v2526_v19 = vpop.f32.mrb[20].mxu0 }
 0x11f   :  { %v2594_v20 = vpop.f32.mrb[20].mxu1  ;;  %v2527_v21 = vpop.f32.mrb[21].mxu0 }
 0x120   :  { %v2595_v23 = vpop.f32.mrb[21].mxu1  ;;  %v3840_v24 = vadd.f32 %v2593_v16, %v919_v18  ;;  %v2528_v25 = vadd.f32 %v2527_v21, %v2526_v19 }
 0x121   :  { %v2596_v26 = vadd.f32 %v2595_v23, %v2594_v20 }
 0x122   :  { %v924_v28 = vadd.f32 %v2528_v25, %v763_v17  ;;  %v2529_v29 = vpop.f32.mrb[22].mxu0 }
 0x123   :  { %v2597_v45 = vpop.f32.mrb[22].mxu1  ;;  %v2530_v31 = vpop.f32.mrb[23].mxu0 }
 0x124   :  { %v2598_v32 = vpop.f32.mrb[23].mxu1  ;;  %v3842_v33 = vadd.f32 %v2596_v26, %v924_v28  ;;  %v2531_v34 = vadd.f32 %v2530_v31, %v2529_v29 }
 0x125   :  { %v2599_v35 = vadd.f32 %v2598_v32, %v2597_v45 }
 0x126   :  { %v929_v36 = vadd.f32 %v2531_v34, %v768_v27  ;;  %v2632_v37 = vpop.f32.mrb[24].mxu0 }
 0x127   :  { %v2700_v38 = vpop.f32.mrb[24].mxu1  ;;  %v2633_v40 = vpop.f32.mrb[25].mxu0 }
 0x128   :  { %v2701_v41 = vpop.f32.mrb[25].mxu1  ;;  %v3844_v42 = vadd.f32 %v2599_v35, %v929_v36  ;;  %v2634_v43 = vadd.f32 %v2633_v40, %v2632_v37 }
 0x129   :  { %v2702_v44 = vadd.f32 %v2701_v41, %v2700_v38 }
 0x12a   :  { %v1124_v46 = vadd.f32 %v2634_v43, %v3822_v5  ;;  %v2635_v47 = vpop.f32.mrb[26].mxu0 }
 0x12b   :  { %v2703_v48 = vpop.f32.mrb[26].mxu1  ;;  %v2636_v50 = vpop.f32.mrb[27].mxu0 }
 0x12c   :  { %v2704_v51 = vpop.f32.mrb[27].mxu1  ;;  %v3847_v52 = vadd.f32 %v2702_v44, %v1124_v46  ;;  %v2637_v53 = vadd.f32 %v2636_v50, %v2635_v47 }
 0x12d   :  { %v2705_v54 = vadd.f32 %v2704_v51, %v2703_v48 }
 0x12e   :  { %v1129_v55 = vadd.f32 %v2637_v53, %v3824_v13  ;;  %v2638_v56 = vpop.f32.mrb[28].mxu0 }
 0x12f   :  { %v2706_v57 = vpop.f32.mrb[28].mxu1  ;;  %v2639_v59 = vpop.f32.mrb[29].mxu0 }
 0x130   :  { %v2707_v60 = vpop.f32.mrb[29].mxu1  ;;  %v3850_v61 = vadd.f32 %v2705_v54, %v1129_v55  ;;  %v2640_v62 = vadd.f32 %v2639_v59, %v2638_v56 }
 0x131   :  { %v2708_v63 = vadd.f32 %v2707_v60, %v2706_v57 }
 0x132   :  { %v1134_v5 = vadd.f32 %v2640_v62, %v3826_v22  ;;  %v2641_v0 = vpop.f32.mrb[30].mxu0 }
 0x133   :  { %v2709_v1 = vpop.f32.mrb[30].mxu1  ;;  %v2642_v2 = vpop.f32.mrb[31].mxu0 }
 0x134   :  { %v2710_v4 = vpop.f32.mrb[31].mxu1  ;;  %v3853_v6 = vadd.f32 %v2708_v63, %v1134_v5  ;;  %v2643_v7 = vadd.f32 %v2642_v2, %v2641_v0 }
 0x135   :  { %v2711_v8 = vadd.f32 %v2710_v4, %v2709_v1 }
 0x136   :  { %v1139_v13 = vadd.f32 %v2643_v7, %v3828_v30  ;;  %v2644_v9 = vpop.f32.mrb[32].mxu0 }
 0x137   :  { %v2712_v10 = vpop.f32.mrb[32].mxu1  ;;  %v2645_v11 = vpop.f32.mrb[33].mxu0 }
 0x138   :  { %v2713_v12 = vpop.f32.mrb[33].mxu1  ;;  %v3856_v15 = vadd.f32 %v2711_v8, %v1139_v13  ;;  %v2646_v16 = vadd.f32 %v2645_v11, %v2644_v9 }
 0x139   :  { %v2714_v17 = vadd.f32 %v2713_v12, %v2712_v10 }
 0x13a   :  { %v1144_v22 = vadd.f32 %v2646_v16, %v3830_v39  ;;  %v2647_v18 = vpop.f32.mrb[34].mxu0 }
 0x13b   :  { %v2715_v19 = vpop.f32.mrb[34].mxu1  ;;  %v2648_v20 = vpop.f32.mrb[35].mxu0 }
 0x13c   :  { %v2716_v21 = vpop.f32.mrb[35].mxu1  ;;  %v3859_v23 = vadd.f32 %v2714_v17, %v1144_v22  ;;  %v2649_v25 = vadd.f32 %v2648_v20, %v2647_v18 }
 0x13d   :  { %v2717_v26 = vadd.f32 %v2716_v21, %v2715_v19 }
 0x13e   :  { %v1149_v30 = vadd.f32 %v2649_v25, %v3832_v49  ;;  %v2650_v27 = vpop.f32.mrb[36].mxu0 }
 0x13f   :  { %v2718_v28 = vpop.f32.mrb[36].mxu1  ;;  %v2651_v29 = vpop.f32.mrb[37].mxu0 }
 0x140   :  { %v2719_v45 = vpop.f32.mrb[37].mxu1  ;;  %v3862_v31 = vadd.f32 %v2717_v26, %v1149_v30  ;;  %v2652_v32 = vadd.f32 %v2651_v29, %v2650_v27 }
 0x141   :  { %v2720_v34 = vadd.f32 %v2719_v45, %v2718_v28 }
 0x142   :  { %v1154_v39 = vadd.f32 %v2652_v32, %v3834_v58  ;;  %v2653_v35 = vpop.f32.mrb[38].mxu0 }
 0x143   :  { %v2721_v36 = vpop.f32.mrb[38].mxu1  ;;  %v2654_v37 = vpop.f32.mrb[39].mxu0 }
 0x144   :  { %v2722_v38 = vpop.f32.mrb[39].mxu1  ;;  %v3865_v40 = vadd.f32 %v2720_v34, %v1154_v39  ;;  %v2655_v41 = vadd.f32 %v2654_v37, %v2653_v35 }
 0x145   :  { %v2723_v43 = vadd.f32 %v2722_v38, %v2721_v36 }
 0x146   :  { %v1159_v49 = vadd.f32 %v2655_v41, %v3836_v3  ;;  %v2656_v44 = vpop.f32.mrb[40].mxu0 }
 0x147   :  { %v2724_v46 = vpop.f32.mrb[40].mxu1  ;;  %v2657_v47 = vpop.f32.mrb[41].mxu0 }
 0x148   :  { %v2725_v48 = vpop.f32.mrb[41].mxu1  ;;  %v3868_v50 = vadd.f32 %v2723_v43, %v1159_v49  ;;  %v2658_v51 = vadd.f32 %v2657_v47, %v2656_v44 }
 0x149   :  { %v2726_v53 = vadd.f32 %v2725_v48, %v2724_v46 }
 0x14a   :  { %v1164_v58 = vadd.f32 %v2658_v51, %v3838_v14  ;;  %v2659_v54 = vpop.f32.mrb[42].mxu0 }
 0x14b   :  { %v2727_v55 = vpop.f32.mrb[42].mxu1  ;;  %v2660_v56 = vpop.f32.mrb[43].mxu0 }
 0x14c   :  { %v2728_v57 = vpop.f32.mrb[43].mxu1  ;;  %v3871_v59 = vadd.f32 %v2726_v53, %v1164_v58  ;;  %v2661_v60 = vadd.f32 %v2660_v56, %v2659_v54 }
 0x14d   :  { %v2729_v62 = vadd.f32 %v2728_v57, %v2727_v55 }
 0x14e   :  { %v1169_v3 = vadd.f32 %v2661_v60, %v3840_v24  ;;  %v2662_v63 = vpop.f32.mrb[44].mxu0 }
 0x14f   :  { %v2730_v5 = vpop.f32.mrb[44].mxu1  ;;  %v2663_v0 = vpop.f32.mrb[45].mxu0 }
 0x150   :  { %v2731_v1 = vpop.f32.mrb[45].mxu1  ;;  %v3874_v2 = vadd.f32 %v2729_v62, %v1169_v3  ;;  %v2664_v4 = vadd.f32 %v2663_v0, %v2662_v63 }
 0x151   :  { %v2732_v7 = vadd.f32 %v2731_v1, %v2730_v5 }
 0x152   :  { %v1174_v14 = vadd.f32 %v2664_v4, %v3842_v33  ;;  %v2665_v8 = vpop.f32.mrb[46].mxu0 }
 0x153   :  { %v2733_v13 = vpop.f32.mrb[46].mxu1  ;;  %v2666_v9 = vpop.f32.mrb[47].mxu0 }
 0x154   :  { %v2734_v10 = vpop.f32.mrb[47].mxu1  ;;  %v3877_v11 = vadd.f32 %v2732_v7, %v1174_v14  ;;  %v2667_v12 = vadd.f32 %v2666_v9, %v2665_v8 }
 0x155   :  { %v2735_v16 = vadd.f32 %v2734_v10, %v2733_v13 }
 0x156   :  { %v1179_v24 = vadd.f32 %v2667_v12, %v3844_v42  ;;  %v2768_v17 = vpop.f32.mrb[48].mxu0 }
 0x157   :  { %v2836_v22 = vpop.f32.mrb[48].mxu1  ;;  %v2769_v18 = vpop.f32.mrb[49].mxu0 }
 0x158   :  { %v2837_v19 = vpop.f32.mrb[49].mxu1  ;;  %v3880_v20 = vadd.f32 %v2735_v16, %v1179_v24  ;;  %v2770_v21 = vadd.f32 %v2769_v18, %v2768_v17 }
 0x159   :  { %v2838_v25 = vadd.f32 %v2837_v19, %v2836_v22 }
 0x15a   :  { %v1374_v33 = vadd.f32 %v2770_v21, %v3847_v52  ;;  %v2771_v26 = vpop.f32.mrb[50].mxu0 }
 0x15b   :  { %v2839_v30 = vpop.f32.mrb[50].mxu1  ;;  %v2772_v27 = vpop.f32.mrb[51].mxu0 }
 0x15c   :  { %v2840_v28 = vpop.f32.mrb[51].mxu1  ;;  %v2773_v29 = vadd.f32 %v2772_v27, %v2771_v26  ;;  %v3883_v32 = vadd.f32 %v2838_v25, %v1374_v33 }
 0x15d   :  { %v2841_v45 = vadd.f32 %v2840_v28, %v2839_v30 }
 0x15e   :  { %v1379_v42 = vadd.f32 %v2773_v29, %v3850_v61  ;;  %v2774_v34 = vpop.f32.mrb[52].mxu0 }
 0x15f   :  { %v2842_v39 = vpop.f32.mrb[52].mxu1  ;;  %v2775_v35 = vpop.f32.mrb[53].mxu0 }
 0x160   :  { %v2843_v36 = vpop.f32.mrb[53].mxu1  ;;  %v2776_v37 = vadd.f32 %v2775_v35, %v2774_v34  ;;  %v3886_v41 = vadd.f32 %v2841_v45, %v1379_v42 }
 0x161   :  { %v2844_v38 = vadd.f32 %v2843_v36, %v2842_v39 }
 0x162   :  { %v1384_v52 = vadd.f32 %v2776_v37, %v3853_v6  ;;  %v2777_v43 = vpop.f32.mrb[54].mxu0 }
 0x163   :  { %v2845_v49 = vpop.f32.mrb[54].mxu1  ;;  %v2778_v44 = vpop.f32.mrb[55].mxu0 }
 0x164   :  { %v2846_v46 = vpop.f32.mrb[55].mxu1  ;;  %v2779_v47 = vadd.f32 %v2778_v44, %v2777_v43  ;;  %v3889_v51 = vadd.f32 %v2844_v38, %v1384_v52 }
 0x165   :  { %v2847_v48 = vadd.f32 %v2846_v46, %v2845_v49 }
 0x166   :  { %v1389_v61 = vadd.f32 %v2779_v47, %v3856_v15  ;;  %v2780_v53 = vpop.f32.mrb[56].mxu0 }
 0x167   :  { %v2848_v58 = vpop.f32.mrb[56].mxu1  ;;  %v2781_v54 = vpop.f32.mrb[57].mxu0 }
 0x168   :  { %v2849_v55 = vpop.f32.mrb[57].mxu1  ;;  %v2782_v56 = vadd.f32 %v2781_v54, %v2780_v53  ;;  %v3892_v60 = vadd.f32 %v2847_v48, %v1389_v61 }
 0x169   :  { %v2850_v57 = vadd.f32 %v2849_v55, %v2848_v58 }
 0x16a   :  { %v1394_v6 = vadd.f32 %v2782_v56, %v3859_v23  ;;  %v2783_v62 = vpop.f32.mrb[58].mxu0 }
 0x16b   :  { %v2851_v3 = vpop.f32.mrb[58].mxu1  ;;  %v2784_v63 = vpop.f32.mrb[59].mxu0 }
 0x16c   :  { %v2852_v5 = vpop.f32.mrb[59].mxu1  ;;  %v2785_v0 = vadd.f32 %v2784_v63, %v2783_v62  ;;  %v3895_v4 = vadd.f32 %v2850_v57, %v1394_v6 }
 0x16d   :  { %v2853_v1 = vadd.f32 %v2852_v5, %v2851_v3 }
 0x16e   :  { %v1399_v15 = vadd.f32 %v2785_v0, %v3862_v31  ;;  %v2786_v7 = vpop.f32.mrb[60].mxu0 }
 0x16f   :  { %v2854_v14 = vpop.f32.mrb[60].mxu1  ;;  %v2787_v8 = vpop.f32.mrb[61].mxu0 }
 0x170   :  { %v2855_v13 = vpop.f32.mrb[61].mxu1  ;;  %v2788_v9 = vadd.f32 %v2787_v8, %v2786_v7  ;;  %v3898_v12 = vadd.f32 %v2853_v1, %v1399_v15 }
 0x171   :  { %v2856_v10 = vadd.f32 %v2855_v13, %v2854_v14 }
 0x172   :  { %v1404_v23 = vadd.f32 %v2788_v9, %v3865_v40  ;;  %v2789_v16 = vpop.f32.mrb[62].mxu0 }
 0x173   :  { %v2857_v24 = vpop.f32.mrb[62].mxu1  ;;  %v2790_v17 = vpop.f32.mrb[63].mxu0 }
 0x174   :  { %v2858_v22 = vpop.f32.mrb[63].mxu1  ;;  %v2791_v18 = vadd.f32 %v2790_v17, %v2789_v16  ;;  %v1529_v21 = vadd.f32 %v2856_v10, %v1404_v23 }
 0x175   :  { %v2859_v19 = vadd.f32 %v2858_v22, %v2857_v24 }
 0x176   :  { %v1409_v25 = vadd.f32 %v2791_v18, %v3868_v50  ;;  %v2792_v31 = vpop.f32.mrb[64].mxu0 }
 0x177   :  { %v2860_v33 = vpop.f32.mrb[64].mxu1  ;;  %v2793_v26 = vpop.f32.mrb[65].mxu0 }
 0x178   :  { %v2861_v30 = vpop.f32.mrb[65].mxu1  ;;  %v2794_v27 = vadd.f32 %v2793_v26, %v2792_v31  ;;  %v1534_v29 = vadd.f32 %v2859_v19, %v1409_v25 }
 0x179   :  { %v2862_v28 = vadd.f32 %v2861_v30, %v2860_v33 }
 0x17a   :  { %v1414_v45 = vadd.f32 %v2794_v27, %v3871_v59  ;;  %v2795_v42 = vpop.f32.mrb[66].mxu0 }
 0x17b   :  { %v2863_v40 = vpop.f32.mrb[66].mxu1  ;;  %v2796_v34 = vpop.f32.mrb[67].mxu0 }
 0x17c   :  { %v2864_v39 = vpop.f32.mrb[67].mxu1  ;;  %v2797_v35 = vadd.f32 %v2796_v34, %v2795_v42  ;;  %v1539_v37 = vadd.f32 %v2862_v28, %v1414_v45 }
 0x17d   :  { %v2865_v36 = vadd.f32 %v2864_v39, %v2863_v40 }
 0x17e   :  { %v1419_v38 = vadd.f32 %v2797_v35, %v3874_v2  ;;  %v2798_v52 = vpop.f32.mrb[68].mxu0 }
 0x17f   :  { %v2866_v50 = vpop.f32.mrb[68].mxu1  ;;  %v2799_v43 = vpop.f32.mrb[69].mxu0 }
 0x180   :  { %v2867_v49 = vpop.f32.mrb[69].mxu1  ;;  %v2800_v44 = vadd.f32 %v2799_v43, %v2798_v52  ;;  %v1544_v47 = vadd.f32 %v2865_v36, %v1419_v38 }
 0x181   :  { %v2868_v46 = vadd.f32 %v2867_v49, %v2866_v50 }
 0x182   :  { %v1424_v48 = vadd.f32 %v2800_v44, %v3877_v11  ;;  %v2801_v61 = vpop.f32.mrb[70].mxu0 }
 0x183   :  { %v2869_v59 = vpop.f32.mrb[70].mxu1  ;;  %v2802_v53 = vpop.f32.mrb[71].mxu0 }
 0x184   :  { %v2870_v58 = vpop.f32.mrb[71].mxu1  ;;  %v2803_v54 = vadd.f32 %v2802_v53, %v2801_v61  ;;  %v3905_v56 = vadd.f32 %v2868_v46, %v1424_v48 }
 0x185   :  { %v2871_v55 = vadd.f32 %v2870_v58, %v2869_v59 }
 0x186   :  { %v1429_v57 = vadd.f32 %v2803_v54, %v3880_v20  ;;  %v1623_v2 = vpop.f32.mrb[72].mxu0 }
 0x187   :  { %v1653_v6 = vpop.f32.mrb[72].mxu1  ;;  %v3909_v62 = vadd.f32 %v1623_v2, %v3883_v32  ;;  %v1625_v63 = vpop.f32.mrb[73].mxu0 }
 0x188   :  { %v3911_v3 = vadd.f32 %v1653_v6, %v1529_v21  ;;  %v1655_v5 = vpop.f32.mrb[73].mxu1  ;;  %v3913_v11 = vadd.f32 %v2871_v55, %v1429_v57 }
 0x189   :  { %v1694_v0 = vmul.f32 0.044715, %v3909_v62 }
 0x18a   :  { %v1700_v1 = vmul.f32 0.044715, %v3911_v3  ;;  %v1628_v15 = vpop.f32.mrb[74].mxu0 }
 0x18b   :  { %v1658_v7 = vpop.f32.mrb[74].mxu1  ;;  %v1706_v14 = vmul.f32 %v1694_v0, %v3909_v62  ;;  %v3920_v8 = vadd.f32 %v1628_v15, %v3886_v41  ;;  %v1630_v13 = vpop.f32.mrb[75].mxu0 }
 0x18c   :  { %v1712_v20 = vmul.f32 %v1700_v1, %v3911_v3  ;;  %v3922_v32 = vadd.f32 %v1658_v7, %v1534_v29  ;;  %v1660_v9 = vpop.f32.mrb[75].mxu1 }
 0x18d   :  { %v1718_v10 = vmul.f32 %v1706_v14, %v3909_v62  ;;  %v1695_v16 = vmul.f32 0.044715, %v3920_v8 }
 0x18e   :  { %v1724_v23 = vmul.f32 %v1712_v20, %v3911_v3  ;;  %v1701_v24 = vmul.f32 0.044715, %v3922_v32  ;;  %v1633_v17 = vpop.f32.mrb[76].mxu0 }
 0x18f   :  { %v1663_v22 = vpop.f32.mrb[76].mxu1  ;;  %v1730_v18 = vadd.f32 %v1718_v10, %v3909_v62  ;;  %v1707_v41 = vmul.f32 %v1695_v16, %v3920_v8  ;;  %v3932_v21 = vadd.f32 %v1633_v17, %v3889_v51  ;;  %v1635_v25 = vpop.f32.mrb[77].mxu0 }
 0x190   :  { %v1736_v19 = vadd.f32 %v1724_v23, %v3911_v3  ;;  %v1665_v31 = vpop.f32.mrb[77].mxu1  ;;  %v1713_v33 = vmul.f32 %v1701_v24, %v3922_v32  ;;  %v3935_v26 = vadd.f32 %v1663_v22, %v1539_v37 }
 0x191   :  { %v1742_v30 = vmul.f32 0.7978846, %v1730_v18  ;;  %v1719_v28 = vmul.f32 %v1707_v41, %v3920_v8  ;;  %v1696_v45 = vmul.f32 0.044715, %v3932_v21  ;;  %v1682_v41 = vmul.f32 0.5, %v3909_v62 }
 0x192   :  { %v1748_v27 = vmul.f32 0.7978846, %v1736_v19  ;;  %v1725_v29 = vmul.f32 %v1713_v33, %v3922_v32  ;;  %v1702_v42 = vmul.f32 0.044715, %v3935_v26  ;;  %v1638_v40 = vpop.f32.mrb[78].mxu0  ;;  %v1688_v31 = vmul.f32 0.5, %v3911_v3 }
 0x193   :  { %3128 = vtanh.f32 %v1742_v30  ;;  %v1731_v51 = vadd.f32 %v1719_v28, %v3920_v8  ;;  %v3943_v34 = vadd.f32 %v1638_v40, %v3892_v60  ;;  %v1668_v39 = vpop.f32.mrb[78].mxu1  ;;  %v1640_v35 = vpop.f32.mrb[79].mxu0  ;;  %v1708_v37 = vmul.f32 %v1696_v45, %v3932_v21 }
 0x194   :  { %3130 = vtanh.f32 %v1748_v27  ;;  %v1737_v36 = vadd.f32 %v1725_v29, %v3922_v32  ;;  %v1714_v38 = vmul.f32 %v1702_v42, %v3935_v26  ;;  %v1670_v52 = vpop.f32.mrb[79].mxu1  ;;  %v3949_v49 = vadd.f32 %v1668_v39, %v1544_v47 }
 0x195   :  { %v1743_v50 = vmul.f32 0.7978846, %v1731_v51  ;;  %v1697_v43 = vmul.f32 0.044715, %v3943_v34  ;;  %v1720_v46 = vmul.f32 %v1708_v37, %v3932_v21  ;;  %v1683_v62 = vmul.f32 0.5, %v3920_v8 }
 0x196   :  { %v1749_v44 = vmul.f32 0.7978846, %v1737_v36  ;;  %v1726_v60 = vmul.f32 %v1714_v38, %v3935_v26  ;;  %v1643_v48 = vpop.f32.mrb[80].mxu0  ;;  %v1703_v53 = vmul.f32 0.044715, %v3949_v49  ;;  %v1689_v3 = vmul.f32 0.5, %v3922_v32 }
 0x197   :  { %v1673_v61 = vpop.f32.mrb[80].mxu1  ;;  %3132 = vtanh.f32 %v1743_v50  ;;  %v1709_v59 = vmul.f32 %v1697_v43, %v3943_v34  ;;  %v1645_v58 = vpop.f32.mrb[81].mxu0  ;;  %v1732_v55 = vadd.f32 %v1720_v46, %v3932_v21  ;;  %v3958_v57 = vadd.f32 %v1643_v48, %v3895_v4 }
 0x198   :  { %v1675_v54 = vpop.f32.mrb[81].mxu1  ;;  %3134 = vtanh.f32 %v1749_v44  ;;  %v1738_v47 = vadd.f32 %v1726_v60, %v3935_v26  ;;  %v1715_v6 = vmul.f32 %v1703_v53, %v3949_v49  ;;  %v3963_v63 = vadd.f32 %v1673_v61, %v3905_v56 }
 0x199   :  { %v1721_v2 = vmul.f32 %v1709_v59, %v3943_v34  ;;  %v1744_v5 = vmul.f32 0.7978846, %v1732_v55  ;;  %v1698_v14 = vmul.f32 0.044715, %v3958_v57 }
 0x19a   :  { %v1750_v0 = vmul.f32 0.7978846, %v1738_v47  ;;  %v1648_v1 = vpop.f32.mrb[82].mxu0  ;;  %v1727_v7 = vmul.f32 %v1715_v6, %v3949_v49  ;;  %v1704_v4 = vmul.f32 0.044715, %v3963_v63  ;;  %v1684_v47 = vmul.f32 0.5, %v3932_v21 }
 0x19b   :  { %v1733_v15 = vadd.f32 %v1721_v2, %v3943_v34  ;;  %v1678_v20 = vpop.f32.mrb[82].mxu1  ;;  %v1650_v13 = vpop.f32.mrb[83].mxu0  ;;  %3136 = vtanh.f32 %v1744_v5  ;;  %v3970_v9 = vadd.f32 %v1648_v1, %v3898_v12  ;;  %v1710_v17 = vmul.f32 %v1698_v14, %v3958_v57 }
 0x19c   :  { %v3973_v56 = vadd.f32 %v1678_v20, %v3913_v11  ;;  %v1680_v10 = vpop.f32.mrb[83].mxu1  ;;  %3138 = vtanh.f32 %v1750_v0  ;;  %v1739_v24 = vadd.f32 %v1727_v7, %v3949_v49  ;;  %v1716_v18 = vmul.f32 %v1704_v4, %v3963_v63 }
 0x19d   :  { %v3129_v23 = vpop.eup %3128  ;;  %v1745_v16 = vmul.f32 0.7978846, %v1733_v15  ;;  %v1699_v19 = vmul.f32 0.044715, %v3970_v9  ;;  %v1722_v11 = vmul.f32 %v1710_v17, %v3958_v57  ;;  %v1685_v6 = vmul.f32 0.5, %v3943_v34 }
 0x19e   :  { %v3131_v22 = vpop.eup %3130  ;;  %v1751_v12 = vmul.f32 0.7978846, %v1739_v24  ;;  %v1766_v25 = vadd.f32 1.0, %v3129_v23  ;;  %v1728_v33 = vmul.f32 %v1716_v18, %v3963_v63  ;;  %v1705_v45 = vmul.f32 0.044715, %v3973_v56 }
 0x19f   :  { %3140 = vtanh.f32 %v1745_v16  ;;  %v1711_v30 = vmul.f32 %v1699_v19, %v3970_v9  ;;  %v1772_v28 = vadd.f32 1.0, %v3131_v22  ;;  %v1734_v29 = vadd.f32 %v1722_v11, %v3958_v57 }
 0x1a0   :  { %3142 = vtanh.f32 %v1751_v12  ;;  %v1740_v51 = vadd.f32 %v1728_v33, %v3963_v63  ;;  %v1717_v37 = vmul.f32 %v1705_v45, %v3973_v56  ;;  %v1778_v38 = vmul.f32 %v1766_v25, %v1682_v41 }
 0x1a1   :  { %v3133_v27 = vpop.eup %3132  ;;  %v1723_v39 = vmul.f32 %v1711_v30, %v3970_v9  ;;  %v1746_v36 = vmul.f32 0.7978846, %v1734_v29  ;;  %v1784_v44 = vmul.f32 %v1772_v28, %v1688_v31  ;;  %v1690_v1 = vmul.f32 0.5, %v3935_v26 }
 0x1a2   :  { %v3135_v42 = vpop.eup %3134  ;;  %v1767_v40 = vadd.f32 1.0, %v3133_v27  ;;  %v1752_v50 = vmul.f32 0.7978846, %v1740_v51  ;;  %v1729_v8 = vmul.f32 %v1717_v37, %v3973_v56  ;;  %v1691_v14 = vmul.f32 0.5, %v3949_v49 }
 0x1a3   :  { %v1773_v35 = vadd.f32 1.0, %v3135_v42  ;;  %v1735_v43 = vadd.f32 %v1723_v39, %v3970_v9  ;;  %3144 = vtanh.f32 %v1746_v36  ;;  %v1686_v26 = vmul.f32 0.5, %v3958_v57 }
 0x1a4   :  { %v1779_v52 = vmul.f32 %v1767_v40, %v1683_v62  ;;  %3146 = vtanh.f32 %v1752_v50  ;;  %v1741_v32 = vadd.f32 %v1729_v8, %v3973_v56  ;;  %v1687_v49 = vmul.f32 0.5, %v3970_v9 }
 0x1a5   :  { %v1785_v46 = vmul.f32 %v1773_v35, %v1689_v3  ;;  %v3137_v60 = vpop.eup %3136  ;;  %v1747_v61 = vmul.f32 0.7978846, %v1735_v43  ;;  %v1692_v12 = vmul.f32 0.5, %v3963_v63  ;;  %v1693_v11 = vmul.f32 0.5, %v3973_v56 }
 0x1a6   :  { %v2325_v48 = vpack.c.bf16 %v1779_v52, %v1778_v38  ;;  %v3139_v59 = vpop.eup %3138  ;;  %v1768_v58 = vadd.f32 1.0, %v3137_v60  ;;  %v1753_v55 = vmul.f32 0.7978846, %v1741_v32 }
 0x1a7   :  { %v2340_v53 = vpack.c.bf16 %v1785_v46, %v1784_v44  ;;  %3148 = vtanh.f32 %v1747_v61  ;;  %v1774_v2 = vadd.f32 1.0, %v3139_v59 }
 0x1a8   :  { %2326 = vst [vmem:[%s4023_s3] sm:$0xff] %v2325_v48   ;;  %3150 = vtanh.f32 %v1753_v55  ;;  %v1780_v15 = vmul.f32 %v1768_v58, %v1684_v47 }
 0x1a9   :  { %v3141_v54 = vpop.eup %3140  ;;  %2461 = vst [vmem:[%s4023_s3 + $0x18] sm:$0xff] %v2340_v53   ;;  %v1786_v13 = vmul.f32 %v1774_v2, %v1690_v1 }
 0x1aa   :  { %v1769_v5 = vadd.f32 1.0, %v3141_v54  ;;  %v3143_v0 = vpop.eup %3142 }
 0x1ab   :  { %v1775_v20 = vadd.f32 1.0, %v3143_v0 }
 0x1ac   :  { %v1781_v7 = vmul.f32 %v1769_v5, %v1685_v6 }
 0x1ad   :  { %v1787_v10 = vmul.f32 %v1775_v20, %v1691_v14  ;;  %v3145_v23 = vpop.eup %3144 }
 0x1ae   :  { %v2330_v4 = vpack.c.bf16 %v1781_v7, %v1780_v15  ;;  %v3147_v34 = vpop.eup %3146  ;;  %v1770_v16 = vadd.f32 1.0, %v3145_v23 }
 0x1af   :  { %v2345_v21 = vpack.c.bf16 %v1787_v10, %v1786_v13  ;;  %v1776_v22 = vadd.f32 1.0, %v3147_v34 }
 0x1b0   :  { %2459 = vst [vmem:[%s4023_s3 + $0x8] sm:$0xff] %v2330_v4   ;;  %v1782_v19 = vmul.f32 %v1770_v16, %v1686_v26 }
 0x1b1   :  { %v3149_v24 = vpop.eup %3148  ;;  %2462 = vst [vmem:[%s4023_s3 + $0x20] sm:$0xff] %v2345_v21   ;;  %v1788_v33 = vmul.f32 %v1776_v22, %v1692_v12 }
 0x1b2   :  { %v1771_v17 = vadd.f32 1.0, %v3149_v24  ;;  %v3151_v18 = vpop.eup %3150 }
 0x1b3   :  { %v1777_v25 = vadd.f32 1.0, %v3151_v18 }
 0x1b4   :  { %v1783_v41 = vmul.f32 %v1771_v17, %v1687_v49 }
 0x1b5   :  { %v1789_v30 = vmul.f32 %v1777_v25, %v1693_v11 }
 0x1b6   :  { %v2335_v31 = vpack.c.bf16 %v1783_v41, %v1782_v19 }
 0x1b7   :  { %v2350_v57 = vpack.c.bf16 %v1789_v30, %v1788_v33 }
 0x1b8   :  { %2460 = vst [vmem:[%s4023_s3 + $0x10] sm:$0xff] %v2335_v31  }
 0x1b9   :  { %2463 = vst [vmem:[%s4023_s3 + $0x28] sm:$0xff] %v2350_v57  }

// kernel: forward_pallas.9
= control target key start
LH: loop header
LB: loop body
LE: loop exit
PB: predicated region body
PF: predicated region fallthrough
CT: control target
= control target key end

     0   :  { %v781_v1 = vmov 0.0|0.0   ;;  %vm782_vm0 = vmmov 0   ;;  %v783_v2 = vmov 0.0   ;;  %s940_s0 = inlined_call_operand.vmem [shape: f32[2,96], index: 0, kind: input, shape index: {}]   ;;  %s941_s1 = inlined_call_operand.vmem [shape: bf16[96,96], index: 1, kind: input, shape index: {}]   ;;  %s942_s2 = inlined_call_operand.vmem [shape: f32[1,96], index: 2, kind: input, shape index: {}]   ;;  %s943_s3 = inlined_call_operand.vmem [shape: bf16[96,64], index: 3, kind: input, shape index: {}]   ;;  %s944_s4 = inlined_call_operand.vmem [shape: f32[1,64], index: 4, kind: input, shape index: {}]   ;;  %s945_s5 = inlined_call_operand.vmem [shape: bf16[64,32], index: 5, kind: input, shape index: {}]   ;;  %s946_s6 = inlined_call_operand.vmem [shape: f32[1,32], index: 6, kind: input, shape index: {}]   ;;  %s947_s7 = inlined_call_operand.vmem [shape: bf16[32,6], index: 7, kind: input, shape index: {}]   ;;  %s948_s8 = inlined_call_operand.vmem [shape: f32[1,6], index: 8, kind: input, shape index: {}]   ;;  %s949_s9 = inlined_call_operand.hbm [shape: f32[2,6], index: 9, kind: output, shape index: {}]  }
   0x1   :  { %v482_v0 = vld [vmem:[%s941_s1] sm:$0xff]   ;;  %691 = vmatprep.subr.bf16.mxu0 %v781_v1  ;;  %631 = vmatprep.mubr.msk.f32.mxu0 %vm782_vm0, %v783_v2 }
   0x2   :  { %693 = vmatpush3.bf16.msra.mxu0 %v482_v0  ;;  %709 = vmatprep.subr.bf16.mxu1 %v781_v1 }
   0x3   :  { %14 = vsyncpa [#allocation3], 0  ;;  %694 = vmatprep.subr.bf16.mxu0 %v781_v1  ;;  %v553_v3 = vld [vmem:[%s941_s1 + $0x8] sm:$0xff]   ;;  %658 = vmatprep.mubr.msk.f32.mxu1 %vm782_vm0, %v783_v2  ;;  %v554_v4 = vld [vmem:[%s941_s1 + $0x10] sm:$0xff]   ;;  %vm65_vm1 = vcmask 785408   ;;  %vm284_vm2 = vcmask 523264  }
   0x4   :  { %v555_v5 = vld [vmem:[%s941_s1 + $0x18] sm:$0xff]   ;;  %v556_v6 = vld [vmem:[%s941_s1 + $0x20] sm:$0xff]   ;;  %v557_v7 = vld [vmem:[%s941_s1 + $0x28] sm:$0xff]   ;;  %vm382_vm3 = vcmask 261120   ;;  %vm457_vm4 = vcmask 41984  }
   0x5   :  { %v33_v8 = vld [vmem:[%s940_s0] sm:$0x3]  ;;  %v558_v10 = vld [vmem:[%s943_s3 + $0x8] sm:$0xff]   ;;  %v559_v11 = vld [vmem:[%s943_s3 + $0x10] sm:$0xff]  }
   0x6   :  { %696 = vmatpush3.bf16.msra.mxu0 %v553_v3  ;;  %v506_v9 = vld [vmem:[%s943_s3] sm:$0xff]   ;;  %v560_v12 = vld [vmem:[%s943_s3 + $0x18] sm:$0xff]   ;;  %v562_v14 = vld [vmem:[%s943_s3 + $0x28] sm:$0xff]  }
   0x7   :  { %697 = vmatprep.subr.bf16.mxu0 %v781_v1  ;;  %711 = vmatpush3.bf16.msra.mxu1 %v506_v9  ;;  %v561_v13 = vld [vmem:[%s943_s3 + $0x20] sm:$0xff]   ;;  %v563_v29 = vld [vmem:[%s945_s5 + $0x8] sm:$0xff]   ;;  %v564_v30 = vld [vmem:[%s945_s5 + $0x10] sm:$0xff]  }
   0x8   :  { %712 = vmatprep.subr.bf16.mxu1 %v781_v1  ;;  %v473_v15 = vld [vmem:[%s942_s2] ss:$0 sm:$0xff]  ;;  %v565_v31 = vld [vmem:[%s945_s5 + $0x18] sm:$0xff]   ;;  %v566_v46 = vld [vmem:[%s947_s7 + $0x8] sm:$0xff]  }
   0x9   :  { %v530_v28 = vld [vmem:[%s945_s5] sm:$0xff]  }
   0xa   :  { %699 = vmatpush3.bf16.msra.mxu0 %v554_v4  ;;  %v475_v32 = vld [vmem:[%s944_s4] ss:$0 sm:$0xff] }
   0xb   :  { %700 = vmatprep.subr.bf16.mxu0 %v781_v1  ;;  %714 = vmatpush3.bf16.msra.mxu1 %v558_v10  ;;  %v546_v45 = vld [vmem:[%s947_s7] sm:$0xff]  }
   0xc   :  { %715 = vmatprep.subr.bf16.mxu1 %v781_v1  ;;  %v477_v47 = vld [vmem:[%s946_s6] ss:$0 sm:$0xff]  ;;  %s784_s6 = smov [#allocation2]  }
   0xd   :  { %v479_v60 = vld [vmem:[%s948_s8] ss:$0 sm:$0xff]  ;;  %s465_s0 = sshll.u32 %s784_s6, 4  ;;  %s466_s0 = int_to_ptr.vmem [resolvable:$true] %s465_s0 }
   0xe   :  { %702 = vmatpush3.bf16.msra.mxu0 %v555_v5  ;;  %s757_s26 = scalar_lea.vmem %s466_s0, 32  ;;  %p762_p1 = scmp.lt.s32.totalorder %s466_s0, %s466_s0 }
   0xf   :  { %703 = vmatprep.subr.bf16.mxu0 %v781_v1  ;;  %717 = vmatpush3.bf16.msra.mxu1 %v559_v11  ;;  %p758_p0 = scmp.ne.s32.totalorder %s466_s0, %s757_s26  ;;  %p763_p2 = scmp.lt.s32.totalorder %s757_s26, %s757_s26 }
  0x10   :  { %718 = vmatprep.subr.bf16.mxu1 %v781_v1 }
  0x11   :  { %p764_p3 = por %p763_p2, %p762_p1 }
  0x12   :  { %705 = vmatpush3.bf16.msra.mxu0 %v556_v6 }
  0x13   :  { %706 = vmatprep.subr.bf16.mxu0 %v781_v1  ;;  %720 = vmatpush3.bf16.msra.mxu1 %v560_v12  ;;  %p765_p4 = pnand %p764_p3, %p758_p0 }
  0x14   :  { %721 = vmatprep.subr.bf16.mxu1 %v781_v1 }
  0x16   :  { %708 = vmatpush3.bf16.msra.mxu0 %v557_v7 }
  0x17   :  { %727 = vmatprep.subr.bf16.mxu0 %v781_v1  ;;  %723 = vmatpush3.bf16.msra.mxu1 %v561_v13 }
  0x18   :  { %724 = vmatprep.subr.bf16.mxu1 %v781_v1 }
  0x19   :  { %632 = vmatmul.mubr.msk.f32.vlgmr.msra.gmra.mrb[0].mxu0 %vm65_vm1, %v33_v8 }
  0x1a   :  { %677 = vmatprep.mubr.msk.f32.mxu0 %vm782_vm0, %v783_v2  ;;  %729 = vmatpush3.bf16.msra.mxu0 %v530_v28 }
  0x1b   :  { %726 = vmatpush3.bf16.msra.mxu1 %v562_v14  ;;  %730 = vmatprep.subr.bf16.mxu0 %v781_v1 }
  0x1c   :  { %739 = vmatprep.subr.bf16.mxu1 %v781_v1 }
  0x1e   :  { %732 = vmatpush3.bf16.msra.mxu0 %v563_v29 }
  0x1f   :  { %733 = vmatprep.subr.bf16.mxu0 %v781_v1 }
  0x22   :  { %735 = vmatpush3.bf16.msra.mxu0 %v564_v30 }
  0x23   :  { %736 = vmatprep.subr.bf16.mxu0 %v781_v1 }
  0x26   :  { %738 = vmatpush3.bf16.msra.mxu0 %v565_v31 }
  0xec   :  { %v135_v16 = vpop.f32.mrb[0].mxu0 }
  0xed   :  { %v136_v17 = vadd.f32 %v473_v15, %v135_v16  ;;  %v633_v18 = vpop.f32.mrb[1].mxu0 }
  0xef   :  { %v140_v19 = vmul.f32 0.044715, %v136_v17  ;;  %v139_v25 = vmul.f32 0.5, %v136_v17 }
  0xf1   :  { %v141_v20 = vmul.f32 %v140_v19, %v136_v17 }
  0xf3   :  { %v142_v21 = vmul.f32 %v141_v20, %v136_v17 }
  0xf5   :  { %v143_v22 = vadd.f32 %v142_v21, %v136_v17 }
  0xf7   :  { %v144_v23 = vmul.f32 0.7978846, %v143_v22 }
  0xf9   :  { %749 = vtanh.f32 %v144_v23 }
 0x103   :  { %v750_v24 = vpop.eup %749 }
 0x104   :  { %v146_v26 = vadd.f32 1.0, %v750_v24 }
 0x106   :  { %v147_v27 = vmul.f32 %v146_v26, %v139_v25 }
 0x108   :  { %659 = vmatmul.mubr.msk.f32.vlgmr.msra.gmra.mrb[0].mxu1 %vm65_vm1, %v147_v27 }
 0x109   :  { %688 = vmatprep.mubr.msk.f32.mxu1 %vm782_vm0, %v783_v2  ;;  %741 = vmatpush3.bf16.msra.mxu1 %v546_v45 }
 0x10a   :  { %742 = vmatprep.subr.bf16.mxu1 %v781_v1 }
 0x10d   :  { %744 = vmatpush3.bf16.msra.mxu1 %v566_v46 }
 0x1db   :  { %v248_v33 = vpop.f32.mrb[0].mxu1 }
 0x1dc   :  { %v249_v34 = vadd.f32 %v475_v32, %v248_v33  ;;  %v660_v35 = vpop.f32.mrb[1].mxu1 }
 0x1de   :  { %v253_v36 = vmul.f32 0.044715, %v249_v34  ;;  %v252_v42 = vmul.f32 0.5, %v249_v34 }
 0x1e0   :  { %v254_v37 = vmul.f32 %v253_v36, %v249_v34 }
 0x1e2   :  { %v255_v38 = vmul.f32 %v254_v37, %v249_v34 }
 0x1e4   :  { %v256_v39 = vadd.f32 %v255_v38, %v249_v34 }
 0x1e6   :  { %v257_v40 = vmul.f32 0.7978846, %v256_v39 }
 0x1e8   :  { %751 = vtanh.f32 %v257_v40 }
 0x1f2   :  { %v752_v41 = vpop.eup %751 }
 0x1f3   :  { %v259_v43 = vadd.f32 1.0, %v752_v41 }
 0x1f5   :  { %v260_v44 = vmul.f32 %v259_v43, %v252_v42 }
 0x1f7   :  { %678 = vmatmul.mubr.msk.f32.vlgmr.msra.gmra.mrb[2].mxu0 %vm284_vm2, %v260_v44 }
 0x2ca   :  { %v354_v48 = vpop.f32.mrb[2].mxu0 }
 0x2cb   :  { %v355_v49 = vadd.f32 %v477_v47, %v354_v48  ;;  %v679_v50 = vpop.f32.mrb[3].mxu0 }
 0x2cd   :  { %v359_v51 = vmul.f32 0.044715, %v355_v49  ;;  %v358_v57 = vmul.f32 0.5, %v355_v49 }
 0x2cf   :  { %v360_v52 = vmul.f32 %v359_v51, %v355_v49 }
 0x2d1   :  { %v361_v53 = vmul.f32 %v360_v52, %v355_v49 }
 0x2d3   :  { %v362_v54 = vadd.f32 %v361_v53, %v355_v49 }
 0x2d5   :  { %v363_v55 = vmul.f32 0.7978846, %v362_v54 }
 0x2d7   :  { %753 = vtanh.f32 %v363_v55 }
 0x2e1   :  { %v754_v56 = vpop.eup %753 }
 0x2e2   :  { %v365_v58 = vadd.f32 1.0, %v754_v56 }
 0x2e4   :  { %v366_v59 = vmul.f32 %v365_v58, %v358_v57 }
 0x2e6   :  { %689 = vmatmul.mubr.msk.f32.vlgmr.msra.gmra.mrb[2].mxu1 %vm382_vm3, %v366_v59 }
 0x3b9   :  { %v452_v61 = vpop.f32.mrb[2].mxu1 }
 0x3ba   :  { %v453_v62 = vadd.f32 %v479_v60, %v452_v61  ;;  %v690_v63 = vpop.f32.mrb[3].mxu1 }
 0x3bc   :  { %755 = vtanh.f32 %v453_v62 }
 0x3c6   :  { %v756_v0 = vpop.eup %755 }
 0x3c7   :  { %458 = vst.msk [vmem:[#allocation2] sm:$0x3] %vm457_vm4, %v756_v0 }
 0x3c8   :  { %768 = shalt.err (!%p765_p4)
}
 0x3c9   :  { %s769_s8 = scalar_lea.hbm %s949_s9, 32 }
 0x3ca   :  { %p770_p5 = scmp.ne.s32.totalorder %s949_s9, %s769_s8  ;;  %p773_p6 = scmp.lt.u32.totalorder %s769_s8, %s949_s9 }
 0x3cc   :  { %p775_p7 = pnand %p773_p6, %p770_p5 }
 0x3ce   :  { %778 = shalt.err (!%p775_p7)
}
 0x3cf   :  { %468 = dma.vmem_to_hbm [thread:$0]  %s466_s0, 32, %s949_s9, [#allocation3]  }
 0x3d0   :  { %779 = dma.done.wait [#allocation3], 32  }
 0x3d1   :  { %780 = vsyncadd [#allocation3], 4294967264 }
 0x3d2   :  { %472 = vsyncpa [#allocation3], 1 }

</bundles_post_ra>
